<compile_context>
chip_gen: v7x
topology: tpu7x:2x2x1
jax: 0.10.0
libtpu: 0.0.40
codegen_flags: <defaults>
</compile_context>

<pallas_src>
import functools

import jax
import jax.numpy as jnp
from jax.experimental import pallas as pl
from jax.experimental.pallas import tpu as pltpu


def _resident_spec(a):
    """Full-array BlockSpec whose block index never changes across the grid
    (weights / biases stay resident in VMEM, DMA'd only once)."""
    zeros = (0,) * a.ndim
    return pl.BlockSpec(tuple(a.shape), lambda n: zeros)


# ---------------------------------------------------------------------------
# Fused Inception kernel (whole block, one image per grid step)
# ---------------------------------------------------------------------------
def _inception_kernel(x_ref, w123_ref, b123_ref, w4_ref, b4b_ref,
                      w2b_ref, b2b_ref, w3b_ref, b3b_ref, out_ref, *,
                      CH1, C2R):
    # x_ref   : (1, H, W, Cin)  input image (original dtype, e.g. f32)
    # w123_ref: (Cin, CH1+C2R+C3R) hstacked 1x1 weights [b1 | b2-reduce | b3-reduce]
    # w4_ref  : (Cin, POOL) pool-proj 1x1 weight
    # w2b_ref : (9*C2R, CH3)  3x3 weight, taps folded into the contraction dim
    # w3b_ref : (25*C3R, CH5) 5x5 weight, taps folded into the contraction dim
    # b*_ref  : (1, C) f32 biases
    # out_ref : (1, H, W, CH1+CH3+CH5+POOL) final concatenated NHWC output
    _, H, W, Cin = x_ref.shape
    HW = H * W
    cdt = w123_ref.dtype                      # MXU compute dtype (bf16 default)

    xf = x_ref[0]                             # (H, W, Cin)

    # ---- fused 1x1 convs: [branch1 | branch2-reduce | branch3-reduce] ------
    y = jnp.dot(xf.astype(cdt).reshape(HW, Cin), w123_ref[...],
                preferred_element_type=jnp.float32)
    y = jnp.maximum(y + b123_ref[...], 0.0)   # f32 bias + ReLU epilogue
    b1 = y[:, :CH1]
    r2 = y[:, CH1:CH1 + C2R]
    r3 = y[:, CH1 + C2R:]

    # ---- branch4: 3x3 / stride-1 / pad-1 max-pool + 1x1 proj ---------------
    # Separable (row pass, col pass) with edge-replicate shifts, which is
    # exactly equivalent to the -inf-padded "same" max-pool.
    left = jnp.concatenate([xf[:, :1], xf[:, :-1]], axis=1)
    right = jnp.concatenate([xf[:, 1:], xf[:, -1:]], axis=1)
    rmax = jnp.maximum(jnp.maximum(left, xf), right)
    up = jnp.concatenate([rmax[:1], rmax[:-1]], axis=0)
    down = jnp.concatenate([rmax[1:], rmax[-1:]], axis=0)
    pooled = jnp.maximum(jnp.maximum(up, rmax), down)
    b4 = jnp.dot(pooled.astype(cdt).reshape(HW, Cin), w4_ref[...],
                 preferred_element_type=jnp.float32)
    b4 = jnp.maximum(b4 + b4b_ref[...], 0.0)

    # ---- conv tails: "same" KxK conv as ONE im2col matmul per branch -------
    def pad_hw(a, p):
        # zero halo of width p around an (h, w, c) VMEM value (no HBM pass)
        h, w, c = a.shape
        zc = jnp.zeros((h, p, c), a.dtype)
        a = jnp.concatenate([zc, a, zc], axis=1)
        zr = jnp.zeros((p, w + 2 * p, c), a.dtype)
        return jnp.concatenate([zr, a, zr], axis=0)

    def conv_tail(r, K, w_ref, b_ref):
        c = r.shape[-1]
        xpad = pad_hw(r.reshape(H, W, c).astype(cdt), K // 2)
        patches = jnp.concatenate(
            [xpad[kh:kh + H, kw:kw + W, :]
             for kh in range(K) for kw in range(K)], axis=-1)     # (H, W, K*K*c)
        yy = jnp.dot(patches.reshape(HW, K * K * c), w_ref[...],
                     preferred_element_type=jnp.float32)
        return jnp.maximum(yy + b_ref[...], 0.0)

    b2 = conv_tail(r2, 3, w2b_ref, b2b_ref)   # branch2: 3x3, pad 1
    b3 = conv_tail(r3, 5, w3b_ref, b3b_ref)   # branch3: 5x5, pad 2

    # ---- single lane-dense store of the concatenated output ----------------
    out = jnp.concatenate([b1, b2, b3, b4], axis=-1)
    out_ref[...] = out.reshape(out_ref.shape).astype(out_ref.dtype)


# ---------------------------------------------------------------------------
# Wrappers
# ---------------------------------------------------------------------------
def inception_forward_nhwc(x, p, *, compute_dtype=jnp.bfloat16):
    """NHWC in / NHWC out (preferred when chaining blocks)."""
    N, H, W, Cin = x.shape

    ch1 = p["b1_b"].shape[0]
    c2r = p["b2a_b"].shape[0]
    ch3 = p["b2b_b"].shape[0]
    c3r = p["b3a_b"].shape[0]
    ch5 = p["b3b_b"].shape[0]
    cpp = p["b4_b"].shape[0]

    cd = compute_dtype
    # hstacked 1x1 weights / biases (one fused matmul on x)
    w123 = jnp.concatenate([p["b1_w"].reshape(Cin, ch1),
                            p["b2a_w"].reshape(Cin, c2r),
                            p["b3a_w"].reshape(Cin, c3r)], axis=1).astype(cd)
    b123 = jnp.concatenate([p["b1_b"], p["b2a_b"], p["b3a_b"]]
                           ).reshape(1, ch1 + c2r + c3r).astype(jnp.float32)
    w4 = p["b4_w"].reshape(Cin, cpp).astype(cd)
    b4 = p["b4_b"].reshape(1, cpp).astype(jnp.float32)
    # conv-tail weights with the (kh, kw, cin) taps folded into the K dim
    w2b = p["b2b_w"].reshape(9 * c2r, ch3).astype(cd)
    b2b = p["b2b_b"].reshape(1, ch3).astype(jnp.float32)
    w3b = p["b3b_w"].reshape(25 * c3r, ch5).astype(cd)
    b3b = p["b3b_b"].reshape(1, ch5).astype(jnp.float32)

    weights = (w123, b123, w4, b4, w2b, b2b, w3b, b3b)
    c_out = ch1 + ch3 + ch5 + cpp

    return pl.pallas_call(
        functools.partial(_inception_kernel, CH1=ch1, C2R=c2r),
        grid=(N,),
        out_shape=jax.ShapeDtypeStruct((N, H, W, c_out), jnp.float32),
        in_specs=[pl.BlockSpec((1, H, W, Cin), lambda n: (n, 0, 0, 0))]
                 + [_resident_spec(a) for a in weights],
        out_specs=pl.BlockSpec((1, H, W, c_out), lambda n: (n, 0, 0, 0)),
        compiler_params=pltpu.CompilerParams(
            dimension_semantics=("parallel",),
            vmem_limit_bytes=32 * 1024 * 1024),
    )(x, *weights)


def inception_forward(x_nchw, p, *, compute_dtype=jnp.bfloat16):
    """NCHW in / NCHW out, matching the PyTorch reference module."""
    x = jnp.transpose(x_nchw, (0, 2, 3, 1)).astype(jnp.float32)   # NCHW -> NHWC
    out = inception_forward_nhwc(x, p, compute_dtype=compute_dtype)
    return jnp.transpose(out, (0, 3, 1, 2))                       # NHWC -> NCHW


# ---------------------------------------------------------------------------
# Deterministic parameter init (PyTorch Conv2d-style uniform fan-in bounds)
# ---------------------------------------------------------------------------
def _init_conv(key, kh, kw, cin, cout):
    kw_key, kb_key = jax.random.split(key)
    bound = 1.0 / (kh * kw * cin) ** 0.5
    w = jax.random.uniform(kw_key, (kh, kw, cin, cout), jnp.float32, -bound, bound)
    b = jax.random.uniform(kb_key, (cout,), jnp.float32, -bound, bound)
    return w, b


def make_inception_params(key, in_channels, ch1x1, ch3x3red, ch3x3,
                          ch5x5red, ch5x5, pool_proj):
    keys = jax.random.split(key, 6)
    p = {}
    p["b1_w"], p["b1_b"] = _init_conv(keys[0], 1, 1, in_channels, ch1x1)
    p["b2a_w"], p["b2a_b"] = _init_conv(keys[1], 1, 1, in_channels, ch3x3red)
    p["b2b_w"], p["b2b_b"] = _init_conv(keys[2], 3, 3, ch3x3red, ch3x3)
    p["b3a_w"], p["b3a_b"] = _init_conv(keys[3], 1, 1, in_channels, ch5x5red)
    p["b3b_w"], p["b3b_b"] = _init_conv(keys[4], 5, 5, ch5x5red, ch5x5)
    p["b4_w"], p["b4_b"] = _init_conv(keys[5], 1, 1, in_channels, pool_proj)
    return p


# ---------------------------------------------------------------------------
# Pure-JAX reference (mirrors the PyTorch semantics) for verification.
# compute_dtype lets us build a reference that matches the kernel's
# bf16-operand / f32-accumulate numerics exactly.
# ---------------------------------------------------------------------------
def _ref_conv_relu(x, w, b, pad, cd):
    y = jax.lax.conv_general_dilated(
        x.astype(cd), w.astype(cd), (1, 1), [(pad, pad), (pad, pad)],
        dimension_numbers=("NHWC", "HWIO", "NHWC"),
        preferred_element_type=jnp.float32,
        precision=jax.lax.Precision.HIGHEST)
    return jax.nn.relu(y + b.astype(jnp.float32))


def ref_inception(x_nchw, p, *, compute_dtype=jnp.float32):
    cd = compute_dtype
    x = jnp.transpose(x_nchw, (0, 2, 3, 1)).astype(cd)
    b1 = _ref_conv_relu(x, p["b1_w"], p["b1_b"], 0, cd)
    b2 = _ref_conv_relu(_ref_conv_relu(x, p["b2a_w"], p["b2a_b"], 0, cd),
                        p["b2b_w"], p["b2b_b"], 1, cd)
    b3 = _ref_conv_relu(_ref_conv_relu(x, p["b3a_w"], p["b3a_b"], 0, cd),
                        p["b3b_w"], p["b3b_b"], 2, cd)
    pooled = jax.lax.reduce_window(x, jnp.array(-jnp.inf, cd), jax.lax.max,
                                   (1, 3, 3, 1), (1, 1, 1, 1),
                                   [(0, 0), (1, 1), (1, 1), (0, 0)])
    b4 = _ref_conv_relu(pooled, p["b4_w"], p["b4_b"], 0, cd)
    out = jnp.concatenate([b1, b2, b3, b4], axis=-1)
    return jnp.transpose(out, (0, 3, 1, 2))


# ---------------------------------------------------------------------------
if __name__ == "__main__":
    key = jax.random.PRNGKey(0)
    kx, kp = jax.random.split(key)

    # Small Inception config: in=4, 1x1=8, 3x3red=4, 3x3=8, 5x5red=4, 5x5=8, pool=8
    in_channels, ch1x1, ch3x3red, ch3x3, ch5x5red, ch5x5, pool_proj = 4, 8, 4, 8, 4, 8, 8
    params = make_inception_params(kp, in_channels, ch1x1, ch3x3red, ch3x3,
                                   ch5x5red, ch5x5, pool_proj)

    x = jax.random.normal(kx, (2, in_channels, 16, 16), jnp.float32)  # NCHW like PyTorch

    out = jax.jit(inception_forward)(x, params)
    out = jax.block_until_ready(out)

    assert out.shape == (2, ch1x1 + ch3x3 + ch5x5 + pool_proj, 16, 16), out.shape

    # Strict check vs a reference that mirrors the kernel's bf16-matmul /
    # f32-accumulate numerics (only summation order differs).
    ref_bf16 = ref_inception(x, params, compute_dtype=jnp.bfloat16)
    err_match = float(jnp.max(jnp.abs(out - ref_bf16)))
    assert err_match < 2e-3, f"mismatch vs bf16-matched reference: {err_match}"

    # Loose sanity check vs the pure-f32 PyTorch-equivalent reference
    # (difference is dominated by the intentional bf16 operand rounding).
    ref_f32 = ref_inception(x, params, compute_dtype=jnp.float32)
    err_f32 = float(jnp.max(jnp.abs(out - ref_f32)))
    assert err_f32 < 1e-1, f"mismatch vs f32 reference: {err_f32}"

    print("KERNEL_OK")
</pallas_src>

<mosaic_0001>
module attributes {stable_mosaic.version = 11 : i64} {
  func.func @_inception_kernel(%arg0: i32, %arg1: memref<1x16x16x4xf32, #tpu.memory_space<vmem>>, %arg2: memref<4x16xbf16, #tpu.memory_space<vmem>>, %arg3: memref<1x16xf32, #tpu.memory_space<vmem>>, %arg4: memref<4x8xbf16, #tpu.memory_space<vmem>>, %arg5: memref<1x8xf32, #tpu.memory_space<vmem>>, %arg6: memref<36x8xbf16, #tpu.memory_space<vmem>>, %arg7: memref<1x8xf32, #tpu.memory_space<vmem>>, %arg8: memref<100x8xbf16, #tpu.memory_space<vmem>>, %arg9: memref<1x8xf32, #tpu.memory_space<vmem>>, %arg10: memref<1x16x16x32xf32, #tpu.memory_space<vmem>>) attributes {dimension_semantics = [#tpu.dimension_semantics<parallel>], iteration_bounds = array<i64: 2>, scalar_prefetch = 0 : i64, scratch_operands = 0 : i64, tpu.core_type = #tpu.core_type<tc>, window_params = [{transform_indices = @transform_0, window_bounds = array<i64: 1, 16, 16, 4>}, {pipeline_mode = #tpu.pipeline_mode<synchronous>, transform_indices = @transform_1, window_bounds = array<i64: 4, 16>}, {pipeline_mode = #tpu.pipeline_mode<synchronous>, transform_indices = @transform_2, window_bounds = array<i64: 1, 16>}, {pipeline_mode = #tpu.pipeline_mode<synchronous>, transform_indices = @transform_3, window_bounds = array<i64: 4, 8>}, {pipeline_mode = #tpu.pipeline_mode<synchronous>, transform_indices = @transform_4, window_bounds = array<i64: 1, 8>}, {pipeline_mode = #tpu.pipeline_mode<synchronous>, transform_indices = @transform_5, window_bounds = array<i64: 36, 8>}, {pipeline_mode = #tpu.pipeline_mode<synchronous>, transform_indices = @transform_6, window_bounds = array<i64: 1, 8>}, {pipeline_mode = #tpu.pipeline_mode<synchronous>, transform_indices = @transform_7, window_bounds = array<i64: 100, 8>}, {pipeline_mode = #tpu.pipeline_mode<synchronous>, transform_indices = @transform_8, window_bounds = array<i64: 1, 8>}, {transform_indices = @transform_9, window_bounds = array<i64: 1, 16, 16, 32>}]} {
    %c0 = arith.constant 0 : index
    %c0_0 = arith.constant 0 : index
    %c0_1 = arith.constant 0 : index
    %c0_2 = arith.constant 0 : index
    %0 = vector.load %arg1[%c0, %c0_0, %c0_1, %c0_2] : memref<1x16x16x4xf32, #tpu.memory_space<vmem>>, vector<1x16x16x4xf32>
    %1 = vector.shape_cast %0 : vector<1x16x16x4xf32> to vector<16x16x4xf32>
    %2 = arith.truncf %1 : vector<16x16x4xf32> to vector<16x16x4xbf16>
    %3 = vector.shape_cast %2 : vector<16x16x4xbf16> to vector<256x4xbf16>
    %c0_3 = arith.constant 0 : index
    %c0_4 = arith.constant 0 : index
    %4 = vector.load %arg2[%c0_3, %c0_4] : memref<4x16xbf16, #tpu.memory_space<vmem>>, vector<4x16xbf16>
    %cst = arith.constant dense<0.000000e+00> : vector<256x16xf32>
    %5 = tpu.matmul %3, %4, %cst {dimension_numbers = #tpu.dot_dimension_numbers<[1], [0], [0], [1], [0, 0, 1, 1], [], []>} : vector<256x4xbf16>, vector<4x16xbf16>, vector<256x16xf32> -> vector<256x16xf32>
    %c0_5 = arith.constant 0 : index
    %c0_6 = arith.constant 0 : index
    %6 = vector.load %arg3[%c0_5, %c0_6] : memref<1x16xf32, #tpu.memory_space<vmem>>, vector<1x16xf32>
    %7 = vector.broadcast %6 : vector<1x16xf32> to vector<256x16xf32>
    %8 = arith.addf %5, %7 : vector<256x16xf32>
    %cst_7 = arith.constant 0.000000e+00 : f32
    %9 = vector.broadcast %cst_7 : f32 to vector<256x16xf32>
    %10 = arith.maximumf %8, %9 : vector<256x16xf32>
    %11 = vector.extract_strided_slice %10 {offsets = [0, 0], sizes = [256, 8], strides = [1, 1]} : vector<256x16xf32> to vector<256x8xf32>
    %12 = vector.extract_strided_slice %10 {offsets = [0, 8], sizes = [256, 4], strides = [1, 1]} : vector<256x16xf32> to vector<256x4xf32>
    %13 = vector.extract_strided_slice %10 {offsets = [0, 12], sizes = [256, 4], strides = [1, 1]} : vector<256x16xf32> to vector<256x4xf32>
    %14 = vector.extract_strided_slice %1 {offsets = [0, 0, 0], sizes = [16, 1, 4], strides = [1, 1, 1]} : vector<16x16x4xf32> to vector<16x1x4xf32>
    %15 = vector.extract_strided_slice %1 {offsets = [0, 0, 0], sizes = [16, 15, 4], strides = [1, 1, 1]} : vector<16x16x4xf32> to vector<16x15x4xf32>
    %16 = tpu.concatenate %14, %15 in 1 : vector<16x1x4xf32>, vector<16x15x4xf32> -> vector<16x16x4xf32>
    %17 = vector.extract_strided_slice %1 {offsets = [0, 1, 0], sizes = [16, 15, 4], strides = [1, 1, 1]} : vector<16x16x4xf32> to vector<16x15x4xf32>
    %18 = vector.extract_strided_slice %1 {offsets = [0, 15, 0], sizes = [16, 1, 4], strides = [1, 1, 1]} : vector<16x16x4xf32> to vector<16x1x4xf32>
    %19 = tpu.concatenate %17, %18 in 1 : vector<16x15x4xf32>, vector<16x1x4xf32> -> vector<16x16x4xf32>
    %20 = arith.maximumf %16, %1 : vector<16x16x4xf32>
    %21 = arith.maximumf %20, %19 : vector<16x16x4xf32>
    %22 = vector.extract_strided_slice %21 {offsets = [0, 0, 0], sizes = [1, 16, 4], strides = [1, 1, 1]} : vector<16x16x4xf32> to vector<1x16x4xf32>
    %23 = vector.extract_strided_slice %21 {offsets = [0, 0, 0], sizes = [15, 16, 4], strides = [1, 1, 1]} : vector<16x16x4xf32> to vector<15x16x4xf32>
    %24 = tpu.concatenate %22, %23 in 0 : vector<1x16x4xf32>, vector<15x16x4xf32> -> vector<16x16x4xf32>
    %25 = vector.extract_strided_slice %21 {offsets = [1, 0, 0], sizes = [15, 16, 4], strides = [1, 1, 1]} : vector<16x16x4xf32> to vector<15x16x4xf32>
    %26 = vector.extract_strided_slice %21 {offsets = [15, 0, 0], sizes = [1, 16, 4], strides = [1, 1, 1]} : vector<16x16x4xf32> to vector<1x16x4xf32>
    %27 = tpu.concatenate %25, %26 in 0 : vector<15x16x4xf32>, vector<1x16x4xf32> -> vector<16x16x4xf32>
    %28 = arith.maximumf %24, %21 : vector<16x16x4xf32>
    %29 = arith.maximumf %28, %27 : vector<16x16x4xf32>
    %30 = arith.truncf %29 : vector<16x16x4xf32> to vector<16x16x4xbf16>
    %31 = vector.shape_cast %30 : vector<16x16x4xbf16> to vector<256x4xbf16>
    %c0_8 = arith.constant 0 : index
    %c0_9 = arith.constant 0 : index
    %32 = vector.load %arg4[%c0_8, %c0_9] : memref<4x8xbf16, #tpu.memory_space<vmem>>, vector<4x8xbf16>
    %cst_10 = arith.constant dense<0.000000e+00> : vector<256x8xf32>
    %33 = tpu.matmul %31, %32, %cst_10 {dimension_numbers = #tpu.dot_dimension_numbers<[1], [0], [0], [1], [0, 0, 1, 1], [], []>} : vector<256x4xbf16>, vector<4x8xbf16>, vector<256x8xf32> -> vector<256x8xf32>
    %c0_11 = arith.constant 0 : index
    %c0_12 = arith.constant 0 : index
    %34 = vector.load %arg5[%c0_11, %c0_12] : memref<1x8xf32, #tpu.memory_space<vmem>>, vector<1x8xf32>
    %35 = vector.broadcast %34 : vector<1x8xf32> to vector<256x8xf32>
    %36 = arith.addf %33, %35 : vector<256x8xf32>
    %cst_13 = arith.constant 0.000000e+00 : f32
    %37 = vector.broadcast %cst_13 : f32 to vector<256x8xf32>
    %38 = arith.maximumf %36, %37 : vector<256x8xf32>
    %39 = vector.shape_cast %12 : vector<256x4xf32> to vector<16x16x4xf32>
    %40 = arith.truncf %39 : vector<16x16x4xf32> to vector<16x16x4xbf16>
    %cst_14 = arith.constant 0.000000e+00 : bf16
    %41 = vector.broadcast %cst_14 : bf16 to vector<16x1x4xbf16>
    %42 = tpu.concatenate %41, %40, %41 in 1 : vector<16x1x4xbf16>, vector<16x16x4xbf16>, vector<16x1x4xbf16> -> vector<16x18x4xbf16>
    %cst_15 = arith.constant 0.000000e+00 : bf16
    %43 = vector.broadcast %cst_15 : bf16 to vector<1x18x4xbf16>
    %44 = tpu.concatenate %43, %42, %43 in 0 : vector<1x18x4xbf16>, vector<16x18x4xbf16>, vector<1x18x4xbf16> -> vector<18x18x4xbf16>
    %45 = vector.extract_strided_slice %44 {offsets = [0, 0, 0], sizes = [16, 16, 4], strides = [1, 1, 1]} : vector<18x18x4xbf16> to vector<16x16x4xbf16>
    %46 = vector.extract_strided_slice %44 {offsets = [0, 1, 0], sizes = [16, 16, 4], strides = [1, 1, 1]} : vector<18x18x4xbf16> to vector<16x16x4xbf16>
    %47 = vector.extract_strided_slice %44 {offsets = [0, 2, 0], sizes = [16, 16, 4], strides = [1, 1, 1]} : vector<18x18x4xbf16> to vector<16x16x4xbf16>
    %48 = vector.extract_strided_slice %44 {offsets = [1, 0, 0], sizes = [16, 16, 4], strides = [1, 1, 1]} : vector<18x18x4xbf16> to vector<16x16x4xbf16>
    %49 = vector.extract_strided_slice %44 {offsets = [1, 1, 0], sizes = [16, 16, 4], strides = [1, 1, 1]} : vector<18x18x4xbf16> to vector<16x16x4xbf16>
    %50 = vector.extract_strided_slice %44 {offsets = [1, 2, 0], sizes = [16, 16, 4], strides = [1, 1, 1]} : vector<18x18x4xbf16> to vector<16x16x4xbf16>
    %51 = vector.extract_strided_slice %44 {offsets = [2, 0, 0], sizes = [16, 16, 4], strides = [1, 1, 1]} : vector<18x18x4xbf16> to vector<16x16x4xbf16>
    %52 = vector.extract_strided_slice %44 {offsets = [2, 1, 0], sizes = [16, 16, 4], strides = [1, 1, 1]} : vector<18x18x4xbf16> to vector<16x16x4xbf16>
    %53 = vector.extract_strided_slice %44 {offsets = [2, 2, 0], sizes = [16, 16, 4], strides = [1, 1, 1]} : vector<18x18x4xbf16> to vector<16x16x4xbf16>
    %54 = tpu.concatenate %45, %46, %47, %48, %49, %50, %51, %52, %53 in 2 : vector<16x16x4xbf16>, vector<16x16x4xbf16>, vector<16x16x4xbf16>, vector<16x16x4xbf16>, vector<16x16x4xbf16>, vector<16x16x4xbf16>, vector<16x16x4xbf16>, vector<16x16x4xbf16>, vector<16x16x4xbf16> -> vector<16x16x36xbf16>
    %55 = vector.shape_cast %54 : vector<16x16x36xbf16> to vector<256x36xbf16>
    %c0_16 = arith.constant 0 : index
    %c0_17 = arith.constant 0 : index
    %56 = vector.load %arg6[%c0_16, %c0_17] : memref<36x8xbf16, #tpu.memory_space<vmem>>, vector<36x8xbf16>
    %cst_18 = arith.constant dense<0.000000e+00> : vector<256x8xf32>
    %57 = tpu.matmul %55, %56, %cst_18 {dimension_numbers = #tpu.dot_dimension_numbers<[1], [0], [0], [1], [0, 0, 1, 1], [], []>} : vector<256x36xbf16>, vector<36x8xbf16>, vector<256x8xf32> -> vector<256x8xf32>
    %c0_19 = arith.constant 0 : index
    %c0_20 = arith.constant 0 : index
    %58 = vector.load %arg7[%c0_19, %c0_20] : memref<1x8xf32, #tpu.memory_space<vmem>>, vector<1x8xf32>
    %59 = vector.broadcast %58 : vector<1x8xf32> to vector<256x8xf32>
    %60 = arith.addf %57, %59 : vector<256x8xf32>
    %cst_21 = arith.constant 0.000000e+00 : f32
    %61 = vector.broadcast %cst_21 : f32 to vector<256x8xf32>
    %62 = arith.maximumf %60, %61 : vector<256x8xf32>
    %63 = vector.shape_cast %13 : vector<256x4xf32> to vector<16x16x4xf32>
    %64 = arith.truncf %63 : vector<16x16x4xf32> to vector<16x16x4xbf16>
    %cst_22 = arith.constant 0.000000e+00 : bf16
    %65 = vector.broadcast %cst_22 : bf16 to vector<16x2x4xbf16>
    %66 = tpu.concatenate %65, %64, %65 in 1 : vector<16x2x4xbf16>, vector<16x16x4xbf16>, vector<16x2x4xbf16> -> vector<16x20x4xbf16>
    %cst_23 = arith.constant 0.000000e+00 : bf16
    %67 = vector.broadcast %cst_23 : bf16 to vector<2x20x4xbf16>
    %68 = tpu.concatenate %67, %66, %67 in 0 : vector<2x20x4xbf16>, vector<16x20x4xbf16>, vector<2x20x4xbf16> -> vector<20x20x4xbf16>
    %69 = vector.extract_strided_slice %68 {offsets = [0, 0, 0], sizes = [16, 16, 4], strides = [1, 1, 1]} : vector<20x20x4xbf16> to vector<16x16x4xbf16>
    %70 = vector.extract_strided_slice %68 {offsets = [0, 1, 0], sizes = [16, 16, 4], strides = [1, 1, 1]} : vector<20x20x4xbf16> to vector<16x16x4xbf16>
    %71 = vector.extract_strided_slice %68 {offsets = [0, 2, 0], sizes = [16, 16, 4], strides = [1, 1, 1]} : vector<20x20x4xbf16> to vector<16x16x4xbf16>
    %72 = vector.extract_strided_slice %68 {offsets = [0, 3, 0], sizes = [16, 16, 4], strides = [1, 1, 1]} : vector<20x20x4xbf16> to vector<16x16x4xbf16>
    %73 = vector.extract_strided_slice %68 {offsets = [0, 4, 0], sizes = [16, 16, 4], strides = [1, 1, 1]} : vector<20x20x4xbf16> to vector<16x16x4xbf16>
    %74 = vector.extract_strided_slice %68 {offsets = [1, 0, 0], sizes = [16, 16, 4], strides = [1, 1, 1]} : vector<20x20x4xbf16> to vector<16x16x4xbf16>
    %75 = vector.extract_strided_slice %68 {offsets = [1, 1, 0], sizes = [16, 16, 4], strides = [1, 1, 1]} : vector<20x20x4xbf16> to vector<16x16x4xbf16>
    %76 = vector.extract_strided_slice %68 {offsets = [1, 2, 0], sizes = [16, 16, 4], strides = [1, 1, 1]} : vector<20x20x4xbf16> to vector<16x16x4xbf16>
    %77 = vector.extract_strided_slice %68 {offsets = [1, 3, 0], sizes = [16, 16, 4], strides = [1, 1, 1]} : vector<20x20x4xbf16> to vector<16x16x4xbf16>
    %78 = vector.extract_strided_slice %68 {offsets = [1, 4, 0], sizes = [16, 16, 4], strides = [1, 1, 1]} : vector<20x20x4xbf16> to vector<16x16x4xbf16>
    %79 = vector.extract_strided_slice %68 {offsets = [2, 0, 0], sizes = [16, 16, 4], strides = [1, 1, 1]} : vector<20x20x4xbf16> to vector<16x16x4xbf16>
    %80 = vector.extract_strided_slice %68 {offsets = [2, 1, 0], sizes = [16, 16, 4], strides = [1, 1, 1]} : vector<20x20x4xbf16> to vector<16x16x4xbf16>
    %81 = vector.extract_strided_slice %68 {offsets = [2, 2, 0], sizes = [16, 16, 4], strides = [1, 1, 1]} : vector<20x20x4xbf16> to vector<16x16x4xbf16>
    %82 = vector.extract_strided_slice %68 {offsets = [2, 3, 0], sizes = [16, 16, 4], strides = [1, 1, 1]} : vector<20x20x4xbf16> to vector<16x16x4xbf16>
    %83 = vector.extract_strided_slice %68 {offsets = [2, 4, 0], sizes = [16, 16, 4], strides = [1, 1, 1]} : vector<20x20x4xbf16> to vector<16x16x4xbf16>
    %84 = vector.extract_strided_slice %68 {offsets = [3, 0, 0], sizes = [16, 16, 4], strides = [1, 1, 1]} : vector<20x20x4xbf16> to vector<16x16x4xbf16>
    %85 = vector.extract_strided_slice %68 {offsets = [3, 1, 0], sizes = [16, 16, 4], strides = [1, 1, 1]} : vector<20x20x4xbf16> to vector<16x16x4xbf16>
    %86 = vector.extract_strided_slice %68 {offsets = [3, 2, 0], sizes = [16, 16, 4], strides = [1, 1, 1]} : vector<20x20x4xbf16> to vector<16x16x4xbf16>
    %87 = vector.extract_strided_slice %68 {offsets = [3, 3, 0], sizes = [16, 16, 4], strides = [1, 1, 1]} : vector<20x20x4xbf16> to vector<16x16x4xbf16>
    %88 = vector.extract_strided_slice %68 {offsets = [3, 4, 0], sizes = [16, 16, 4], strides = [1, 1, 1]} : vector<20x20x4xbf16> to vector<16x16x4xbf16>
    %89 = vector.extract_strided_slice %68 {offsets = [4, 0, 0], sizes = [16, 16, 4], strides = [1, 1, 1]} : vector<20x20x4xbf16> to vector<16x16x4xbf16>
    %90 = vector.extract_strided_slice %68 {offsets = [4, 1, 0], sizes = [16, 16, 4], strides = [1, 1, 1]} : vector<20x20x4xbf16> to vector<16x16x4xbf16>
    %91 = vector.extract_strided_slice %68 {offsets = [4, 2, 0], sizes = [16, 16, 4], strides = [1, 1, 1]} : vector<20x20x4xbf16> to vector<16x16x4xbf16>
    %92 = vector.extract_strided_slice %68 {offsets = [4, 3, 0], sizes = [16, 16, 4], strides = [1, 1, 1]} : vector<20x20x4xbf16> to vector<16x16x4xbf16>
    %93 = vector.extract_strided_slice %68 {offsets = [4, 4, 0], sizes = [16, 16, 4], strides = [1, 1, 1]} : vector<20x20x4xbf16> to vector<16x16x4xbf16>
    %94 = tpu.concatenate %69, %70, %71, %72, %73, %74, %75, %76, %77, %78, %79, %80, %81, %82, %83, %84 in 2 : vector<16x16x4xbf16>, vector<16x16x4xbf16>, vector<16x16x4xbf16>, vector<16x16x4xbf16>, vector<16x16x4xbf16>, vector<16x16x4xbf16>, vector<16x16x4xbf16>, vector<16x16x4xbf16>, vector<16x16x4xbf16>, vector<16x16x4xbf16>, vector<16x16x4xbf16>, vector<16x16x4xbf16>, vector<16x16x4xbf16>, vector<16x16x4xbf16>, vector<16x16x4xbf16>, vector<16x16x4xbf16> -> vector<16x16x64xbf16>
    %95 = tpu.concatenate %85, %86, %87, %88, %89, %90, %91, %92, %93 in 2 : vector<16x16x4xbf16>, vector<16x16x4xbf16>, vector<16x16x4xbf16>, vector<16x16x4xbf16>, vector<16x16x4xbf16>, vector<16x16x4xbf16>, vector<16x16x4xbf16>, vector<16x16x4xbf16>, vector<16x16x4xbf16> -> vector<16x16x36xbf16>
    %96 = tpu.concatenate %94, %95 in 2 : vector<16x16x64xbf16>, vector<16x16x36xbf16> -> vector<16x16x100xbf16>
    %97 = vector.shape_cast %96 : vector<16x16x100xbf16> to vector<256x100xbf16>
    %c0_24 = arith.constant 0 : index
    %c0_25 = arith.constant 0 : index
    %98 = vector.load %arg8[%c0_24, %c0_25] : memref<100x8xbf16, #tpu.memory_space<vmem>>, vector<100x8xbf16>
    %cst_26 = arith.constant dense<0.000000e+00> : vector<256x8xf32>
    %99 = tpu.matmul %97, %98, %cst_26 {dimension_numbers = #tpu.dot_dimension_numbers<[1], [0], [0], [1], [0, 0, 1, 1], [], []>} : vector<256x100xbf16>, vector<100x8xbf16>, vector<256x8xf32> -> vector<256x8xf32>
    %c0_27 = arith.constant 0 : index
    %c0_28 = arith.constant 0 : index
    %100 = vector.load %arg9[%c0_27, %c0_28] : memref<1x8xf32, #tpu.memory_space<vmem>>, vector<1x8xf32>
    %101 = vector.broadcast %100 : vector<1x8xf32> to vector<256x8xf32>
    %102 = arith.addf %99, %101 : vector<256x8xf32>
    %cst_29 = arith.constant 0.000000e+00 : f32
    %103 = vector.broadcast %cst_29 : f32 to vector<256x8xf32>
    %104 = arith.maximumf %102, %103 : vector<256x8xf32>
    %105 = tpu.concatenate %11, %62, %104, %38 in 1 : vector<256x8xf32>, vector<256x8xf32>, vector<256x8xf32>, vector<256x8xf32> -> vector<256x32xf32>
    %106 = vector.shape_cast %105 : vector<256x32xf32> to vector<1x16x16x32xf32>
    %c0_30 = arith.constant 0 : index
    %c0_31 = arith.constant 0 : index
    %c0_32 = arith.constant 0 : index
    %c0_33 = arith.constant 0 : index
    %107 = vector.load %arg10[%c0_30, %c0_31, %c0_32, %c0_33] : memref<1x16x16x32xf32, #tpu.memory_space<vmem>>, vector<1x16x16x32xf32>
    tpu.vector_store %arg10[%c0_30, %c0_31, %c0_32, %c0_33], %106 {strides = array<i32>} : memref<1x16x16x32xf32, #tpu.memory_space<vmem>>, vector<1x16x16x32xf32>,
    return
  }
  func.func @transform_0(%arg0: i32) -> (i32, i32, i32, i32) {
    %c0_i32 = arith.constant 0 : i32
    %c0_i32_0 = arith.constant 0 : i32
    %c0_i32_1 = arith.constant 0 : i32
    %c0_i32_2 = arith.constant 0 : i32
    return %arg0, %c0_i32, %c0_i32_0, %c0_i32_1 : i32, i32, i32, i32
  }
  func.func @transform_1(%arg0: i32) -> (i32, i32) {
    %c0_i32 = arith.constant 0 : i32
    %c0_i32_0 = arith.constant 0 : i32
    %c0_i32_1 = arith.constant 0 : i32
    return %c0_i32, %c0_i32_0 : i32, i32
  }
  func.func @transform_2(%arg0: i32) -> (i32, i32) {
    %c0_i32 = arith.constant 0 : i32
    %c0_i32_0 = arith.constant 0 : i32
    %c0_i32_1 = arith.constant 0 : i32
    return %c0_i32, %c0_i32_0 : i32, i32
  }
  func.func @transform_3(%arg0: i32) -> (i32, i32) {
    %c0_i32 = arith.constant 0 : i32
    %c0_i32_0 = arith.constant 0 : i32
    %c0_i32_1 = arith.constant 0 : i32
    return %c0_i32, %c0_i32_0 : i32, i32
  }
  func.func @transform_4(%arg0: i32) -> (i32, i32) {
    %c0_i32 = arith.constant 0 : i32
    %c0_i32_0 = arith.constant 0 : i32
    %c0_i32_1 = arith.constant 0 : i32
    return %c0_i32, %c0_i32_0 : i32, i32
  }
  func.func @transform_5(%arg0: i32) -> (i32, i32) {
    %c0_i32 = arith.constant 0 : i32
    %c0_i32_0 = arith.constant 0 : i32
    %c0_i32_1 = arith.constant 0 : i32
    return %c0_i32, %c0_i32_0 : i32, i32
  }
  func.func @transform_6(%arg0: i32) -> (i32, i32) {
    %c0_i32 = arith.constant 0 : i32
    %c0_i32_0 = arith.constant 0 : i32
    %c0_i32_1 = arith.constant 0 : i32
    return %c0_i32, %c0_i32_0 : i32, i32
  }
  func.func @transform_7(%arg0: i32) -> (i32, i32) {
    %c0_i32 = arith.constant 0 : i32
    %c0_i32_0 = arith.constant 0 : i32
    %c0_i32_1 = arith.constant 0 : i32
    return %c0_i32, %c0_i32_0 : i32, i32
  }
  func.func @transform_8(%arg0: i32) -> (i32, i32) {
    %c0_i32 = arith.constant 0 : i32
    %c0_i32_0 = arith.constant 0 : i32
    %c0_i32_1 = arith.constant 0 : i32
    return %c0_i32, %c0_i32_0 : i32, i32
  }
  func.func @transform_9(%arg0: i32) -> (i32, i32, i32, i32) {
    %c0_i32 = arith.constant 0 : i32
    %c0_i32_0 = arith.constant 0 : i32
    %c0_i32_1 = arith.constant 0 : i32
    %c0_i32_2 = arith.constant 0 : i32
    return %arg0, %c0_i32, %c0_i32_0, %c0_i32_1 : i32, i32, i32, i32
  }
}

</mosaic_0001>

<bundles_post_ra>
// kernel: inception_forward.1
= control target key start
LH: loop header
LB: loop body
LE: loop exit
PB: predicated region body
PF: predicated region fallthrough
CT: control target
= control target key end

     0   :  { %14 = vsyncpa [#allocation3], 0  ;;  %s12168_s0 = inlined_call_operand.vmem [shape: f32[2,16,16,4], index: 0, kind: input, shape index: {}]   ;;  %s12169_s1 = inlined_call_operand.vmem [shape: bf16[4,16], index: 1, kind: input, shape index: {}]   ;;  %s12170_s2 = inlined_call_operand.vmem [shape: f32[1,16], index: 2, kind: input, shape index: {}]   ;;  %s12171_s3 = inlined_call_operand.vmem [shape: bf16[4,8], index: 3, kind: input, shape index: {}]   ;;  %s12172_s4 = inlined_call_operand.vmem [shape: f32[1,8], index: 4, kind: input, shape index: {}]   ;;  %s12173_s5 = inlined_call_operand.vmem [shape: bf16[36,8], index: 5, kind: input, shape index: {}]   ;;  %s12174_s6 = inlined_call_operand.vmem [shape: f32[1,8], index: 6, kind: input, shape index: {}]   ;;  %s12175_s7 = inlined_call_operand.vmem [shape: bf16[100,8], index: 7, kind: input, shape index: {}]   ;;  %s12176_s8 = inlined_call_operand.vmem [shape: f32[1,8], index: 8, kind: input, shape index: {}]   ;;  %s12177_s9 = inlined_call_operand.hbm [shape: f32[2,16,16,32], index: 9, kind: output, shape index: {}]  }
   0x1   :  { %16 = vsyncpa [#allocation3 + $0x1], 0  ;;  %s6442_s30 = smov 0   ;;  %s6444_s10 = smov 0  }
   0x2   :  { %s6446_s11 = smov 0   ;;  %s6448_s12 = smov 0  }
   0x3 LB: > { %s6463_s13 = sadd.s32 4294967295, %s6369_s12   ;;  %s5851_s14 = sadd.s32 4294967294, %s6369_s12   ;;  %s6369_s12 = sphi %s6448_s12, %s13970_s12   ;;  %s6365_s11 = sphi %s6446_s11, %s13969_s11   ;;  %s6361_s10 = sphi %s6444_s10, %s13968_s10   ;;  %s6357_s30 = sphi %s6442_s30, %s13967_s30  }
   0x4   : > { %s6467_s15 = sadd.s32 1, %s6369_s12   ;;  %s223_s16 = sadd.s32 1, %s6365_s11 }
   0x5   : > { %s220_s17 = ssub.s32 %s6369_s12, %s6467_s15  ;;  %p233_p0 = scmp.ne.s32.totalorder %s6365_s11, %s6361_s10 }
   0x6   : > { %p221_p1 = scmp.eq.s32.totalorder %s220_s17, 0  ;;  %p234_p2 = scmp.eq.s32.totalorder %s6463_s13, 1 }
   0x7   : > { %p239_p3 = scmp.ne.s32.totalorder %s6361_s10, %s6357_s30  ;;  %p240_p4 = scmp.eq.s32.totalorder %s5851_s14, 1 }
   0x8   : > { %s6478_s18 = scalar_select %p221_p1, %s6365_s11, %s223_s16  }
   0x9   : > { %p6480_p5 = por %p234_p2, %p233_p0  ;;  %p6484_p6 = por %p240_p4, %p239_p3 }
   0xa   : > { %p5854_p7 = scmp.ge.s32.totalorder %s6369_s12, 1  ;;  %p290_p8 = scmp.lt.s32.totalorder %s6369_s12, 3 }
   0xc   : > { %p291_p9 = pnand %p5854_p7, %p290_p8 }
   0xe   : > { %294 = sbr.rel (%p291_p9) target bundleno = 2033 (0x7f1), region = 56 }
  0x15   : > { %v380_v0 = vld [vmem:[%s12169_s1] sm:$0x3]  ;;  %vm437_vm0 = vcmask 1041408   ;;  %p326_p10 = scmp.lt.s32.totalorder %s6463_s13, 1  ;;  %v12211_v2 = vmov 0   ;;  %s6372_s28 = smov 24  }
  0x16   : > { %6171 = vmatprep.subr.msk.bf16.mxu0 %vm437_vm0, %v380_v0  ;;  %v439_v1 = vsel %vm437_vm0, %v380_v0, 0  ;;  %v6497_v3 = vrot.slane %v12211_v2, 1  ;;  %s6373_s29 = smov 4   ;;  %vm388_vm1 = vcmask 31744   ;;  %s6374_s14 = smov 28   ;;  %v6564_v55 = vrot.slane %v12211_v2, 2 }
  0x17   : > { %6020 = vmatpush3.bf16.msra.mxu0 %v439_v1  ;;  %s327_s23 = scalar_select %p326_p10, %s6463_s13, 1  ;;  %v6576_v57 = vld [vmem:[%s12170_s2] ss:$0 sm:$0xff]  ;;  %vm666_vm2 = vcmask 1040384   ;;  %vm1477_vm3 = vsmask.f32 256 }
  0x18   : > { %12679 = vst [vmem:[#allocation5_spill] sm:$0xff] %v6497_v3  ;;  %v6244_v4 = vpack.i.bf16 %v6497_v3, %v12211_v2  ;;  %v6234_v5 = vpack.i.bf16 %v12211_v2, %v6497_v3  ;;  %v6249_v54 = vpack.i.bf16 %v6497_v3, %v6497_v3  ;;  %s6375_s16 = smov 8   ;;  %12680 = vst [vmem:[#allocation6_spill] sm:$0xff] %v6564_v55  ;;  %s6376_s17 = smov 32   ;;  %vm763_vm4 = vcmask 1046528  }
  0x19   : > { %s5941_s24 = sshll.u32 %s327_s23, 8  ;;  %v6568_v56 = vor.u32 %v6564_v55, %v6497_v3  ;;  %s6377_s21 = smov 12   ;;  %vm6839_vm5 = vmand %vm666_vm2, %vm1477_vm3  ;;  %vm1511_vm6 = vsmask.f32 7424  ;;  %vm2949_vm7 = vsmask.f32 6400 }
  0x1a   : > { %s6507_s27 = scalar_lea.vmem %s12168_s0, %s5941_s24  ;;  %6245 = vrot.lane.b32.xlu1 %v6244_v4, %s6372_s28  ;;  %6235 = vrot.lane.b32.xlu0 %v6234_v5, %s6373_s29  ;;  %s6378_s24 = smov 116   ;;  %vm12675_vm8 = vcmask 64512   ;;  %vm2117_vm9 = vcmask 97280   ;;  %vm2150_vm10 = vcmask 130048   ;;  %vm2183_vm11 = vcmask 162816  }
  0x1b   : > { %v332_v6 = vld [vmem:[%s6507_s27] sm:$0xff]  ;;  %v333_v7 = vld [vmem:[%s6507_s27 + $0x8] sm:$0xff]  ;;  %v334_v8 = vld [vmem:[%s6507_s27 + $0x10] sm:$0xff]  ;;  %12681 = vst [vmem:[#allocation7_spill] sm:$0xff] %v6568_v56  ;;  %s6379_s25 = smov 120   ;;  %s6380_s26 = smov 20  }
  0x1c   : > { %v364_v9 = vpack.c.bf16 %v333_v7, %v332_v6  ;;  %v335_v10 = vld [vmem:[%s6507_s27 + $0x18] sm:$0xff]  ;;  %v336_v11 = vld [vmem:[%s6507_s27 + $0x20] sm:$0xff]  ;;  %v337_v12 = vld [vmem:[%s6507_s27 + $0x28] sm:$0xff]  ;;  %s6381_s22 = smov 16   ;;  %vm2249_vm12 = vcmask 228352   ;;  %vm12676_vm13 = vcmask 195584  }
  0x1d   : > { %v365_v13 = vpack.c.bf16 %v335_v10, %v334_v8  ;;  %v366_v14 = vpack.c.bf16 %v337_v12, %v336_v11  ;;  %v338_v15 = vld [vmem:[%s6507_s27 + $0x30] sm:$0xff]  ;;  %v339_v16 = vld [vmem:[%s6507_s27 + $0x38] sm:$0xff]  ;;  %v340_v17 = vld [vmem:[%s6507_s27 + $0x40] sm:$0xff]  ;;  %vm2282_vm14 = vcmask 261120   ;;  %vm2342_vm15 = vcmask 293888   ;;  %s6382_s23 = smov 36  }
  0x1e   : > { %6021 = vmatprep.mubr.msk.bf16.mxu0 %vm388_vm1, %v364_v9  ;;  %v341_v18 = vld [vmem:[%s6507_s27 + $0x48] sm:$0xff]  ;;  %v367_v19 = vpack.c.bf16 %v339_v16, %v338_v15  ;;  %v342_v21 = vld [vmem:[%s6507_s27 + $0x50] sm:$0xff]  ;;  %v343_v22 = vld [vmem:[%s6507_s27 + $0x58] sm:$0xff]  ;;  %6250 = vrot.lane.b32.xlu1 %v6249_v54, %s6374_s14  ;;  %vm3110_vm3 = vcmask 1045504  }
  0x1f   : > { %6022 = vmatmul.mubr.msk.bf16.vlgmr.msra.gmra.mrb[0].mxu0 %vm388_vm1, %v365_v13  ;;  %v368_v20 = vpack.c.bf16 %v341_v18, %v340_v17  ;;  %v344_v23 = vld [vmem:[%s6507_s27 + $0x60] sm:$0xff]  ;;  %v345_v24 = vld [vmem:[%s6507_s27 + $0x68] sm:$0xff]  ;;  %v369_v25 = vpack.c.bf16 %v343_v22, %v342_v21  ;;  %v346_v27 = vld [vmem:[%s6507_s27 + $0x70] sm:$0xff]  ;;  %6240 = vrot.lane.b32.xlu0 %v6249_v54, %s6375_s16 }
  0x20   : > { %6025 = vmatprep.mubr.msk.bf16.mxu0 %vm388_vm1, %v366_v14  ;;  %v370_v26 = vpack.c.bf16 %v345_v24, %v344_v23  ;;  %v347_v28 = vld [vmem:[%s6507_s27 + $0x78] sm:$0xff]  ;;  %v348_v29 = vld [vmem:[%s6507_s27 + $0x80] sm:$0xff]  ;;  %v349_v30 = vld [vmem:[%s6507_s27 + $0x88] sm:$0xff] }
  0x21   : > { %v371_v31 = vpack.c.bf16 %v347_v28, %v346_v27  ;;  %v372_v32 = vpack.c.bf16 %v349_v30, %v348_v29  ;;  %v350_v33 = vld [vmem:[%s6507_s27 + $0x90] sm:$0xff]  ;;  %v351_v34 = vld [vmem:[%s6507_s27 + $0x98] sm:$0xff]  ;;  %v352_v35 = vld [vmem:[%s6507_s27 + $0xa0] sm:$0xff] }
  0x22   : > { %v353_v36 = vld [vmem:[%s6507_s27 + $0xa8] sm:$0xff]  ;;  %v373_v37 = vpack.c.bf16 %v351_v34, %v350_v33  ;;  %v354_v39 = vld [vmem:[%s6507_s27 + $0xb0] sm:$0xff]  ;;  %v355_v40 = vld [vmem:[%s6507_s27 + $0xb8] sm:$0xff]  ;;  %6255 = vrot.lane.b32.xlu1 %v6249_v54, %s6376_s17 }
  0x23   : > { %v374_v38 = vpack.c.bf16 %v353_v36, %v352_v35  ;;  %v356_v41 = vld [vmem:[%s6507_s27 + $0xc0] sm:$0xff]  ;;  %v357_v42 = vld [vmem:[%s6507_s27 + $0xc8] sm:$0xff]  ;;  %v375_v43 = vpack.c.bf16 %v355_v40, %v354_v39  ;;  %v358_v45 = vld [vmem:[%s6507_s27 + $0xd0] sm:$0xff]  ;;  %3080 = vrot.lane.b32.xlu0 %v6568_v56, %s6377_s21 }
  0x24   : > { %v376_v44 = vpack.c.bf16 %v357_v42, %v356_v41  ;;  %v359_v46 = vld [vmem:[%s6507_s27 + $0xd8] sm:$0xff]  ;;  %v360_v47 = vld [vmem:[%s6507_s27 + $0xe0] sm:$0xff]  ;;  %v361_v48 = vld [vmem:[%s6507_s27 + $0xe8] sm:$0xff] }
  0x25   : > { %v377_v49 = vpack.c.bf16 %v359_v46, %v358_v45  ;;  %v378_v50 = vpack.c.bf16 %v361_v48, %v360_v47  ;;  %v362_v51 = vld [vmem:[%s6507_s27 + $0xf0] sm:$0xff]  ;;  %v363_v52 = vld [vmem:[%s6507_s27 + $0xf8] sm:$0xff] }
  0x26   : > { %v379_v53 = vpack.c.bf16 %v363_v52, %v362_v51 }
  0x27   : > { %6026 = vmatmul.mubr.msk.bf16.gmra.mrb[4].mxu0 %vm388_vm1, %v367_v19 }
  0x28   : > { %6029 = vmatprep.mubr.msk.bf16.mxu0 %vm388_vm1, %v368_v20 }
  0x2f   : > { %6030 = vmatmul.mubr.msk.bf16.gmra.mrb[8].mxu0 %vm388_vm1, %v369_v25 }
  0x30   : > { %6033 = vmatprep.mubr.msk.bf16.mxu0 %vm388_vm1, %v370_v26 }
  0x37   : > { %6034 = vmatmul.mubr.msk.bf16.gmra.mrb[12].mxu0 %vm388_vm1, %v371_v31 }
  0x38   : > { %6037 = vmatprep.mubr.msk.bf16.mxu0 %vm388_vm1, %v372_v32 }
  0x3f   : > { %6038 = vmatmul.mubr.msk.bf16.gmra.mrb[16].mxu0 %vm388_vm1, %v373_v37 }
  0x40   : > { %6041 = vmatprep.mubr.msk.bf16.mxu0 %vm388_vm1, %v374_v38 }
  0x47   : > { %6042 = vmatmul.mubr.msk.bf16.gmra.mrb[20].mxu0 %vm388_vm1, %v375_v43 }
  0x48   : > { %6045 = vmatprep.mubr.msk.bf16.mxu0 %vm388_vm1, %v376_v44 }
  0x4f   : > { %6046 = vmatmul.mubr.msk.bf16.gmra.mrb[24].mxu0 %vm388_vm1, %v377_v49 }
  0x50   : > { %6049 = vmatprep.mubr.msk.bf16.mxu0 %vm388_vm1, %v378_v50 }
  0x57   : > { %6050 = vmatmul.mubr.msk.bf16.gmra.mrb[28].mxu0 %vm388_vm1, %v379_v53 }
  0xf2   : > { %v6023_v58 = vpop.f32.mrb[0].mxu0 }
  0xf3   : > { %v6579_v59 = vadd.f32 %v6023_v58, %v6576_v57  ;;  %v475_v60 = vpop.f32.mrb[1].mxu0 }
  0xf4   : > { %v6582_v61 = vadd.f32 %v6576_v57, %v475_v60  ;;  %v6024_v62 = vpop.f32.mrb[2].mxu0 }
  0xf5   : > { %12682 = vst [vmem:[#allocation8_spill] sm:$0xff] %v6579_v59  ;;  %v6585_v63 = vadd.f32 %v6024_v62, %v6576_v57  ;;  %v478_v0 = vpop.f32.mrb[3].mxu0  ;;  %v12207_v4 = vmax.f32 %v6579_v59, 0.0 }
  0xf6   : > { %12683 = vst [vmem:[#allocation9_spill] sm:$0xff] %v6582_v61  ;;  %v6588_v1 = vadd.f32 %v6576_v57, %v478_v0  ;;  %v12209_v6 = vmax.f32 %v6582_v61, 0.0 }
  0xf7   : > { %12684 = vst [vmem:[#allocation10_spill] sm:$0xff] %v6585_v63  ;;  %v12206_v5 = vmax.f32 %v6585_v63, 0.0 }
  0xf8   : > { %12685 = vst [vmem:[#allocation11_spill] sm:$0xff] %v6588_v1  ;;  %v12208_v7 = vmax.f32 %v6588_v1, 0.0 }
  0xf9   : > { %v1253_v8 = vpack.c.bf16 %v12206_v5, %v12207_v4 }
  0xfa   : > { %v1252_v9 = vpack.c.bf16 %v12208_v7, %v12209_v6  ;;  %v6027_v10 = vpop.f32.mrb[4].mxu0 }
  0xfb   : > { %v2588_v11 = vrot.slane %v1253_v8, 7  ;;  %v1276_v12 = vshrl.u32 %v1253_v8, 16  ;;  %v6603_v13 = vadd.f32 %v6027_v10, %v6576_v57  ;;  %v491_v14 = vpop.f32.mrb[5].mxu0  ;;  %v1279_v28 = vshll.u32 %v1253_v8, 16 }
  0xfc   : > { %v2587_v15 = vrot.slane %v1252_v9, 7  ;;  %v1269_v16 = vshrl.u32 %v1252_v9, 16  ;;  %v6606_v17 = vadd.f32 %v6576_v57, %v491_v14  ;;  %v6028_v18 = vpop.f32.mrb[6].mxu0  ;;  %v1272_v30 = vshll.u32 %v1252_v9, 16 }
  0xfd   : > { %12686 = vst [vmem:[#allocation12_spill] sm:$0xff] %v6603_v13  ;;  %2605 = vrot.lane.b32.xlu1 %v2588_v11, %s6378_s24  ;;  %v12203_v19 = vmax.f32 %v6603_v13, 0.0  ;;  %v6611_v20 = vadd.f32 %v6028_v18, %v6576_v57  ;;  %v494_v21 = vpop.f32.mrb[7].mxu0  ;;  %v1278_v24 = vrot.slane %v1276_v12, 7 }
  0xfe   : > { %12687 = vst [vmem:[#allocation13_spill] sm:$0xff] %v6606_v17  ;;  %2603 = vrot.lane.b32.xlu0 %v2587_v15, %s6378_s24  ;;  %v12205_v22 = vmax.f32 %v6606_v17, 0.0  ;;  %v6616_v23 = vadd.f32 %v6576_v57, %v494_v21  ;;  %v1271_v26 = vrot.slane %v1269_v16, 7 }
  0xff   : > { %12688 = vst [vmem:[#allocation14_spill] sm:$0xff] %v6611_v20  ;;  %v12202_v25 = vmax.f32 %v6611_v20, 0.0  ;;  %v1281_v33 = vor.u32 %v1279_v28, %v1278_v24 }
 0x100   : > { %12689 = vst [vmem:[#allocation15_spill] sm:$0xff] %v6616_v23  ;;  %v12204_v27 = vmax.f32 %v6616_v23, 0.0  ;;  %v1274_v37 = vor.u32 %v1272_v30, %v1271_v26 }
 0x101   : > { %1386 = vrot.lane.b32.xlu1 %v1278_v24, %s6379_s25  ;;  %v1255_v29 = vpack.c.bf16 %v12202_v25, %v12203_v19 }
 0x102   : > { %1382 = vrot.lane.b32.xlu0 %v1271_v26, %s6379_s25  ;;  %v1254_v31 = vpack.c.bf16 %v12204_v27, %v12205_v22  ;;  %v6031_v32 = vpop.f32.mrb[8].mxu0 }
 0x103   : > { %v6631_v34 = vadd.f32 %v6031_v32, %v6576_v57  ;;  %v507_v35 = vpop.f32.mrb[9].mxu0  ;;  %v1290_v36 = vshrl.u32 %v1255_v29, 16  ;;  %v2590_v38 = vrot.slane %v1255_v29, 7  ;;  %v1293_v42 = vshll.u32 %v1255_v29, 16 }
 0x104   : > { %v6032_v39 = vpop.f32.mrb[10].mxu0  ;;  %v2589_v40 = vrot.slane %v1254_v31, 7  ;;  %v6635_v41 = vadd.f32 %v6576_v57, %v507_v35  ;;  %v1283_v48 = vshrl.u32 %v1254_v31, 16  ;;  %v1286_v58 = vshll.u32 %v1254_v31, 16 }
 0x105   : > { %12690 = vst [vmem:[#allocation16_spill] sm:$0xff] %v6631_v34  ;;  %1384 = vrot.lane.b32.xlu1 %v1281_v33, %s6379_s25  ;;  %v6638_v43 = vadd.f32 %v6032_v39, %v6576_v57  ;;  %v510_v44 = vpop.f32.mrb[11].mxu0  ;;  %v12191_v45 = vmax.f32 %v6631_v34, 0.0  ;;  %v1292_v46 = vrot.slane %v1290_v36, 7 }
 0x106   : > { %12691 = vst [vmem:[#allocation17_spill] sm:$0xff] %v6635_v41  ;;  %1380 = vrot.lane.b32.xlu0 %v1274_v37, %s6379_s25  ;;  %v6643_v47 = vadd.f32 %v6576_v57, %v510_v44  ;;  %v12201_v50 = vmax.f32 %v6635_v41, 0.0  ;;  %v1285_v54 = vrot.slane %v1283_v48, 7 }
 0x107   : > { %12692 = vst [vmem:[#allocation18_spill] sm:$0xff] %v6638_v43  ;;  %v12186_v49 = vmax.f32 %v6638_v43, 0.0  ;;  %v1295_v52 = vor.u32 %v1293_v42, %v1292_v46 }
 0x108   : > { %12693 = vst [vmem:[#allocation19_spill] sm:$0xff] %v6643_v47  ;;  %v12200_v51 = vmax.f32 %v6643_v47, 0.0  ;;  %v1288_v10 = vor.u32 %v1286_v58, %v1285_v54 }
 0x109   : > { %2609 = vrot.lane.b32.xlu1 %v2590_v38, %s6378_s24  ;;  %v1257_v53 = vpack.c.bf16 %v12186_v49, %v12191_v45 }
 0x10a   : > { %2607 = vrot.lane.b32.xlu0 %v2589_v40, %s6378_s24  ;;  %v6035_v60 = vpop.f32.mrb[12].mxu0  ;;  %v1256_v8 = vpack.c.bf16 %v12200_v51, %v12201_v50 }
 0x10b   : > { %v523_v62 = vpop.f32.mrb[13].mxu0  ;;  %v6661_v11 = vadd.f32 %v6035_v60, %v6576_v57  ;;  %v1304_v14 = vshrl.u32 %v1257_v53, 16  ;;  %v2592_v15 = vrot.slane %v1257_v53, 7  ;;  %v1307_v21 = vshll.u32 %v1257_v53, 16 }
 0x10c   : > { %v6036_v0 = vpop.f32.mrb[14].mxu0  ;;  %v2591_v16 = vrot.slane %v1256_v8, 7  ;;  %v6668_v18 = vadd.f32 %v6576_v57, %v523_v62  ;;  %v1297_v24 = vshrl.u32 %v1256_v8, 16  ;;  %v1300_v36 = vshll.u32 %v1256_v8, 16 }
 0x10d   : > { %1394 = vrot.lane.b32.xlu1 %v1292_v46, %s6379_s25  ;;  %v526_v9 = vpop.f32.mrb[15].mxu0  ;;  %12694 = vst [vmem:[#allocation20_spill] sm:$0xff] %v6661_v11  ;;  %v6664_v12 = vadd.f32 %v6036_v0, %v6576_v57  ;;  %v12183_v26 = vmax.f32 %v6661_v11, 0.0  ;;  %v1306_v30 = vrot.slane %v1304_v14, 7 }
 0x10e   : > { %1392 = vrot.lane.b32.xlu0 %v1295_v52, %s6379_s25  ;;  %12696 = vst [vmem:[#allocation22_spill] sm:$0xff] %v6668_v18  ;;  %v6674_v29 = vadd.f32 %v6576_v57, %v526_v9  ;;  %v1299_v35 = vrot.slane %v1297_v24, 7  ;;  %v12185_v38 = vmax.f32 %v6668_v18, 0.0 }
 0x10f   : > { %12695 = vst [vmem:[#allocation21_spill] sm:$0xff] %v6664_v12  ;;  %v12182_v28 = vmax.f32 %v6664_v12, 0.0  ;;  %v1309_v42 = vor.u32 %v1307_v21, %v1306_v30 }
 0x110   : > { %12697 = vst [vmem:[#allocation23_spill] sm:$0xff] %v6674_v29  ;;  %v12184_v40 = vmax.f32 %v6674_v29, 0.0  ;;  %v1302_v44 = vor.u32 %v1300_v36, %v1299_v35 }
 0x111   : > { %1390 = vrot.lane.b32.xlu1 %v1285_v54, %s6379_s25  ;;  %v1259_v39 = vpack.c.bf16 %v12182_v28, %v12183_v26 }
 0x112   : > { %1388 = vrot.lane.b32.xlu0 %v1288_v10, %s6379_s25  ;;  %v6039_v31 = vpop.f32.mrb[16].mxu0  ;;  %v1258_v46 = vpack.c.bf16 %v12184_v40, %v12185_v38 }
 0x113   : > { %v539_v32 = vpop.f32.mrb[17].mxu0  ;;  %v6691_v48 = vadd.f32 %v6039_v31, %v6576_v57  ;;  %v1318_v53 = vshrl.u32 %v1259_v39, 16  ;;  %v2594_v60 = vrot.slane %v1259_v39, 7  ;;  %v1321_v9 = vshll.u32 %v1259_v39, 16 }
 0x114   : > { %v6040_v33 = vpop.f32.mrb[18].mxu0  ;;  %v6698_v0 = vadd.f32 %v6576_v57, %v539_v32  ;;  %v1311_v10 = vshrl.u32 %v1258_v46, 16 }
 0x115   : > { %2613 = vrot.lane.b32.xlu1 %v2592_v15, %s6378_s24  ;;  %v542_v37 = vpop.f32.mrb[19].mxu0  ;;  %12698 = vst [vmem:[#allocation24_spill] sm:$0xff] %v6691_v48  ;;  %v6694_v52 = vadd.f32 %v6040_v33, %v6576_v57  ;;  %v12179_v15 = vmax.f32 %v6691_v48, 0.0  ;;  %v1320_v24 = vrot.slane %v1318_v53, 7  ;;  %v1314_v33 = vshll.u32 %v1258_v46, 16 }
 0x116   : > { %2611 = vrot.lane.b32.xlu0 %v2591_v16, %s6378_s24  ;;  %12700 = vst [vmem:[#allocation26_spill] sm:$0xff] %v6698_v0  ;;  %v6701_v8 = vadd.f32 %v6576_v57, %v542_v37  ;;  %v2593_v16 = vrot.slane %v1258_v46, 7  ;;  %v1313_v32 = vrot.slane %v1311_v10, 7 }
 0x117   : > { %12699 = vst [vmem:[#allocation25_spill] sm:$0xff] %v6694_v52  ;;  %v12178_v21 = vmax.f32 %v6694_v52, 0.0  ;;  %v1323_v36 = vor.u32 %v1321_v9, %v1320_v24 }
 0x118   : > { %12701 = vst [vmem:[#allocation27_spill] sm:$0xff] %v6701_v8  ;;  %v12180_v31 = vmax.f32 %v6701_v8, 0.0 }
 0x119   : > { %1402 = vrot.lane.b32.xlu1 %v1306_v30, %s6379_s25  ;;  %v12181_v30 = vmax.f32 %v6698_v0, 0.0 }
 0x11a   : > { %1400 = vrot.lane.b32.xlu0 %v1309_v42, %s6379_s25  ;;  %v6043_v54 = vpop.f32.mrb[20].mxu0 }
 0x11b   : > { %v555_v58 = vpop.f32.mrb[21].mxu0  ;;  %v1260_v46 = vpack.c.bf16 %v12180_v31, %v12181_v30 }
 0x11c   : > { %v6044_v62 = vpop.f32.mrb[22].mxu0 }
 0x11d   : > { %1398 = vrot.lane.b32.xlu1 %v1299_v35, %s6379_s25  ;;  %v558_v14 = vpop.f32.mrb[23].mxu0  ;;  %v1261_v35 = vpack.c.bf16 %v12178_v21, %v12179_v15 }
 0x11e   : > { %1396 = vrot.lane.b32.xlu0 %v1302_v44, %s6379_s25 }
 0x11f   : > { %v2596_v15 = vrot.slane %v1261_v35, 7 }
 0x121   : > { %2617 = vrot.lane.b32.xlu1 %v2594_v60, %s6378_s24  ;;  %v1316_v60 = vor.u32 %v1314_v33, %v1313_v32  ;;  %v6740_v33 = vadd.f32 %v6576_v57, %v555_v58 }
 0x122   : > { %2615 = vrot.lane.b32.xlu0 %v2593_v16, %s6378_s24  ;;  %v6047_v37 = vpop.f32.mrb[24].mxu0  ;;  %v6730_v16 = vadd.f32 %v6043_v54, %v6576_v57 }
 0x123   : > { %v6715_v39 = vadd.f32 %v6047_v37, %v6576_v57  ;;  %v571_v42 = vpop.f32.mrb[25].mxu0  ;;  %v6733_v37 = vadd.f32 %v6044_v62, %v6576_v57  ;;  %12708 = vst [vmem:[#allocation34_spill] sm:$0xff] %v6740_v33 }
 0x124   : > { %v6718_v44 = vadd.f32 %v6576_v57, %v571_v42  ;;  %v6048_v53 = vpop.f32.mrb[26].mxu0  ;;  %12705 = vst [vmem:[#allocation31_spill] sm:$0xff] %v6730_v16  ;;  %v1332_v42 = vshrl.u32 %v1261_v35, 16  ;;  %v12188_v54 = vmax.f32 %v6730_v16, 0.0 }
 0x125   : > { %12702 = vst [vmem:[#allocation28_spill] sm:$0xff] %v6715_v39  ;;  %1410 = vrot.lane.b32.xlu1 %v1320_v24, %s6379_s25  ;;  %v6726_v10 = vadd.f32 %v6048_v53, %v6576_v57  ;;  %v574_v9 = vpop.f32.mrb[27].mxu0  ;;  %12706 = vst [vmem:[#allocation32_spill] sm:$0xff] %v6733_v37  ;;  %v2595_v24 = vrot.slane %v1260_v46, 7  ;;  %v6743_v53 = vadd.f32 %v6576_v57, %v558_v14  ;;  %v12187_v62 = vmax.f32 %v6733_v37, 0.0 }
 0x126   : > { %12703 = vst [vmem:[#allocation29_spill] sm:$0xff] %v6718_v44  ;;  %1408 = vrot.lane.b32.xlu0 %v1323_v36, %s6379_s25  ;;  %v6736_v21 = vadd.f32 %v6576_v57, %v574_v9  ;;  %v1335_v36 = vshll.u32 %v1261_v35, 16  ;;  %v1334_v31 = vrot.slane %v1332_v42, 7  ;;  %v1325_v9 = vshrl.u32 %v1260_v46, 16 }
 0x127   : > { %12704 = vst [vmem:[#allocation30_spill] sm:$0xff] %v6726_v10  ;;  %12709 = vst [vmem:[#allocation35_spill] sm:$0xff] %v6743_v53  ;;  %v12190_v14 = vmax.f32 %v6740_v33, 0.0  ;;  %v12189_v35 = vmax.f32 %v6743_v53, 0.0 }
 0x128   : > { %12707 = vst [vmem:[#allocation33_spill] sm:$0xff] %v6736_v21  ;;  %v1327_v38 = vrot.slane %v1325_v9, 7  ;;  %v12192_v9 = vmax.f32 %v6726_v10, 0.0 }
 0x129   : > { %1406 = vrot.lane.b32.xlu1 %v1313_v32, %s6379_s25 }
 0x12a   : > { %1404 = vrot.lane.b32.xlu0 %v1316_v60, %s6379_s25  ;;  %v6051_v30 = vpop.f32.mrb[28].mxu0  ;;  %v1328_v60 = vshll.u32 %v1260_v46, 16 }
 0x12b   : > { %v6749_v28 = vadd.f32 %v6051_v30, %v6576_v57  ;;  %v587_v32 = vpop.f32.mrb[29].mxu0  ;;  %v1263_v30 = vpack.c.bf16 %v12187_v62, %v12188_v54 }
 0x12c   : > { %v6752_v58 = vadd.f32 %v6576_v57, %v587_v32  ;;  %v6052_v26 = vpop.f32.mrb[30].mxu0  ;;  %v1337_v32 = vor.u32 %v1335_v36, %v1334_v31 }
 0x12d   : > { %12710 = vst [vmem:[#allocation36_spill] sm:$0xff] %v6749_v28  ;;  %2621 = vrot.lane.b32.xlu1 %v2596_v15, %s6378_s24  ;;  %v6758_v40 = vadd.f32 %v6052_v26, %v6576_v57  ;;  %v590_v42 = vpop.f32.mrb[31].mxu0  ;;  %v1262_v15 = vpack.c.bf16 %v12189_v35, %v12190_v14  ;;  %v1330_v26 = vor.u32 %v1328_v60, %v1327_v38  ;;  %v1346_v46 = vshrl.u32 %v1263_v30, 16 }
 0x12e   : > { %12711 = vst [vmem:[#allocation37_spill] sm:$0xff] %v6752_v58  ;;  %2619 = vrot.lane.b32.xlu0 %v2595_v24, %s6378_s24  ;;  %v6766_v49 = vadd.f32 %v6576_v57, %v590_v42  ;;  %v2598_v62 = vrot.slane %v1263_v30, 7  ;;  %v1349_v36 = vshll.u32 %v1263_v30, 16  ;;  %v12193_v57 = vmax.f32 %v6715_v39, 0.0 }
 0x12f   : > { %12712 = vst [vmem:[#allocation38_spill] sm:$0xff] %v6758_v40  ;;  %v2597_v24 = vrot.slane %v1262_v15, 7  ;;  %v1348_v42 = vrot.slane %v1346_v46, 7  ;;  %v1339_v54 = vshrl.u32 %v1262_v15, 16  ;;  %v12199_v35 = vmax.f32 %v6718_v44, 0.0 }
 0x130   : > { %12713 = vst [vmem:[#allocation39_spill] sm:$0xff] %v6766_v49 }
 0x131   : > { %1418 = vrot.lane.b32.xlu1 %v1334_v31, %s6379_s25  ;;  %v12198_v31 = vmax.f32 %v6736_v21, 0.0  ;;  %v1351_v60 = vor.u32 %v1349_v36, %v1348_v42  ;;  %v1341_v30 = vrot.slane %v1339_v54, 7  ;;  %v12195_v54 = vmax.f32 %v6749_v28, 0.0 }
 0x132   : > { %1416 = vrot.lane.b32.xlu0 %v1337_v32, %s6379_s25  ;;  %v1342_v32 = vshll.u32 %v1262_v15, 16  ;;  %v12194_v15 = vmax.f32 %v6758_v40, 0.0 }
 0x135   : > { %1414 = vrot.lane.b32.xlu1 %v1327_v38, %s6379_s25  ;;  %v1265_v38 = vpack.c.bf16 %v12192_v9, %v12193_v57  ;;  %v12197_v57 = vmax.f32 %v6752_v58, 0.0 }
 0x136   : > { %1412 = vrot.lane.b32.xlu0 %v1330_v26, %s6379_s25  ;;  %v1264_v26 = vpack.c.bf16 %v12198_v31, %v12199_v35 }
 0x137   : > { %v1360_v46 = vshrl.u32 %v1265_v38, 16  ;;  %v2600_v14 = vrot.slane %v1265_v38, 7  ;;  %v1363_v45 = vshll.u32 %v1265_v38, 16  ;;  %v1267_v38 = vpack.c.bf16 %v12194_v15, %v12195_v54 }
 0x138   : > { %v1353_v9 = vshrl.u32 %v1264_v26, 16 }
 0x139   : > { %2625 = vrot.lane.b32.xlu1 %v2598_v62, %s6378_s24  ;;  %v1344_v62 = vor.u32 %v1342_v32, %v1341_v30  ;;  %v1362_v36 = vrot.slane %v1360_v46, 7  ;;  %v2602_v46 = vrot.slane %v1267_v38, 7 }
 0x13a   : > { %2623 = vrot.lane.b32.xlu0 %v2597_v24, %s6378_s24  ;;  %v2599_v24 = vrot.slane %v1264_v26, 7  ;;  %v1355_v32 = vrot.slane %v1353_v9, 7 }
 0x13d   : > { %1426 = vrot.lane.b32.xlu1 %v1348_v42, %s6379_s25  ;;  %v1356_v42 = vshll.u32 %v1264_v26, 16  ;;  %v1374_v26 = vshrl.u32 %v1267_v38, 16 }
 0x13e   : > { %1424 = vrot.lane.b32.xlu0 %v1351_v60, %s6379_s25  ;;  %v12196_v60 = vmax.f32 %v6766_v49, 0.0 }
 0x13f   : > { %v1376_v15 = vrot.slane %v1374_v26, 7 }
 0x141   : > { %1422 = vrot.lane.b32.xlu1 %v1341_v30, %s6379_s25  ;;  %v1365_v30 = vor.u32 %v1363_v45, %v1362_v36  ;;  %v1377_v45 = vshll.u32 %v1267_v38, 16  ;;  %v6820_v38 = vpop.permute.xlu0 %6235 }
 0x142   : > { %1420 = vrot.lane.b32.xlu0 %v1344_v62, %s6379_s25  ;;  %v1266_v62 = vpack.c.bf16 %v12196_v60, %v12197_v57  ;;  %12715 = vst [vmem:[#allocation41_spill] sm:$0xff] %v6820_v38 }
 0x144   : > { %v1367_v9 = vshrl.u32 %v1266_v62, 16  ;;  %v1370_v60 = vshll.u32 %v1266_v62, 16 }
 0x145   : > { %2629 = vrot.lane.b32.xlu1 %v2600_v14, %s6378_s24  ;;  %v1358_v14 = vor.u32 %v1356_v42, %v1355_v32 }
 0x146   : > { %2627 = vrot.lane.b32.xlu0 %v2599_v24, %s6378_s24  ;;  %v2601_v24 = vrot.slane %v1266_v62, 7  ;;  %v1369_v54 = vrot.slane %v1367_v9, 7 }
 0x148   : > { %v1372_v42 = vor.u32 %v1370_v60, %v1369_v54 }
 0x149   : > { %1434 = vrot.lane.b32.xlu1 %v1362_v36, %s6379_s25  ;;  %v1379_v36 = vor.u32 %v1377_v45, %v1376_v15 }
 0x14a   : > { %1432 = vrot.lane.b32.xlu0 %v1365_v30, %s6379_s25  ;;  %v6818_v30 = vpop.permute.xlu1 %6245 }
 0x14b   : > { %12714 = vst [vmem:[#allocation40_spill] sm:$0xff] %v6818_v30 }
 0x14d   : > { %1430 = vrot.lane.b32.xlu1 %v1355_v32, %s6379_s25 }
 0x14e   : > { %1428 = vrot.lane.b32.xlu0 %v1358_v14, %s6379_s25  ;;  %v6822_v32 = vpop.permute.xlu1 %6250  ;;  %v6824_v14 = vpop.permute.xlu0 %6240 }
 0x14f   : > { %12716 = vst [vmem:[#allocation42_spill] sm:$0xff] %v6822_v32  ;;  %12717 = vst [vmem:[#allocation43_spill] sm:$0xff] %v6824_v14 }
 0x151   : > { %2633 = vrot.lane.b32.xlu1 %v2602_v46, %s6378_s24 }
 0x152   : > { %2631 = vrot.lane.b32.xlu0 %v2601_v24, %s6378_s24  ;;  %v6826_v26 = vpop.permute.xlu1 %6255  ;;  %v6828_v62 = vpop.permute.xlu0 %3080  ;;  %s6383_s24 = smov 40  }
 0x153   : > { %12718 = vst [vmem:[#allocation44_spill] sm:$0xff] %v6826_v26  ;;  %12719 = vst [vmem:[#allocation45_spill] sm:$0xff] %v6828_v62 }
 0x155   : > { %1442 = vrot.lane.b32.xlu1 %v1376_v15, %s6379_s25 }
 0x156   : > { %1440 = vrot.lane.b32.xlu0 %v1379_v36, %s6379_s25 }
 0x159   : > { %1438 = vrot.lane.b32.xlu1 %v1369_v54, %s6379_s25 }
 0x15a   : > { %1436 = vrot.lane.b32.xlu0 %v1372_v42, %s6379_s25  ;;  %s6384_s25 = smov 44  }
 0x16f   : > { %v2606_v15 = vpop.permute.xlu1 %2605 }
 0x170   : > { %v6831_v60 = vsel %vm666_vm2, 0, %v2606_v15  ;;  %v6834_v54 = vsel %vm666_vm2, %v2606_v15, 0  ;;  %v2604_v46 = vpop.permute.xlu0 %2603 }
 0x171   : > { %12720 = vst [vmem:[#allocation46_spill] sm:$0xff] %v6831_v60  ;;  %12721 = vst [vmem:[#allocation47_spill] sm:$0xff] %v6834_v54  ;;  %v2882_v24 = vrot.slane %v6831_v60, 1  ;;  %v12210_v45 = vrot.slane %v6834_v54, 1  ;;  %v2695_v57 = vshll.u32 %v6831_v60, 16  ;;  %v6850_v31 = vsel %vm666_vm2, 0, %v2604_v46 }
 0x172   : > { %12725 = vst [vmem:[#allocation49_spill] sm:$0xff] %v6850_v31  ;;  %v6853_v35 = vsel %vm666_vm2, %v2604_v46, 0  ;;  %v2879_v19 = vrot.slane %v6850_v31, 1  ;;  %v2699_v4 = vshll.u32 %v6834_v54, 16  ;;  %v2685_v2 = vshll.u32 %v6850_v31, 16 }
 0x173   : > { %v1387_v36 = vpop.permute.xlu1 %1386  ;;  %v6846_v42 = vsel %vm763_vm4, %v2882_v24, %v12210_v45  ;;  %12726 = vst [vmem:[#allocation50_spill] sm:$0xff] %v6853_v35  ;;  %v2880_v27 = vrot.slane %v6853_v35, 1  ;;  %v2697_v22 = vrot.slane %v2695_v57, 1  ;;  %v2957_v5 = vshrl.u32 %v6853_v35, 16 }
 0x174   : > { %12724 = vst [vmem:[#allocation48_spill] sm:$0xff] %v6846_v42  ;;  %v1383_v15 = vpop.permute.xlu0 %1382  ;;  %2923 = vrot.lane.b32.xlu1 %v6846_v42, %s6375_s16  ;;  %v6859_v51 = vsel %vm6839_vm5, %v1387_v36, 0  ;;  %v12223_v7 = vshll.u32 %v6853_v35, 16  ;;  %v12224_v45 = vshrl.u32 %v6850_v31, 16  ;;  %v2964_v33 = vrot.slane %v2695_v57, 2 }
 0x175   : > { %v1770_v46 = vrot.slane %v6859_v51, 1  ;;  %v6881_v28 = vsel %vm763_vm4, %v2879_v19, %v2880_v27  ;;  %v1495_v19 = vsel %vm6839_vm5, %v1383_v15, 0  ;;  %v2955_v27 = vrot.slane %v2685_v2, 2 }
 0x176   : > { %12727 = vst [vmem:[#allocation51_spill] sm:$0xff] %v6881_v28  ;;  %v1767_v15 = vrot.slane %v1495_v19, 1  ;;  %v2969_v48 = vrot.slane %v2699_v4, 2 }
 0x177   : > { %v1385_v50 = vpop.permute.xlu1 %1384 }
 0x178   : > { %v6863_v24 = vsel %vm6839_vm5, 0, %v1385_v50  ;;  %v1381_v25 = vpop.permute.xlu0 %1380  ;;  %v2693_v50 = vshrl.u32 %v6831_v60, 16 }
 0x179   : > { %1846 = vrot.lane.b32.xlu1 %v6863_v24, %s6377_s21  ;;  %1956 = vrot.lane.b32.xlu0 %v6863_v24, %s6372_s28  ;;  %v1769_v36 = vrot.slane %v6863_v24, 1  ;;  %v6887_v10 = vsel %vm6839_vm5, 0, %v1381_v25  ;;  %v2960_v25 = vrot.slane %v12223_v7, 2  ;;  %v1535_v37 = vshll.u32 %v6863_v24, 16 }
 0x17a   : > { %v2698_v49 = vor.u32 %v2697_v22, %v2693_v50  ;;  %v2954_v22 = vrot.slane %v12224_v45, 1  ;;  %v2963_v53 = vrot.slane %v2693_v50, 1  ;;  %v1533_v57 = vshrl.u32 %v6863_v24, 16 }
 0x17b   : > { %v1771_v6 = vsel %vm763_vm4, %v1769_v36, %v1770_v46  ;;  %v2610_v40 = vpop.permute.xlu1 %2609  ;;  %v2959_v46 = vrot.slane %v2957_v5, 1  ;;  %v2701_v36 = vrot.slane %v2699_v4, 1  ;;  %v1766_v5 = vrot.slane %v6887_v10, 1 }
 0x17c   : > { %v6883_v58 = vpop.permute.xlu0 %2607  ;;  %v2956_v7 = vor.u32 %v2955_v27, %v2954_v22  ;;  %v1537_v8 = vrot.slane %v1535_v37, 1  ;;  %v1523_v50 = vshll.u32 %v6887_v10, 16  ;;  %v6923_v22 = vsel %vm666_vm2, 0, %v2610_v40 }
 0x17d   : > { %1926 = vrot.lane.b32.xlu1 %v1771_v6, %s6380_s26  ;;  %2921 = vrot.lane.b32.xlu0 %v6881_v28, %s6375_s16  ;;  %v6902_v44 = vsel %vm1511_vm6, %v2698_v49, %v2701_v36  ;;  %v2961_v45 = vor.u32 %v2960_v25, %v2959_v46  ;;  %v1768_v49 = vsel %vm763_vm4, %v1766_v5, %v1767_v15  ;;  %v12729_v36 = vshrl.u32 %v6834_v54, 16 }
 0x17e   : > { %12728 = vst [vmem:[#allocation52_spill] sm:$0xff] %v6902_v44  ;;  %v1540_v46 = vshll.u32 %v6859_v51, 16  ;;  %12731 = vst [vmem:[#allocation54_spill] sm:$0xff] %v6923_v22  ;;  %v6926_v27 = vsel %vm666_vm2, %v2610_v40, 0  ;;  %v2965_v25 = vor.u32 %v2964_v33, %v2963_v53  ;;  %v1538_v15 = vor.u32 %v1537_v8, %v1533_v57 }
 0x17f   : > { %v6898_v39 = vpop.permute.xlu1 %1394  ;;  %v6915_v52 = vrot.slane %v12729_v36, 1  ;;  %12732 = vst [vmem:[#allocation55_spill] sm:$0xff] %v6926_v27  ;;  %v6931_v37 = vsel %vm2949_vm7, %v2956_v7, %v2961_v45  ;;  %v2888_v40 = vrot.slane %v6923_v22, 1  ;;  %v6941_v12 = vrot.slane %v6926_v27, 1 }
 0x180   : > { %v1393_v16 = vpop.permute.xlu0 %1392  ;;  %12733 = vst [vmem:[#allocation56_spill] sm:$0xff] %v6931_v37  ;;  %v1542_v36 = vrot.slane %v1540_v46, 1  ;;  %v2687_v8 = vrot.slane %v2685_v2, 1  ;;  %v1525_v33 = vrot.slane %v1523_v50, 1  ;;  %v1521_v45 = vshrl.u32 %v6887_v10, 16 }
 0x181   : > { %2825 = vrot.lane.b32.xlu1 %v6902_v44, %s6373_s29  ;;  %1844 = vrot.lane.b32.xlu0 %v6887_v10, %s6377_s21  ;;  %12730 = vst [vmem:[#allocation53_spill] sm:$0xff] %v6915_v52  ;;  %v2970_v5 = vor.u32 %v2969_v48, %v6915_v52  ;;  %12734 = vst [vmem:[#allocation57_spill] sm:$0xff] %v6941_v12  ;;  %v6957_v46 = vsel %vm763_vm4, %v2888_v40, %v6941_v12  ;;  %v12737_v2 = vshrl.u32 %v6850_v31, 16 }
 0x182   : > { %v1543_v48 = vsel %vm1511_vm6, %v1538_v15, %v1542_v36  ;;  %12736 = vst [vmem:[#allocation59_spill] sm:$0xff] %v6957_v46  ;;  %v12738_v15 = vshll.u32 %v6853_v35, 16  ;;  %v7015_v43 = vsel %vm666_vm2, %v6883_v58, 0  ;;  %v7035_v13 = vsel %vm666_vm2, 0, %v6883_v58 }
 0x183   : > { %v6910_v21 = vpop.permute.xlu1 %1390  ;;  %v6946_v7 = vsel %vm2949_vm7, %v2965_v25, %v2970_v5  ;;  %v2688_v50 = vor.u32 %v2687_v8, %v12737_v2  ;;  %v1526_v25 = vor.u32 %v1525_v33, %v1521_v45  ;;  %v6985_v33 = vsel %vm6839_vm5, 0, %v1393_v16  ;;  %12743 = vst [vmem:[#allocation64_spill] sm:$0xff] %v7015_v43  ;;  %12744 = vst [vmem:[#allocation65_spill] sm:$0xff] %v7035_v13 }
 0x184   : > { %v1389_v0 = vpop.permute.xlu0 %1388  ;;  %12735 = vst [vmem:[#allocation58_spill] sm:$0xff] %v6946_v7  ;;  %v2691_v36 = vrot.slane %v12738_v15, 1  ;;  %12740 = vst [vmem:[#allocation61_spill] sm:$0xff] %v6985_v33  ;;  %v6991_v45 = vshll.u32 %v6923_v22, 16  ;;  %v2719_v15 = vshll.u32 %v6926_v27, 16  ;;  %v7022_v34 = vsel %vm6839_vm5, %v6910_v21, 0 }
 0x185   : > { %1815 = vrot.lane.b32.xlu0 %v1771_v6, %s6375_s16  ;;  %1813 = vrot.lane.b32.xlu1 %v1768_v49, %s6375_s16  ;;  %v7002_v16 = vsel %vm6839_vm5, 0, %v1389_v0  ;;  %v1773_v21 = vrot.slane %v7022_v34, 1  ;;  %v2885_v23 = vrot.slane %v7035_v13, 1  ;;  %v7057_v63 = vshrl.u32 %v7035_v13, 16 }
 0x186   : > { %v6973_v40 = vsel %vm1511_vm6, %v2688_v50, %v2691_v36  ;;  %12741 = vst [vmem:[#allocation62_spill] sm:$0xff] %v6991_v45  ;;  %v7011_v36 = vshrl.u32 %v6923_v22, 16  ;;  %v2721_v41 = vrot.slane %v2719_v15, 1  ;;  %v7060_v59 = vshll.u32 %v7035_v13, 16 }
 0x187   : > { %v6928_v4 = vpop.permute.xlu1 %2613  ;;  %12739 = vst [vmem:[#allocation60_spill] sm:$0xff] %v6973_v40  ;;  %12748 = vst [vmem:[#allocation69_spill] sm:$0xff] %v7057_v63  ;;  %v2972_v17 = vrot.slane %v7057_v63, 1  ;;  %v12752_v3 = vshll.u32 %v7015_v43, 16  ;;  %v1559_v12 = vshll.u32 %v6985_v33, 16  ;;  %v2987_v26 = vrot.slane %v2719_v15, 2 }
 0x188   : > { %v6934_v51 = vpop.permute.xlu0 %2611  ;;  %12742 = vst [vmem:[#allocation63_spill] sm:$0xff] %v7011_v36  ;;  %12749 = vst [vmem:[#allocation70_spill] sm:$0xff] %v7060_v59  ;;  %v2973_v61 = vrot.slane %v7060_v59, 2  ;;  %v1547_v42 = vshll.u32 %v7002_v16, 16  ;;  %v1552_v15 = vshll.u32 %v7022_v34, 16 }
 0x189   : > { %2020 = vrot.lane.b32.xlu0 %v1771_v6, %s6376_s17  ;;  %3082 = vrot.lane.b32.xlu1 %v6931_v37, %s6377_s21  ;;  %v1528_v6 = vshll.u32 %v1495_v19, 16  ;;  %v2978_v52 = vrot.slane %v12752_v3, 2  ;;  %v1561_v3 = vrot.slane %v1559_v12, 1  ;;  %v2982_v12 = vrot.slane %v6991_v45, 2 }
 0x18a   : > { %v6266_v34 = vld [vmem:[%s12173_s5 + $0x10] ss:$0 sps:$4 sm:$0x33]   ;;  %v7229_v32 = vsel %vm666_vm2, 0, %v6934_v51 }
 0x18b   : > { %v6943_v11 = vpop.permute.xlu1 %1402  ;;  %v1530_v19 = vrot.slane %v1528_v6, 1  ;;  %v1498_v6 = vsel %vm6839_vm5, %v6898_v39, 0  ;;  %v2717_v39 = vrot.slane %v6991_v45, 1  ;;  %v7120_v45 = vsel %vm666_vm2, 0, %v6928_v4  ;;  %12771 = vst [vmem:[#allocation89_spill] sm:$0xff] %v7229_v32 }
 0x18c   : > { %v6949_v53 = vpop.permute.xlu0 %1400  ;;  %v1776_v50 = vrot.slane %v1498_v6, 1  ;;  %12757 = vst [vmem:[#allocation77_spill] sm:$0xff] %v7120_v45  ;;  %v7253_v28 = vshll.u32 %v7229_v32, 16 }
 0x18d   : > { %3084 = vrot.lane.b32.xlu0 %v6946_v7, %s6377_s21  ;;  %1890 = vrot.lane.b32.xlu1 %v1543_v48, %s6381_s22  ;;  %v1531_v18 = vsel %vm1511_vm6, %v1526_v25, %v1530_v19  ;;  %v1775_v19 = vrot.slane %v6985_v33, 1  ;;  %v1557_v7 = vshrl.u32 %v6985_v33, 16 }
 0x18e   : > { %12777 = vst [vmem:[#allocation95_spill] sm:$0xff] %v7253_v28 }
 0x18f   : > { %v6959_v57 = vpop.permute.xlu1 %1398  ;;  %v7025_v47 = vsel %vm763_vm4, %v1775_v19, %v1776_v50  ;;  %v7040_v50 = vrot.slane %v7015_v43, 1  ;;  %v1772_v19 = vrot.slane %v7002_v16, 1 }
 0x190   : > { %v6963_v5 = vpop.permute.xlu0 %1396 }
 0x191   : > { %1924 = vrot.lane.b32.xlu0 %v1768_v49, %s6380_s26  ;;  %2927 = vrot.lane.b32.xlu1 %v6957_v46, %s6375_s16  ;;  %12745 = vst [vmem:[#allocation66_spill] sm:$0xff] %v7040_v50  ;;  %v1562_v46 = vor.u32 %v1561_v3, %v1557_v7  ;;  %v6265_v7 = vld [vmem:[%s12173_s5 + $0x8] sm:$0xff]  }
 0x193   : > { %v6970_v29 = vpop.permute.xlu1 %2617 }
 0x194   : > { %v6976_v8 = vpop.permute.xlu0 %2615 }
 0x195   : > { %2823 = vrot.lane.b32.xlu0 %v6973_v40, %s6373_s29  ;;  %1702 = vrot.lane.b32.xlu1 %v1531_v18, %s6373_s29 }
 0x197   : > { %v6981_v49 = vpop.permute.xlu1 %1410 }
 0x198   : > { %v6996_v2 = vpop.permute.xlu0 %1408 }
 0x199   : > { %1704 = vrot.lane.b32.xlu0 %v1543_v48, %s6373_s29  ;;  %1850 = vrot.lane.b32.xlu1 %v6985_v33, %s6377_s21 }
 0x19b   : > { %v6998_v25 = vpop.permute.xlu1 %1406 }
 0x19c   : > { %v7017_v0 = vpop.permute.xlu0 %1404 }
 0x19d   : > { %1988 = vrot.lane.b32.xlu0 %v1543_v48, %s6374_s14  ;;  %1958 = vrot.lane.b32.xlu1 %v7002_v16, %s6372_s28  ;;  %v2718_v48 = vor.u32 %v2717_v39, %v7011_v36 }
 0x19f   : > { %v7031_v20 = vpop.permute.xlu1 %2621  ;;  %v7047_v39 = vsel %vm1511_vm6, %v2718_v48, %v2721_v41  ;;  %v7064_v41 = vsel %vm763_vm4, %v2885_v23, %v7040_v50  ;;  %v7067_v48 = vsel %vm763_vm4, %v1772_v19, %v1773_v21  ;;  %v1564_v23 = vshll.u32 %v1498_v6, 16  ;;  %v6264_v6 = vld [vmem:[%s12173_s5] sm:$0xff]  }
 0x1a0   : > { %12747 = vst [vmem:[#allocation68_spill] sm:$0xff] %v7047_v39  ;;  %v7054_v58 = vpop.permute.xlu0 %2619  ;;  %12750 = vst [vmem:[#allocation71_spill] sm:$0xff] %v7064_v41  ;;  %v7084_v21 = vshrl.u32 %v6926_v27, 16  ;;  %v2974_v50 = vor.u32 %v2973_v61, %v2972_v17  ;;  %v7101_v61 = vsel %vm666_vm2, %v6928_v4, 0  ;;  %v2981_v17 = vrot.slane %v7011_v36, 1  ;;  %6087 = vmatprep.subr.bf16.mxu0 %v6264_v6 }
 0x1a1   : > { %1888 = vrot.lane.b32.xlu0 %v1531_v18, %s6381_s22  ;;  %1930 = vrot.lane.b32.xlu1 %v7025_v47, %s6380_s26  ;;  %v7044_v18 = vshrl.u32 %v7015_v43, 16  ;;  %v1566_v37 = vrot.slane %v1564_v23, 1  ;;  %12754 = vst [vmem:[#allocation74_spill] sm:$0xff] %v7101_v61  ;;  %v7128_v3 = vrot.slane %v7101_v61, 1  ;;  %v1545_v4 = vshrl.u32 %v7002_v16, 16 }
 0x1a2   : > { %12753 = vst [vmem:[#allocation73_spill] sm:$0xff] %v7084_v21  ;;  %6088 = vmatpush3.bf16.msra.mxu0 %v6264_v6  ;;  %v7270_v44 = vsel %vm666_vm2, %v7054_v58, 0 }
 0x1a3   : > { %12746 = vst [vmem:[#allocation67_spill] sm:$0xff] %v7044_v18  ;;  %v7070_v1 = vpop.permute.xlu1 %1418  ;;  %v7074_v62 = vrot.slane %v7044_v18, 1  ;;  %12758 = vst [vmem:[#allocation78_spill] sm:$0xff] %v7128_v3  ;;  %v1567_v36 = vsel %vm1511_vm6, %v1562_v46, %v1566_v37  ;;  %6089 = vmatprep.subr.bf16.mxu0 %v6265_v7  ;;  %v2707_v37 = vrot.slane %v7060_v59, 1  ;;  %v7208_v59 = vshrl.u32 %v7120_v45, 16 }
 0x1a4   : > { %v7086_v19 = vpop.permute.xlu0 %1416  ;;  %12781 = vst [vmem:[#allocation98_spill] sm:$0xff] %v7270_v44  ;;  %v12796_v54 = vshll.u32 %v7270_v44, 16 }
 0x1a5   : > { %1960 = vrot.lane.b32.xlu0 %v6985_v33, %s6372_s28  ;;  %2829 = vrot.lane.b32.xlu1 %v7047_v39, %s6373_s29  ;;  %12751 = vst [vmem:[#allocation72_spill] sm:$0xff] %v7074_v62  ;;  %v2979_v18 = vor.u32 %v2978_v52, %v7074_v62  ;;  %v7106_v52 = vrot.slane %v7084_v21, 1  ;;  %12767 = vst [vmem:[#allocation86_spill] sm:$0xff] %v7208_v59 }
 0x1a6   : > { %6090 = vmatpush3.bf16.msra.mxu0 %v6265_v7  ;;  %v2376_v7 = vsel %vm437_vm0, %v6266_v34, 0  ;;  %v3032_v60 = vrot.slane %v12796_v54, 2 }
 0x1a7   : > { %v7094_v56 = vpop.permute.xlu1 %1414  ;;  %12755 = vst [vmem:[#allocation75_spill] sm:$0xff] %v7106_v52  ;;  %v7109_v62 = vsel %vm2949_vm7, %v2974_v50, %v2979_v18  ;;  %v2983_v50 = vor.u32 %v2982_v12, %v2981_v17  ;;  %v2894_v18 = vrot.slane %v7120_v45, 1  ;;  %v2988_v21 = vor.u32 %v2987_v26, %v7106_v52  ;;  %6173 = vmatprep.subr.msk.bf16.mxu0 %vm437_vm0, %v6266_v34 }
 0x1a8   : > { %12756 = vst [vmem:[#allocation76_spill] sm:$0xff] %v7109_v62  ;;  %v7116_v23 = vpop.permute.xlu0 %1412  ;;  %v1554_v17 = vrot.slane %v1552_v15, 1  ;;  %v2708_v15 = vor.u32 %v2707_v37, %v7057_v63  ;;  %v7173_v34 = vsel %vm6839_vm5, 0, %v6949_v53  ;;  %v7188_v37 = vshll.u32 %v7120_v45, 16 }
 0x1a9   : > { %2925 = vrot.lane.b32.xlu0 %v7064_v41, %s6375_s16  ;;  %1817 = vrot.lane.b32.xlu1 %v7067_v48, %s6375_s16  ;;  %v7145_v26 = vsel %vm2949_vm7, %v2983_v50, %v2988_v21  ;;  %v12761_v50 = vshll.u32 %v7015_v43, 16  ;;  %12762 = vst [vmem:[#allocation81_spill] sm:$0xff] %v7173_v34  ;;  %v7250_v41 = vshrl.u32 %v7229_v32, 16  ;;  %v1583_v43 = vshll.u32 %v7173_v34, 16 }
 0x1aa   : > { %12759 = vst [vmem:[#allocation79_spill] sm:$0xff] %v7145_v26  ;;  %6092 = vmatpush3.bf16.msra.mxu0 %v2376_v7  ;;  %12764 = vst [vmem:[#allocation83_spill] sm:$0xff] %v7188_v37 }
 0x1ab   : > { %v7130_v6 = vpop.permute.xlu1 %2625  ;;  %12776 = vst [vmem:[#allocation94_spill] sm:$0xff] %v7250_v41 }
 0x1ac   : > { %v7141_v12 = vpop.permute.xlu0 %2623 }
 0x1ad   : > { %1848 = vrot.lane.b32.xlu0 %v7002_v16, %s6377_s21  ;;  %2022 = vrot.lane.b32.xlu1 %v7067_v48, %s6376_s17 }
 0x1af   : > { %v7156_v46 = vpop.permute.xlu1 %1426 }
 0x1b1   : > { %1819 = vrot.lane.b32.xlu0 %v7025_v47, %s6375_s16  ;;  %3086 = vrot.lane.b32.xlu1 %v7109_v62, %s6377_s21  ;;  %v1549_v62 = vrot.slane %v1547_v42, 1  ;;  %v7149_v42 = vsel %vm763_vm4, %v2894_v18, %v7128_v3  ;;  %v2711_v18 = vrot.slane %v12761_v50, 1  ;;  %v1781_v50 = vrot.slane %v7173_v34, 1 }
 0x1b2   : > { %12760 = vst [vmem:[#allocation80_spill] sm:$0xff] %v7149_v42 }
 0x1b5   : > { %2024 = vrot.lane.b32.xlu0 %v7025_v47, %s6376_s17  ;;  %1894 = vrot.lane.b32.xlu1 %v1567_v36, %s6381_s22  ;;  %v1550_v47 = vor.u32 %v1549_v62, %v1545_v4  ;;  %v7166_v62 = vpop.permute.xlu0 %1424  ;;  %v7168_v4 = vpop.permute.xlu1 %1422 }
 0x1b7   : > { %v1555_v21 = vsel %vm1511_vm6, %v1550_v47, %v1554_v17  ;;  %v7176_v17 = vsel %vm1511_vm6, %v2708_v15, %v2711_v18  ;;  %v1500_v47 = vsel %vm6839_vm5, %v6943_v11, 0  ;;  %v7197_v15 = vsel %vm6839_vm5, 0, %v6963_v5 }
 0x1b8   : > { %12763 = vst [vmem:[#allocation82_spill] sm:$0xff] %v7176_v17  ;;  %v1782_v7 = vrot.slane %v1500_v47, 1  ;;  %12765 = vst [vmem:[#allocation84_spill] sm:$0xff] %v7197_v15  ;;  %v2737_v18 = vrot.slane %v7188_v37, 1  ;;  %v7212_v5 = vsel %vm666_vm2, %v6934_v51, 0  ;;  %v7219_v11 = vsel %vm6839_vm5, %v6959_v57, 0 }
 0x1b9   : > { %3088 = vrot.lane.b32.xlu0 %v7145_v26, %s6377_s21  ;;  %2931 = vrot.lane.b32.xlu1 %v7149_v42, %s6375_s16  ;;  %v7192_v53 = vpop.permute.xlu1 %2629  ;;  %12768 = vst [vmem:[#allocation87_spill] sm:$0xff] %v7212_v5  ;;  %v12770_v26 = vshll.u32 %v7101_v61, 16  ;;  %v7235_v57 = vshrl.u32 %v7212_v5, 16  ;;  %v7243_v30 = vrot.slane %v7212_v5, 1  ;;  %v12780_v40 = vshll.u32 %v7212_v5, 16 }
 0x1ba   : > { %v7222_v3 = vsel %vm763_vm4, %v1781_v50, %v1782_v7  ;;  %v1779_v50 = vrot.slane %v7219_v11, 1  ;;  %v1588_v13 = vshll.u32 %v1500_v47, 16  ;;  %v1571_v55 = vshll.u32 %v7197_v15, 16 }
 0x1bb   : > { %v2741_v42 = vrot.slane %v12770_v26, 1  ;;  %12772 = vst [vmem:[#allocation90_spill] sm:$0xff] %v7235_v57  ;;  %v2891_v26 = vrot.slane %v7229_v32, 1  ;;  %12774 = vst [vmem:[#allocation92_spill] sm:$0xff] %v7243_v30  ;;  %v2996_v39 = vrot.slane %v12780_v40, 2  ;;  %v2727_v61 = vrot.slane %v7253_v28, 1 }
 0x1bd   : > { %1928 = vrot.lane.b32.xlu0 %v7067_v48, %s6380_s26  ;;  %1706 = vrot.lane.b32.xlu1 %v1555_v21, %s6373_s29  ;;  %v7182_v48 = vpop.permute.xlu0 %1420  ;;  %v7214_v63 = vpop.permute.xlu1 %1434  ;;  %v7274_v32 = vsel %vm763_vm4, %v2891_v26, %v7243_v30  ;;  %v1581_v30 = vshrl.u32 %v7173_v34, 16 }
 0x1be   : > { %12769 = vst [vmem:[#allocation88_spill] sm:$0xff] %v7214_v63  ;;  %12782 = vst [vmem:[#allocation99_spill] sm:$0xff] %v7274_v32 }
 0x1c1   : > { %2827 = vrot.lane.b32.xlu0 %v7176_v17, %s6373_s29  ;;  %1854 = vrot.lane.b32.xlu1 %v7173_v34, %s6377_s21  ;;  %v7202_v52 = vpop.permute.xlu0 %2627  ;;  %v7259_v7 = vpop.permute.xlu1 %1430  ;;  %v2990_v17 = vrot.slane %v7250_v41, 1 }
 0x1c2   : > { %12766 = vst [vmem:[#allocation85_spill] sm:$0xff] %v7202_v52  ;;  %12778 = vst [vmem:[#allocation96_spill] sm:$0xff] %v7259_v7  ;;  %v1573_v7 = vrot.slane %v1571_v55, 1  ;;  %v7394_v55 = vsel %vm666_vm2, %v7192_v53, 0 }
 0x1c3   : > { %12806 = vst [vmem:[#allocation121_spill] sm:$0xff] %v7394_v55 }
 0x1c5   : > { %1708 = vrot.lane.b32.xlu0 %v1567_v36, %s6373_s29  ;;  %1990 = vrot.lane.b32.xlu1 %v1555_v21, %s6374_s14 }
 0x1c9   : > { %1992 = vrot.lane.b32.xlu0 %v1567_v36, %s6374_s14  ;;  %1962 = vrot.lane.b32.xlu1 %v7197_v15, %s6372_s28  ;;  %v2738_v36 = vor.u32 %v2737_v18, %v7208_v59  ;;  %v7239_v18 = vpop.permute.xlu0 %1432  ;;  %v7358_v59 = vsel %vm666_vm2, %v7130_v6, 0 }
 0x1ca   : > { %12773 = vst [vmem:[#allocation91_spill] sm:$0xff] %v7239_v18  ;;  %12799 = vst [vmem:[#allocation115_spill] sm:$0xff] %v7358_v59 }
 0x1cb   : > { %v7246_v51 = vsel %vm1511_vm6, %v2738_v36, %v2741_v42  ;;  %v2991_v42 = vrot.slane %v7253_v28, 2  ;;  %v7264_v36 = vrot.slane %v7235_v57, 1  ;;  %v7282_v57 = vsel %vm666_vm2, 0, %v7054_v58 }
 0x1cc   : > { %12775 = vst [vmem:[#allocation93_spill] sm:$0xff] %v7246_v51  ;;  %12783 = vst [vmem:[#allocation100_spill] sm:$0xff] %v7282_v57  ;;  %v7299_v58 = vsel %vm666_vm2, %v7141_v12, 0  ;;  %v7303_v31 = vshrl.u32 %v7282_v57, 16  ;;  %v7315_v47 = vshll.u32 %v7282_v57, 16 }
 0x1cd   : > { %1892 = vrot.lane.b32.xlu0 %v1555_v21, %s6381_s22  ;;  %1934 = vrot.lane.b32.xlu1 %v7222_v3, %s6380_s26  ;;  %v1778_v21 = vrot.slane %v7197_v15, 1  ;;  %12779 = vst [vmem:[#allocation97_spill] sm:$0xff] %v7264_v36  ;;  %v7284_v45 = vpop.permute.xlu0 %1428  ;;  %v2992_v40 = vor.u32 %v2991_v42, %v2990_v17  ;;  %v2997_v26 = vor.u32 %v2996_v39, %v7264_v36  ;;  %12787 = vst [vmem:[#allocation104_spill] sm:$0xff] %v7299_v58 }
 0x1ce   : > { %12784 = vst [vmem:[#allocation101_spill] sm:$0xff] %v7284_v45  ;;  %12788 = vst [vmem:[#allocation105_spill] sm:$0xff] %v7303_v31  ;;  %v1590_v17 = vrot.slane %v1588_v13, 1  ;;  %v1576_v39 = vshll.u32 %v7219_v11, 16  ;;  %v7308_v42 = vsel %vm666_vm2, 0, %v7141_v12  ;;  %v7323_v13 = vsel %vm666_vm2, %v6970_v29, 0 }
 0x1cf   : > { %12789 = vst [vmem:[#allocation106_spill] sm:$0xff] %v7315_v47  ;;  %12791 = vst [vmem:[#allocation108_spill] sm:$0xff] %v7323_v13  ;;  %v7326_v12 = vsel %vm2949_vm7, %v2992_v40, %v2997_v26  ;;  %v3026_v11 = vrot.slane %v7303_v31, 1  ;;  %v7330_v36 = vshrl.u32 %v7299_v58, 16  ;;  %v3027_v22 = vrot.slane %v7315_v47, 2 }
 0x1d0   : > { %12792 = vst [vmem:[#allocation109_spill] sm:$0xff] %v7326_v12  ;;  %v7342_v40 = vshrl.u32 %v7308_v42, 16  ;;  %v7353_v54 = vshll.u32 %v7308_v42, 16  ;;  %v7361_v26 = vrot.slane %v7323_v13, 1  ;;  %v12803_v28 = vshll.u32 %v7299_v58, 16 }
 0x1d1   : > { %1964 = vrot.lane.b32.xlu0 %v7173_v34, %s6372_s28  ;;  %2833 = vrot.lane.b32.xlu1 %v7246_v51, %s6373_s29  ;;  %v7277_v51 = vsel %vm763_vm4, %v1778_v21, %v1779_v50  ;;  %v7292_v50 = vshrl.u32 %v7270_v44, 16  ;;  %v7294_v21 = vpop.permute.xlu1 %2633  ;;  %12793 = vst [vmem:[#allocation110_spill] sm:$0xff] %v7330_v36  ;;  %v7332_v27 = vpop.permute.xlu0 %2631 }
 0x1d2   : > { %12786 = vst [vmem:[#allocation103_spill] sm:$0xff] %v7294_v21  ;;  %12794 = vst [vmem:[#allocation111_spill] sm:$0xff] %v7332_v27  ;;  %v3050_v45 = vrot.slane %v12803_v28, 2 }
 0x1d3   : > { %12785 = vst [vmem:[#allocation102_spill] sm:$0xff] %v7292_v50  ;;  %v7336_v35 = vrot.slane %v7292_v50, 1  ;;  %12797 = vst [vmem:[#allocation113_spill] sm:$0xff] %v7342_v40 }
 0x1d4   : > { %12800 = vst [vmem:[#allocation116_spill] sm:$0xff] %v7361_v26 }
 0x1d5   : > { %2929 = vrot.lane.b32.xlu0 %v7274_v32, %s6375_s16  ;;  %1821 = vrot.lane.b32.xlu1 %v7277_v51, %s6375_s16  ;;  %v1585_v32 = vrot.slane %v1583_v43, 1  ;;  %v7319_v43 = vsel %vm666_vm2, 0, %v6970_v29  ;;  %12795 = vst [vmem:[#allocation112_spill] sm:$0xff] %v7336_v35  ;;  %v7345_v37 = vpop.permute.xlu1 %1442 }
 0x1d6   : > { %12790 = vst [vmem:[#allocation107_spill] sm:$0xff] %v7319_v43  ;;  %12798 = vst [vmem:[#allocation114_spill] sm:$0xff] %v7345_v37  ;;  %v2900_v50 = vrot.slane %v7319_v43, 1  ;;  %v3044_v37 = vrot.slane %v7342_v40, 1 }
 0x1d7   : > { %v1586_v29 = vor.u32 %v1585_v32, %v1581_v30  ;;  %v3028_v30 = vor.u32 %v3027_v22, %v3026_v11  ;;  %v3033_v32 = vor.u32 %v3032_v60, %v7336_v35  ;;  %v3045_v22 = vrot.slane %v7353_v54, 2 }
 0x1d8   : > { %v7371_v60 = vrot.slane %v7330_v36, 1  ;;  %v7375_v11 = vsel %vm666_vm2, 0, %v7130_v6  ;;  %v7390_v6 = vsel %vm666_vm2, 0, %v7192_v53 }
 0x1d9   : > { %1852 = vrot.lane.b32.xlu0 %v7197_v15, %s6377_s21  ;;  %2026 = vrot.lane.b32.xlu1 %v7277_v51, %s6376_s17  ;;  %v7367_v34 = vsel %vm2949_vm7, %v3028_v30, %v3033_v32  ;;  %v1591_v35 = vsel %vm1511_vm6, %v1586_v29, %v1590_v17  ;;  %v7383_v30 = vpop.permute.xlu0 %1440  ;;  %v3046_v32 = vor.u32 %v3045_v22, %v3044_v37  ;;  %v1578_v29 = vrot.slane %v1576_v39, 1  ;;  %v7398_v36 = vpop.permute.xlu1 %1438 }
 0x1da   : > { %12801 = vst [vmem:[#allocation117_spill] sm:$0xff] %v7367_v34  ;;  %12802 = vst [vmem:[#allocation118_spill] sm:$0xff] %v7371_v60  ;;  %v3051_v17 = vor.u32 %v3050_v45, %v7371_v60  ;;  %v12808_v34 = vshll.u32 %v7212_v5, 16  ;;  %v7404_v22 = vshrl.u32 %v7375_v11, 16  ;;  %v7411_v28 = vshll.u32 %v7375_v11, 16 }
 0x1db   : > { %12805 = vst [vmem:[#allocation120_spill] sm:$0xff] %v7383_v30  ;;  %12807 = vst [vmem:[#allocation122_spill] sm:$0xff] %v7398_v36  ;;  %v7408_v30 = vsel %vm763_vm4, %v2900_v50, %v7361_v26  ;;  %v7417_v39 = vshrl.u32 %v7394_v55, 16  ;;  %v7429_v50 = vshll.u32 %v7390_v6, 16 }
 0x1dc   : > { %v2731_v37 = vrot.slane %v12808_v34, 1  ;;  %12809 = vst [vmem:[#allocation123_spill] sm:$0xff] %v7404_v22  ;;  %12810 = vst [vmem:[#allocation124_spill] sm:$0xff] %v7408_v30  ;;  %v7414_v45 = vsel %vm2949_vm7, %v3046_v32, %v3051_v17 }
 0x1dd   : > { %1823 = vrot.lane.b32.xlu0 %v7222_v3, %s6375_s16  ;;  %3090 = vrot.lane.b32.xlu1 %v7326_v12, %s6377_s21  ;;  %v1569_v12 = vshrl.u32 %v7197_v15, 16  ;;  %v7381_v15 = vshrl.u32 %v7358_v59, 16  ;;  %12811 = vst [vmem:[#allocation125_spill] sm:$0xff] %v7414_v45  ;;  %12812 = vst [vmem:[#allocation126_spill] sm:$0xff] %v7417_v39  ;;  %v7437_v60 = vpop.permute.xlu0 %1436 }
 0x1de   : > { %12814 = vst [vmem:[#allocation128_spill] sm:$0xff] %v7429_v50  ;;  %12817 = vst [vmem:[#allocation130_spill] sm:$0xff] %v7437_v60 }
 0x1df   : > { %12804 = vst [vmem:[#allocation119_spill] sm:$0xff] %v7381_v15  ;;  %v1574_v53 = vor.u32 %v1573_v7, %v1569_v12  ;;  %v3053_v7 = vrot.slane %v7404_v22, 1  ;;  %v3054_v12 = vrot.slane %v7411_v28, 2  ;;  %v7433_v32 = vrot.slane %v7381_v15, 1 }
 0x1e0   : > { %v3072_v15 = vrot.slane %v7429_v50, 2 }
 0x1e1   : > { %2028 = vrot.lane.b32.xlu0 %v7222_v3, %s6376_s17  ;;  %1898 = vrot.lane.b32.xlu1 %v1591_v35, %s6381_s22  ;;  %v2728_v3 = vor.u32 %v2727_v61, %v7250_v41  ;;  %v7424_v61 = vshrl.u32 %v7390_v6, 16  ;;  %12815 = vst [vmem:[#allocation129_spill] sm:$0xff] %v7433_v32  ;;  %v3055_v5 = vor.u32 %v3054_v12, %v3053_v7 }
 0x1e3   : > { %12813 = vst [vmem:[#allocation127_spill] sm:$0xff] %v7424_v61  ;;  %v7442_v26 = vsel %vm1511_vm6, %v2728_v3, %v2731_v37  ;;  %v3071_v34 = vrot.slane %v7424_v61, 1  ;;  %v12821_v3 = vshll.u32 %v7394_v55, 16 }
 0x1e4   : > { %12819 = vst [vmem:[#allocation132_spill] sm:$0xff] %v7442_v26 }
 0x1e5   : > { %1932 = vrot.lane.b32.xlu0 %v7277_v51, %s6380_s26  ;;  %2935 = vrot.lane.b32.xlu1 %v7408_v30, %s6375_s16  ;;  %v12816_v51 = vshll.u32 %v7358_v59, 16  ;;  %v1579_v30 = vsel %vm1511_vm6, %v1574_v53, %v1578_v29  ;;  %v3077_v37 = vrot.slane %v12821_v3, 2  ;;  %v3073_v29 = vor.u32 %v3072_v15, %v3071_v34 }
 0x1e6   : > { %v7439_v41 = vpop.permute.xlu1 %2923  ;;  %v1502_v34 = vsel %vm6839_vm5, %v6981_v49, 0  ;;  %v7483_v3 = vshll.u32 %v7319_v43, 16 }
 0x1e7   : > { %v3059_v17 = vrot.slane %v12816_v51, 2  ;;  %12818 = vst [vmem:[#allocation131_spill] sm:$0xff] %v7439_v41  ;;  %v7452_v51 = vrot.slane %v7417_v39, 1 }
 0x1e8   : > { %12826 = vst [vmem:[#allocation138_spill] sm:$0xff] %v7483_v3  ;;  %v2757_v49 = vrot.slane %v7483_v3, 1  ;;  %v1612_v3 = vshll.u32 %v1502_v34, 16 }
 0x1e9   : > { %v3060_v45 = vor.u32 %v3059_v17, %v7433_v32  ;;  %2831 = vrot.lane.b32.xlu0 %v7442_v26, %s6373_s29  ;;  %1710 = vrot.lane.b32.xlu1 %v1579_v30, %s6373_s29  ;;  %12820 = vst [vmem:[#allocation133_spill] sm:$0xff] %v7452_v51  ;;  %v3078_v12 = vor.u32 %v3077_v37, %v7452_v51  ;;  %v7467_v17 = vsel %vm6839_vm5, 0, %v6996_v2  ;;  %v1788_v2 = vrot.slane %v1502_v34, 1 }
 0x1ea   : > { %12823 = vst [vmem:[#allocation135_spill] sm:$0xff] %v7467_v17  ;;  %v7508_v32 = vsel %vm666_vm2, 0, %v6976_v8  ;;  %v7516_v51 = vsel %vm6839_vm5, %v6998_v25, 0  ;;  %v1607_v25 = vshll.u32 %v7467_v17, 16  ;;  %v7560_v34 = vsel %vm666_vm2, 0, %v7332_v27 }
 0x1eb   : > { %v7457_v41 = vsel %vm2949_vm7, %v3055_v5, %v3060_v45  ;;  %v7459_v53 = vpop.permute.xlu1 %1846  ;;  %v7461_v7 = vpop.permute.xlu0 %1956  ;;  %v7473_v5 = vsel %vm2949_vm7, %v3073_v29, %v3078_v12  ;;  %v7494_v12 = vsel %vm6839_vm5, 0, %v7017_v0  ;;  %12829 = vst [vmem:[#allocation141_spill] sm:$0xff] %v7508_v32  ;;  %v7511_v0 = vshrl.u32 %v7319_v43, 16  ;;  %12837 = vst [vmem:[#allocation148_spill] sm:$0xff] %v7560_v34 }
 0x1ec   : > { %12822 = vst [vmem:[#allocation134_spill] sm:$0xff] %v7457_v41  ;;  %12824 = vst [vmem:[#allocation136_spill] sm:$0xff] %v7473_v5  ;;  %v12832_v5 = vshll.u32 %v7323_v13, 16  ;;  %v1784_v13 = vrot.slane %v7494_v12, 1  ;;  %v1614_v60 = vrot.slane %v1612_v3, 1  ;;  %v7577_v27 = vsel %vm666_vm2, 0, %v7031_v20 }
 0x1ed   : > { %1712 = vrot.lane.b32.xlu0 %v1591_v35, %s6373_s29  ;;  %1858 = vrot.lane.b32.xlu1 %v7467_v17, %s6377_s21  ;;  %12830 = vst [vmem:[#allocation142_spill] sm:$0xff] %v7511_v0  ;;  %v2758_v43 = vor.u32 %v2757_v49, %v7511_v0  ;;  %v7544_v49 = vsel %vm666_vm2, 0, %v7202_v52  ;;  %v1595_v63 = vshll.u32 %v7494_v12, 16  ;;  %v7599_v18 = vshll.u32 %v7508_v32, 16 }
 0x1ee   : > { %v2761_v41 = vrot.slane %v12832_v5, 1  ;;  %12834 = vst [vmem:[#allocation145_spill] sm:$0xff] %v7544_v49  ;;  %v7602_v33 = vshll.u32 %v7544_v49, 16 }
 0x1ef   : > { %v7475_v15 = vpop.permute.xlu1 %1926  ;;  %v7477_v45 = vpop.permute.xlu0 %2921  ;;  %12845 = vst [vmem:[#allocation156_spill] sm:$0xff] %v7599_v18 }
 0x1f0   : > { %12825 = vst [vmem:[#allocation137_spill] sm:$0xff] %v7477_v45  ;;  %v1787_v45 = vrot.slane %v7467_v17, 1  ;;  %v7551_v0 = vsel %vm1511_vm6, %v2758_v43, %v2761_v41  ;;  %v1609_v41 = vrot.slane %v1607_v25, 1  ;;  %v7587_v25 = vshrl.u32 %v7560_v34, 16  ;;  %12846 = vst [vmem:[#allocation157_spill] sm:$0xff] %v7602_v33 }
 0x1f1   : > { %1996 = vrot.lane.b32.xlu0 %v1591_v35, %s6374_s14  ;;  %1994 = vrot.lane.b32.xlu1 %v1579_v30, %s6374_s14  ;;  %v7501_v35 = vsel %vm666_vm2, %v6976_v8, 0  ;;  %12836 = vst [vmem:[#allocation147_spill] sm:$0xff] %v7551_v0 }
 0x1f2   : > { %12828 = vst [vmem:[#allocation140_spill] sm:$0xff] %v7501_v35  ;;  %v7524_v26 = vsel %vm763_vm4, %v1787_v45, %v1788_v2  ;;  %v7527_v8 = vrot.slane %v7501_v35, 1  ;;  %v1785_v45 = vrot.slane %v7516_v51, 1  ;;  %12842 = vst [vmem:[#allocation153_spill] sm:$0xff] %v7587_v25 }
 0x1f3   : > { %v7487_v37 = vpop.permute.xlu1 %2825  ;;  %v7489_v29 = vpop.permute.xlu0 %1844 }
 0x1f4   : > { %12827 = vst [vmem:[#allocation139_spill] sm:$0xff] %v7487_v37  ;;  %12831 = vst [vmem:[#allocation143_spill] sm:$0xff] %v7527_v8 }
 0x1f5   : > { %1896 = vrot.lane.b32.xlu0 %v1579_v30, %s6381_s22  ;;  %1966 = vrot.lane.b32.xlu1 %v7494_v12, %s6372_s28  ;;  %v2897_v30 = vrot.slane %v7508_v32, 1 }
 0x1f7   : > { %v7518_v37 = vpop.permute.xlu1 %1813  ;;  %v7520_v39 = vpop.permute.xlu0 %1815  ;;  %v7548_v5 = vsel %vm763_vm4, %v2897_v30, %v7527_v8  ;;  %v1605_v30 = vshrl.u32 %v7467_v17, 16 }
 0x1f8   : > { %12835 = vst [vmem:[#allocation146_spill] sm:$0xff] %v7548_v5 }
 0x1f9   : > { %1968 = vrot.lane.b32.xlu0 %v7467_v17, %s6372_s28  ;;  %1938 = vrot.lane.b32.xlu1 %v7524_v26, %s6380_s26 }
 0x1fb   : > { %v7538_v2 = vpop.permute.xlu1 %3082  ;;  %v7540_v36 = vpop.permute.xlu0 %2020 }
 0x1fc   : > { %12833 = vst [vmem:[#allocation144_spill] sm:$0xff] %v7538_v2  ;;  %v7564_v2 = vsel %vm666_vm2, 0, %v7294_v21  ;;  %v7581_v21 = vsel %vm666_vm2, %v7031_v20, 0 }
 0x1fd   : > { %2933 = vrot.lane.b32.xlu0 %v7548_v5, %s6375_s16  ;;  %2837 = vrot.lane.b32.xlu1 %v7551_v0, %s6373_s29  ;;  %12838 = vst [vmem:[#allocation149_spill] sm:$0xff] %v7564_v2  ;;  %v7572_v5 = vshrl.u32 %v7544_v49, 16  ;;  %v1786_v0 = vsel %vm763_vm4, %v1784_v13, %v1785_v45  ;;  %12841 = vst [vmem:[#allocation152_spill] sm:$0xff] %v7581_v21  ;;  %v7590_v3 = vshrl.u32 %v7564_v2, 16  ;;  %v12392_v45 = vrot.slane %v7404_v22, 7 }
 0x1fe   : > { %v1610_v13 = vor.u32 %v1609_v41, %v1605_v30  ;;  %v7606_v30 = vshll.u32 %v7560_v34, 16  ;;  %v7627_v55 = vshll.u32 %v7564_v2, 16  ;;  %v7643_v2 = vrot.slane %v7581_v21, 1 }
 0x1ff   : > { %v7567_v43 = vpop.permute.xlu1 %1890  ;;  %v7569_v8 = vpop.permute.xlu0 %3084  ;;  %12840 = vst [vmem:[#allocation151_spill] sm:$0xff] %v7572_v5  ;;  %12843 = vst [vmem:[#allocation154_spill] sm:$0xff] %v7590_v3  ;;  %v7611_v41 = vor.u32 %v12392_v45, %v7411_v28  ;;  %v12853_v45 = vrot.slane %v7572_v5, 7  ;;  %v1597_v5 = vrot.slane %v1595_v63, 1 }
 0x200   : > { %12839 = vst [vmem:[#allocation150_spill] sm:$0xff] %v7569_v8  ;;  %v12393_v8 = vrot.slane %v7342_v40, 7  ;;  %12847 = vst [vmem:[#allocation158_spill] sm:$0xff] %v7606_v30 }
 0x201   : > { %1856 = vrot.lane.b32.xlu0 %v7494_v12, %s6377_s21  ;;  %1825 = vrot.lane.b32.xlu1 %v1786_v0, %s6375_s16  ;;  %12848 = vst [vmem:[#allocation159_spill] sm:$0xff] %v7611_v41  ;;  %12852 = vst [vmem:[#allocation162_spill] sm:$0xff] %v7627_v55  ;;  %v7632_v41 = vor.u32 %v12853_v45, %v7602_v33  ;;  %v12412_v33 = vshll.u32 %v7501_v35, 16 }
 0x202   : > { %v7616_v17 = vor.u32 %v12393_v8, %v7353_v54  ;;  %v12405_v8 = vrot.slane %v7590_v3, 7  ;;  %12856 = vst [vmem:[#allocation165_spill] sm:$0xff] %v7643_v2 }
 0x203   : > { %v7595_v20 = vpop.permute.xlu1 %2927  ;;  %v1925_v52 = vpop.permute.xlu0 %1924  ;;  %12854 = vst [vmem:[#allocation163_spill] sm:$0xff] %v7632_v41  ;;  %v1615_v41 = vsel %vm1511_vm6, %v1610_v13, %v1614_v60 }
 0x204   : > { %12844 = vst [vmem:[#allocation155_spill] sm:$0xff] %v7595_v20  ;;  %12849 = vst [vmem:[#allocation160_spill] sm:$0xff] %v7616_v17  ;;  %v12850_v20 = vrot.slane %v7424_v61, 7  ;;  %v12408_v17 = vrot.slane %v7587_v25, 7  ;;  %v7649_v45 = vor.u32 %v12405_v8, %v7627_v55  ;;  %v7663_v8 = vshrl.u32 %v7508_v32, 16 }
 0x205   : > { %1827 = vrot.lane.b32.xlu0 %v7524_v26, %s6375_s16  ;;  %2030 = vrot.lane.b32.xlu1 %v1786_v0, %s6376_s17 }
 0x206   : > { %v7621_v49 = vor.u32 %v12850_v20, %v7429_v50  ;;  %v1600_v20 = vshll.u32 %v7516_v51, 16  ;;  %v1593_v50 = vshrl.u32 %v7494_v12, 16  ;;  %12857 = vst [vmem:[#allocation166_spill] sm:$0xff] %v7649_v45  ;;  %v7654_v51 = vor.u32 %v12408_v17, %v7606_v30  ;;  %12859 = vst [vmem:[#allocation168_spill] sm:$0xff] %v7663_v8 }
 0x207   : > { %v7638_v34 = vpop.permute.xlu1 %1702  ;;  %v7640_v61 = vpop.permute.xlu0 %2823  ;;  %v6237_v45 = vunpack.i.l.bf16 %v6820_v38 }
 0x208   : > { %12851 = vst [vmem:[#allocation161_spill] sm:$0xff] %v7621_v49  ;;  %v2906_v49 = vrot.slane %v7577_v27, 1  ;;  %12855 = vst [vmem:[#allocation164_spill] sm:$0xff] %v7640_v61  ;;  %v2747_v61 = vrot.slane %v7599_v18, 1  ;;  %v1602_v3 = vrot.slane %v1600_v20, 1  ;;  %v1598_v60 = vor.u32 %v1597_v5, %v1593_v50 }
 0x209   : > { %12858 = vst [vmem:[#allocation167_spill] sm:$0xff] %v7654_v51  ;;  %2032 = vrot.lane.b32.xlu0 %v7524_v26, %s6376_s17  ;;  %1902 = vrot.lane.b32.xlu1 %v1615_v41, %s6381_s22  ;;  %v2751_v26 = vrot.slane %v12412_v33, 1  ;;  %v6242_v20 = vunpack.i.l.bf16 %v6824_v14  ;;  %v2053_v38 = vsel %vm388_vm1, 0, %v6237_v45  ;;  %v2055_v25 = vsel %vm388_vm1, %v6887_v10, %v7638_v34 }
 0x20a   : > { %v7672_v63 = vsel %vm763_vm4, %v2906_v49, %v7643_v2  ;;  %v2748_v13 = vor.u32 %v2747_v61, %v7663_v8  ;;  %v1603_v50 = vsel %vm1511_vm6, %v1598_v60, %v1602_v3  ;;  %v7702_v60 = vsel %vm6839_vm5, 0, %v7086_v19 }
 0x20b   : > { %v7666_v17 = vpop.permute.xlu1 %1850  ;;  %v7668_v51 = vpop.permute.xlu0 %1704  ;;  %12860 = vst [vmem:[#allocation169_spill] sm:$0xff] %v7672_v63  ;;  %12863 = vst [vmem:[#allocation172_spill] sm:$0xff] %v7702_v60  ;;  %v2912_v10 = vrot.slane %v7375_v11, 1  ;;  %v7805_v34 = vrot.slane %v7358_v59, 1 }
 0x20c   : > { %v7686_v61 = vsel %vm1511_vm6, %v2748_v13, %v2751_v26 }
 0x20d   : > { %2939 = vrot.lane.b32.xlu1 %v7672_v63, %s6375_s16  ;;  %1936 = vrot.lane.b32.xlu0 %v1786_v0, %s6380_s26  ;;  %12861 = vst [vmem:[#allocation170_spill] sm:$0xff] %v7686_v61  ;;  %v7692_v0 = vsel %vm12675_vm8, %v2053_v38, %v6242_v20  ;;  %12875 = vst [vmem:[#allocation183_spill] sm:$0xff] %v7805_v34 }
 0x20e   : > { %12862 = vst [vmem:[#allocation171_spill] sm:$0xff] %v7692_v0  ;;  %v2119_v5 = vsel %vm2117_vm9, %v7692_v0, %v7489_v29  ;;  %v12868_v0 = vshll.u32 %v7581_v21, 16 }
 0x20f   : > { %v7682_v55 = vpop.permute.xlu1 %1958  ;;  %v1989_v49 = vpop.permute.xlu0 %1988 }
 0x210   : > { %v2781_v14 = vrot.slane %v12868_v0, 1 }
 0x211   : > { %1714 = vrot.lane.b32.xlu1 %v1603_v50, %s6373_s29  ;;  %2835 = vrot.lane.b32.xlu0 %v7686_v61, %s6373_s29 }
 0x213   : > { %v7697_v45 = vpop.permute.xlu1 %1930  ;;  %v1889_v3 = vpop.permute.xlu0 %1888 }
 0x214   : > { %v2152_v13 = vsel %vm2150_vm10, %v2119_v5, %v1889_v3  ;;  %v7722_v3 = vshll.u32 %v7577_v27, 16 }
 0x215   : > { %v2185_v38 = vsel %vm2183_vm11, %v2152_v13, %v1925_v52  ;;  %1862 = vrot.lane.b32.xlu1 %v7702_v60, %s6377_s21  ;;  %1716 = vrot.lane.b32.xlu0 %v1615_v41, %s6373_s29  ;;  %v1504_v52 = vsel %vm6839_vm5, %v7070_v1, 0  ;;  %v7735_v1 = vsel %vm6839_vm5, 0, %v7116_v23 }
 0x216   : > { %v2218_v29 = vsel %vm12676_vm13, %v2185_v38, %v7461_v7  ;;  %12865 = vst [vmem:[#allocation174_spill] sm:$0xff] %v7722_v3  ;;  %v1794_v7 = vrot.slane %v1504_v52, 1  ;;  %v1793_v38 = vrot.slane %v7702_v60, 1 }
 0x217   : > { %v7711_v26 = vpop.permute.xlu1 %2829  ;;  %v7713_v19 = vpop.permute.xlu0 %1960  ;;  %v2251_v20 = vsel %vm2249_vm12, %v2218_v29, %v1989_v49 }
 0x218   : > { %12864 = vst [vmem:[#allocation173_spill] sm:$0xff] %v7711_v26  ;;  %v2284_v5 = vsel %vm2282_vm14, %v2251_v20, %v7540_v36  ;;  %v2777_v36 = vrot.slane %v7722_v3, 1  ;;  %v1503_v20 = vsel %vm6839_vm5, %v7094_v56, 0  ;;  %v1795_v33 = vsel %vm763_vm4, %v1793_v38, %v1794_v7 }
 0x219   : > { %1998 = vrot.lane.b32.xlu1 %v1603_v50, %s6374_s14  ;;  %2000 = vrot.lane.b32.xlu0 %v1615_v41, %s6374_s14  ;;  %v7743_v41 = vshrl.u32 %v7577_v27, 16  ;;  %v7758_v26 = vrot.slane %v7270_v44, 1  ;;  %v1791_v56 = vrot.slane %v1503_v20, 1  ;;  %v1790_v38 = vrot.slane %v7735_v1, 1 }
 0x21a   : > { %6093 = vmatprep.mubr.msk.bf16.mxu0 %vm2342_vm15, %v2284_v5 }
 0x21b   : > { %v7727_v13 = vpop.permute.xlu1 %1817  ;;  %v7729_v49 = vpop.permute.xlu0 %2925  ;;  %12867 = vst [vmem:[#allocation176_spill] sm:$0xff] %v7743_v41  ;;  %v2778_v29 = vor.u32 %v2777_v36, %v7743_v41  ;;  %12869 = vst [vmem:[#allocation177_spill] sm:$0xff] %v7758_v26  ;;  %v1631_v36 = vshll.u32 %v7702_v60, 16 }
 0x21c   : > { %12866 = vst [vmem:[#allocation175_spill] sm:$0xff] %v7729_v49 }
 0x21d   : > { %1970 = vrot.lane.b32.xlu1 %v7735_v1, %s6372_s28  ;;  %1900 = vrot.lane.b32.xlu0 %v1603_v50, %s6381_s22  ;;  %v2903_v50 = vrot.slane %v7282_v57, 1  ;;  %v7768_v7 = vsel %vm1511_vm6, %v2778_v29, %v2781_v14  ;;  %v1636_v14 = vshll.u32 %v1504_v52, 16  ;;  %v1792_v29 = vsel %vm763_vm4, %v1790_v38, %v1791_v56 }
 0x21e   : > { %12871 = vst [vmem:[#allocation179_spill] sm:$0xff] %v7768_v7  ;;  %v1619_v56 = vshll.u32 %v7735_v1, 16  ;;  %v2088_v38 = vsel %vm12675_vm8, %v2055_v25, %v7518_v37 }
 0x21f   : > { %v7748_v5 = vpop.permute.xlu1 %2022  ;;  %v7750_v23 = vpop.permute.xlu0 %1848  ;;  %v7772_v0 = vsel %vm763_vm4, %v2903_v50, %v7758_v26  ;;  %v1629_v50 = vshrl.u32 %v7702_v60, 16  ;;  %v1633_v26 = vrot.slane %v1631_v36, 1  ;;  %v1638_v61 = vrot.slane %v1636_v14, 1 }
 0x220   : > { %12872 = vst [vmem:[#allocation180_spill] sm:$0xff] %v7772_v0  ;;  %v1624_v36 = vshll.u32 %v1503_v20, 16  ;;  %v2121_v14 = vsel %vm2117_vm9, %v2088_v38, %v7459_v53  ;;  %v1621_v25 = vrot.slane %v1619_v56, 1  ;;  %v7822_v53 = vsel %vm763_vm4, %v2912_v10, %v7805_v34 }
 0x221   : > { %1942 = vrot.lane.b32.xlu1 %v1795_v33, %s6380_s26  ;;  %1972 = vrot.lane.b32.xlu0 %v7702_v60, %s6372_s28  ;;  %v1634_v52 = vor.u32 %v1633_v26, %v1629_v50  ;;  %v1617_v26 = vshrl.u32 %v7735_v1, 16  ;;  %v2767_v50 = vrot.slane %v7315_v47, 1  ;;  %12877 = vst [vmem:[#allocation185_spill] sm:$0xff] %v7822_v53  ;;  %v12878_v56 = vshll.u32 %v7270_v44, 16 }
 0x222   : > { %v1626_v20 = vrot.slane %v1624_v36, 1 }
 0x223   : > { %v7763_v49 = vpop.permute.xlu1 %3086  ;;  %v7765_v2 = vpop.permute.xlu0 %1819  ;;  %v1639_v37 = vsel %vm1511_vm6, %v1634_v52, %v1638_v61  ;;  %v1622_v61 = vor.u32 %v1621_v25, %v1617_v26  ;;  %v2768_v52 = vor.u32 %v2767_v50, %v7303_v31  ;;  %v2771_v38 = vrot.slane %v12878_v56, 1 }
 0x224   : > { %12870 = vst [vmem:[#allocation178_spill] sm:$0xff] %v7763_v49 }
 0x225   : > { %2841 = vrot.lane.b32.xlu1 %v7768_v7, %s6373_s29  ;;  %2937 = vrot.lane.b32.xlu0 %v7772_v0, %s6375_s16  ;;  %v7839_v25 = vsel %vm1511_vm6, %v2768_v52, %v2771_v38 }
 0x226   : > { %12879 = vst [vmem:[#allocation186_spill] sm:$0xff] %v7839_v25 }
 0x227   : > { %v7780_v49 = vpop.permute.xlu1 %1894  ;;  %v7782_v63 = vpop.permute.xlu0 %2024 }
 0x229   : > { %1829 = vrot.lane.b32.xlu1 %v1792_v29, %s6375_s16  ;;  %1860 = vrot.lane.b32.xlu0 %v7735_v1, %s6377_s21 }
 0x22b   : > { %v7792_v0 = vpop.permute.xlu1 %2931  ;;  %v7794_v30 = vpop.permute.xlu0 %3088 }
 0x22c   : > { %12873 = vst [vmem:[#allocation181_spill] sm:$0xff] %v7792_v0  ;;  %12874 = vst [vmem:[#allocation182_spill] sm:$0xff] %v7794_v30  ;;  %v2154_v0 = vsel %vm2150_vm10, %v2121_v14, %v7567_v43  ;;  %v1627_v14 = vsel %vm1511_vm6, %v1622_v61, %v1626_v20  ;;  %v1506_v61 = vsel %vm6839_vm5, %v7156_v46, 0 }
 0x22d   : > { %2034 = vrot.lane.b32.xlu1 %v1792_v29, %s6376_s17  ;;  %1831 = vrot.lane.b32.xlu0 %v1795_v33, %s6375_s16  ;;  %v1800_v56 = vrot.slane %v1506_v61, 1 }
 0x22f   : > { %v7801_v7 = vpop.permute.xlu1 %1706  ;;  %v1929_v60 = vpop.permute.xlu0 %1928 }
 0x231   : > { %1906 = vrot.lane.b32.xlu1 %v1639_v37, %s6381_s22  ;;  %2036 = vrot.lane.b32.xlu0 %v1795_v33, %s6376_s17  ;;  %v2187_v33 = vsel %vm2183_vm11, %v2154_v0, %v7475_v15 }
 0x232   : > { %v2220_v43 = vsel %vm12676_vm13, %v2187_v33, %v7682_v55  ;;  %v2057_v55 = vsel %vm388_vm1, %v6863_v24, %v7668_v51 }
 0x233   : > { %v7816_v30 = vpop.permute.xlu1 %1854  ;;  %v7818_v57 = vpop.permute.xlu0 %2827 }
 0x234   : > { %12876 = vst [vmem:[#allocation184_spill] sm:$0xff] %v7818_v57  ;;  %v2787_v57 = vrot.slane %v7353_v54, 1 }
 0x235   : > { %2943 = vrot.lane.b32.xlu1 %v7822_v53, %s6375_s16  ;;  %1940 = vrot.lane.b32.xlu0 %v1792_v29, %s6380_s26  ;;  %v7855_v29 = vsel %vm6839_vm5, 0, %v7166_v62 }
 0x236   : > { %v1799_v46 = vrot.slane %v7855_v29, 1 }
 0x237   : > { %v1991_v36 = vpop.permute.xlu1 %1990  ;;  %v7834_v10 = vpop.permute.xlu0 %1708 }
 0x238   : > { %v2253_v26 = vsel %vm2249_vm12, %v2220_v43, %v1991_v36  ;;  %v2797_v43 = vrot.slane %v7411_v28, 1  ;;  %v12882_v28 = vshll.u32 %v7358_v59, 16 }
 0x239   : > { %v2286_v50 = vsel %vm2282_vm14, %v2253_v26, %v7748_v5  ;;  %1718 = vrot.lane.b32.xlu1 %v1627_v14, %s6373_s29  ;;  %2839 = vrot.lane.b32.xlu0 %v7839_v25, %s6373_s29  ;;  %v2090_v5 = vsel %vm12675_vm8, %v2057_v55, %v7520_v39  ;;  %v1801_v26 = vsel %vm763_vm4, %v1799_v46, %v1800_v56  ;;  %v2909_v55 = vrot.slane %v7308_v42, 1 }
 0x23a   : > { %6094 = vmatmul.mubr.msk.bf16.vlgmr.msra.gmra.mrb[32].mxu0 %vm2342_vm15, %v2286_v50  ;;  %v2123_v20 = vsel %vm2117_vm9, %v2090_v5, %v7750_v23  ;;  %v2801_v50 = vrot.slane %v12882_v28, 1 }
 0x23b   : > { %v7850_v15 = vpop.permute.xlu1 %1962  ;;  %v1993_v0 = vpop.permute.xlu0 %1992 }
 0x23d   : > { %1866 = vrot.lane.b32.xlu1 %v7855_v29, %s6377_s21  ;;  %1720 = vrot.lane.b32.xlu0 %v1639_v37, %s6373_s29 }
 0x23f   : > { %v7864_v24 = vpop.permute.xlu1 %1934  ;;  %v1893_v51 = vpop.permute.xlu0 %1892 }
 0x240   : > { %v2156_v62 = vsel %vm2150_vm10, %v2123_v20, %v1893_v51 }
 0x241   : > { %v2189_v52 = vsel %vm2183_vm11, %v2156_v62, %v1929_v60  ;;  %2002 = vrot.lane.b32.xlu1 %v1627_v14, %s6374_s14  ;;  %2004 = vrot.lane.b32.xlu0 %v1639_v37, %s6374_s14  ;;  %v7884_v60 = vsel %vm6839_vm5, 0, %v7182_v48 }
 0x242   : > { %v2222_v39 = vsel %vm12676_vm13, %v2189_v52, %v7713_v19  ;;  %v1505_v19 = vsel %vm6839_vm5, %v7168_v4, 0  ;;  %v1796_v62 = vrot.slane %v7884_v60, 1  ;;  %v1655_v52 = vshll.u32 %v7855_v29, 16 }
 0x243   : > { %v7875_v23 = vpop.permute.xlu1 %2833  ;;  %v7877_v38 = vpop.permute.xlu0 %1964  ;;  %v2255_v33 = vsel %vm2249_vm12, %v2222_v39, %v1993_v0  ;;  %v1797_v4 = vrot.slane %v1505_v19, 1 }
 0x244   : > { %12880 = vst [vmem:[#allocation187_spill] sm:$0xff] %v7875_v23  ;;  %v2288_v37 = vsel %vm2282_vm14, %v2255_v33, %v7782_v63  ;;  %v2798_v63 = vor.u32 %v2797_v43, %v7404_v22  ;;  %v1660_v33 = vshll.u32 %v1506_v61, 16  ;;  %v1657_v43 = vrot.slane %v1655_v52, 1 }
 0x245   : > { %1974 = vrot.lane.b32.xlu1 %v7884_v60, %s6372_s28  ;;  %1904 = vrot.lane.b32.xlu0 %v1627_v14, %s6381_s22  ;;  %v7906_v14 = vrot.slane %v7299_v58, 1  ;;  %v1798_v46 = vsel %vm763_vm4, %v1796_v62, %v1797_v4  ;;  %v2059_v61 = vsel %vm388_vm1, %v7002_v16, %v7801_v7  ;;  %v1648_v4 = vshll.u32 %v1505_v19, 16 }
 0x246   : > { %6097 = vmatprep.mubr.msk.bf16.mxu0 %vm2342_vm15, %v2288_v37  ;;  %v7916_v20 = vsel %vm1511_vm6, %v2798_v63, %v2801_v50  ;;  %v1653_v37 = vshrl.u32 %v7855_v29, 16  ;;  %v1662_v50 = vrot.slane %v1660_v33, 1  ;;  %v2918_v23 = vrot.slane %v7390_v6, 1 }
 0x247   : > { %v7896_v36 = vpop.permute.xlu1 %1821  ;;  %v7898_v48 = vpop.permute.xlu0 %2929  ;;  %12883 = vst [vmem:[#allocation189_spill] sm:$0xff] %v7906_v14  ;;  %12884 = vst [vmem:[#allocation190_spill] sm:$0xff] %v7916_v20  ;;  %v7920_v51 = vsel %vm763_vm4, %v2909_v55, %v7906_v14  ;;  %v2092_v22 = vsel %vm12675_vm8, %v2059_v61, %v7727_v13  ;;  %v1650_v16 = vrot.slane %v1648_v4, 1  ;;  %v12892_v13 = vshll.u32 %v7299_v58, 16 }
 0x248   : > { %12881 = vst [vmem:[#allocation188_spill] sm:$0xff] %v7898_v48  ;;  %12885 = vst [vmem:[#allocation191_spill] sm:$0xff] %v7920_v51  ;;  %v1658_v55 = vor.u32 %v1657_v43, %v1653_v37  ;;  %v12888_v48 = vld [vmem:[#allocation121_spill] sm:$0xff]  ;;  %v1641_v37 = vshrl.u32 %v7884_v60, 16 }
 0x249   : > { %1946 = vrot.lane.b32.xlu1 %v1801_v26, %s6380_s26  ;;  %1976 = vrot.lane.b32.xlu0 %v7855_v29, %s6372_s28  ;;  %v7951_v34 = vrot.slane %v12888_v48, 1  ;;  %v2791_v61 = vrot.slane %v12892_v13, 1 }
 0x24a   : > { %v1663_v33 = vsel %vm1511_vm6, %v1658_v55, %v1662_v50  ;;  %v2788_v55 = vor.u32 %v2787_v57, %v7342_v40 }
 0x24b   : > { %v7911_v0 = vpop.permute.xlu1 %2026  ;;  %v7913_v5 = vpop.permute.xlu0 %1852  ;;  %12889 = vst [vmem:[#allocation194_spill] sm:$0xff] %v7951_v34  ;;  %v7966_v50 = vsel %vm763_vm4, %v2918_v23, %v7951_v34 }
 0x24c   : > { %12891 = vst [vmem:[#allocation196_spill] sm:$0xff] %v7966_v50 }
 0x24d   : > { %2845 = vrot.lane.b32.xlu1 %v7916_v20, %s6373_s29  ;;  %2941 = vrot.lane.b32.xlu0 %v7920_v51, %s6375_s16 }
 0x24f   : > { %v7928_v39 = vpop.permute.xlu1 %3090  ;;  %v7930_v56 = vpop.permute.xlu0 %1823 }
 0x250   : > { %12886 = vst [vmem:[#allocation192_spill] sm:$0xff] %v7928_v39  ;;  %v1643_v39 = vshll.u32 %v7884_v60, 16 }
 0x251   : > { %1833 = vrot.lane.b32.xlu1 %v1798_v46, %s6375_s16  ;;  %1864 = vrot.lane.b32.xlu0 %v7884_v60, %s6377_s21 }
 0x252   : > { %v1645_v43 = vrot.slane %v1643_v39, 1  ;;  %v2125_v39 = vsel %vm2117_vm9, %v2092_v22, %v7666_v17  ;;  %v7984_v17 = vsel %vm1511_vm6, %v2788_v55, %v2791_v61 }
 0x253   : > { %v7937_v63 = vpop.permute.xlu1 %1898  ;;  %v7939_v28 = vpop.permute.xlu0 %2028  ;;  %12893 = vst [vmem:[#allocation197_spill] sm:$0xff] %v7984_v17 }
 0x254   : > { %v1646_v54 = vor.u32 %v1645_v43, %v1641_v37 }
 0x255   : > { %2038 = vrot.lane.b32.xlu1 %v1798_v46, %s6376_s17  ;;  %1835 = vrot.lane.b32.xlu0 %v1801_v26, %s6375_s16 }
 0x256   : > { %v1651_v22 = vsel %vm1511_vm6, %v1646_v54, %v1650_v16 }
 0x257   : > { %v7947_v62 = vpop.permute.xlu1 %2935  ;;  %v1933_v52 = vpop.permute.xlu0 %1932 }
 0x258   : > { %12887 = vst [vmem:[#allocation193_spill] sm:$0xff] %v7947_v62 }
 0x259   : > { %1910 = vrot.lane.b32.xlu1 %v1663_v33, %s6381_s22  ;;  %2040 = vrot.lane.b32.xlu0 %v1801_v26, %s6376_s17  ;;  %v2158_v26 = vsel %vm2150_vm10, %v2125_v39, %v7780_v49  ;;  %v12895_v39 = vld [vmem:[#allocation91_spill] sm:$0xff] }
 0x25a   : > { %v2191_v57 = vsel %vm2183_vm11, %v2158_v26, %v7697_v45  ;;  %v7999_v54 = vsel %vm6839_vm5, 0, %v12895_v39  ;;  %v12897_v26 = vld [vmem:[#allocation88_spill] sm:$0xff] }
 0x25b   : > { %v7960_v7 = vpop.permute.xlu1 %1710  ;;  %v7962_v19 = vpop.permute.xlu0 %2831  ;;  %v2224_v37 = vsel %vm12676_vm13, %v2191_v57, %v7850_v15  ;;  %v1508_v57 = vsel %vm6839_vm5, %v12897_v26, 0  ;;  %v1805_v39 = vrot.slane %v7999_v54, 1 }
 0x25c   : > { %12890 = vst [vmem:[#allocation195_spill] sm:$0xff] %v7962_v19 }
 0x25d   : > { %2947 = vrot.lane.b32.xlu1 %v7966_v50, %s6375_s16  ;;  %1944 = vrot.lane.b32.xlu0 %v1798_v46, %s6380_s26  ;;  %v12894_v46 = vld [vmem:[#allocation61_spill] sm:$0xff] }
 0x25e   : > { %v2061_v49 = vsel %vm388_vm1, %v12894_v46, %v7834_v10  ;;  %12896 = vst [vmem:[#allocation61_spill] sm:$0xff] %v7999_v54 }
 0x25f   : > { %v7978_v4 = vpop.permute.xlu1 %1858  ;;  %v7980_v23 = vpop.permute.xlu0 %1712  ;;  %v2094_v10 = vsel %vm12675_vm8, %v2061_v49, %v7765_v2 }
 0x260   : > { %v2127_v15 = vsel %vm2117_vm9, %v2094_v10, %v7913_v5 }
 0x261   : > { %1722 = vrot.lane.b32.xlu1 %v1651_v22, %s6373_s29  ;;  %2843 = vrot.lane.b32.xlu0 %v7984_v17, %s6373_s29  ;;  %v12938_v17 = vld [vmem:[#allocation138_spill] sm:$0xff] }
 0x263   : > { %v1995_v43 = vpop.permute.xlu1 %1994  ;;  %v1997_v16 = vpop.permute.xlu0 %1996 }
 0x264   : > { %v2257_v55 = vsel %vm2249_vm12, %v2224_v37, %v1995_v43 }
 0x265   : > { %1870 = vrot.lane.b32.xlu1 %v7999_v54, %s6377_s21  ;;  %1724 = vrot.lane.b32.xlu0 %v1663_v33, %s6373_s29  ;;  %v2290_v45 = vsel %vm2282_vm14, %v2257_v55, %v7911_v0  ;;  %v1806_v0 = vrot.slane %v1508_v57, 1  ;;  %v12898_v55 = vld [vmem:[#allocation101_spill] sm:$0xff] }
 0x266   : > { %6098 = vmatmul.mubr.msk.bf16.gmra.mrb[36].mxu0 %vm2342_vm15, %v2290_v45  ;;  %v12899_v45 = vld [vmem:[#allocation128_spill] sm:$0xff] }
 0x267   : > { %v8012_v13 = vpop.permute.xlu1 %1966  ;;  %v1897_v61 = vpop.permute.xlu0 %1896  ;;  %v2817_v10 = vrot.slane %v12899_v45, 1  ;;  %v12907_v45 = vld [vmem:[#allocation145_spill] sm:$0xff] }
 0x268   : > { %v2160_v46 = vsel %vm2150_vm10, %v2127_v15, %v1897_v61 }
 0x269   : > { %v2193_v37 = vsel %vm2183_vm11, %v2160_v46, %v1933_v52  ;;  %2006 = vrot.lane.b32.xlu1 %v1651_v22, %s6374_s14  ;;  %2008 = vrot.lane.b32.xlu0 %v1663_v33, %s6374_s14  ;;  %v8032_v52 = vsel %vm6839_vm5, 0, %v12898_v55  ;;  %v1807_v46 = vsel %vm763_vm4, %v1805_v39, %v1806_v0 }
 0x26a   : > { %v2226_v2 = vsel %vm12676_vm13, %v2193_v37, %v7877_v38  ;;  %v12900_v38 = vld [vmem:[#allocation85_spill] sm:$0xff]  ;;  %v12905_v37 = vld [vmem:[#allocation127_spill] sm:$0xff]  ;;  %v1665_v47 = vshrl.u32 %v8032_v52, 16 }
 0x26b   : > { %v8023_v5 = vpop.permute.xlu1 %1938  ;;  %v8025_v49 = vpop.permute.xlu0 %1968  ;;  %v2259_v43 = vsel %vm2249_vm12, %v2226_v2, %v1997_v16  ;;  %v8039_v15 = vsel %vm666_vm2, %v12900_v38, 0  ;;  %v12902_v16 = vld [vmem:[#allocation96_spill] sm:$0xff]  ;;  %v2818_v2 = vor.u32 %v2817_v10, %v12905_v37  ;;  %v2915_v38 = vrot.slane %v12907_v45, 1 }
 0x26c   : > { %v2292_v33 = vsel %vm2282_vm14, %v2259_v43, %v7939_v28  ;;  %12901 = vst [vmem:[#allocation91_spill] sm:$0xff] %v8039_v15  ;;  %v1507_v61 = vsel %vm6839_vm5, %v12902_v16, 0  ;;  %v12906_v43 = vshll.u32 %v12888_v48, 16  ;;  %v1802_v10 = vrot.slane %v8032_v52, 1 }
 0x26d   : > { %1978 = vrot.lane.b32.xlu1 %v8032_v52, %s6372_s28  ;;  %1908 = vrot.lane.b32.xlu0 %v1651_v22, %s6381_s22  ;;  %v8058_v22 = vrot.slane %v8039_v15, 1  ;;  %v1684_v37 = vshll.u32 %v1508_v57, 16 }
 0x26e   : > { %6101 = vmatprep.mubr.msk.bf16.mxu0 %vm2342_vm15, %v2292_v33  ;;  %v2821_v55 = vrot.slane %v12906_v43, 1  ;;  %v1803_v33 = vrot.slane %v1507_v61, 1  ;;  %v1679_v43 = vshll.u32 %v7999_v54, 16 }
 0x26f   : > { %v8048_v26 = vpop.permute.xlu1 %2837  ;;  %v8050_v28 = vpop.permute.xlu0 %2933  ;;  %12908 = vst [vmem:[#allocation128_spill] sm:$0xff] %v8058_v22  ;;  %v8072_v39 = vsel %vm763_vm4, %v2915_v38, %v8058_v22  ;;  %v1667_v22 = vshll.u32 %v8032_v52, 16  ;;  %v1686_v57 = vrot.slane %v1684_v37, 1  ;;  %v12913_v37 = vld [vmem:[#allocation157_spill] sm:$0xff] }
 0x270   : > { %12903 = vst [vmem:[#allocation88_spill] sm:$0xff] %v8048_v26  ;;  %12904 = vst [vmem:[#allocation101_spill] sm:$0xff] %v8050_v28  ;;  %v8068_v0 = vsel %vm1511_vm6, %v2818_v2, %v2821_v55  ;;  %v1804_v2 = vsel %vm763_vm4, %v1802_v10, %v1803_v33  ;;  %v1677_v55 = vshrl.u32 %v7999_v54, 16  ;;  %v1681_v38 = vrot.slane %v1679_v43, 1  ;;  %v12911_v10 = vld [vmem:[#allocation84_spill] sm:$0xff] }
 0x271   : > { %1950 = vrot.lane.b32.xlu1 %v1807_v46, %s6380_s26  ;;  %1980 = vrot.lane.b32.xlu0 %v7999_v54, %s6372_s28  ;;  %12909 = vst [vmem:[#allocation85_spill] sm:$0xff] %v8068_v0  ;;  %12910 = vst [vmem:[#allocation96_spill] sm:$0xff] %v8072_v39  ;;  %v1672_v26 = vshll.u32 %v1507_v61, 16  ;;  %v1669_v33 = vrot.slane %v1667_v22, 1  ;;  %v2063_v43 = vsel %vm388_vm1, %v12911_v10, %v7960_v7  ;;  %v12934_v54 = vld [vmem:[#allocation108_spill] sm:$0xff] }
 0x272   : > { %v1682_v14 = vor.u32 %v1681_v38, %v1677_v55  ;;  %v2807_v55 = vrot.slane %v12913_v37, 1  ;;  %v12454_v38 = vshll.u32 %v8039_v15, 16  ;;  %v2096_v22 = vsel %vm12675_vm8, %v2063_v43, %v7896_v36  ;;  %v12916_v43 = vld [vmem:[#allocation120_spill] sm:$0xff] }
 0x273   : > { %v8063_v16 = vpop.permute.xlu1 %1825  ;;  %v8065_v34 = vpop.permute.xlu0 %1856  ;;  %v1674_v31 = vrot.slane %v1672_v26, 1  ;;  %v2129_v26 = vsel %vm2117_vm9, %v2096_v22, %v7816_v30 }
 0x274   : > { %v1687_v53 = vsel %vm1511_vm6, %v1682_v14, %v1686_v57  ;;  %v12915_v14 = vld [vmem:[#allocation151_spill] sm:$0xff]  ;;  %v2162_v36 = vsel %vm2150_vm10, %v2129_v26, %v7937_v63  ;;  %v12918_v63 = vld [vmem:[#allocation81_spill] sm:$0xff] }
 0x275   : > { %2849 = vrot.lane.b32.xlu1 %v8068_v0, %s6373_s29  ;;  %2945 = vrot.lane.b32.xlu0 %v8072_v39, %s6375_s16  ;;  %v1670_v39 = vor.u32 %v1669_v33, %v1665_v47  ;;  %v2808_v57 = vor.u32 %v2807_v55, %v12915_v14  ;;  %v2811_v33 = vrot.slane %v12454_v38, 1  ;;  %v3018_v0 = vrot.slane %v12938_v17, 2 }
 0x277   : > { %v2031_v62 = vpop.permute.xlu1 %2030  ;;  %v8080_v28 = vpop.permute.xlu0 %1827  ;;  %v1675_v47 = vsel %vm1511_vm6, %v1670_v39, %v1674_v31  ;;  %v1494_v31 = vsel %vm6839_vm5, 0, %v12916_v43  ;;  %v8129_v30 = vsel %vm1511_vm6, %v2808_v57, %v2811_v33  ;;  %v2195_v39 = vsel %vm2183_vm11, %v2162_v36, %v7864_v24  ;;  %v12919_v33 = vld [vmem:[#allocation114_spill] sm:$0xff] }
 0x278   : > { %12917 = vst [vmem:[#allocation157_spill] sm:$0xff] %v8129_v30  ;;  %v2228_v55 = vsel %vm12676_vm13, %v2195_v39, %v8012_v13  ;;  %v1510_v43 = vsel %vm6839_vm5, %v12919_v33, 0 }
 0x279   : > { %1837 = vrot.lane.b32.xlu1 %v1804_v2, %s6375_s16  ;;  %1868 = vrot.lane.b32.xlu0 %v8032_v52, %s6377_s21 }
 0x27b   : > { %v8088_v19 = vpop.permute.xlu1 %1902  ;;  %v8090_v40 = vpop.permute.xlu0 %2032 }
 0x27d   : > { %2042 = vrot.lane.b32.xlu1 %v1804_v2, %s6376_s17  ;;  %1839 = vrot.lane.b32.xlu0 %v1807_v46, %s6375_s16 }
 0x27f   : > { %v8098_v50 = vpop.permute.xlu1 %2939  ;;  %v1937_v61 = vpop.permute.xlu0 %1936 }
 0x280   : > { %12912 = vst [vmem:[#allocation145_spill] sm:$0xff] %v8098_v50 }
 0x281   : > { %1914 = vrot.lane.b32.xlu1 %v1687_v53, %s6381_s22  ;;  %2044 = vrot.lane.b32.xlu0 %v1807_v46, %s6376_s17 }
 0x283   : > { %v8107_v51 = vpop.permute.xlu1 %1714  ;;  %v8109_v7 = vpop.permute.xlu0 %2835 }
 0x284   : > { %12914 = vst [vmem:[#allocation84_spill] sm:$0xff] %v8109_v7  ;;  %v3008_v7 = vrot.slane %v7663_v8, 1  ;;  %v2067_v8 = vsel %vm388_vm1, %v7494_v12, %v8107_v51 }
 0x285   : > { %1726 = vrot.lane.b32.xlu1 %v1675_v47, %s6373_s29  ;;  %1948 = vrot.lane.b32.xlu0 %v1804_v2, %s6380_s26  ;;  %v2065_v2 = vsel %vm388_vm1, %v12918_v63, %v7980_v23  ;;  %v1922_v63 = vrot.slane %v1510_v43, 1  ;;  %v2100_v12 = vsel %vm12675_vm8, %v2067_v8, %v8063_v16  ;;  %v12942_v16 = vshll.u32 %v12934_v54, 16 }
 0x286   : > { %v2098_v23 = vsel %vm12675_vm8, %v2065_v2, %v7930_v56 }
 0x287   : > { %v8121_v46 = vpop.permute.xlu1 %1862  ;;  %v8123_v10 = vpop.permute.xlu0 %1716  ;;  %v2131_v13 = vsel %vm2117_vm9, %v2098_v23, %v8065_v34 }
 0x289   : > { %1874 = vrot.lane.b32.xlu1 %v1494_v31, %s6377_s21  ;;  %2847 = vrot.lane.b32.xlu0 %v8129_v30, %s6373_s29 }
 0x28b   : > { %v1999_v22 = vpop.permute.xlu1 %1998  ;;  %v2001_v26 = vpop.permute.xlu0 %2000 }
 0x28c   : > { %v2261_v57 = vsel %vm2249_vm12, %v2228_v55, %v1999_v22  ;;  %v12920_v55 = vld [vmem:[#allocation130_spill] sm:$0xff] }
 0x28d   : > { %2010 = vrot.lane.b32.xlu1 %v1675_v47, %s6374_s14  ;;  %1728 = vrot.lane.b32.xlu0 %v1687_v53, %s6373_s29  ;;  %v2294_v24 = vsel %vm2282_vm14, %v2261_v57, %v2031_v62  ;;  %v8158_v22 = vsel %vm6839_vm5, 0, %v12920_v55  ;;  %v1921_v62 = vrot.slane %v1494_v31, 1  ;;  %v12922_v57 = vld [vmem:[#allocation122_spill] sm:$0xff] }
 0x28e   : > { %6102 = vmatmul.mubr.msk.bf16.gmra.mrb[40].mxu0 %vm2342_vm15, %v2294_v24  ;;  %12921 = vst [vmem:[#allocation120_spill] sm:$0xff] %v8158_v22  ;;  %v1509_v56 = vsel %vm6839_vm5, %v12922_v57, 0  ;;  %v1879_v24 = vshll.u32 %v1494_v31, 16  ;;  %vm3867_vm5 = vcmask 326656  }
 0x28f   : > { %v8153_v36 = vpop.permute.xlu1 %1970  ;;  %v1901_v39 = vpop.permute.xlu0 %1900  ;;  %v1923_v9 = vsel %vm763_vm4, %v1921_v62, %v1922_v63  ;;  %v1691_v62 = vshll.u32 %v8158_v22, 16 }
 0x290   : > { %v2164_v33 = vsel %vm2150_vm10, %v2131_v13, %v1901_v39  ;;  %v1809_v39 = vrot.slane %v1509_v56, 1 }
 0x291   : > { %v2197_v2 = vsel %vm2183_vm11, %v2164_v33, %v1937_v61  ;;  %1982 = vrot.lane.b32.xlu1 %v8158_v22, %s6372_s28  ;;  %2012 = vrot.lane.b32.xlu0 %v1687_v53, %s6374_s14  ;;  %v1808_v33 = vrot.slane %v8158_v22, 1  ;;  %v1884_v53 = vshll.u32 %v1510_v43, 16  ;;  %v1696_v43 = vshll.u32 %v1509_v56, 16 }
 0x292   : > { %v2230_v34 = vsel %vm12676_vm13, %v2197_v2, %v8025_v49  ;;  %v1881_v2 = vrot.slane %v1879_v24, 1  ;;  %v1693_v38 = vrot.slane %v1691_v62, 1 }
 0x293   : > { %v8170_v23 = vpop.permute.xlu1 %1942  ;;  %v8172_v55 = vpop.permute.xlu0 %1972  ;;  %v2263_v13 = vsel %vm2249_vm12, %v2230_v34, %v2001_v26  ;;  %v1877_v26 = vshrl.u32 %v1494_v31, 16  ;;  %v1810_v63 = vsel %vm763_vm4, %v1808_v33, %v1809_v39  ;;  %v1698_v33 = vrot.slane %v1696_v43, 1 }
 0x294   : > { %v2296_v61 = vsel %vm2282_vm14, %v2263_v13, %v8090_v40  ;;  %v1886_v40 = vrot.slane %v1884_v53, 1  ;;  %v3009_v43 = vrot.slane %v7599_v18, 2 }
 0x295   : > { %1954 = vrot.lane.b32.xlu1 %v1923_v9, %s6380_s26  ;;  %1912 = vrot.lane.b32.xlu0 %v1675_v47, %s6381_s22  ;;  %v1882_v13 = vor.u32 %v1881_v2, %v1877_v26  ;;  %v12926_v26 = vld [vmem:[#allocation74_spill] sm:$0xff] }
 0x296   : > { %6105 = vmatprep.mubr.msk.bf16.mxu0 %vm2342_vm15, %v2296_v61  ;;  %v1689_v61 = vshrl.u32 %v8158_v22, 16  ;;  %v8209_v2 = vshrl.u32 %v12926_v26, 16  ;;  %v12933_v18 = vshll.u32 %v12926_v26, 16 }
 0x297   : > { %v8182_v49 = vpop.permute.xlu1 %2841  ;;  %v8184_v57 = vpop.permute.xlu0 %2937  ;;  %v1887_v53 = vsel %vm1511_vm6, %v1882_v13, %v1886_v40 }
 0x298   : > { %12923 = vst [vmem:[#allocation81_spill] sm:$0xff] %v8182_v49  ;;  %12924 = vst [vmem:[#allocation114_spill] sm:$0xff] %v8184_v57  ;;  %v1694_v56 = vor.u32 %v1693_v38, %v1689_v61  ;;  %v12929_v38 = vshll.u32 %v7501_v35, 16  ;;  %v12931_v49 = vld [vmem:[#allocation83_spill] sm:$0xff] }
 0x299   : > { %1841 = vrot.lane.b32.xlu1 %v1810_v63, %s6375_s16  ;;  %1984 = vrot.lane.b32.xlu0 %v1494_v31, %s6372_s28  ;;  %v8203_v31 = vshrl.u32 %v7501_v35, 16  ;;  %12927 = vst [vmem:[#allocation122_spill] sm:$0xff] %v8209_v2 }
 0x29a   : > { %v1699_v50 = vsel %vm1511_vm6, %v1694_v56, %v1698_v33  ;;  %v3014_v13 = vrot.slane %v12929_v38, 2  ;;  %v3000_v33 = vrot.slane %v12931_v49, 2  ;;  %v8231_v56 = vrot.slane %v8209_v2, 1 }
 0x29b   : > { %v8190_v34 = vpop.permute.xlu1 %1829  ;;  %v8192_v47 = vpop.permute.xlu0 %1860  ;;  %12925 = vst [vmem:[#allocation130_spill] sm:$0xff] %v8203_v31  ;;  %v8219_v40 = vrot.slane %v8203_v31, 1  ;;  %v3005_v31 = vrot.slane %v12933_v18, 2  ;;  %v8236_v38 = vshrl.u32 %v12934_v54, 16  ;;  %v12937_v18 = vld [vmem:[#allocation142_spill] sm:$0xff] }
 0x29c   : > { %12932 = vst [vmem:[#allocation199_spill] sm:$0xff] %v8231_v56  ;;  %v3017_v2 = vrot.slane %v12937_v18, 1 }
 0x29d   : > { %2046 = vrot.lane.b32.xlu1 %v1810_v63, %s6376_s17  ;;  %1872 = vrot.lane.b32.xlu0 %v8158_v22, %s6377_s21  ;;  %12928 = vst [vmem:[#allocation198_spill] sm:$0xff] %v8219_v40  ;;  %12935 = vst [vmem:[#allocation200_spill] sm:$0xff] %v8236_v38  ;;  %v3010_v22 = vor.u32 %v3009_v43, %v3008_v7  ;;  %v3006_v49 = vor.u32 %v3005_v31, %v8231_v56  ;;  %v8256_v8 = vrot.slane %v8236_v38, 1  ;;  %v12970_v38 = vld [vmem:[#allocation64_spill] sm:$0xff] }
 0x29e   : > { %v2133_v31 = vsel %vm2117_vm9, %v2100_v12, %v7978_v4 }
 0x29f   : > { %v8198_v24 = vpop.permute.xlu1 %2034  ;;  %v8200_v39 = vpop.permute.xlu0 %1831  ;;  %12941 = vst [vmem:[#allocation204_spill] sm:$0xff] %v8256_v8  ;;  %v2166_v56 = vsel %vm2150_vm10, %v2133_v31, %v8088_v19  ;;  %v12948_v19 = vshll.u32 %v7581_v21, 16  ;;  %v12949_v31 = vld [vmem:[#allocation117_spill] sm:$0xff] }
 0x2a1   : > { %1918 = vrot.lane.b32.xlu1 %v1887_v53, %s6381_s22  ;;  %2048 = vrot.lane.b32.xlu0 %v1923_v9, %s6376_s17  ;;  %v12930_v9 = vld [vmem:[#allocation86_spill] sm:$0xff] }
 0x2a2   : > { %v2999_v61 = vrot.slane %v12930_v9, 1  ;;  %v3015_v9 = vor.u32 %v3014_v13, %v8219_v40  ;;  %v8261_v13 = vshrl.u32 %v7581_v21, 16  ;;  %v3063_v40 = vrot.slane %v12913_v37, 2 }
 0x2a3   : > { %v8211_v62 = vpop.permute.xlu1 %1906  ;;  %v8213_v57 = vpop.permute.xlu0 %2036 }
 0x2a4   : > { %v3001_v51 = vor.u32 %v3000_v33, %v2999_v61  ;;  %12943 = vst [vmem:[#allocation205_spill] sm:$0xff] %v8261_v13  ;;  %v8266_v61 = vsel %vm2949_vm7, %v3010_v22, %v3015_v9  ;;  %v8291_v37 = vrot.slane %v8261_v13, 1 }
 0x2a5   : > { %1730 = vrot.lane.b32.xlu1 %v1699_v50, %s6373_s29  ;;  %1952 = vrot.lane.b32.xlu0 %v1810_v63, %s6380_s26  ;;  %12944 = vst [vmem:[#allocation206_spill] sm:$0xff] %v8266_v61 }
 0x2a6   : > { %v8272_v33 = vsel %vm2949_vm7, %v3001_v51, %v3006_v49  ;;  %12947 = vst [vmem:[#allocation208_spill] sm:$0xff] %v8291_v37  ;;  %v3041_v51 = vrot.slane %v12948_v19, 2 }
 0x2a7   : > { %v8238_v30 = vpop.permute.xlu1 %2943  ;;  %v1941_v63 = vpop.permute.xlu0 %1940 }
 0x2a8   : > { %12936 = vst [vmem:[#allocation201_spill] sm:$0xff] %v8238_v30  ;;  %v8249_v30 = vshrl.u32 %v8039_v15, 16 }
 0x2a9   : > { %2014 = vrot.lane.b32.xlu1 %v1699_v50, %s6374_s14  ;;  %2016 = vrot.lane.b32.xlu0 %v1887_v53, %s6374_s14  ;;  %v3023_v53 = vrot.slane %v12942_v16, 2  ;;  %v3062_v16 = vrot.slane %v12915_v14, 1 }
 0x2aa   : > { %12939 = vst [vmem:[#allocation202_spill] sm:$0xff] %v8249_v30  ;;  %v8284_v12 = vrot.slane %v8249_v30, 1 }
 0x2ab   : > { %v8251_v7 = vpop.permute.xlu1 %1718  ;;  %v8253_v43 = vpop.permute.xlu0 %2839  ;;  %v3024_v9 = vor.u32 %v3023_v53, %v8256_v8  ;;  %v2199_v53 = vsel %vm2183_vm11, %v2166_v56, %v8023_v5  ;;  %v3064_v17 = vor.u32 %v3063_v40, %v3062_v16  ;;  %v3042_v5 = vor.u32 %v3041_v51, %v8291_v37  ;;  %v12951_v56 = vld [vmem:[#allocation125_spill] sm:$0xff]  ;;  %v12956_v51 = vld [vmem:[#allocation47_spill] sm:$0xff] }
 0x2ac   : > { %12940 = vst [vmem:[#allocation203_spill] sm:$0xff] %v8253_v43  ;;  %v3019_v43 = vor.u32 %v3018_v0, %v3017_v2  ;;  %12945 = vst [vmem:[#allocation207_spill] sm:$0xff] %v8284_v12  ;;  %v3035_v0 = vrot.slane %v7743_v41, 1  ;;  %v3036_v2 = vrot.slane %v7722_v3, 2  ;;  %v2232_v8 = vsel %vm12676_vm13, %v2199_v53, %v8153_v36  ;;  %v12969_v37 = vld [vmem:[#allocation65_spill] sm:$0xff] }
 0x2ad   : > { %3094 = vrot.lane.b32.xlu1 %v8266_v61, %s6377_s21  ;;  %1916 = vrot.lane.b32.xlu0 %v1699_v50, %s6381_s22  ;;  %v12946_v50 = vshll.u32 %v8039_v15, 16  ;;  %v12952_v36 = vmov 0   ;;  %v3117_v53 = vrot.slane %v12956_v51, 2  ;;  %v3120_v51 = vrot.slane %v12970_v38, 2  ;;  %v12974_v38 = vld [vmem:[#allocation89_spill] sm:$0xff] }
 0x2ae   : > { %v8307_v19 = vsel %vm2949_vm7, %v3019_v43, %v3024_v9  ;;  %v3037_v30 = vor.u32 %v3036_v2, %v3035_v0  ;;  %v8319_v43 = vrot.slane %v12952_v36, 7 }
 0x2af   : > { %v8278_v4 = vpop.permute.xlu1 %1866  ;;  %v8280_v22 = vpop.permute.xlu0 %1720  ;;  %v3068_v49 = vrot.slane %v12946_v50, 2  ;;  %v12950_v50 = vld [vmem:[#allocation135_spill] sm:$0xff] }
 0x2b0   : > { %v2069_v14 = vsel %vm388_vm1, %v12950_v50, %v8123_v10  ;;  %12953 = vst [vmem:[#allocation135_spill] sm:$0xff] %v8319_v43  ;;  %v12957_v50 = vld [vmem:[#allocation134_spill] sm:$0xff] }
 0x2b1   : > { %3098 = vrot.lane.b32.xlu1 %v12949_v31, %s6377_s21  ;;  %3092 = vrot.lane.b32.xlu0 %v8272_v33, %s6377_s21  ;;  %v3069_v13 = vor.u32 %v3068_v49, %v8284_v12 }
 0x2b3   : > { %v2003_v3 = vpop.permute.xlu1 %2002  ;;  %v2005_v41 = vpop.permute.xlu0 %2004  ;;  %v8330_v49 = vsel %vm2949_vm7, %v3064_v17, %v3069_v13  ;;  %v12955_v13 = vld [vmem:[#allocation46_spill] sm:$0xff] }
 0x2b4   : > { %v2265_v18 = vsel %vm2249_vm12, %v2232_v8, %v2003_v3  ;;  %v2102_v3 = vsel %vm12675_vm8, %v2069_v14, %v8080_v28  ;;  %v12954_v28 = vld [vmem:[#allocation6_spill] sm:$0xff]  ;;  %v3116_v2 = vrot.slane %v12955_v13, 2 }
 0x2b5   : > { %3102 = vrot.lane.b32.xlu1 %v12951_v56, %s6377_s21  ;;  %3096 = vrot.lane.b32.xlu0 %v8307_v19, %s6377_s21  ;;  %v2298_v10 = vsel %vm2282_vm14, %v2265_v18, %v8198_v24  ;;  %v2135_v40 = vsel %vm2117_vm9, %v2102_v3, %v8192_v47  ;;  %v8333_v24 = vsel %vm2949_vm7, %v3037_v30, %v3042_v5  ;;  %v12962_v3 = vld [vmem:[#allocation54_spill] sm:$0xff] }
 0x2b6   : > { %6106 = vmatmul.mubr.msk.bf16.gmra.mrb[44].mxu0 %vm2342_vm15, %v2298_v10  ;;  %v6259_v14 = vpack.i.bf16 %v8319_v43, %v12954_v28  ;;  %v12975_v28 = vld [vmem:[#allocation87_spill] sm:$0xff] }
 0x2b7   : > { %v8326_v8 = vpop.permute.xlu1 %1974  ;;  %v1905_v16 = vpop.permute.xlu0 %1904 }
 0x2b8   : > { %v2168_v9 = vsel %vm2150_vm10, %v2135_v40, %v1905_v16  ;;  %v3122_v40 = vrot.slane %v12962_v3, 2  ;;  %v12963_v16 = vld [vmem:[#allocation55_spill] sm:$0xff] }
 0x2b9   : > { %v2201_v18 = vsel %vm2183_vm11, %v2168_v9, %v1941_v63  ;;  %3106 = vrot.lane.b32.xlu1 %v8330_v49, %s6377_s21  ;;  %3100 = vrot.lane.b32.xlu0 %v8333_v24, %s6377_s21  ;;  %v3123_v9 = vrot.slane %v12963_v16, 2  ;;  %v3119_v16 = vrot.slane %v12969_v37, 2 }
 0x2ba   : > { %v2234_v47 = vsel %vm12676_vm13, %v2201_v18, %v8172_v55  ;;  %v12958_v55 = vld [vmem:[#allocation50_spill] sm:$0xff]  ;;  %v12964_v18 = vld [vmem:[#allocation49_spill] sm:$0xff] }
 0x2bb   : > { %v8344_v0 = vpop.permute.xlu1 %1946  ;;  %v8346_v17 = vpop.permute.xlu0 %1976  ;;  %v2267_v30 = vsel %vm2249_vm12, %v2234_v47, %v2005_v41  ;;  %v3114_v5 = vrot.slane %v12958_v55, 2  ;;  %v12965_v47 = vld [vmem:[#allocation136_spill] sm:$0xff]  ;;  %v12966_v55 = vld [vmem:[#allocation77_spill] sm:$0xff] }
 0x2bc   : > { %v2300_v63 = vsel %vm2282_vm14, %v2267_v30, %v8213_v57  ;;  %v8363_v57 = vsel %vm3110_vm3, %v3116_v2, %v3117_v53  ;;  %v3128_v43 = vrot.slane %v12966_v55, 2  ;;  %v3129_v2 = vrot.slane %v12926_v26, 2 }
 0x2bd   : > { %6260 = vrot.lane.b32.xlu1 %v6259_v14, %s6381_s22  ;;  %3104 = vrot.lane.b32.xlu0 %v12957_v50, %s6377_s21  ;;  %12961 = vst [vmem:[#allocation134_spill] sm:$0xff] %v8363_v57  ;;  %v3113_v14 = vrot.slane %v12964_v18, 2  ;;  %v8379_v53 = vsel %vm3110_vm3, %v3122_v40, %v3123_v9  ;;  %v12972_v40 = vld [vmem:[#allocation107_spill] sm:$0xff] }
 0x2be   : > { %6109 = vmatprep.mubr.msk.bf16.mxu0 %vm2342_vm15, %v2300_v63  ;;  %12967 = vst [vmem:[#allocation50_spill] sm:$0xff] %v8379_v53  ;;  %v8393_v26 = vsel %vm3110_vm3, %v3128_v43, %v3129_v2  ;;  %v3134_v9 = vrot.slane %v12972_v40, 2  ;;  %v3140_v2 = vrot.slane %v7577_v27, 2 }
 0x2bf   : > { %v8358_v10 = vpop.permute.xlu1 %2845  ;;  %v8360_v41 = vpop.permute.xlu0 %2941  ;;  %v8382_v12 = vsel %vm3110_vm3, %v3113_v14, %v3114_v5  ;;  %12971 = vst [vmem:[#allocation65_spill] sm:$0xff] %v8393_v26  ;;  %v8397_v5 = vsel %vm3110_vm3, %v3119_v16, %v3120_v51  ;;  %v3135_v14 = vrot.slane %v12934_v54, 2  ;;  %v3141_v51 = vrot.slane %v7581_v21, 2 }
 0x2c0   : > { %12959 = vst [vmem:[#allocation125_spill] sm:$0xff] %v8358_v10  ;;  %12960 = vst [vmem:[#allocation46_spill] sm:$0xff] %v8360_v41  ;;  %v2071_v21 = vsel %vm388_vm1, %v7735_v1, %v8251_v7 }
 0x2c1   : > { %3159 = vrot.lane.b32.xlu1 %v8363_v57, %s6381_s22  ;;  %3108 = vrot.lane.b32.xlu0 %v12965_v47, %s6377_s21  ;;  %12968 = vst [vmem:[#allocation209_spill] sm:$0xff] %v8382_v12  ;;  %12973 = vst [vmem:[#allocation210_spill] sm:$0xff] %v8397_v5  ;;  %v3125_v57 = vrot.slane %v12974_v38, 2  ;;  %v8413_v16 = vsel %vm3110_vm3, %v3134_v9, %v3135_v14  ;;  %v8432_v14 = vsel %vm3110_vm3, %v3140_v2, %v3141_v51 }
 0x2c2   : > { %12976 = vst [vmem:[#allocation89_spill] sm:$0xff] %v8413_v16  ;;  %v2104_v1 = vsel %vm12675_vm8, %v2071_v21, %v8190_v34  ;;  %v3143_v34 = vrot.slane %v7308_v42, 2 }
 0x2c3   : > { %v8372_v30 = vpop.permute.xlu1 %1833  ;;  %v8374_v63 = vpop.permute.xlu0 %1864  ;;  %v2137_v51 = vsel %vm2117_vm9, %v2104_v1, %v8121_v46  ;;  %v3150_v1 = vrot.slane %v8039_v15, 2 }
 0x2c5   : > { %3163 = vrot.lane.b32.xlu1 %v8379_v53, %s6381_s22  ;;  %3157 = vrot.lane.b32.xlu0 %v8382_v12, %s6381_s22  ;;  %v3126_v53 = vrot.slane %v12975_v28, 2  ;;  %v3131_v28 = vrot.slane %v7508_v32, 2 }
 0x2c7   : > { %v2039_v41 = vpop.permute.xlu1 %2038  ;;  %v8390_v10 = vpop.permute.xlu0 %1835  ;;  %v8416_v54 = vsel %vm3110_vm3, %v3125_v57, %v3126_v53  ;;  %v3146_v57 = vrot.slane %v7375_v11, 2  ;;  %v3147_v53 = vrot.slane %v7358_v59, 2 }
 0x2c8   : > { %12977 = vst [vmem:[#allocation211_spill] sm:$0xff] %v8416_v54 }
 0x2c9   : > { %3167 = vrot.lane.b32.xlu1 %v8393_v26, %s6381_s22  ;;  %3161 = vrot.lane.b32.xlu0 %v8397_v5, %s6381_s22  ;;  %v3132_v26 = vrot.slane %v7501_v35, 2  ;;  %v8448_v2 = vsel %vm3110_vm3, %v3146_v57, %v3147_v53  ;;  %v2170_v57 = vsel %vm2150_vm10, %v2137_v51, %v8211_v62  ;;  %v12983_v51 = vld [vmem:[#allocation172_spill] sm:$0xff] }
 0x2ca   : > { %v2203_v62 = vsel %vm2183_vm11, %v2170_v57, %v8170_v23 }
 0x2cb   : > { %v8406_v47 = vpop.permute.xlu1 %1910  ;;  %v8408_v43 = vpop.permute.xlu0 %2040  ;;  %v8435_v35 = vsel %vm3110_vm3, %v3131_v28, %v3132_v26  ;;  %v3152_v26 = vrot.slane %v7390_v6, 2  ;;  %v3153_v28 = vrot.slane %v12888_v48, 2 }
 0x2cd   : > { %3171 = vrot.lane.b32.xlu1 %v8413_v16, %s6381_s22  ;;  %3165 = vrot.lane.b32.xlu0 %v8416_v54, %s6381_s22  ;;  %v12979_v16 = vld [vmem:[#allocation100_spill] sm:$0xff]  ;;  %v3138_v54 = vrot.slane %v7270_v44, 2  ;;  %v3144_v44 = vrot.slane %v7299_v58, 2 }
 0x2ce   : > { %v3137_v12 = vrot.slane %v12979_v16, 2 }
 0x2cf   : > { %v8427_v5 = vpop.permute.xlu1 %2947  ;;  %v1945_v9 = vpop.permute.xlu0 %1944  ;;  %v8473_v46 = vsel %vm3110_vm3, %v3143_v34, %v3144_v44  ;;  %v2236_v44 = vsel %vm12676_vm13, %v2203_v62, %v8326_v8 }
 0x2d0   : > { %12978 = vst [vmem:[#allocation212_spill] sm:$0xff] %v8427_v5  ;;  %v8455_v21 = vsel %vm3110_vm3, %v3137_v12, %v3138_v54  ;;  %v8470_v54 = vsel %vm3110_vm3, %v3152_v26, %v3153_v28  ;;  %12982 = vst [vmem:[#allocation215_spill] sm:$0xff] %v8473_v46  ;;  %v3149_v12 = vrot.slane %v12907_v45, 2  ;;  %v2073_v26 = vsel %vm388_vm1, %v12983_v51, %v8280_v22 }
 0x2d1   : > { %3175 = vrot.lane.b32.xlu1 %v8432_v14, %s6381_s22  ;;  %3169 = vrot.lane.b32.xlu0 %v8435_v35, %s6381_s22  ;;  %12981 = vst [vmem:[#allocation214_spill] sm:$0xff] %v8455_v21  ;;  %v2106_v22 = vsel %vm12675_vm8, %v2073_v26, %v8200_v39 }
 0x2d2   : > { %v8490_v58 = vsel %vm3110_vm3, %v3149_v12, %v3150_v1  ;;  %v2139_v8 = vsel %vm2117_vm9, %v2106_v22, %v8374_v63 }
 0x2d3   : > { %v1723_v7 = vpop.permute.xlu1 %1722  ;;  %v8445_v59 = vpop.permute.xlu0 %2843 }
 0x2d4   : > { %12980 = vst [vmem:[#allocation213_spill] sm:$0xff] %v8445_v59 }
 0x2d5   : > { %3179 = vrot.lane.b32.xlu1 %v8448_v2, %s6381_s22  ;;  %3173 = vrot.lane.b32.xlu0 %v8455_v21, %s6381_s22 }
 0x2d7   : > { %v8465_v53 = vpop.permute.xlu1 %1870  ;;  %v8467_v48 = vpop.permute.xlu0 %1724 }
 0x2d9   : > { %3183 = vrot.lane.b32.xlu1 %v8470_v54, %s6381_s22  ;;  %3177 = vrot.lane.b32.xlu0 %v8473_v46, %s6381_s22 }
 0x2db   : > { %v2007_v28 = vpop.permute.xlu1 %2006  ;;  %v2009_v34 = vpop.permute.xlu0 %2008 }
 0x2dc   : > { %v2269_v15 = vsel %vm2249_vm12, %v2236_v44, %v2007_v28 }
 0x2dd   : > { %3188 = vrot.lane.b32.xlu1 %v12964_v18, %s6380_s26  ;;  %3181 = vrot.lane.b32.xlu0 %v8490_v58, %s6381_s22  ;;  %v2302_v23 = vsel %vm2282_vm14, %v2269_v15, %v2039_v41 }
 0x2de   : > { %6110 = vmatmul.mubr.msk.bf16.gmra.mrb[48].mxu0 %vm2342_vm15, %v2302_v23 }
 0x2df   : > { %v1979_v57 = vpop.permute.xlu1 %1978  ;;  %v1909_v62 = vpop.permute.xlu0 %1908 }
 0x2e0   : > { %v2172_v12 = vsel %vm2150_vm10, %v2139_v8, %v1909_v62 }
 0x2e1   : > { %v2205_v1 = vsel %vm2183_vm11, %v2172_v12, %v1945_v9  ;;  %3192 = vrot.lane.b32.xlu1 %v12969_v37, %s6380_s26  ;;  %3186 = vrot.lane.b32.xlu0 %v12952_v36, %s6380_s26 }
 0x2e2   : > { %v2238_v15 = vsel %vm12676_vm13, %v2205_v1, %v8346_v17 }
 0x2e3   : > { %v8510_v39 = vpop.permute.xlu1 %1950  ;;  %v1981_v41 = vpop.permute.xlu0 %1980  ;;  %v2271_v63 = vsel %vm2249_vm12, %v2238_v15, %v2009_v34  ;;  %v2075_v34 = vsel %vm388_vm1, %v7884_v60, %v1723_v7  ;;  %v12986_v15 = vld [vmem:[#allocation148_spill] sm:$0xff] }
 0x2e4   : > { %v2304_v51 = vsel %vm2282_vm14, %v2271_v63, %v8408_v43  ;;  %v2108_v8 = vsel %vm12675_vm8, %v2075_v34, %v8372_v30  ;;  %v12988_v63 = vld [vmem:[#allocation52_spill] sm:$0xff] }
 0x2e5   : > { %3196 = vrot.lane.b32.xlu1 %v12974_v38, %s6380_s26  ;;  %3190 = vrot.lane.b32.xlu0 %v12955_v13, %s6380_s26  ;;  %v2141_v1 = vsel %vm2117_vm9, %v2108_v8, %v8278_v4 }
 0x2e6   : > { %6113 = vmatprep.mubr.msk.bf16.mxu0 %vm2342_vm15, %v2304_v51  ;;  %v2174_v60 = vsel %vm2150_vm10, %v2141_v1, %v8406_v47  ;;  %v12989_v47 = vld [vmem:[#allocation68_spill] sm:$0xff] }
 0x2e7   : > { %v8520_v9 = vpop.permute.xlu1 %2849  ;;  %v8522_v26 = vpop.permute.xlu0 %2945  ;;  %v2207_v4 = vsel %vm2183_vm11, %v2174_v60, %v8344_v0  ;;  %v12990_v1 = vld [vmem:[#allocation60_spill] sm:$0xff]  ;;  %v2077_v0 = vsel %vm388_vm1, %v7855_v29, %v8467_v48  ;;  %v12993_v29 = vld [vmem:[#allocation147_spill] sm:$0xff] }
 0x2e8   : > { %12984 = vst [vmem:[#allocation172_spill] sm:$0xff] %v8520_v9  ;;  %12985 = vst [vmem:[#allocation216_spill] sm:$0xff] %v8522_v26  ;;  %v2240_v51 = vsel %vm12676_vm13, %v2207_v4, %v1979_v57  ;;  %v12991_v4 = vld [vmem:[#allocation93_spill] sm:$0xff]  ;;  %v12994_v48 = vld [vmem:[#allocation132_spill] sm:$0xff] }
 0x2e9   : > { %3200 = vrot.lane.b32.xlu1 %v7508_v32, %s6380_s26  ;;  %3194 = vrot.lane.b32.xlu0 %v12962_v3, %s6380_s26 }
 0x2eb   : > { %v8528_v17 = vpop.permute.xlu1 %1837  ;;  %v1869_v43 = vpop.permute.xlu0 %1868 }
 0x2ed   : > { %3204 = vrot.lane.b32.xlu1 %v12979_v16, %s6380_s26  ;;  %3198 = vrot.lane.b32.xlu0 %v12966_v55, %s6380_s26 }
 0x2ef   : > { %v2043_v44 = vpop.permute.xlu1 %2042  ;;  %v8534_v28 = vpop.permute.xlu0 %1839 }
 0x2f1   : > { %3208 = vrot.lane.b32.xlu1 %v7308_v42, %s6380_s26  ;;  %3202 = vrot.lane.b32.xlu0 %v12972_v40, %s6380_s26 }
 0x2f3   : > { %v8542_v23 = vpop.permute.xlu1 %1914  ;;  %v2045_v22 = vpop.permute.xlu0 %2044 }
 0x2f5   : > { %3212 = vrot.lane.b32.xlu1 %v12907_v45, %s6380_s26  ;;  %3206 = vrot.lane.b32.xlu0 %v7577_v27, %s6380_s26 }
 0x2f7   : > { %v1727_v62 = vpop.permute.xlu1 %1726  ;;  %v1949_v12 = vpop.permute.xlu0 %1948 }
 0x2f9   : > { %3216 = vrot.lane.b32.xlu1 %v12986_v15, %s6380_s26  ;;  %3210 = vrot.lane.b32.xlu0 %v7375_v11, %s6380_s26 }
 0x2fb   : > { %v8558_v30 = vpop.permute.xlu1 %1874  ;;  %v8560_v7 = vpop.permute.xlu0 %2847 }
 0x2fc   : > { %12987 = vst [vmem:[#allocation217_spill] sm:$0xff] %v8560_v7 }
 0x2fd   : > { %3232 = vrot.lane.b32.xlu1 %v12988_v63, %s6372_s28  ;;  %3214 = vrot.lane.b32.xlu0 %v7390_v6, %s6380_s26 }
 0x2ff   : > { %v2011_v34 = vpop.permute.xlu1 %2010  ;;  %v1729_v8 = vpop.permute.xlu0 %1728 }
 0x300   : > { %v2273_v36 = vsel %vm2249_vm12, %v2240_v51, %v2011_v34  ;;  %v12992_v51 = vld [vmem:[#allocation82_spill] sm:$0xff]  ;;  %v2110_v34 = vsel %vm12675_vm8, %v2077_v0, %v8390_v10  ;;  %v12995_v0 = vld [vmem:[#allocation179_spill] sm:$0xff] }
 0x301   : > { %3236 = vrot.lane.b32.xlu1 %v12989_v47, %s6372_s28  ;;  %3230 = vrot.lane.b32.xlu0 %v12990_v1, %s6372_s28  ;;  %v2306_v26 = vsel %vm2282_vm14, %v2273_v36, %v2043_v44  ;;  %v2143_v7 = vsel %vm2117_vm9, %v2110_v34, %v1869_v43  ;;  %v2079_v34 = vsel %vm388_vm1, %v8032_v52, %v1727_v62 }
 0x302   : > { %6114 = vmatmul.mubr.msk.bf16.gmra.mrb[52].mxu0 %vm2342_vm15, %v2306_v26 }
 0x303   : > { %v1983_v60 = vpop.permute.xlu1 %1982  ;;  %v2013_v57 = vpop.permute.xlu0 %2012 }
 0x305   : > { %3240 = vrot.lane.b32.xlu1 %v12991_v4, %s6372_s28  ;;  %3234 = vrot.lane.b32.xlu0 %v12992_v51, %s6372_s28 }
 0x307   : > { %v1955_v36 = vpop.permute.xlu1 %1954  ;;  %v1913_v44 = vpop.permute.xlu0 %1912 }
 0x308   : > { %v2176_v26 = vsel %vm2150_vm10, %v2143_v7, %v1913_v44 }
 0x309   : > { %v2209_v5 = vsel %vm2183_vm11, %v2176_v26, %v1949_v12  ;;  %3244 = vrot.lane.b32.xlu1 %v12993_v29, %s6372_s28  ;;  %3238 = vrot.lane.b32.xlu0 %v12994_v48, %s6372_s28  ;;  %v12997_v12 = vld [vmem:[#allocation170_spill] sm:$0xff] }
 0x30a   : > { %v2242_v9 = vsel %vm12676_vm13, %v2209_v5, %v1981_v41 }
 0x30b   : > { %v1842_v59 = vpop.permute.xlu1 %1841  ;;  %v1985_v51 = vpop.permute.xlu0 %1984  ;;  %v2275_v10 = vsel %vm2249_vm12, %v2242_v9, %v2013_v57  ;;  %v13001_v57 = vld [vmem:[#allocation111_spill] sm:$0xff] }
 0x30c   : > { %v2308_v43 = vsel %vm2282_vm14, %v2275_v10, %v2045_v22  ;;  %v8612_v26 = vsel %vm666_vm2, %v13001_v57, 0  ;;  %v2112_v10 = vsel %vm12675_vm8, %v2079_v34, %v8528_v17  ;;  %v13004_v57 = vld [vmem:[#allocation85_spill] sm:$0xff] }
 0x30d   : > { %3248 = vrot.lane.b32.xlu1 %v12995_v0, %s6372_s28  ;;  %v8597_v7 = vpop.f32.mrb[32].mxu0  ;;  %3242 = vrot.lane.b32.xlu0 %v12997_v12, %s6372_s28  ;;  %13002 = vst [vmem:[#allocation111_spill] sm:$0xff] %v8612_v26  ;;  %v2145_v62 = vsel %vm2117_vm9, %v2112_v10, %v8465_v53  ;;  %v13005_v17 = vld [vmem:[#allocation197_spill] sm:$0xff] }
 0x30e   : > { %12996 = vst [vmem:[#allocation52_spill] sm:$0xff] %v8597_v7  ;;  %6117 = vmatprep.mubr.msk.bf16.mxu0 %vm2342_vm15, %v2308_v43  ;;  %v8604_v5 = vpop.f32.mrb[33].mxu0  ;;  %v2178_v34 = vsel %vm2150_vm10, %v2145_v62, %v8542_v23  ;;  %v13007_v53 = vld [vmem:[#allocation153_spill] sm:$0xff] }
 0x30f   : > { %12998 = vst [vmem:[#allocation68_spill] sm:$0xff] %v8604_v5  ;;  %v2047_v41 = vpop.permute.xlu1 %2046  ;;  %v8606_v44 = vpop.f32.mrb[34].mxu0  ;;  %v12521_v5 = vshll.u32 %v8612_v26, 16  ;;  %v2211_v23 = vsel %vm2183_vm11, %v2178_v34, %v8510_v39 }
 0x310   : > { %12999 = vst [vmem:[#allocation60_spill] sm:$0xff] %v8606_v44  ;;  %v1873_v9 = vpop.permute.xlu0 %1872  ;;  %v8608_v22 = vpop.f32.mrb[35].mxu0  ;;  %v13003_v44 = vld [vmem:[#allocation158_spill] sm:$0xff] }
 0x311   : > { %13000 = vst [vmem:[#allocation93_spill] sm:$0xff] %v8608_v22  ;;  %3252 = vrot.lane.b32.xlu1 %v7916_v20, %s6372_s28  ;;  %3246 = vrot.lane.b32.xlu0 %v7839_v25, %s6372_s28  ;;  %v3222_v22 = vrot.slane %v13003_v44, 1  ;;  %v13006_v25 = vld [vmem:[#allocation120_spill] sm:$0xff]  ;;  %v3226_v0 = vrot.slane %v12521_v5, 1  ;;  %v13010_v5 = vld [vmem:[#allocation61_spill] sm:$0xff] }
 0x313   : > { %v1919_v52 = vpop.permute.xlu1 %1918  ;;  %v3223_v10 = vor.u32 %v3222_v22, %v13007_v53 }
 0x314   : > { %v2049_v43 = vpop.permute.xlu0 %2048 }
 0x315   : > { %3256 = vrot.lane.b32.xlu1 %v13004_v57, %s6372_s28  ;;  %3250 = vrot.lane.b32.xlu0 %v13005_v17, %s6372_s28  ;;  %v13008_v57 = vld [vmem:[#allocation51_spill] sm:$0xff]  ;;  %v13009_v17 = vld [vmem:[#allocation157_spill] sm:$0xff]  ;;  %v8650_v29 = vsel %vm1511_vm6, %v3223_v10, %v3226_v0  ;;  %v13014_v10 = vld [vmem:[#allocation42_spill] sm:$0xff] }
 0x317   : > { %v1731_v7 = vpop.permute.xlu1 %1730 }
 0x318   : > { %v2083_v20 = vsel %vm388_vm1, %v13006_v25, %v1731_v7  ;;  %v1953_v12 = vpop.permute.xlu0 %1952  ;;  %v2244_v7 = vsel %vm12676_vm13, %v2211_v23, %v1983_v60  ;;  %v13012_v60 = vld [vmem:[#allocation40_spill] sm:$0xff]  ;;  %v6252_v23 = vunpack.i.l.bf16 %v13014_v10 }
 0x319   : > { %v2116_v48 = vsel %vm12675_vm8, %v2083_v20, %v1842_v59  ;;  %3266 = vrot.lane.b32.xlu1 %v13008_v57, %s6374_s14  ;;  %3254 = vrot.lane.b32.xlu0 %v13009_v17, %s6372_s28  ;;  %v2081_v59 = vsel %vm388_vm1, %v13010_v5, %v1729_v8  ;;  %v13011_v17 = vld [vmem:[#allocation71_spill] sm:$0xff] }
 0x31a   : > { %v2149_v25 = vsel %vm2117_vm9, %v2116_v48, %v8558_v30  ;;  %v6247_v48 = vunpack.i.l.bf16 %v13012_v60  ;;  %v2114_v8 = vsel %vm12675_vm8, %v2081_v59, %v8534_v28  ;;  %v13038_v60 = vld [vmem:[#allocation185_spill] sm:$0xff] }
 0x31b   : > { %v2182_v22 = vsel %vm2150_vm10, %v2149_v25, %v1919_v52  ;;  %v2015_v62 = vpop.permute.xlu1 %2014  ;;  %v2147_v0 = vsel %vm2117_vm9, %v2114_v8, %v1873_v9  ;;  %v13016_v25 = vld [vmem:[#allocation48_spill] sm:$0xff] }
 0x31c   : > { %v2277_v20 = vsel %vm2249_vm12, %v2244_v7, %v2015_v62  ;;  %v2017_v57 = vpop.permute.xlu0 %2016  ;;  %v2215_v30 = vsel %vm2183_vm11, %v2182_v22, %v1955_v36  ;;  %v13015_v36 = vld [vmem:[#allocation99_spill] sm:$0xff]  ;;  %v13018_v62 = vld [vmem:[#allocation44_spill] sm:$0xff] }
 0x31d   : > { %3270 = vrot.lane.b32.xlu1 %v13011_v17, %s6374_s14  ;;  %3258 = vrot.lane.b32.xlu0 %v8650_v29, %s6372_s28  ;;  %v2310_v39 = vsel %vm2282_vm14, %v2277_v20, %v2047_v41  ;;  %v2248_v34 = vsel %vm12676_vm13, %v2215_v30, %v6247_v48  ;;  %v6257_v59 = vunpack.i.l.bf16 %v13018_v62  ;;  %v13020_v30 = vld [vmem:[#allocation146_spill] sm:$0xff]  ;;  %v13021_v48 = vld [vmem:[#allocation59_spill] sm:$0xff] }
 0x31e   : > { %6118 = vmatmul.mubr.msk.bf16.gmra.mrb[56].mxu0 %vm2342_vm15, %v2310_v39  ;;  %v2281_v9 = vsel %vm2249_vm12, %v2248_v34, %v6252_v23 }
 0x31f   : > { %v8662_v5 = vpop.permute.xlu1 %3094 }
 0x320   : > { %13013 = vst [vmem:[#allocation158_spill] sm:$0xff] %v8662_v5  ;;  %v1917_v52 = vpop.permute.xlu0 %1916 }
 0x321   : > { %v2180_v41 = vsel %vm2150_vm10, %v2147_v0, %v1917_v52  ;;  %3274 = vrot.lane.b32.xlu1 %v13015_v36, %s6374_s14  ;;  %3268 = vrot.lane.b32.xlu0 %v13016_v25, %s6374_s14  ;;  %v13025_v52 = vld [vmem:[#allocation80_spill] sm:$0xff] }
 0x322   : > { %v2213_v7 = vsel %vm2183_vm11, %v2180_v41, %v1953_v12  ;;  %v13029_v41 = vld [vmem:[#allocation124_spill] sm:$0xff] }
 0x323   : > { %v2246_v28 = vsel %vm12676_vm13, %v2213_v7, %v1985_v51  ;;  %v8674_v22 = vpop.permute.xlu1 %3098  ;;  %v2314_v51 = vsel %vm2282_vm14, %v2281_v9, %v6257_v59  ;;  %v3261_v9 = vrot.slane %v12986_v15, 1  ;;  %v8711_v59 = vrot.slane %v8612_v26, 1 }
 0x324   : > { %13017 = vst [vmem:[#allocation120_spill] sm:$0xff] %v8674_v22  ;;  %v8678_v20 = vpop.permute.xlu0 %3092  ;;  %v2279_v39 = vsel %vm2249_vm12, %v2246_v28, %v2017_v57  ;;  %v13024_v57 = vld [vmem:[#allocation180_spill] sm:$0xff] }
 0x325   : > { %13019 = vst [vmem:[#allocation61_spill] sm:$0xff] %v8678_v20  ;;  %3278 = vrot.lane.b32.xlu1 %v13020_v30, %s6374_s14  ;;  %3272 = vrot.lane.b32.xlu0 %v13021_v48, %s6374_s14  ;;  %v2312_v12 = vsel %vm2282_vm14, %v2279_v39, %v2049_v43  ;;  %v13028_v43 = vld [vmem:[#allocation191_spill] sm:$0xff]  ;;  %13032 = vst [vmem:[#allocation80_spill] sm:$0xff] %v8711_v59  ;;  %v13033_v39 = vld [vmem:[#allocation96_spill] sm:$0xff]  ;;  %v8723_v10 = vsel %vm763_vm4, %v3261_v9, %v8711_v59 }
 0x326   : > { %6121 = vmatprep.mubr.msk.bf16.mxu0 %vm2342_vm15, %v2312_v12  ;;  %v13034_v12 = vld [vmem:[#allocation169_spill] sm:$0xff]  ;;  %13037 = vst [vmem:[#allocation96_spill] sm:$0xff] %v8723_v10  ;;  %v13041_v20 = vld [vmem:[#allocation56_spill] sm:$0xff] }
 0x327   : > { %6122 = vmatmul.mubr.msk.bf16.gmra.mrb[60].mxu0 %vm2342_vm15, %v2314_v51  ;;  %v8689_v8 = vpop.permute.xlu1 %3102  ;;  %v13043_v22 = vld [vmem:[#allocation196_spill] sm:$0xff] }
 0x328   : > { %13022 = vst [vmem:[#allocation71_spill] sm:$0xff] %v8689_v8  ;;  %v8691_v0 = vpop.permute.xlu0 %3096 }
 0x329   : > { %13023 = vst [vmem:[#allocation99_spill] sm:$0xff] %v8691_v0  ;;  %3282 = vrot.lane.b32.xlu1 %v13024_v57, %s6374_s14  ;;  %3276 = vrot.lane.b32.xlu0 %v13025_v52, %s6374_s14 }
 0x32b   : > { %v8697_v34 = vpop.permute.xlu1 %3106 }
 0x32c   : > { %13026 = vst [vmem:[#allocation48_spill] sm:$0xff] %v8697_v34  ;;  %v8699_v23 = vpop.permute.xlu0 %3100 }
 0x32d   : > { %13027 = vst [vmem:[#allocation146_spill] sm:$0xff] %v8699_v23  ;;  %3286 = vrot.lane.b32.xlu1 %v13028_v43, %s6374_s14  ;;  %3280 = vrot.lane.b32.xlu0 %v13029_v41, %s6374_s14  ;;  %v3297_v23 = vrot.slane %v13003_v44, 2 }
 0x32f   : > { %v8705_v7 = vpop.permute.xlu1 %6260 }
 0x330   : > { %13030 = vst [vmem:[#allocation59_spill] sm:$0xff] %v8705_v7  ;;  %v8707_v28 = vpop.permute.xlu0 %3104 }
 0x331   : > { %13031 = vst [vmem:[#allocation180_spill] sm:$0xff] %v8707_v28  ;;  %3290 = vrot.lane.b32.xlu1 %v13033_v39, %s6374_s14  ;;  %3284 = vrot.lane.b32.xlu0 %v13034_v12, %s6374_s14 }
 0x333   : > { %v8717_v51 = vpop.permute.xlu1 %3159 }
 0x334   : > { %13035 = vst [vmem:[#allocation191_spill] sm:$0xff] %v8717_v51  ;;  %v8719_v62 = vpop.permute.xlu0 %3108 }
 0x335   : > { %13036 = vst [vmem:[#allocation124_spill] sm:$0xff] %v8719_v62  ;;  %3294 = vrot.lane.b32.xlu1 %v8723_v10, %s6374_s14  ;;  %3288 = vrot.lane.b32.xlu0 %v13038_v60, %s6374_s14 }
 0x337   : > { %v8729_v7 = vpop.permute.xlu1 %3163 }
 0x338   : > { %13039 = vst [vmem:[#allocation169_spill] sm:$0xff] %v8729_v7  ;;  %v8731_v0 = vpop.permute.xlu0 %3157  ;;  %v13050_v7 = vld [vmem:[#allocation7_spill] sm:$0xff] }
 0x339   : > { %13040 = vst [vmem:[#allocation185_spill] sm:$0xff] %v8731_v0  ;;  %3307 = vrot.lane.b32.xlu1 %v13041_v20, %s6376_s17  ;;  %v8735_v51 = vpop.f32.mrb[36].mxu0  ;;  %3292 = vrot.lane.b32.xlu0 %v13043_v22, %s6374_s14  ;;  %v13049_v0 = vld [vmem:[#allocation76_spill] sm:$0xff] }
 0x33a   : > { %13042 = vst [vmem:[#allocation56_spill] sm:$0xff] %v8735_v51  ;;  %v8739_v9 = vpop.f32.mrb[37].mxu0 }
 0x33b   : > { %13044 = vst [vmem:[#allocation196_spill] sm:$0xff] %v8739_v9  ;;  %v8741_v59 = vpop.permute.xlu1 %3167  ;;  %v8743_v5 = vpop.f32.mrb[38].mxu0  ;;  %v13053_v9 = vld [vmem:[#allocation109_spill] sm:$0xff] }
 0x33c   : > { %13045 = vst [vmem:[#allocation218_spill] sm:$0xff] %v8741_v59  ;;  %13046 = vst [vmem:[#allocation219_spill] sm:$0xff] %v8743_v5  ;;  %v8745_v34 = vpop.permute.xlu0 %3161  ;;  %v8747_v8 = vpop.f32.mrb[39].mxu0  ;;  %v13054_v59 = vld [vmem:[#allocation58_spill] sm:$0xff] }
 0x33d   : > { %13047 = vst [vmem:[#allocation220_spill] sm:$0xff] %v8745_v34  ;;  %13048 = vst [vmem:[#allocation221_spill] sm:$0xff] %v8747_v8  ;;  %3311 = vrot.lane.b32.xlu1 %v13049_v0, %s6376_s17  ;;  %3305 = vrot.lane.b32.xlu0 %v13050_v7, %s6376_s17  ;;  %v13057_v8 = vld [vmem:[#allocation79_spill] sm:$0xff] }
 0x33f   : > { %v8753_v51 = vpop.permute.xlu1 %3171 }
 0x340   : > { %13051 = vst [vmem:[#allocation76_spill] sm:$0xff] %v8753_v51  ;;  %v8755_v62 = vpop.permute.xlu0 %3165  ;;  %v8772_v51 = vshrl.u32 %v8612_v26, 16 }
 0x341   : > { %13052 = vst [vmem:[#allocation7_spill] sm:$0xff] %v8755_v62  ;;  %3315 = vrot.lane.b32.xlu1 %v13053_v9, %s6376_s17  ;;  %3309 = vrot.lane.b32.xlu0 %v13054_v59, %s6376_s17 }
 0x342   : > { %13059 = vst [vmem:[#allocation222_spill] sm:$0xff] %v8772_v51 }
 0x343   : > { %v8761_v5 = vpop.permute.xlu1 %3175 }
 0x344   : > { %13055 = vst [vmem:[#allocation109_spill] sm:$0xff] %v8761_v5  ;;  %v8763_v34 = vpop.permute.xlu0 %3169  ;;  %v3296_v5 = vrot.slane %v13007_v53, 1 }
 0x345   : > { %13056 = vst [vmem:[#allocation58_spill] sm:$0xff] %v8763_v34  ;;  %3319 = vrot.lane.b32.xlu1 %v8266_v61, %s6376_s17  ;;  %3313 = vrot.lane.b32.xlu0 %v13057_v8, %s6376_s17  ;;  %v13064_v61 = vshll.u32 %v8612_v26, 16 }
 0x347   : > { %v8769_v7 = vpop.permute.xlu1 %3179 }
 0x348   : > { %13058 = vst [vmem:[#allocation79_spill] sm:$0xff] %v8769_v7  ;;  %v8774_v62 = vpop.permute.xlu0 %3173  ;;  %v8787_v7 = vrot.slane %v8772_v51, 1 }
 0x349   : > { %13060 = vst [vmem:[#allocation223_spill] sm:$0xff] %v8774_v62  ;;  %3323 = vrot.lane.b32.xlu1 %v12949_v31, %s6376_s17  ;;  %3317 = vrot.lane.b32.xlu0 %v8272_v33, %s6376_s17  ;;  %v3302_v62 = vrot.slane %v13064_v61, 2 }
 0x34a   : > { %13063 = vst [vmem:[#allocation226_spill] sm:$0xff] %v8787_v7 }
 0x34b   : > { %v8780_v34 = vpop.permute.xlu1 %3183  ;;  %v3303_v53 = vor.u32 %v3302_v62, %v8787_v7  ;;  %v13077_v7 = vld [vmem:[#allocation6_spill] sm:$0xff] }
 0x34c   : > { %13061 = vst [vmem:[#allocation224_spill] sm:$0xff] %v8780_v34  ;;  %v8782_v28 = vpop.permute.xlu0 %3177 }
 0x34d   : > { %13062 = vst [vmem:[#allocation225_spill] sm:$0xff] %v8782_v28  ;;  %3327 = vrot.lane.b32.xlu1 %v12951_v56, %s6376_s17  ;;  %3321 = vrot.lane.b32.xlu0 %v8307_v19, %s6376_s17  ;;  %v3298_v28 = vor.u32 %v3297_v23, %v3296_v5  ;;  %v13072_v23 = vld [vmem:[#allocation209_spill] sm:$0xff] }
 0x34f   : > { %v8795_v31 = vpop.permute.xlu1 %3188  ;;  %v8809_v51 = vsel %vm2949_vm7, %v3298_v28, %v3303_v53  ;;  %v13076_v28 = vld [vmem:[#allocation210_spill] sm:$0xff] }
 0x350   : > { %13065 = vst [vmem:[#allocation227_spill] sm:$0xff] %v8795_v31  ;;  %v8797_v34 = vpop.permute.xlu0 %3181  ;;  %13069 = vst [vmem:[#allocation231_spill] sm:$0xff] %v8809_v51  ;;  %v13073_v31 = vld [vmem:[#allocation136_spill] sm:$0xff] }
 0x351   : > { %13066 = vst [vmem:[#allocation228_spill] sm:$0xff] %v8797_v34  ;;  %3331 = vrot.lane.b32.xlu1 %v8330_v49, %s6376_s17  ;;  %3325 = vrot.lane.b32.xlu0 %v8333_v24, %s6376_s17 }
 0x353   : > { %v8804_v61 = vpop.permute.xlu1 %3192 }
 0x354   : > { %13067 = vst [vmem:[#allocation229_spill] sm:$0xff] %v8804_v61  ;;  %v8806_v44 = vpop.permute.xlu0 %3186  ;;  %v13080_v61 = vld [vmem:[#allocation211_spill] sm:$0xff] }
 0x355   : > { %13068 = vst [vmem:[#allocation230_spill] sm:$0xff] %v8806_v44  ;;  %3335 = vrot.lane.b32.xlu1 %v8809_v51, %s6376_s17  ;;  %3329 = vrot.lane.b32.xlu0 %v12957_v50, %s6376_s17 }
 0x357   : > { %v8815_v5 = vpop.permute.xlu1 %3196 }
 0x358   : > { %13070 = vst [vmem:[#allocation232_spill] sm:$0xff] %v8815_v5  ;;  %v8817_v62 = vpop.permute.xlu0 %3190 }
 0x359   : > { %13071 = vst [vmem:[#allocation233_spill] sm:$0xff] %v8817_v62  ;;  %3342 = vrot.lane.b32.xlu1 %v13072_v23, %s6382_s23  ;;  %3333 = vrot.lane.b32.xlu0 %v13073_v31, %s6376_s17  ;;  %v13082_v23 = vld [vmem:[#allocation134_spill] sm:$0xff] }
 0x35b   : > { %v8823_v44 = vpop.permute.xlu1 %3200 }
 0x35c   : > { %13074 = vst [vmem:[#allocation136_spill] sm:$0xff] %v8823_v44  ;;  %v8825_v53 = vpop.permute.xlu0 %3194 }
 0x35d   : > { %13075 = vst [vmem:[#allocation234_spill] sm:$0xff] %v8825_v53  ;;  %3346 = vrot.lane.b32.xlu1 %v13076_v28, %s6382_s23  ;;  %3340 = vrot.lane.b32.xlu0 %v13077_v7, %s6382_s23 }
 0x35f   : > { %v8831_v5 = vpop.permute.xlu1 %3204 }
 0x360   : > { %13078 = vst [vmem:[#allocation6_spill] sm:$0xff] %v8831_v5  ;;  %v8833_v62 = vpop.permute.xlu0 %3198  ;;  %v13088_v5 = vld [vmem:[#allocation50_spill] sm:$0xff] }
 0x361   : > { %13079 = vst [vmem:[#allocation235_spill] sm:$0xff] %v8833_v62  ;;  %3350 = vrot.lane.b32.xlu1 %v13080_v61, %s6382_s23  ;;  %v8837_v34 = vpop.f32.mrb[40].mxu0  ;;  %3344 = vrot.lane.b32.xlu0 %v13082_v23, %s6382_s23 }
 0x362   : > { %13081 = vst [vmem:[#allocation211_spill] sm:$0xff] %v8837_v34  ;;  %v8841_v44 = vpop.f32.mrb[41].mxu0 }
 0x363   : > { %13083 = vst [vmem:[#allocation134_spill] sm:$0xff] %v8841_v44  ;;  %v8843_v53 = vpop.permute.xlu1 %3208  ;;  %v8845_v28 = vpop.f32.mrb[42].mxu0  ;;  %v13091_v44 = vld [vmem:[#allocation65_spill] sm:$0xff] }
 0x364   : > { %13084 = vst [vmem:[#allocation236_spill] sm:$0xff] %v8843_v53  ;;  %13085 = vst [vmem:[#allocation237_spill] sm:$0xff] %v8845_v28  ;;  %v8847_v51 = vpop.permute.xlu0 %3202  ;;  %v8849_v7 = vpop.f32.mrb[43].mxu0 }
 0x365   : > { %13086 = vst [vmem:[#allocation238_spill] sm:$0xff] %v8847_v51  ;;  %13087 = vst [vmem:[#allocation239_spill] sm:$0xff] %v8849_v7  ;;  %3354 = vrot.lane.b32.xlu1 %v8435_v35, %s6382_s23  ;;  %3348 = vrot.lane.b32.xlu0 %v13088_v5, %s6382_s23  ;;  %v13094_v7 = vld [vmem:[#allocation89_spill] sm:$0xff] }
 0x367   : > { %v8855_v34 = vpop.permute.xlu1 %3212 }
 0x368   : > { %13089 = vst [vmem:[#allocation50_spill] sm:$0xff] %v8855_v34  ;;  %v8857_v62 = vpop.permute.xlu0 %3206 }
 0x369   : > { %13090 = vst [vmem:[#allocation240_spill] sm:$0xff] %v8857_v62  ;;  %3358 = vrot.lane.b32.xlu1 %v8455_v21, %s6382_s23  ;;  %3352 = vrot.lane.b32.xlu0 %v13091_v44, %s6382_s23  ;;  %v3337_v62 = vrot.slane %v12986_v15, 2  ;;  %v3338_v21 = vrot.slane %v8612_v26, 2 }
 0x36b   : > { %v8863_v28 = vpop.permute.xlu1 %3216 }
 0x36c   : > { %13092 = vst [vmem:[#allocation65_spill] sm:$0xff] %v8863_v28  ;;  %v8865_v51 = vpop.permute.xlu0 %3210 }
 0x36d   : > { %13093 = vst [vmem:[#allocation241_spill] sm:$0xff] %v8865_v51  ;;  %3362 = vrot.lane.b32.xlu1 %v8473_v46, %s6382_s23  ;;  %3356 = vrot.lane.b32.xlu0 %v13094_v7, %s6382_s23  ;;  %v8886_v46 = vsel %vm3110_vm3, %v3337_v62, %v3338_v21 }
 0x36f   : > { %v8871_v53 = vpop.permute.xlu1 %3232 }
 0x370   : > { %13095 = vst [vmem:[#allocation89_spill] sm:$0xff] %v8871_v53  ;;  %v8873_v34 = vpop.permute.xlu0 %3214 }
 0x371   : > { %13096 = vst [vmem:[#allocation242_spill] sm:$0xff] %v8873_v34  ;;  %3366 = vrot.lane.b32.xlu1 %v8490_v58, %s6382_s23  ;;  %3360 = vrot.lane.b32.xlu0 %v8432_v14, %s6382_s23 }
 0x373   : > { %v8881_v51 = vpop.permute.xlu1 %3236 }
 0x374   : > { %13097 = vst [vmem:[#allocation243_spill] sm:$0xff] %v8881_v51  ;;  %v8883_v28 = vpop.permute.xlu0 %3230 }
 0x375   : > { %13098 = vst [vmem:[#allocation244_spill] sm:$0xff] %v8883_v28  ;;  %3370 = vrot.lane.b32.xlu1 %v8886_v46, %s6382_s23  ;;  %3364 = vrot.lane.b32.xlu0 %v8448_v2, %s6382_s23 }
 0x377   : > { %v8892_v53 = vpop.permute.xlu1 %3240 }
 0x378   : > { %13099 = vst [vmem:[#allocation245_spill] sm:$0xff] %v8892_v53  ;;  %v8894_v26 = vpop.permute.xlu0 %3234 }
 0x379   : > { %13100 = vst [vmem:[#allocation246_spill] sm:$0xff] %v8894_v26  ;;  %3375 = vrot.lane.b32.xlu1 %v12955_v13, %s6383_s24  ;;  %3368 = vrot.lane.b32.xlu0 %v8470_v54, %s6382_s23  ;;  %s6385_s23 = smov 48  }
 0x37b   : > { %v8900_v28 = vpop.permute.xlu1 %3244 }
 0x37c   : > { %13101 = vst [vmem:[#allocation247_spill] sm:$0xff] %v8900_v28  ;;  %v8902_v21 = vpop.permute.xlu0 %3238 }
 0x37d   : > { %13102 = vst [vmem:[#allocation248_spill] sm:$0xff] %v8902_v21  ;;  %3379 = vrot.lane.b32.xlu1 %v12962_v3, %s6383_s24  ;;  %3373 = vrot.lane.b32.xlu0 %v12964_v18, %s6383_s24  ;;  %v13144_v3 = vld [vmem:[#allocation154_spill] sm:$0xff] }
 0x37f   : > { %v8908_v62 = vpop.permute.xlu1 %3248 }
 0x380   : > { %13103 = vst [vmem:[#allocation249_spill] sm:$0xff] %v8908_v62  ;;  %v8910_v53 = vpop.permute.xlu0 %3242 }
 0x381   : > { %13104 = vst [vmem:[#allocation250_spill] sm:$0xff] %v8910_v53  ;;  %3383 = vrot.lane.b32.xlu1 %v12966_v55, %s6383_s24  ;;  %3377 = vrot.lane.b32.xlu0 %v12969_v37, %s6383_s24 }
 0x383   : > { %v8916_v51 = vpop.permute.xlu1 %3252 }
 0x384   : > { %13105 = vst [vmem:[#allocation251_spill] sm:$0xff] %v8916_v51  ;;  %v8918_v28 = vpop.permute.xlu0 %3246  ;;  %v13139_v51 = vld [vmem:[#allocation162_spill] sm:$0xff] }
 0x385   : > { %13106 = vst [vmem:[#allocation252_spill] sm:$0xff] %v8918_v28  ;;  %3387 = vrot.lane.b32.xlu1 %v12972_v40, %s6383_s24  ;;  %3381 = vrot.lane.b32.xlu0 %v12974_v38, %s6383_s24 }
 0x387   : > { %v8924_v18 = vpop.permute.xlu1 %3256 }
 0x388   : > { %13107 = vst [vmem:[#allocation253_spill] sm:$0xff] %v8924_v18  ;;  %v8926_v62 = vpop.permute.xlu0 %3250 }
 0x389   : > { %13108 = vst [vmem:[#allocation254_spill] sm:$0xff] %v8926_v62  ;;  %3391 = vrot.lane.b32.xlu1 %v7577_v27, %s6383_s24  ;;  %v8930_v53 = vpop.f32.mrb[44].mxu0  ;;  %3385 = vrot.lane.b32.xlu0 %v7508_v32, %s6383_s24 }
 0x38a   : > { %13109 = vst [vmem:[#allocation255_spill] sm:$0xff] %v8930_v53  ;;  %v8934_v21 = vpop.f32.mrb[45].mxu0 }
 0x38b   : > { %13110 = vst [vmem:[#allocation256_spill] sm:$0xff] %v8934_v21  ;;  %v8936_v28 = vpop.permute.xlu1 %3266  ;;  %v8938_v26 = vpop.f32.mrb[46].mxu0 }
 0x38c   : > { %13111 = vst [vmem:[#allocation257_spill] sm:$0xff] %v8936_v28  ;;  %13112 = vst [vmem:[#allocation258_spill] sm:$0xff] %v8938_v26  ;;  %v8940_v40 = vpop.permute.xlu0 %3254  ;;  %v8942_v34 = vpop.f32.mrb[47].mxu0 }
 0x38d   : > { %13113 = vst [vmem:[#allocation259_spill] sm:$0xff] %v8940_v40  ;;  %13114 = vst [vmem:[#allocation260_spill] sm:$0xff] %v8942_v34  ;;  %3395 = vrot.lane.b32.xlu1 %v7375_v11, %s6383_s24  ;;  %3389 = vrot.lane.b32.xlu0 %v12979_v16, %s6383_s24  ;;  %v13119_v34 = vld [vmem:[#allocation149_spill] sm:$0xff]  ;;  %v13136_v16 = vld [vmem:[#allocation170_spill] sm:$0xff] }
 0x38f   : > { %v8948_v53 = vpop.permute.xlu1 %3270 }
 0x390   : > { %13115 = vst [vmem:[#allocation261_spill] sm:$0xff] %v8948_v53  ;;  %v8950_v18 = vpop.permute.xlu0 %3258 }
 0x391   : > { %13116 = vst [vmem:[#allocation262_spill] sm:$0xff] %v8950_v18  ;;  %3399 = vrot.lane.b32.xlu1 %v7390_v6, %s6383_s24  ;;  %3393 = vrot.lane.b32.xlu0 %v7308_v42, %s6383_s24 }
 0x393   : > { %v8956_v26 = vpop.permute.xlu1 %3274 }
 0x394   : > { %13117 = vst [vmem:[#allocation263_spill] sm:$0xff] %v8956_v26  ;;  %v8958_v21 = vpop.permute.xlu0 %3268 }
 0x395   : > { %13118 = vst [vmem:[#allocation264_spill] sm:$0xff] %v8958_v21  ;;  %3403 = vrot.lane.b32.xlu1 %v13119_v34, %s6383_s24  ;;  %3397 = vrot.lane.b32.xlu0 %v12907_v45, %s6383_s24 }
 0x397   : > { %v8964_v28 = vpop.permute.xlu1 %3278 }
 0x398   : > { %13120 = vst [vmem:[#allocation265_spill] sm:$0xff] %v8964_v28  ;;  %v8966_v53 = vpop.permute.xlu0 %3272 }
 0x399   : > { %13121 = vst [vmem:[#allocation266_spill] sm:$0xff] %v8966_v53  ;;  %3417 = vrot.lane.b32.xlu1 %v12988_v63, %s6384_s25  ;;  %3401 = vrot.lane.b32.xlu0 %v12986_v15, %s6383_s24  ;;  %v13126_v63 = vld [vmem:[#allocation82_spill] sm:$0xff]  ;;  %s6386_s24 = smov 52  }
 0x39b   : > { %v8972_v26 = vpop.permute.xlu1 %3282 }
 0x39c   : > { %13122 = vst [vmem:[#allocation267_spill] sm:$0xff] %v8972_v26  ;;  %v8974_v21 = vpop.permute.xlu0 %3276 }
 0x39d   : > { %13123 = vst [vmem:[#allocation268_spill] sm:$0xff] %v8974_v21  ;;  %3421 = vrot.lane.b32.xlu1 %v12989_v47, %s6384_s25  ;;  %3415 = vrot.lane.b32.xlu0 %v12990_v1, %s6384_s25  ;;  %v13129_v21 = vld [vmem:[#allocation147_spill] sm:$0xff]  ;;  %v13130_v47 = vld [vmem:[#allocation132_spill] sm:$0xff] }
 0x39f   : > { %v8980_v28 = vpop.permute.xlu1 %3286 }
 0x3a0   : > { %13124 = vst [vmem:[#allocation269_spill] sm:$0xff] %v8980_v28  ;;  %v8982_v53 = vpop.permute.xlu0 %3280 }
 0x3a1   : > { %13125 = vst [vmem:[#allocation270_spill] sm:$0xff] %v8982_v53  ;;  %3425 = vrot.lane.b32.xlu1 %v12991_v4, %s6384_s25  ;;  %3419 = vrot.lane.b32.xlu0 %v13126_v63, %s6384_s25  ;;  %v13133_v53 = vld [vmem:[#allocation103_spill] sm:$0xff] }
 0x3a2   : > { %v9002_v4 = vsel %vm666_vm2, %v13133_v53, 0  ;;  %v13135_v63 = vld [vmem:[#allocation179_spill] sm:$0xff]  ;;  %v13141_v53 = vld [vmem:[#allocation186_spill] sm:$0xff] }
 0x3a3   : > { %v8988_v15 = vpop.permute.xlu1 %3290  ;;  %13134 = vst [vmem:[#allocation103_spill] sm:$0xff] %v9002_v4 }
 0x3a4   : > { %13127 = vst [vmem:[#allocation82_spill] sm:$0xff] %v8988_v15  ;;  %v8990_v26 = vpop.permute.xlu0 %3284  ;;  %v13147_v15 = vld [vmem:[#allocation197_spill] sm:$0xff] }
 0x3a5   : > { %13128 = vst [vmem:[#allocation271_spill] sm:$0xff] %v8990_v26  ;;  %3429 = vrot.lane.b32.xlu1 %v13129_v21, %s6384_s25  ;;  %3423 = vrot.lane.b32.xlu0 %v13130_v47, %s6384_s25  ;;  %v3409_v47 = vrot.slane %v13139_v51, 1 }
 0x3a7   : > { %v8996_v1 = vpop.permute.xlu1 %3294 }
 0x3a8   : > { %13131 = vst [vmem:[#allocation147_spill] sm:$0xff] %v8996_v1  ;;  %v8998_v55 = vpop.permute.xlu0 %3288  ;;  %v12585_v1 = vshll.u32 %v9002_v4, 16 }
 0x3a9   : > { %13132 = vst [vmem:[#allocation132_spill] sm:$0xff] %v8998_v55  ;;  %3433 = vrot.lane.b32.xlu1 %v13135_v63, %s6384_s25  ;;  %3427 = vrot.lane.b32.xlu0 %v13136_v16, %s6384_s25  ;;  %v13140_v55 = vld [vmem:[#allocation190_spill] sm:$0xff]  ;;  %v3410_v16 = vor.u32 %v3409_v47, %v13144_v3 }
 0x3ab   : > { %v9008_v26 = vpop.permute.xlu1 %3307 }
 0x3ac   : > { %13137 = vst [vmem:[#allocation179_spill] sm:$0xff] %v9008_v26  ;;  %v9010_v21 = vpop.permute.xlu0 %3292  ;;  %v3413_v26 = vrot.slane %v12585_v1, 1 }
 0x3ad   : > { %13138 = vst [vmem:[#allocation170_spill] sm:$0xff] %v9010_v21  ;;  %3437 = vrot.lane.b32.xlu1 %v13140_v55, %s6384_s25  ;;  %3431 = vrot.lane.b32.xlu0 %v13141_v53, %s6384_s25  ;;  %v13145_v21 = vld [vmem:[#allocation85_spill] sm:$0xff] }
 0x3ae   : > { %v9042_v1 = vsel %vm1511_vm6, %v3410_v16, %v3413_v26  ;;  %v13158_v16 = vld [vmem:[#allocation51_spill] sm:$0xff] }
 0x3af   : > { %v9018_v18 = vpop.permute.xlu1 %3311  ;;  %13153 = vst [vmem:[#allocation275_spill] sm:$0xff] %v9042_v1 }
 0x3b0   : > { %13142 = vst [vmem:[#allocation162_spill] sm:$0xff] %v9018_v18  ;;  %v9020_v63 = vpop.permute.xlu0 %3305 }
 0x3b1   : > { %13143 = vst [vmem:[#allocation190_spill] sm:$0xff] %v9020_v63  ;;  %3441 = vrot.lane.b32.xlu1 %v13145_v21, %s6384_s25  ;;  %v9027_v32 = vpop.f32.mrb[48].mxu0  ;;  %3435 = vrot.lane.b32.xlu0 %v13147_v15, %s6384_s25  ;;  %v13154_v21 = vld [vmem:[#allocation157_spill] sm:$0xff] }
 0x3b2   : > { %13146 = vst [vmem:[#allocation186_spill] sm:$0xff] %v9027_v32  ;;  %v9031_v55 = vpop.f32.mrb[49].mxu0 }
 0x3b3   : > { %13148 = vst [vmem:[#allocation85_spill] sm:$0xff] %v9031_v55  ;;  %v9033_v53 = vpop.permute.xlu1 %3315  ;;  %v9035_v18 = vpop.f32.mrb[50].mxu0 }
 0x3b4   : > { %13149 = vst [vmem:[#allocation197_spill] sm:$0xff] %v9033_v53  ;;  %13150 = vst [vmem:[#allocation272_spill] sm:$0xff] %v9035_v18  ;;  %v9037_v63 = vpop.permute.xlu0 %3309  ;;  %v9039_v47 = vpop.f32.mrb[51].mxu0 }
 0x3b5   : > { %13151 = vst [vmem:[#allocation273_spill] sm:$0xff] %v9037_v63  ;;  %13152 = vst [vmem:[#allocation274_spill] sm:$0xff] %v9039_v47  ;;  %3445 = vrot.lane.b32.xlu1 %v9042_v1, %s6384_s25  ;;  %3439 = vrot.lane.b32.xlu0 %v13154_v21, %s6384_s25  ;;  %v3448_v63 = vrot.slane %v13119_v34, 1 }
 0x3b7   : > { %v9048_v15 = vpop.permute.xlu1 %3319 }
 0x3b8   : > { %13155 = vst [vmem:[#allocation157_spill] sm:$0xff] %v9048_v15  ;;  %v9050_v32 = vpop.permute.xlu0 %3313  ;;  %v9860_v15 = vld [vmem:[%s6507_s27 + $0x48] sm:$0xff] }
 0x3b9   : > { %3453 = vrot.lane.b32.xlu1 %v13016_v25, %s6385_s23  ;;  %3443 = vrot.lane.b32.xlu0 %v8650_v29, %s6384_s25  ;;  %s6387_s25 = smov 56  }
 0x3bb   : > { %v9056_v18 = vpop.permute.xlu1 %3323 }
 0x3bc   : > { %13156 = vst [vmem:[#allocation276_spill] sm:$0xff] %v9056_v18  ;;  %v9058_v26 = vpop.permute.xlu0 %3317 }
 0x3bd   : > { %13157 = vst [vmem:[#allocation277_spill] sm:$0xff] %v9058_v26  ;;  %3457 = vrot.lane.b32.xlu1 %v13021_v48, %s6385_s23  ;;  %3451 = vrot.lane.b32.xlu0 %v13158_v16, %s6385_s23 }
 0x3bf   : > { %v9064_v21 = vpop.permute.xlu1 %3327 }
 0x3c0   : > { %13159 = vst [vmem:[#allocation51_spill] sm:$0xff] %v9064_v21  ;;  %v9066_v47 = vpop.permute.xlu0 %3321 }
 0x3c1   : > { %13160 = vst [vmem:[#allocation278_spill] sm:$0xff] %v9066_v47  ;;  %3461 = vrot.lane.b32.xlu1 %v13025_v52, %s6385_s23  ;;  %3455 = vrot.lane.b32.xlu0 %v13011_v17, %s6385_s23  ;;  %v9846_v47 = vld [vmem:[%s6507_s27 + $0x30] sm:$0xff] }
 0x3c3   : > { %v9072_v25 = vpop.permute.xlu1 %3331 }
 0x3c4   : > { %13161 = vst [vmem:[#allocation279_spill] sm:$0xff] %v9072_v25  ;;  %v9074_v55 = vpop.permute.xlu0 %3325 }
 0x3c5   : > { %13162 = vst [vmem:[#allocation280_spill] sm:$0xff] %v9074_v55  ;;  %3465 = vrot.lane.b32.xlu1 %v13029_v41, %s6385_s23  ;;  %3459 = vrot.lane.b32.xlu0 %v13015_v36, %s6385_s23  ;;  %v13385_v55 = vld [vmem:[#allocation113_spill] sm:$0xff] }
 0x3c7   : > { %v9080_v48 = vpop.permute.xlu1 %3335 }
 0x3c8   : > { %13163 = vst [vmem:[#allocation281_spill] sm:$0xff] %v9080_v48  ;;  %v9082_v16 = vpop.permute.xlu0 %3329 }
 0x3c9   : > { %13164 = vst [vmem:[#allocation282_spill] sm:$0xff] %v9082_v16  ;;  %3469 = vrot.lane.b32.xlu1 %v13034_v12, %s6385_s23  ;;  %3463 = vrot.lane.b32.xlu0 %v13020_v30, %s6385_s23  ;;  %v9102_v12 = vrot.slane %v9002_v4, 1 }
 0x3cb   : > { %v9088_v17 = vpop.permute.xlu1 %3342  ;;  %13169 = vst [vmem:[#allocation287_spill] sm:$0xff] %v9102_v12 }
 0x3cc   : > { %13165 = vst [vmem:[#allocation283_spill] sm:$0xff] %v9088_v17  ;;  %v9090_v52 = vpop.permute.xlu0 %3333 }
 0x3cd   : > { %13166 = vst [vmem:[#allocation284_spill] sm:$0xff] %v9090_v52  ;;  %3473 = vrot.lane.b32.xlu1 %v13038_v60, %s6385_s23  ;;  %3467 = vrot.lane.b32.xlu0 %v13024_v57, %s6385_s23  ;;  %v9114_v57 = vsel %vm763_vm4, %v3448_v63, %v9102_v12 }
 0x3ce   : > { %13172 = vst [vmem:[#allocation290_spill] sm:$0xff] %v9114_v57 }
 0x3cf   : > { %v9096_v36 = vpop.permute.xlu1 %3346 }
 0x3d0   : > { %13167 = vst [vmem:[#allocation285_spill] sm:$0xff] %v9096_v36  ;;  %v9098_v41 = vpop.permute.xlu0 %3340 }
 0x3d1   : > { %13168 = vst [vmem:[#allocation286_spill] sm:$0xff] %v9098_v41  ;;  %3477 = vrot.lane.b32.xlu1 %v13043_v22, %s6385_s23  ;;  %3471 = vrot.lane.b32.xlu0 %v13028_v43, %s6385_s23 }
 0x3d3   : > { %v9108_v30 = vpop.permute.xlu1 %3350 }
 0x3d4   : > { %13170 = vst [vmem:[#allocation288_spill] sm:$0xff] %v9108_v30  ;;  %v9110_v60 = vpop.permute.xlu0 %3344 }
 0x3d5   : > { %13171 = vst [vmem:[#allocation289_spill] sm:$0xff] %v9110_v60  ;;  %3481 = vrot.lane.b32.xlu1 %v9114_v57, %s6385_s23  ;;  %v9118_v36 = vpop.f32.mrb[52].mxu0  ;;  %3475 = vrot.lane.b32.xlu0 %v13033_v39, %s6385_s23  ;;  %v13386_v57 = vrot.slane %v13385_v55, 7 }
 0x3d6   : > { %13173 = vst [vmem:[#allocation291_spill] sm:$0xff] %v9118_v36  ;;  %v9122_v22 = vpop.f32.mrb[53].mxu0 }
 0x3d7   : > { %13174 = vst [vmem:[#allocation292_spill] sm:$0xff] %v9122_v22  ;;  %v9124_v17 = vpop.permute.xlu1 %3354  ;;  %v9126_v43 = vpop.f32.mrb[54].mxu0 }
 0x3d8   : > { %13175 = vst [vmem:[#allocation293_spill] sm:$0xff] %v9124_v17  ;;  %13176 = vst [vmem:[#allocation294_spill] sm:$0xff] %v9126_v43  ;;  %v9128_v30 = vpop.permute.xlu0 %3348  ;;  %v9130_v60 = vpop.f32.mrb[55].mxu0 }
 0x3d9   : > { %13177 = vst [vmem:[#allocation295_spill] sm:$0xff] %v9128_v30  ;;  %13178 = vst [vmem:[#allocation296_spill] sm:$0xff] %v9130_v60  ;;  %3494 = vrot.lane.b32.xlu1 %v13054_v59, %s6386_s24  ;;  %3479 = vrot.lane.b32.xlu0 %v8723_v10, %s6385_s23  ;;  %s6388_s23 = smov 60   ;;  %v13412_v10 = vld [vmem:[#allocation195_spill] sm:$0xff] }
 0x3db   : > { %v9136_v63 = vpop.permute.xlu1 %3358 }
 0x3dc   : > { %13179 = vst [vmem:[#allocation297_spill] sm:$0xff] %v9136_v63  ;;  %v9138_v39 = vpop.permute.xlu0 %3352 }
 0x3dd   : > { %13180 = vst [vmem:[#allocation298_spill] sm:$0xff] %v9138_v39  ;;  %3498 = vrot.lane.b32.xlu1 %v13057_v8, %s6386_s24  ;;  %3492 = vrot.lane.b32.xlu0 %v13041_v20, %s6386_s24  ;;  %v9163_v8 = vshrl.u32 %v9002_v4, 16 }
 0x3df   : > { %v9144_v43 = vpop.permute.xlu1 %3362  ;;  %13183 = vst [vmem:[#allocation301_spill] sm:$0xff] %v9163_v8  ;;  %v9178_v63 = vrot.slane %v9163_v8, 1 }
 0x3e0   : > { %v9146_v36 = vpop.permute.xlu0 %3356 }
 0x3e1   : > { %13181 = vst [vmem:[#allocation299_spill] sm:$0xff] %v9146_v36  ;;  %3502 = vrot.lane.b32.xlu1 %v8272_v33, %s6386_s24  ;;  %3496 = vrot.lane.b32.xlu0 %v13049_v0, %s6386_s24  ;;  %v13184_v33 = vld [vmem:[#allocation206_spill] sm:$0xff]  ;;  %13186 = vst [vmem:[#allocation302_spill] sm:$0xff] %v9178_v63  ;;  %v13187_v36 = vshll.u32 %v9002_v4, 16 }
 0x3e3   : > { %v9152_v59 = vpop.permute.xlu1 %3366  ;;  %v3489_v17 = vrot.slane %v13187_v36, 2 }
 0x3e4   : > { %v9154_v60 = vpop.permute.xlu0 %3360 }
 0x3e5   : > { %13182 = vst [vmem:[#allocation300_spill] sm:$0xff] %v9154_v60  ;;  %3506 = vrot.lane.b32.xlu1 %v8307_v19, %s6386_s24  ;;  %3500 = vrot.lane.b32.xlu0 %v13053_v9, %s6386_s24  ;;  %v3483_v19 = vrot.slane %v13144_v3, 1  ;;  %v3484_v9 = vrot.slane %v13139_v51, 2  ;;  %v13393_v3 = vld [vmem:[#allocation184_spill] sm:$0xff] }
 0x3e7   : > { %v9160_v20 = vpop.permute.xlu1 %3370  ;;  %v3485_v30 = vor.u32 %v3484_v9, %v3483_v19  ;;  %v13200_v19 = vld [vmem:[#allocation231_spill] sm:$0xff] }
 0x3e8   : > { %v9165_v22 = vpop.permute.xlu0 %3364 }
 0x3e9   : > { %3510 = vrot.lane.b32.xlu1 %v8333_v24, %s6386_s24  ;;  %3504 = vrot.lane.b32.xlu0 %v13184_v33, %s6386_s24  ;;  %v13188_v24 = vld [vmem:[#allocation117_spill] sm:$0xff] }
 0x3eb   : > { %v9171_v0 = vpop.permute.xlu1 %3375 }
 0x3ec   : > { %13185 = vst [vmem:[#allocation206_spill] sm:$0xff] %v9171_v0  ;;  %v9173_v60 = vpop.permute.xlu0 %3368  ;;  %v3490_v0 = vor.u32 %v3489_v17, %v9178_v63 }
 0x3ed   : > { %3514 = vrot.lane.b32.xlu1 %v12957_v50, %s6386_s24  ;;  %3508 = vrot.lane.b32.xlu0 %v13188_v24, %s6386_s24 }
 0x3ee   : > { %v9208_v17 = vsel %vm2949_vm7, %v3485_v30, %v3490_v0  ;;  %vm3900_vm7 = vcmask 359424  }
 0x3ef   : > { %v9186_v33 = vpop.permute.xlu1 %3379  ;;  %13197 = vst [vmem:[#allocation310_spill] sm:$0xff] %v9208_v17 }
 0x3f0   : > { %13189 = vst [vmem:[#allocation117_spill] sm:$0xff] %v9186_v33  ;;  %v9188_v39 = vpop.permute.xlu0 %3373 }
 0x3f1   : > { %13190 = vst [vmem:[#allocation303_spill] sm:$0xff] %v9188_v39  ;;  %3518 = vrot.lane.b32.xlu1 %v13073_v31, %s6386_s24  ;;  %v9193_v51 = vpop.f32.mrb[56].mxu0  ;;  %3512 = vrot.lane.b32.xlu0 %v12951_v56, %s6386_s24 }
 0x3f2   : > { %13191 = vst [vmem:[#allocation304_spill] sm:$0xff] %v9193_v51  ;;  %v9197_v36 = vpop.f32.mrb[57].mxu0 }
 0x3f3   : > { %13192 = vst [vmem:[#allocation305_spill] sm:$0xff] %v9197_v36  ;;  %v9199_v50 = vpop.permute.xlu1 %3383  ;;  %v9201_v24 = vpop.f32.mrb[58].mxu0 }
 0x3f4   : > { %13193 = vst [vmem:[#allocation306_spill] sm:$0xff] %v9199_v50  ;;  %13194 = vst [vmem:[#allocation307_spill] sm:$0xff] %v9201_v24  ;;  %v9203_v33 = vpop.permute.xlu0 %3377  ;;  %v9205_v39 = vpop.f32.mrb[59].mxu0 }
 0x3f5   : > { %13195 = vst [vmem:[#allocation308_spill] sm:$0xff] %v9203_v33  ;;  %13196 = vst [vmem:[#allocation309_spill] sm:$0xff] %v9205_v39  ;;  %3522 = vrot.lane.b32.xlu1 %v9208_v17, %s6386_s24  ;;  %3516 = vrot.lane.b32.xlu0 %v8330_v49, %s6386_s24 }
 0x3f7   : > { %v9214_v31 = vpop.permute.xlu1 %3387 }
 0x3f8   : > { %13198 = vst [vmem:[#allocation311_spill] sm:$0xff] %v9214_v31  ;;  %v9216_v56 = vpop.permute.xlu0 %3381 }
 0x3f9   : > { %13199 = vst [vmem:[#allocation312_spill] sm:$0xff] %v9216_v56  ;;  %3529 = vrot.lane.b32.xlu1 %v13082_v23, %s6387_s25  ;;  %3520 = vrot.lane.b32.xlu0 %v13200_v19, %s6386_s24  ;;  %v13207_v23 = vld [vmem:[#allocation209_spill] sm:$0xff] }
 0x3fa   : > { %v9222_v9 = vpop.f32.mrb[60].mxu0  ;;  %v9854_v19 = vld [vmem:[%s6507_s27 + $0x40] sm:$0xff] }
 0x3fb   : > { %13201 = vst [vmem:[#allocation313_spill] sm:$0xff] %v9222_v9  ;;  %v9224_v30 = vpop.f32.mrb[61].mxu0  ;;  %v9226_v0 = vpop.permute.xlu1 %3391  ;;  %v13209_v9 = vld [vmem:[#allocation210_spill] sm:$0xff] }
 0x3fc   : > { %13202 = vst [vmem:[#allocation314_spill] sm:$0xff] %v9224_v30  ;;  %13203 = vst [vmem:[#allocation315_spill] sm:$0xff] %v9226_v0  ;;  %v9228_v24 = vpop.f32.mrb[62].mxu0  ;;  %v9230_v49 = vpop.permute.xlu0 %3385 }
 0x3fd   : > { %13204 = vst [vmem:[#allocation316_spill] sm:$0xff] %v9228_v24  ;;  %13205 = vst [vmem:[#allocation317_spill] sm:$0xff] %v9230_v49  ;;  %v9232_v51 = vpop.f32.mrb[63].mxu0  ;;  %3533 = vrot.lane.b32.xlu1 %v13088_v5, %s6387_s25  ;;  %3527 = vrot.lane.b32.xlu0 %v13207_v23, %s6387_s25  ;;  %v13219_v49 = vld [vmem:[#allocation145_spill] sm:$0xff] }
 0x3fe   : > { %13206 = vst [vmem:[#allocation318_spill] sm:$0xff] %v9232_v51 }
 0x3ff   : > { %v3396_v39 = vpop.permute.xlu1 %3395 }
 0x400   : > { %v9238_v36 = vpop.permute.xlu0 %3389 }
 0x401   : > { %13208 = vst [vmem:[#allocation209_spill] sm:$0xff] %v9238_v36  ;;  %3537 = vrot.lane.b32.xlu1 %v13091_v44, %s6387_s25  ;;  %3531 = vrot.lane.b32.xlu0 %v13209_v9, %s6387_s25 }
 0x403   : > { %v9244_v24 = vpop.permute.xlu1 %3399 }
 0x404   : > { %v9246_v30 = vpop.permute.xlu0 %3393 }
 0x405   : > { %13210 = vst [vmem:[#allocation210_spill] sm:$0xff] %v9246_v30  ;;  %3541 = vrot.lane.b32.xlu1 %v13094_v7, %s6387_s25  ;;  %3535 = vrot.lane.b32.xlu0 %v13080_v61, %s6387_s25  ;;  %v13212_v7 = vld [vmem:[#allocation214_spill] sm:$0xff]  ;;  %v3524_v30 = vrot.slane %v13119_v34, 2 }
 0x407   : > { %v9252_v5 = vpop.permute.xlu1 %3403 }
 0x408   : > { %v9254_v23 = vpop.permute.xlu0 %3397 }
 0x409   : > { %3545 = vrot.lane.b32.xlu1 %v8432_v14, %s6387_s25  ;;  %3539 = vrot.lane.b32.xlu0 %v8435_v35, %s6387_s25  ;;  %v3525_v14 = vrot.slane %v9002_v4, 2  ;;  %v13215_v35 = vld [vmem:[#allocation215_spill] sm:$0xff] }
 0x40b   : > { %v9260_v44 = vpop.permute.xlu1 %3417  ;;  %v3526_v31 = vsel %vm3110_vm3, %v3524_v30, %v3525_v14  ;;  %v13225_v30 = vld [vmem:[#allocation109_spill] sm:$0xff]  ;;  %vm12593_vm3 = vcmask 392192  }
 0x40c   : > { %13211 = vst [vmem:[#allocation319_spill] sm:$0xff] %v9260_v44  ;;  %v9262_v9 = vpop.permute.xlu0 %3401  ;;  %v13227_v14 = vld [vmem:[#allocation213_spill] sm:$0xff]  ;;  %v13234_v44 = vld [vmem:[#allocation79_spill] sm:$0xff] }
 0x40d   : > { %3549 = vrot.lane.b32.xlu1 %v8448_v2, %s6387_s25  ;;  %3543 = vrot.lane.b32.xlu0 %v13212_v7, %s6387_s25  ;;  %v13217_v2 = vld [vmem:[#allocation81_spill] sm:$0xff] }
 0x40e   : > { %v3610_v7 = vsel %vm388_vm1, %v7577_v27, %v13217_v2 }
 0x40f   : > { %v9268_v61 = vpop.permute.xlu1 %3421 }
 0x410   : > { %13213 = vst [vmem:[#allocation214_spill] sm:$0xff] %v9268_v61  ;;  %v9270_v51 = vpop.permute.xlu0 %3415  ;;  %v13222_v61 = vld [vmem:[#allocation146_spill] sm:$0xff] }
 0x411   : > { %13214 = vst [vmem:[#allocation320_spill] sm:$0xff] %v9270_v51  ;;  %3553 = vrot.lane.b32.xlu1 %v8470_v54, %s6387_s25  ;;  %3547 = vrot.lane.b32.xlu0 %v13215_v35, %s6387_s25  ;;  %v3638_v54 = vsel %vm12675_vm8, %v3610_v7, %v13219_v49  ;;  %v13221_v35 = vld [vmem:[#allocation125_spill] sm:$0xff] }
 0x412   : > { %v9298_v2 = vsel %vm2117_vm9, %v3638_v54, %v13222_v61  ;;  %v3612_v61 = vsel %vm388_vm1, %v7308_v42, %v13227_v14  ;;  %v13228_v7 = vld [vmem:[#allocation201_spill] sm:$0xff] }
 0x413   : > { %v9278_v0 = vpop.permute.xlu1 %3425  ;;  %13223 = vst [vmem:[#allocation125_spill] sm:$0xff] %v9298_v2  ;;  %v13238_v51 = vld [vmem:[#allocation217_spill] sm:$0xff] }
 0x414   : > { %13216 = vst [vmem:[#allocation215_spill] sm:$0xff] %v9278_v0  ;;  %v9283_v36 = vpop.permute.xlu0 %3419  ;;  %v3614_v0 = vsel %vm388_vm1, %v7375_v11, %v13221_v35 }
 0x415   : > { %13218 = vst [vmem:[#allocation81_spill] sm:$0xff] %v9283_v36  ;;  %3557 = vrot.lane.b32.xlu1 %v3526_v31, %s6387_s25  ;;  %3551 = vrot.lane.b32.xlu0 %v8490_v58, %s6387_s25  ;;  %v3698_v31 = vsel %vm2150_vm10, %v9298_v2, %v13225_v30  ;;  %v13226_v58 = vld [vmem:[#allocation236_spill] sm:$0xff]  ;;  %v3642_v54 = vsel %vm12675_vm8, %v3614_v0, %v13228_v7 }
 0x416   : > { %v3730_v49 = vsel %vm2183_vm11, %v3698_v31, %v13226_v58 }
 0x417   : > { %v9291_v50 = vpop.permute.xlu1 %3429  ;;  %v3762_v35 = vsel %vm12676_vm13, %v3730_v49, %v8926_v62 }
 0x418   : > { %13220 = vst [vmem:[#allocation145_spill] sm:$0xff] %v9291_v50  ;;  %v9300_v56 = vpop.permute.xlu0 %3423  ;;  %v13230_v50 = vld [vmem:[#allocation172_spill] sm:$0xff]  ;;  %v3794_v31 = vsel %vm2249_vm12, %v3762_v35, %v8980_v28 }
 0x419   : > { %13224 = vst [vmem:[#allocation146_spill] sm:$0xff] %v9300_v56  ;;  %3561 = vrot.lane.b32.xlu1 %v12969_v37, %s6388_s23  ;;  %3555 = vrot.lane.b32.xlu0 %v8886_v46, %s6387_s25  ;;  %v3618_v56 = vsel %vm388_vm1, %v7390_v6, %v13230_v50  ;;  %v13231_v46 = vld [vmem:[#allocation180_spill] sm:$0xff]  ;;  %v3826_v49 = vsel %vm2282_vm14, %v3794_v31, %v9064_v21  ;;  %v13235_v50 = vld [vmem:[#allocation46_spill] sm:$0xff]  ;;  %s6390_s25 = smov [#allocation2]  }
 0x41a   : > { %v9325_v36 = vsel %vm2117_vm9, %v3642_v54, %v13231_v46  ;;  %v3640_v7 = vsel %vm12675_vm8, %v3612_v61, %v13235_v50  ;;  %v13236_v54 = vld [vmem:[#allocation50_spill] sm:$0xff]  ;;  %v3858_v46 = vsel %vm2342_vm15, %v3826_v49, %v9144_v43  ;;  %v3616_v61 = vsel %vm388_vm1, %v12907_v45, %v13238_v51  ;;  %v13239_v50 = vld [vmem:[#allocation124_spill] sm:$0xff] }
 0x41b   : > { %v9318_v30 = vpop.permute.xlu1 %3433  ;;  %13232 = vst [vmem:[#allocation213_spill] sm:$0xff] %v9325_v36  ;;  %v3702_v0 = vsel %vm2150_vm10, %v9325_v36, %v13234_v44  ;;  %v13237_v44 = vld [vmem:[#allocation212_spill] sm:$0xff]  ;;  %v13241_v43 = vld [vmem:[#allocation82_spill] sm:$0xff] }
 0x41c   : > { %13229 = vst [vmem:[#allocation109_spill] sm:$0xff] %v9318_v30  ;;  %v9329_v14 = vpop.permute.xlu0 %3427  ;;  %v3734_v35 = vsel %vm2183_vm11, %v3702_v0, %v13236_v54  ;;  %v3646_v30 = vsel %vm12675_vm8, %v3618_v56, %v13237_v44 }
 0x41d   : > { %13233 = vst [vmem:[#allocation201_spill] sm:$0xff] %v9329_v14  ;;  %3565 = vrot.lane.b32.xlu1 %v12974_v38, %s6388_s23  ;;  %3559 = vrot.lane.b32.xlu0 %v12955_v13, %s6388_s23  ;;  %v3766_v31 = vsel %vm12676_vm13, %v3734_v35, %v8940_v40  ;;  %v3891_v14 = vsel %vm3867_vm5, %v3858_v46, %v3396_v39  ;;  %v13243_v35 = vld [vmem:[#allocation71_spill] sm:$0xff]  ;;  %v13245_v46 = vld [vmem:[#allocation224_spill] sm:$0xff] }
 0x41e   : > { %v9356_v0 = vsel %vm2117_vm9, %v3646_v30, %v13239_v50  ;;  %v3798_v49 = vsel %vm2249_vm12, %v3766_v31, %v13241_v43  ;;  %v9367_v39 = vsel %vm2117_vm9, %v3640_v7, %v13243_v35  ;;  %v13246_v50 = vld [vmem:[#allocation141_spill] sm:$0xff]  ;;  %v13247_v31 = vld [vmem:[#allocation54_spill] sm:$0xff]  ;;  %v13252_v40 = vld [vmem:[#allocation216_spill] sm:$0xff] }
 0x41f   : > { %v3438_v33 = vpop.permute.xlu1 %3437  ;;  %13240 = vst [vmem:[#allocation172_spill] sm:$0xff] %v9356_v0  ;;  %13244 = vst [vmem:[#allocation79_spill] sm:$0xff] %v9367_v39  ;;  %v3706_v51 = vsel %vm2150_vm10, %v9356_v0, %v13245_v46  ;;  %v3830_v30 = vsel %vm2282_vm14, %v3798_v49, %v9072_v25  ;;  %v13250_v46 = vld [vmem:[#allocation241_spill] sm:$0xff]  ;;  %v13251_v49 = vld [vmem:[#allocation262_spill] sm:$0xff]  ;;  %v3644_v54 = vsel %vm12675_vm8, %v3616_v61, %v13252_v40 }
 0x420   : > { %v9361_v56 = vsel %vm3900_vm7, %v3891_v14, %v3438_v33  ;;  %v9363_v44 = vpop.permute.xlu0 %3431  ;;  %v13248_v33 = vld [vmem:[#allocation225_spill] sm:$0xff]  ;;  %v3862_v35 = vsel %vm2342_vm15, %v3830_v30, %v9152_v59  ;;  %v13259_v61 = vld [vmem:[#allocation100_spill] sm:$0xff] }
 0x421   : > { %13242 = vst [vmem:[#allocation180_spill] sm:$0xff] %v9363_v44  ;;  %3569 = vrot.lane.b32.xlu1 %v13246_v50, %s6388_s23  ;;  %3563 = vrot.lane.b32.xlu0 %v13247_v31, %s6388_s23  ;;  %v3700_v14 = vsel %vm2150_vm10, %v9367_v39, %v13248_v33  ;;  %v13249_v44 = vld [vmem:[#allocation65_spill] sm:$0xff]  ;;  %v3895_v25 = vsel %vm3867_vm5, %v3862_v35, %v9244_v24  ;;  %v13253_v33 = vld [vmem:[#allocation251_spill] sm:$0xff] }
 0x422   : > { %v3738_v7 = vsel %vm2183_vm11, %v3706_v51, %v13249_v44  ;;  %v3732_v41 = vsel %vm2183_vm11, %v3700_v14, %v13250_v46  ;;  %v13254_v51 = vld [vmem:[#allocation147_spill] sm:$0xff]  ;;  %v13256_v14 = vld [vmem:[#allocation48_spill] sm:$0xff] }
 0x423   : > { %v3770_v0 = vsel %vm12676_vm13, %v3738_v7, %v13251_v49  ;;  %v3442_v43 = vpop.permute.xlu1 %3441  ;;  %v3764_v36 = vsel %vm12676_vm13, %v3732_v41, %v13253_v33  ;;  %v9402_v7 = vsel %vm2117_vm9, %v3644_v54, %v13256_v14  ;;  %v13258_v49 = vld [vmem:[#allocation132_spill] sm:$0xff]  ;;  %v13260_v41 = vld [vmem:[#allocation77_spill] sm:$0xff]  ;;  %v13313_v33 = vld [vmem:[#allocation63_spill] sm:$0xff] }
 0x424   : > { %v3802_v44 = vsel %vm2249_vm12, %v3770_v0, %v13254_v51  ;;  %v3928_v59 = vsel %vm3900_vm7, %v3895_v25, %v3442_v43  ;;  %v9398_v30 = vpop.permute.xlu0 %3435  ;;  %13257 = vst [vmem:[#allocation212_spill] sm:$0xff] %v9402_v7  ;;  %v3796_v24 = vsel %vm2249_vm12, %v3764_v36, %v13258_v49  ;;  %v13261_v0 = vld [vmem:[#allocation228_spill] sm:$0xff]  ;;  %v13262_v36 = vld [vmem:[#allocation242_spill] sm:$0xff]  ;;  %v4175_v58 = vrot.slane %v13313_v33, 7 }
 0x425   : > { %13255 = vst [vmem:[#allocation46_spill] sm:$0xff] %v9398_v30  ;;  %v3834_v40 = vsel %vm2282_vm14, %v3802_v44, %v9080_v48  ;;  %3573 = vrot.lane.b32.xlu1 %v13259_v61, %s6388_s23  ;;  %3567 = vrot.lane.b32.xlu0 %v13260_v41, %s6388_s23  ;;  %v3704_v25 = vsel %vm2150_vm10, %v9402_v7, %v13261_v0  ;;  %v13263_v48 = vld [vmem:[#allocation253_spill] sm:$0xff]  ;;  %v13310_v49 = vld [vmem:[#allocation116_spill] sm:$0xff] }
 0x426   : > { %v3828_v54 = vsel %vm2282_vm14, %v3796_v24, %v9082_v16  ;;  %v3866_v43 = vsel %vm2342_vm15, %v3834_v40, %v9160_v20  ;;  %v3736_v35 = vsel %vm2183_vm11, %v3704_v25, %v13262_v36  ;;  %v13264_v20 = vld [vmem:[#allocation170_spill] sm:$0xff] }
 0x427   : > { %v3860_v44 = vsel %vm2342_vm15, %v3828_v54, %v9165_v22  ;;  %v3899_v14 = vsel %vm3867_vm5, %v3866_v43, %v9252_v5  ;;  %v3446_v30 = vpop.permute.xlu1 %3445  ;;  %v3768_v51 = vsel %vm12676_vm13, %v3736_v35, %v13263_v48  ;;  %v13265_v22 = vld [vmem:[#allocation107_spill] sm:$0xff]  ;;  %v13307_v36 = vld [vmem:[#allocation66_spill] sm:$0xff] }
 0x428   : > { %v3893_v0 = vsel %vm3867_vm5, %v3860_v44, %v9254_v23  ;;  %v3932_v24 = vsel %vm3900_vm7, %v3899_v14, %v3446_v30  ;;  %v3440_v7 = vpop.permute.xlu0 %3439  ;;  %v3800_v40 = vsel %vm2249_vm12, %v3768_v51, %v13264_v20  ;;  %v13272_v44 = vmov 0   ;;  %v13275_v14 = vld [vmem:[#allocation67_spill] sm:$0xff]  ;;  %v13304_v20 = vld [vmem:[#allocation57_spill] sm:$0xff] }
 0x429   : > { %v3926_v25 = vsel %vm3900_vm7, %v3893_v0, %v3440_v7  ;;  %3577 = vrot.lane.b32.xlu1 %v7308_v42, %s6388_s23  ;;  %3571 = vrot.lane.b32.xlu0 %v13265_v22, %s6388_s23  ;;  %v3832_v5 = vsel %vm2282_vm14, %v3800_v40, %v9090_v52  ;;  %v13278_v40 = vld [vmem:[#allocation90_spill] sm:$0xff]  ;;  %v13291_v52 = vld [vmem:[#allocation205_spill] sm:$0xff] }
 0x42a   : > { %v3864_v23 = vsel %vm2342_vm15, %v3832_v5, %v9173_v60  ;;  %v13269_v60 = vld [vmem:[#allocation148_spill] sm:$0xff]  ;;  %v13279_v5 = vld [vmem:[#allocation47_spill] sm:$0xff] }
 0x42b   : > { %v9441_v54 = vpop.permute.xlu1 %3453  ;;  %v3897_v30 = vsel %vm3867_vm5, %v3864_v23, %v9262_v9 }
 0x42c   : > { %13266 = vst [vmem:[#allocation217_spill] sm:$0xff] %v9441_v54  ;;  %v3444_v51 = vpop.permute.xlu0 %3443  ;;  %v13287_v54 = vld [vmem:[#allocation110_spill] sm:$0xff] }
 0x42d   : > { %v3930_v7 = vsel %vm3900_vm7, %v3897_v30, %v3444_v51  ;;  %3581 = vrot.lane.b32.xlu1 %v12907_v45, %s6388_s23  ;;  %3575 = vrot.lane.b32.xlu0 %v7577_v27, %s6388_s23 }
 0x42f   : > { %v9450_v42 = vpop.permute.xlu1 %3457 }
 0x430   : > { %13267 = vst [vmem:[#allocation124_spill] sm:$0xff] %v9450_v42  ;;  %v9452_v43 = vpop.permute.xlu0 %3451  ;;  %v13286_v42 = vld [vmem:[#allocation122_spill] sm:$0xff] }
 0x431   : > { %13268 = vst [vmem:[#allocation71_spill] sm:$0xff] %v9452_v43  ;;  %3585 = vrot.lane.b32.xlu1 %v13269_v60, %s6388_s23  ;;  %3579 = vrot.lane.b32.xlu0 %v7375_v11, %s6388_s23  ;;  %v13288_v43 = vld [vmem:[#allocation200_spill] sm:$0xff]  ;;  %v13290_v60 = vld [vmem:[#allocation202_spill] sm:$0xff] }
 0x433   : > { %v9458_v9 = vpop.permute.xlu1 %3461 }
 0x434   : > { %13270 = vst [vmem:[#allocation224_spill] sm:$0xff] %v9458_v9  ;;  %v9460_v35 = vpop.permute.xlu0 %3455 }
 0x435   : > { %13271 = vst [vmem:[#allocation141_spill] sm:$0xff] %v9460_v35  ;;  %3589 = vrot.lane.b32.xlu1 %v13272_v44, %s6388_s23  ;;  %3583 = vrot.lane.b32.xlu0 %v7390_v6, %s6388_s23  ;;  %v13280_v6 = vshrl.u32 %v13279_v5, 16 }
 0x437   : > { %v9466_v27 = vpop.permute.xlu1 %3465 }
 0x438   : > { %13273 = vst [vmem:[#allocation54_spill] sm:$0xff] %v9466_v27  ;;  %v9468_v45 = vpop.permute.xlu0 %3459  ;;  %v13282_v27 = vld [vmem:[#allocation130_spill] sm:$0xff] }
 0x439   : > { %13274 = vst [vmem:[#allocation225_spill] sm:$0xff] %v9468_v45  ;;  %4067 = vrot.lane.b32.xlu1 %v13275_v14, %s6373_s29  ;;  %3587 = vrot.lane.b32.xlu0 %v13119_v34, %s6388_s23  ;;  %v13391_v34 = vld [vmem:[#allocation115_spill] sm:$0xff]  ;;  %s6311_s23 = sshll.u32 %s6390_s25, 4  ;;  %s6312_s23 = int_to_ptr.vmem [resolvable:$false] %s6311_s23 }
 0x43b   : > { %v9474_v11 = vpop.permute.xlu1 %3469 }
 0x43c   : > { %13276 = vst [vmem:[#allocation216_spill] sm:$0xff] %v9474_v11  ;;  %v9476_v0 = vpop.permute.xlu0 %3463  ;;  %v13283_v11 = vld [vmem:[#allocation73_spill] sm:$0xff] }
 0x43d   : > { %13277 = vst [vmem:[#allocation48_spill] sm:$0xff] %v9476_v0  ;;  %4071 = vrot.lane.b32.xlu1 %v13278_v40, %s6373_s29  ;;  %4065 = vrot.lane.b32.xlu0 %v13280_v6, %s6373_s29  ;;  %v13285_v6 = vld [vmem:[#allocation102_spill] sm:$0xff] }
 0x43f   : > { %v3474_v23 = vpop.permute.xlu1 %3473 }
 0x440   : > { %v3957_v30 = vsel %vm12593_vm3, %v9361_v56, %v3474_v23  ;;  %v9485_v51 = vpop.permute.xlu0 %3467 }
 0x441   : > { %13281 = vst [vmem:[#allocation100_spill] sm:$0xff] %v9485_v51  ;;  %4075 = vrot.lane.b32.xlu1 %v13282_v27, %s6373_s29  ;;  %4069 = vrot.lane.b32.xlu0 %v13283_v11, %s6373_s29 }
 0x443   : > { %v3478_v0 = vpop.permute.xlu1 %3477 }
 0x444   : > { %v3961_v9 = vsel %vm12593_vm3, %v3928_v59, %v3478_v0  ;;  %v9492_v45 = vpop.permute.xlu0 %3471 }
 0x445   : > { %13284 = vst [vmem:[#allocation77_spill] sm:$0xff] %v9492_v45  ;;  %4079 = vrot.lane.b32.xlu1 %v13285_v6, %s6373_s29  ;;  %4073 = vrot.lane.b32.xlu0 %v13286_v42, %s6373_s29 }
 0x447   : > { %v3482_v56 = vpop.permute.xlu1 %3481 }
 0x448   : > { %v3965_v23 = vsel %vm12593_vm3, %v3932_v24, %v3482_v56  ;;  %v3476_v51 = vpop.permute.xlu0 %3475 }
 0x449   : > { %v3959_v35 = vsel %vm12593_vm3, %v3926_v25, %v3476_v51  ;;  %4083 = vrot.lane.b32.xlu1 %v13287_v54, %s6373_s29  ;;  %4077 = vrot.lane.b32.xlu0 %v13288_v43, %s6373_s29  ;;  %v13294_v51 = vld [vmem:[#allocation119_spill] sm:$0xff] }
 0x44b   : > { %v9504_v59 = vpop.permute.xlu1 %3494 }
 0x44c   : > { %13289 = vst [vmem:[#allocation228_spill] sm:$0xff] %v9504_v59  ;;  %v3480_v0 = vpop.permute.xlu0 %3479 }
 0x44d   : > { %v3963_v45 = vsel %vm12593_vm3, %v3930_v7, %v3480_v0  ;;  %4087 = vrot.lane.b32.xlu1 %v13290_v60, %s6373_s29  ;;  %4081 = vrot.lane.b32.xlu0 %v13291_v52, %s6373_s29  ;;  %v13297_v7 = vld [vmem:[#allocation126_spill] sm:$0xff]  ;;  %vm12602_vm3 = vcmask 424960  }
 0x44f   : > { %v9511_v24 = vpop.permute.xlu1 %3498 }
 0x450   : > { %13292 = vst [vmem:[#allocation107_spill] sm:$0xff] %v9511_v24  ;;  %v9513_v25 = vpop.permute.xlu0 %3492 }
 0x451   : > { %13293 = vst [vmem:[#allocation67_spill] sm:$0xff] %v9513_v25  ;;  %4091 = vrot.lane.b32.xlu1 %v8650_v29, %s6373_s29  ;;  %4085 = vrot.lane.b32.xlu0 %v13294_v51, %s6373_s29  ;;  %v13300_v29 = vrot.slane %v13279_v5, 1  ;;  %v13301_v25 = vld [vmem:[#allocation222_spill] sm:$0xff] }
 0x453   : > { %v9519_v56 = vpop.permute.xlu1 %3502 }
 0x454   : > { %13295 = vst [vmem:[#allocation90_spill] sm:$0xff] %v9519_v56  ;;  %v9521_v59 = vpop.permute.xlu0 %3496 }
 0x455   : > { %13296 = vst [vmem:[#allocation47_spill] sm:$0xff] %v9521_v59  ;;  %4095 = vrot.lane.b32.xlu1 %v9042_v1, %s6373_s29  ;;  %4089 = vrot.lane.b32.xlu0 %v13297_v7, %s6373_s29  ;;  %v13392_v1 = vld [vmem:[#allocation139_spill] sm:$0xff] }
 0x457   : > { %v9527_v0 = vpop.permute.xlu1 %3506 }
 0x458   : > { %13298 = vst [vmem:[#allocation130_spill] sm:$0xff] %v9527_v0  ;;  %v9529_v24 = vpop.permute.xlu0 %3500 }
 0x459   : > { %13299 = vst [vmem:[#allocation73_spill] sm:$0xff] %v9529_v24  ;;  %4101 = vrot.lane.b32.xlu1 %v13300_v29, %s6375_s16  ;;  %4093 = vrot.lane.b32.xlu0 %v13301_v25, %s6373_s29  ;;  %v13306_v29 = vld [vmem:[#allocation78_spill] sm:$0xff] }
 0x45b   : > { %v9536_v56 = vpop.permute.xlu1 %3510 }
 0x45c   : > { %13302 = vst [vmem:[#allocation102_spill] sm:$0xff] %v9536_v56  ;;  %v9538_v59 = vpop.permute.xlu0 %3504 }
 0x45d   : > { %13303 = vst [vmem:[#allocation122_spill] sm:$0xff] %v9538_v59  ;;  %4105 = vrot.lane.b32.xlu1 %v13304_v20, %s6375_s16  ;;  %4097 = vrot.lane.b32.xlu0 %v9163_v8, %s6373_s29  ;;  %v13308_v59 = vld [vmem:[#allocation69_spill] sm:$0xff] }
 0x45e   : > { %v4173_v16 = vrot.slane %v13308_v59, 7 }
 0x45f   : > { %v3515_v0 = vpop.permute.xlu1 %3514 }
 0x460   : > { %v3990_v24 = vsel %vm12602_vm3, %v3957_v30, %v3515_v0  ;;  %v9545_v48 = vpop.permute.xlu0 %3508  ;;  %v13311_v30 = vld [vmem:[#allocation92_spill] sm:$0xff] }
 0x461   : > { %13305 = vst [vmem:[#allocation110_spill] sm:$0xff] %v9545_v48  ;;  %4109 = vrot.lane.b32.xlu1 %v13306_v29, %s6375_s16  ;;  %4103 = vrot.lane.b32.xlu0 %v13307_v36, %s6375_s16  ;;  %v13312_v48 = vld [vmem:[#allocation70_spill] sm:$0xff] }
 0x462   : > { %v4174_v62 = vor.u32 %v4173_v16, %v13312_v48  ;;  %v13317_v48 = vld [vmem:[#allocation177_spill] sm:$0xff] }
 0x463   : > { %v3519_v56 = vpop.permute.xlu1 %3518 }
 0x464   : > { %v3994_v21 = vsel %vm12602_vm3, %v3961_v9, %v3519_v56  ;;  %v9553_v28 = vpop.permute.xlu0 %3512  ;;  %v13314_v9 = vld [vmem:[#allocation143_spill] sm:$0xff] }
 0x465   : > { %13309 = vst [vmem:[#allocation200_spill] sm:$0xff] %v9553_v28  ;;  %4113 = vrot.lane.b32.xlu1 %v13310_v49, %s6375_s16  ;;  %4107 = vrot.lane.b32.xlu0 %v13311_v30, %s6375_s16  ;;  %v13316_v28 = vld [vmem:[#allocation62_spill] sm:$0xff] }
 0x466   : > { %v4176_v39 = vor.u32 %v4175_v58, %v13316_v28 }
 0x467   : > { %v3523_v0 = vpop.permute.xlu1 %3522 }
 0x468   : > { %v3998_v46 = vsel %vm12602_vm3, %v3965_v23, %v3523_v0  ;;  %v3517_v2 = vpop.permute.xlu0 %3516 }
 0x469   : > { %v3992_v59 = vsel %vm12602_vm3, %v3959_v35, %v3517_v2  ;;  %4203 = vrot.lane.b32.xlu1 %v4174_v62, %s6381_s22  ;;  %4111 = vrot.lane.b32.xlu0 %v13314_v9, %s6375_s16  ;;  %v13320_v62 = vld [vmem:[#allocation53_spill] sm:$0xff] }
 0x46b   : > { %v9566_v56 = vpop.permute.xlu1 %3529 }
 0x46c   : > { %13315 = vst [vmem:[#allocation202_spill] sm:$0xff] %v9566_v56  ;;  %v3521_v44 = vpop.permute.xlu0 %3520 }
 0x46d   : > { %v3996_v63 = vsel %vm12602_vm3, %v3963_v45, %v3521_v44  ;;  %4207 = vrot.lane.b32.xlu1 %v4176_v39, %s6381_s22  ;;  %4115 = vrot.lane.b32.xlu0 %v13317_v48, %s6375_s16  ;;  %v13323_v44 = vld [vmem:[#allocation64_spill] sm:$0xff]  ;;  %vm12603_vm3 = vcmask 457728  }
 0x46e   : > { %v13324_v39 = vld [vmem:[#allocation72_spill] sm:$0xff] }
 0x46f   : > { %v9573_v33 = vpop.permute.xlu1 %3533 }
 0x470   : > { %13318 = vst [vmem:[#allocation205_spill] sm:$0xff] %v9573_v33  ;;  %v9575_v2 = vpop.permute.xlu0 %3527 }
 0x471   : > { %13319 = vst [vmem:[#allocation119_spill] sm:$0xff] %v9575_v2  ;;  %4205 = vrot.lane.b32.xlu1 %v4173_v16, %s6381_s22  ;;  %4137 = vrot.lane.b32.xlu0 %v13320_v62, %s6377_s21  ;;  %v13329_v62 = vld [vmem:[#allocation55_spill] sm:$0xff] }
 0x473   : > { %v9580_v35 = vpop.permute.xlu1 %3537 }
 0x474   : > { %13321 = vst [vmem:[#allocation57_spill] sm:$0xff] %v9580_v35  ;;  %v9582_v28 = vpop.permute.xlu0 %3531 }
 0x475   : > { %13322 = vst [vmem:[#allocation78_spill] sm:$0xff] %v9582_v28  ;;  %4263 = vrot.lane.b32.xlu1 %v13323_v44, %s6380_s26  ;;  %4139 = vrot.lane.b32.xlu0 %v13324_v39, %s6377_s21 }
 0x477   : > { %v9588_v45 = vpop.permute.xlu1 %3541 }
 0x478   : > { %13325 = vst [vmem:[#allocation66_spill] sm:$0xff] %v9588_v45  ;;  %v9590_v23 = vpop.permute.xlu0 %3535  ;;  %v13330_v45 = vld [vmem:[#allocation94_spill] sm:$0xff] }
 0x479   : > { %13326 = vst [vmem:[#allocation69_spill] sm:$0xff] %v9590_v23  ;;  %4293 = vrot.lane.b32.xlu1 %v13275_v14, %s6372_s28  ;;  %4209 = vrot.lane.b32.xlu0 %v4175_v58, %s6381_s22  ;;  %v4177_v33 = vrot.slane %v13330_v45, 7  ;;  %v13332_v14 = vld [vmem:[#allocation95_spill] sm:$0xff] }
 0x47b   : > { %v9595_v16 = vpop.permute.xlu1 %3545 }
 0x47c   : > { %13327 = vst [vmem:[#allocation116_spill] sm:$0xff] %v9595_v16  ;;  %v9597_v0 = vpop.permute.xlu0 %3539  ;;  %v13333_v16 = vld [vmem:[#allocation86_spill] sm:$0xff] }
 0x47d   : > { %13328 = vst [vmem:[#allocation92_spill] sm:$0xff] %v9597_v0  ;;  %4325 = vrot.lane.b32.xlu1 %v13307_v36, %s6374_s14  ;;  %4265 = vrot.lane.b32.xlu0 %v13329_v62, %s6380_s26  ;;  %v4178_v36 = vor.u32 %v4177_v33, %v13332_v14  ;;  %v4179_v0 = vrot.slane %v13333_v16, 7  ;;  %v13336_v16 = vld [vmem:[#allocation75_spill] sm:$0xff] }
 0x47f   : > { %v3550_v35 = vpop.permute.xlu1 %3549 }
 0x480   : > { %v4023_v23 = vsel %vm12603_vm3, %v3990_v24, %v3550_v35  ;;  %v9605_v28 = vpop.permute.xlu0 %3543  ;;  %v13335_v35 = vld [vmem:[#allocation83_spill] sm:$0xff] }
 0x481   : > { %13331 = vst [vmem:[#allocation70_spill] sm:$0xff] %v9605_v28  ;;  %4357 = vrot.lane.b32.xlu1 %v13324_v39, %s6376_s17  ;;  %4295 = vrot.lane.b32.xlu0 %v13283_v11, %s6372_s28  ;;  %v4180_v39 = vor.u32 %v4179_v0, %v13335_v35 }
 0x483   : > { %v3554_v58 = vpop.permute.xlu1 %3553 }
 0x484   : > { %v4027_v56 = vsel %vm12603_vm3, %v3994_v21, %v3554_v58  ;;  %v9614_v2 = vpop.permute.xlu0 %3547 }
 0x485   : > { %13334 = vst [vmem:[#allocation63_spill] sm:$0xff] %v9614_v2  ;;  %4211 = vrot.lane.b32.xlu1 %v4178_v36, %s6381_s22  ;;  %4327 = vrot.lane.b32.xlu0 %v13304_v20, %s6374_s14  ;;  %v13341_v36 = vld [vmem:[#allocation97_spill] sm:$0xff] }
 0x487   : > { %v3558_v24 = vpop.permute.xlu1 %3557 }
 0x488   : > { %v4031_v45 = vsel %vm12603_vm3, %v3998_v46, %v3558_v24  ;;  %v3552_v11 = vpop.permute.xlu0 %3551 }
 0x489   : > { %v4025_v28 = vsel %vm12603_vm3, %v3992_v59, %v3552_v11  ;;  %4215 = vrot.lane.b32.xlu1 %v4180_v39, %s6381_s22  ;;  %4359 = vrot.lane.b32.xlu0 %v13336_v16, %s6376_s17  ;;  %v13340_v59 = vld [vmem:[#allocation87_spill] sm:$0xff]  ;;  %v13346_v39 = vld [vmem:[#allocation74_spill] sm:$0xff] }
 0x48b   : > { %v9625_v21 = vpop.permute.xlu1 %3561 }
 0x48c   : > { %13337 = vst [vmem:[#allocation143_spill] sm:$0xff] %v9625_v21  ;;  %v3556_v58 = vpop.permute.xlu0 %3555  ;;  %v13378_v21 = vld [vmem:[#allocation152_spill] sm:$0xff] }
 0x48d   : > { %v4029_v14 = vsel %vm12603_vm3, %v3996_v63, %v3556_v58  ;;  %4213 = vrot.lane.b32.xlu1 %v4177_v33, %s6381_s22  ;;  %4141 = vrot.lane.b32.xlu0 %v13336_v16, %s6377_s21  ;;  %v13348_v16 = vld [vmem:[#allocation168_spill] sm:$0xff]  ;;  %vm4032_vm3 = vcmask 490496  }
 0x48e   : > { %v4181_v58 = vrot.slane %v13348_v16, 7  ;;  %v13354_v16 = vld [vmem:[#allocation138_spill] sm:$0xff] }
 0x48f   : > { %v9631_v20 = vpop.permute.xlu1 %3565 }
 0x490   : > { %13338 = vst [vmem:[#allocation62_spill] sm:$0xff] %v9631_v20  ;;  %v9633_v46 = vpop.permute.xlu0 %3559 }
 0x491   : > { %13339 = vst [vmem:[#allocation177_spill] sm:$0xff] %v9633_v46  ;;  %4267 = vrot.lane.b32.xlu1 %v13340_v59, %s6380_s26  ;;  %4143 = vrot.lane.b32.xlu0 %v13341_v36, %s6377_s21 }
 0x493   : > { %v9639_v24 = vpop.permute.xlu1 %3569 }
 0x494   : > { %13342 = vst [vmem:[#allocation53_spill] sm:$0xff] %v9639_v24  ;;  %v9641_v35 = vpop.permute.xlu0 %3563 }
 0x495   : > { %13343 = vst [vmem:[#allocation64_spill] sm:$0xff] %v9641_v35  ;;  %4297 = vrot.lane.b32.xlu1 %v13278_v40, %s6372_s28  ;;  %4217 = vrot.lane.b32.xlu0 %v4179_v0, %s6381_s22  ;;  %v13350_v0 = vld [vmem:[#allocation156_spill] sm:$0xff] }
 0x497   : > { %v9646_v63 = vpop.permute.xlu1 %3573 }
 0x498   : > { %13344 = vst [vmem:[#allocation72_spill] sm:$0xff] %v9646_v63  ;;  %v9648_v33 = vpop.permute.xlu0 %3567  ;;  %v4182_v63 = vor.u32 %v4181_v58, %v13350_v0 }
 0x499   : > { %13345 = vst [vmem:[#allocation55_spill] sm:$0xff] %v9648_v33  ;;  %4329 = vrot.lane.b32.xlu1 %v13311_v30, %s6374_s14  ;;  %4269 = vrot.lane.b32.xlu0 %v13346_v39, %s6380_s26  ;;  %v13351_v30 = vld [vmem:[#allocation142_spill] sm:$0xff] }
 0x49a   : > { %v4183_v24 = vrot.slane %v13351_v30, 7 }
 0x49b   : > { %v9654_v11 = vpop.permute.xlu1 %3577 }
 0x49c   : > { %13347 = vst [vmem:[#allocation94_spill] sm:$0xff] %v9654_v11  ;;  %v9657_v2 = vpop.permute.xlu0 %3571 }
 0x49d   : > { %13349 = vst [vmem:[#allocation95_spill] sm:$0xff] %v9657_v2  ;;  %4361 = vrot.lane.b32.xlu1 %v13341_v36, %s6376_s17  ;;  %4299 = vrot.lane.b32.xlu0 %v13286_v42, %s6372_s28  ;;  %v4184_v2 = vor.u32 %v4183_v24, %v13354_v16 }
 0x49f   : > { %v3582_v40 = vpop.permute.xlu1 %3581 }
 0x4a0   : > { %v9666_v33 = vsel %vm4032_vm3, %v4023_v23, %v3582_v40  ;;  %v9668_v11 = vpop.permute.xlu0 %3575  ;;  %v13357_v23 = vld [vmem:[#allocation199_spill] sm:$0xff] }
 0x4a1   : > { %13352 = vst [vmem:[#allocation86_spill] sm:$0xff] %v9666_v33  ;;  %13353 = vst [vmem:[#allocation83_spill] sm:$0xff] %v9668_v11  ;;  %4219 = vrot.lane.b32.xlu1 %v4182_v63, %s6381_s22  ;;  %4331 = vrot.lane.b32.xlu0 %v13306_v29, %s6374_s14  ;;  %v13368_v33 = vld [vmem:[#allocation174_spill] sm:$0xff] }
 0x4a2   : > { %13396 = vst [vmem:[#allocation174_spill] sm:$0xff] %v9854_v19  ;;  %v9896_v19 = vld [vmem:[%s6507_s27 + $0x80] sm:$0xff] }
 0x4a3   : > { %v3586_v36 = vpop.permute.xlu1 %3585 }
 0x4a4   : > { %v9675_v42 = vsel %vm4032_vm3, %v4027_v56, %v3586_v36  ;;  %v9677_v20 = vpop.permute.xlu0 %3579  ;;  %v13361_v36 = vld [vmem:[#allocation140_spill] sm:$0xff] }
 0x4a5   : > { %13355 = vst [vmem:[#allocation75_spill] sm:$0xff] %v9675_v42  ;;  %13356 = vst [vmem:[#allocation87_spill] sm:$0xff] %v9677_v20  ;;  %4223 = vrot.lane.b32.xlu1 %v4184_v2, %s6381_s22  ;;  %4363 = vrot.lane.b32.xlu0 %v13357_v23, %s6376_s17 }
 0x4a7   : > { %v3590_v40 = vpop.permute.xlu1 %3589 }
 0x4a8   : > { %v9683_v0 = vsel %vm4032_vm3, %v4031_v45, %v3590_v40  ;;  %v3584_v63 = vpop.permute.xlu0 %3583  ;;  %v13362_v45 = vld [vmem:[#allocation198_spill] sm:$0xff] }
 0x4a9   : > { %13358 = vst [vmem:[#allocation97_spill] sm:$0xff] %v9683_v0  ;;  %v9686_v29 = vsel %vm4032_vm3, %v4025_v28, %v3584_v63  ;;  %4221 = vrot.lane.b32.xlu1 %v4181_v58, %s6381_s22  ;;  %4145 = vrot.lane.b32.xlu0 %v13357_v23, %s6377_s21  ;;  %v13364_v63 = vld [vmem:[#allocation105_spill] sm:$0xff] }
 0x4aa   : > { %13359 = vst [vmem:[#allocation74_spill] sm:$0xff] %v9686_v29 }
 0x4ab   : > { %v9691_v56 = vpop.permute.xlu1 %4067 }
 0x4ac   : > { %v3588_v30 = vpop.permute.xlu0 %3587 }
 0x4ad   : > { %v9694_v2 = vsel %vm4032_vm3, %v4029_v14, %v3588_v30  ;;  %4271 = vrot.lane.b32.xlu1 %v13361_v36, %s6380_s26  ;;  %4147 = vrot.lane.b32.xlu0 %v13362_v45, %s6377_s21  ;;  %v13363_v14 = vld [vmem:[#allocation108_spill] sm:$0xff]  ;;  %v4185_v30 = vrot.slane %v13364_v63, 7 }
 0x4ae   : > { %13360 = vst [vmem:[#allocation168_spill] sm:$0xff] %v9694_v2 }
 0x4af   : > { %v9700_v16 = vpop.permute.xlu1 %4071 }
 0x4b0   : > { %v9702_v28 = vpop.permute.xlu0 %4065 }
 0x4b1   : > { %4301 = vrot.lane.b32.xlu1 %v13282_v27, %s6372_s28  ;;  %4225 = vrot.lane.b32.xlu0 %v4183_v24, %s6381_s22  ;;  %v13365_v24 = vld [vmem:[#allocation106_spill] sm:$0xff] }
 0x4b2   : > { %v4186_v2 = vor.u32 %v4185_v30, %v13365_v24  ;;  %13394 = vst [vmem:[#allocation106_spill] sm:$0xff] %v9846_v47  ;;  %v9868_v47 = vld [vmem:[%s6507_s27 + $0x58] sm:$0xff] }
 0x4b3   : > { %v9707_v58 = vpop.permute.xlu1 %4075 }
 0x4b4   : > { %v9709_v23 = vpop.permute.xlu0 %4069 }
 0x4b5   : > { %4333 = vrot.lane.b32.xlu1 %v13314_v9, %s6374_s14  ;;  %4273 = vrot.lane.b32.xlu0 %v13363_v14, %s6380_s26  ;;  %v13366_v9 = vld [vmem:[#allocation176_spill] sm:$0xff] }
 0x4b6   : > { %v4187_v42 = vrot.slane %v13366_v9, 7 }
 0x4b7   : > { %v9715_v40 = vpop.permute.xlu1 %4079 }
 0x4b8   : > { %v9718_v0 = vpop.permute.xlu0 %4073 }
 0x4b9   : > { %4365 = vrot.lane.b32.xlu1 %v13362_v45, %s6376_s17  ;;  %4303 = vrot.lane.b32.xlu0 %v13288_v43, %s6372_s28  ;;  %v4188_v45 = vor.u32 %v4187_v42, %v13368_v33  ;;  %v13369_v43 = vld [vmem:[#allocation204_spill] sm:$0xff]  ;;  %v13374_v33 = vld [vmem:[#allocation98_spill] sm:$0xff] }
 0x4ba   : > { %13397 = vst [vmem:[#allocation204_spill] sm:$0xff] %v9860_v15 }
 0x4bb   : > { %v9724_v27 = vpop.permute.xlu1 %4083 }
 0x4bc   : > { %v9728_v29 = vpop.permute.xlu0 %4077 }
 0x4bd   : > { %4227 = vrot.lane.b32.xlu1 %v4186_v2, %s6381_s22  ;;  %4335 = vrot.lane.b32.xlu0 %v13310_v49, %s6374_s14 }
 0x4bf   : > { %v9733_v63 = vpop.permute.xlu1 %4087 }
 0x4c0   : > { %13367 = vst [vmem:[#allocation156_spill] sm:$0xff] %v9733_v63  ;;  %v9736_v20 = vpop.permute.xlu0 %4081  ;;  %v13383_v63 = vld [vmem:[#allocation159_spill] sm:$0xff] }
 0x4c1   : > { %4231 = vrot.lane.b32.xlu1 %v4188_v45, %s6381_s22  ;;  %4367 = vrot.lane.b32.xlu0 %v13369_v43, %s6376_s17  ;;  %v13375_v45 = vld [vmem:[#allocation112_spill] sm:$0xff]  ;;  %13406 = vst [vmem:[#allocation159_spill] sm:$0xff] %v9896_v19 }
 0x4c2   : > { %13399 = vst [vmem:[#allocation112_spill] sm:$0xff] %v9868_v47  ;;  %v13403_v47 = vld [vmem:[#allocation131_spill] sm:$0xff]  ;;  %v9947_v19 = vld [vmem:[%s6507_s27 + $0xb8] sm:$0xff] }
 0x4c3   : > { %v9741_v24 = vpop.permute.xlu1 %4091 }
 0x4c4   : > { %13370 = vst [vmem:[#allocation142_spill] sm:$0xff] %v9741_v24  ;;  %v9743_v9 = vpop.permute.xlu0 %4085 }
 0x4c5   : > { %13371 = vst [vmem:[#allocation138_spill] sm:$0xff] %v9743_v9  ;;  %4229 = vrot.lane.b32.xlu1 %v4185_v30, %s6381_s22  ;;  %4149 = vrot.lane.b32.xlu0 %v13369_v43, %s6377_s21  ;;  %v13384_v9 = vld [vmem:[#allocation160_spill] sm:$0xff] }
 0x4c7   : > { %v9748_v49 = vpop.permute.xlu1 %4095 }
 0x4c8   : > { %13372 = vst [vmem:[#allocation199_spill] sm:$0xff] %v9748_v49  ;;  %v9750_v2 = vpop.permute.xlu0 %4089 }
 0x4c9   : > { %13373 = vst [vmem:[#allocation140_spill] sm:$0xff] %v9750_v2  ;;  %4275 = vrot.lane.b32.xlu1 %v13374_v33, %s6380_s26  ;;  %4151 = vrot.lane.b32.xlu0 %v13375_v45, %s6377_s21  ;;  %v13380_v2 = vld [vmem:[#allocation189_spill] sm:$0xff] }
 0x4cb   : > { %v9756_v11 = vpop.permute.xlu1 %4101 }
 0x4cc   : > { %v9758_v35 = vpop.permute.xlu0 %4093 }
 0x4cd   : > { %13376 = vst [vmem:[#allocation198_spill] sm:$0xff] %v9758_v35  ;;  %4305 = vrot.lane.b32.xlu1 %v13285_v6, %s6372_s28  ;;  %4233 = vrot.lane.b32.xlu0 %v4187_v42, %s6381_s22 }
 0x4cf   : > { %v9763_v30 = vpop.permute.xlu1 %4105 }
 0x4d0   : > { %v9765_v43 = vpop.permute.xlu0 %4097 }
 0x4d1   : > { %13377 = vst [vmem:[#allocation108_spill] sm:$0xff] %v9765_v43  ;;  %4337 = vrot.lane.b32.xlu1 %v13317_v48, %s6374_s14  ;;  %4277 = vrot.lane.b32.xlu0 %v13378_v21, %s6380_s26  ;;  %v13379_v43 = vld [vmem:[#allocation165_spill] sm:$0xff] }
 0x4d3   : > { %v9771_v46 = vpop.permute.xlu1 %4109 }
 0x4d4   : > { %v9773_v49 = vpop.permute.xlu0 %4103 }
 0x4d5   : > { %4369 = vrot.lane.b32.xlu1 %v13375_v45, %s6376_s17  ;;  %4307 = vrot.lane.b32.xlu0 %v13291_v52, %s6372_s28  ;;  %v13381_v45 = vld [vmem:[#allocation208_spill] sm:$0xff] }
 0x4d7   : > { %v9779_v6 = vpop.permute.xlu1 %4113 }
 0x4d8   : > { %v9781_v42 = vpop.permute.xlu0 %4107 }
 0x4d9   : > { %4117 = vrot.lane.b32.xlu1 %v13379_v43, %s6375_s16  ;;  %4339 = vrot.lane.b32.xlu0 %v13379_v43, %s6374_s14 }
 0x4db   : > { %v9787_v48 = vpop.permute.xlu1 %4203 }
 0x4dc   : > { %v9789_v35 = vpop.permute.xlu0 %4111 }
 0x4dd   : > { %4119 = vrot.lane.b32.xlu1 %v13380_v2, %s6375_s16  ;;  %4371 = vrot.lane.b32.xlu0 %v13381_v45, %s6376_s17 }
 0x4df   : > { %v9795_v52 = vpop.permute.xlu1 %4207 }
 0x4e0   : > { %v9797_v24 = vpop.permute.xlu0 %4115 }
 0x4e1   : > { %13382 = vst [vmem:[#allocation105_spill] sm:$0xff] %v9797_v24  ;;  %4239 = vrot.lane.b32.xlu1 %v13383_v63, %s6381_s22  ;;  %4235 = vrot.lane.b32.xlu0 %v13384_v9, %s6381_s22  ;;  %v13387_v63 = vld [vmem:[#allocation104_spill] sm:$0xff]  ;;  %v13388_v9 = vld [vmem:[#allocation118_spill] sm:$0xff]  ;;  %v13426_v24 = vld [vmem:[#allocation229_spill] sm:$0xff] }
 0x4e3   : > { %v9803_v43 = vpop.permute.xlu1 %4205 }
 0x4e4   : > { %v9805_v12 = vpop.permute.xlu0 %4137 }
 0x4e5   : > { %4237 = vrot.lane.b32.xlu1 %v13386_v57, %s6381_s22  ;;  %4153 = vrot.lane.b32.xlu0 %v13381_v45, %s6377_s21  ;;  %v13389_v57 = vld [vmem:[#allocation123_spill] sm:$0xff] }
 0x4e6   : > { %v13390_v45 = vrot.slane %v13389_v57, 7  ;;  %v3596_v57 = vsel %vm388_vm1, %v12969_v37, %v13393_v3  ;;  %v9864_v3 = vld [vmem:[%s6507_s27 + $0x50] sm:$0xff]  ;;  %v9880_v37 = vld [vmem:[%s6507_s27 + $0x68] sm:$0xff] }
 0x4e7   : > { %v9812_v17 = vpop.permute.xlu1 %4263  ;;  %13398 = vst [vmem:[#allocation98_spill] sm:$0xff] %v9864_v3  ;;  %13401 = vst [vmem:[#allocation165_spill] sm:$0xff] %v9880_v37  ;;  %v9884_v3 = vld [vmem:[%s6507_s27 + $0x70] sm:$0xff]  ;;  %v13407_v37 = vld [vmem:[#allocation150_spill] sm:$0xff] }
 0x4e8   : > { %v9814_v4 = vpop.permute.xlu0 %4139  ;;  %13402 = vst [vmem:[#allocation189_spill] sm:$0xff] %v9884_v3  ;;  %v13409_v3 = vld [vmem:[#allocation173_spill] sm:$0xff] }
 0x4e9   : > { %4279 = vrot.lane.b32.xlu1 %v13387_v63, %s6380_s26  ;;  %4155 = vrot.lane.b32.xlu0 %v13388_v9, %s6377_s21 }
 0x4eb   : > { %v9820_v8 = vpop.permute.xlu1 %4293 }
 0x4ec   : > { %v9822_v55 = vpop.permute.xlu0 %4209 }
 0x4ed   : > { %4309 = vrot.lane.b32.xlu1 %v13287_v54, %s6372_s28  ;;  %4241 = vrot.lane.b32.xlu0 %v13390_v45, %s6381_s22  ;;  %v3594_v54 = vsel %vm388_vm1, %v12955_v13, %v13392_v1  ;;  %v13404_v13 = vld [vmem:[#allocation175_spill] sm:$0xff] }
 0x4ee   : > { %v3622_v15 = vsel %vm12675_vm8, %v3594_v54, %v13403_v47  ;;  %v3598_v47 = vsel %vm388_vm1, %v13247_v31, %v13409_v3  ;;  %v9923_v3 = vld [vmem:[%s6507_s27 + $0x98] sm:$0xff]  ;;  %13420 = vst [vmem:[#allocation175_spill] sm:$0xff] %v9947_v19 }
 0x4ef   : > { %v9829_v18 = vpop.permute.xlu1 %4325  ;;  %13413 = vst [vmem:[#allocation118_spill] sm:$0xff] %v9923_v3  ;;  %v13423_v3 = vld [vmem:[#allocation182_spill] sm:$0xff] }
 0x4f0   : > { %v9831_v25 = vpop.permute.xlu0 %4265 }
 0x4f1   : > { %4341 = vrot.lane.b32.xlu1 %v13380_v2, %s6374_s14  ;;  %4281 = vrot.lane.b32.xlu0 %v13391_v34, %s6380_s26  ;;  %v9850_v2 = vld [vmem:[%s6507_s27 + $0x38] sm:$0xff]  ;;  %v9901_v34 = vsel %vm2117_vm9, %v3622_v15, %v13407_v37  ;;  %v3600_v15 = vsel %vm388_vm1, %v12974_v38, %v13412_v10  ;;  %v13416_v38 = vld [vmem:[#allocation178_spill] sm:$0xff] }
 0x4f2   : > { %13395 = vst [vmem:[#allocation176_spill] sm:$0xff] %v9850_v2  ;;  %v9872_v2 = vld [vmem:[%s6507_s27 + $0x60] sm:$0xff]  ;;  %13408 = vst [vmem:[#allocation160_spill] sm:$0xff] %v9901_v34  ;;  %v4498_v37 = vsel %vm2150_vm10, %v9901_v34, %v9787_v48  ;;  %v13418_v48 = vld [vmem:[#allocation183_spill] sm:$0xff] }
 0x4f3   : > { %v9843_v45 = vpop.permute.xlu1 %4357  ;;  %13400 = vst [vmem:[#allocation152_spill] sm:$0xff] %v9872_v2  ;;  %v3624_v2 = vsel %vm12675_vm8, %v3596_v57, %v13404_v13  ;;  %v9907_v57 = vld [vmem:[%s6507_s27 + $0x88] sm:$0xff]  ;;  %v9943_v13 = vld [vmem:[%s6507_s27 + $0xb0] sm:$0xff]  ;;  %v13425_v34 = vld [vmem:[#allocation188_spill] sm:$0xff] }
 0x4f4   : > { %v9857_v1 = vpop.permute.xlu0 %4295  ;;  %13410 = vst [vmem:[#allocation113_spill] sm:$0xff] %v9907_v57  ;;  %v9927_v57 = vld [vmem:[%s6507_s27 + $0xa0] sm:$0xff]  ;;  %v9936_v10 = vsel %vm2117_vm9, %v3624_v2, %v13416_v38  ;;  %13419 = vst [vmem:[#allocation131_spill] sm:$0xff] %v9943_v13  ;;  %v3628_v13 = vsel %vm12675_vm8, %v3600_v15, %v13425_v34 }
 0x4f5   : > { %4373 = vrot.lane.b32.xlu1 %v13388_v9, %s6376_s17  ;;  %4311 = vrot.lane.b32.xlu0 %v13294_v51, %s6372_s28  ;;  %v9892_v9 = vld [vmem:[%s6507_s27 + $0x78] sm:$0xff]  ;;  %v9911_v51 = vld [vmem:[%s6507_s27 + $0x90] sm:$0xff]  ;;  %13414 = vst [vmem:[#allocation123_spill] sm:$0xff] %v9927_v57  ;;  %13417 = vst [vmem:[#allocation184_spill] sm:$0xff] %v9936_v10  ;;  %v4502_v2 = vsel %vm2150_vm10, %v9936_v10, %v9795_v52 }
 0x4f6   : > { %13405 = vst [vmem:[#allocation208_spill] sm:$0xff] %v9892_v9  ;;  %13411 = vst [vmem:[#allocation104_spill] sm:$0xff] %v9911_v51  ;;  %v9931_v9 = vld [vmem:[%s6507_s27 + $0xa8] sm:$0xff]  ;;  %v9956_v38 = vld [vmem:[%s6507_s27 + $0xc0] sm:$0xff]  ;;  %v4559_v51 = vsel %vm2183_vm11, %v4498_v37, %v13426_v24 }
 0x4f7   : > { %v4212_v54 = vpop.permute.xlu1 %4211  ;;  %13415 = vst [vmem:[#allocation139_spill] sm:$0xff] %v9931_v9  ;;  %v13421_v9 = vld [vmem:[#allocation155_spill] sm:$0xff]  ;;  %13422 = vst [vmem:[#allocation150_spill] sm:$0xff] %v9956_v38  ;;  %v13429_v10 = vld [vmem:[#allocation88_spill] sm:$0xff] }
 0x4f8   : > { %v9920_v31 = vpop.permute.xlu0 %4327  ;;  %v3626_v57 = vsel %vm12675_vm8, %v3598_v47, %v13421_v9  ;;  %v9968_v9 = vld [vmem:[%s6507_s27 + $0xc8] sm:$0xff]  ;;  %v13428_v52 = vld [vmem:[#allocation187_spill] sm:$0xff]  ;;  %v13431_v24 = vld [vmem:[#allocation84_spill] sm:$0xff] }
 0x4f9   : > { %4121 = vrot.lane.b32.xlu1 %v13418_v48, %s6375_s16  ;;  %4343 = vrot.lane.b32.xlu0 %v13418_v48, %s6374_s14  ;;  %v9961_v7 = vsel %vm2117_vm9, %v3626_v57, %v13423_v3  ;;  %13427 = vst [vmem:[#allocation195_spill] sm:$0xff] %v9968_v9  ;;  %v3602_v48 = vsel %vm388_vm1, %v13260_v41, %v13428_v52  ;;  %v9982_v37 = vld [vmem:[%s6507_s27 + $0xd0] sm:$0xff]  ;;  %v13432_v52 = vld [vmem:[#allocation234_spill] sm:$0xff]  ;;  %v13440_v9 = vld [vmem:[#allocation232_spill] sm:$0xff] }
 0x4fa   : > { %13424 = vst [vmem:[#allocation173_spill] sm:$0xff] %v9961_v7  ;;  %v3606_v57 = vsel %vm388_vm1, %v13265_v22, %v13429_v10  ;;  %v4506_v34 = vsel %vm2150_vm10, %v9961_v7, %v4212_v54  ;;  %13430 = vst [vmem:[#allocation178_spill] sm:$0xff] %v9982_v37  ;;  %v3604_v47 = vsel %vm388_vm1, %v13246_v50, %v13431_v24  ;;  %v13433_v10 = vld [vmem:[#allocation128_spill] sm:$0xff]  ;;  %v13434_v54 = vld [vmem:[#allocation129_spill] sm:$0xff] }
 0x4fb   : > { %v4216_v19 = vpop.permute.xlu1 %4215  ;;  %v4390_v41 = vsel %vm388_vm1, %v13279_v5, %v9702_v28  ;;  %v4562_v22 = vsel %vm2183_vm11, %v4502_v2, %v13432_v52  ;;  %v13435_v7 = vld [vmem:[#allocation203_spill] sm:$0xff]  ;;  %v13436_v37 = vld [vmem:[#allocation192_spill] sm:$0xff]  ;;  %v13438_v28 = vld [vmem:[#allocation246_spill] sm:$0xff] }
 0x4fc   : > { %v9979_v15 = vpop.permute.xlu0 %4359  ;;  %v3608_v3 = vsel %vm388_vm1, %v13259_v61, %v13435_v7  ;;  %v10002_v50 = vsel %vm2117_vm9, %v3628_v13, %v13436_v37  ;;  %v4426_v5 = vsel %vm12675_vm8, %v4390_v41, %v9756_v11  ;;  %v4606_v24 = vsel %vm12676_vm13, %v4559_v51, %v13438_v28  ;;  %v10009_v2 = vld [vmem:[%s6507_s27 + $0xd8] sm:$0xff]  ;;  %v13441_v37 = vld [vmem:[#allocation101_spill] sm:$0xff] }
 0x4fd   : > { %4123 = vrot.lane.b32.xlu1 %v13433_v10, %s6375_s16  ;;  %4375 = vrot.lane.b32.xlu0 %v13434_v54, %s6376_s17  ;;  %13437 = vst [vmem:[#allocation183_spill] sm:$0xff] %v10002_v50  ;;  %13439 = vst [vmem:[#allocation155_spill] sm:$0xff] %v10009_v2  ;;  %v4462_v38 = vsel %vm2117_vm9, %v4426_v5, %v9805_v12  ;;  %v4565_v61 = vsel %vm2183_vm11, %v4506_v34, %v13440_v9  ;;  %v13442_v41 = vld [vmem:[#allocation181_spill] sm:$0xff]  ;;  %v13444_v2 = vld [vmem:[#allocation243_spill] sm:$0xff] }
 0x4fe   : > { %v4510_v7 = vsel %vm2150_vm10, %v10002_v50, %v4216_v19  ;;  %v3632_v11 = vsel %vm12675_vm8, %v3604_v47, %v13441_v37  ;;  %v3630_v51 = vsel %vm12675_vm8, %v3602_v48, %v13442_v41  ;;  %v13443_v28 = vld [vmem:[#allocation193_spill] sm:$0xff]  ;;  %v4609_v12 = vsel %vm12676_vm13, %v4562_v22, %v13444_v2  ;;  %v13445_v19 = vld [vmem:[#allocation158_spill] sm:$0xff]  ;;  %v13450_v22 = vld [vmem:[#allocation163_spill] sm:$0xff] }
 0x4ff   : > { %v10018_v13 = vpop.permute.xlu1 %4213  ;;  %v3634_v52 = vsel %vm12675_vm8, %v3606_v57, %v13443_v28  ;;  %v10029_v10 = vld [vmem:[%s6507_s27 + $0xe0] sm:$0xff]  ;;  %v10034_v9 = vsel %vm2117_vm9, %v3632_v11, %v13445_v19  ;;  %v13447_v50 = vld [vmem:[#allocation114_spill] sm:$0xff]  ;;  %v4392_v28 = vsel %vm388_vm1, %v13323_v44, %v9691_v56  ;;  %v4500_v11 = vsel %vm2150_vm10, %v4462_v38, %v9803_v43  ;;  %v13451_v41 = vld [vmem:[#allocation248_spill] sm:$0xff] }
 0x500   : > { %v4142_v5 = vpop.permute.xlu0 %4141  ;;  %13446 = vst [vmem:[#allocation182_spill] sm:$0xff] %v10034_v9  ;;  %v3636_v47 = vsel %vm12675_vm8, %v3608_v3, %v13447_v50  ;;  %v13448_v37 = vld [vmem:[#allocation261_spill] sm:$0xff]  ;;  %v4612_v3 = vsel %vm12676_vm13, %v4565_v61, %v13451_v41  ;;  %v13452_v50 = vld [vmem:[#allocation235_spill] sm:$0xff]  ;;  %v13453_v19 = vld [vmem:[#allocation120_spill] sm:$0xff]  ;;  %v4561_v44 = vsel %vm2183_vm11, %v4500_v11, %v9812_v17 }
 0x501   : > { %v4654_v48 = vsel %vm2249_vm12, %v4606_v24, %v13448_v37  ;;  %v13449_v57 = vld [vmem:[#allocation161_spill] sm:$0xff]  ;;  %4243 = vrot.lane.b32.xlu0 %v13450_v22, %s6381_s22  ;;  %v4568_v24 = vsel %vm2183_vm11, %v4510_v7, %v13452_v50  ;;  %v4428_v22 = vsel %vm12675_vm8, %v4392_v28, %v9773_v49  ;;  %v13455_v34 = vld [vmem:[#allocation266_spill] sm:$0xff]  ;;  %v4608_v49 = vsel %vm12676_vm13, %v4561_v44, %v9820_v8  ;;  %v13463_v8 = vld [vmem:[#allocation99_spill] sm:$0xff] }
 0x502   : > { %4247 = vrot.lane.b32.xlu1 %v13449_v57, %s6381_s22  ;;  %v10055_v57 = vsel %vm2117_vm9, %v3636_v47, %v13453_v19  ;;  %v4657_v37 = vsel %vm2249_vm12, %v4609_v12, %v13455_v34  ;;  %v13456_v43 = vld [vmem:[#allocation61_spill] sm:$0xff]  ;;  %v13458_v61 = vld [vmem:[#allocation162_spill] sm:$0xff]  ;;  %v4464_v47 = vsel %vm2117_vm9, %v4428_v22, %v9814_v4  ;;  %v4656_v11 = vsel %vm2249_vm12, %v4608_v49, %v9829_v18  ;;  %v13461_v4 = vld [vmem:[#allocation151_spill] sm:$0xff] }
 0x503   : > { %13454 = vst [vmem:[#allocation188_spill] sm:$0xff] %v10055_v57  ;;  %v4268_v56 = vpop.permute.xlu1 %4267  ;;  %v10065_v38 = vsel %vm2117_vm9, %v3630_v51, %v13456_v43  ;;  %v4702_v7 = vsel %vm2282_vm14, %v4654_v48, %v13458_v61  ;;  %v10076_v12 = vld [vmem:[%s6507_s27 + $0xe8] sm:$0xff]  ;;  %v13459_v51 = vld [vmem:[#allocation263_spill] sm:$0xff]  ;;  %v13460_v43 = vld [vmem:[#allocation245_spill] sm:$0xff]  ;;  %v13462_v22 = vrot.slane %v13461_v4, 7  ;;  %v10092_v44 = vsel %vm2117_vm9, %v3634_v52, %v13463_v8 }
 0x504   : > { %13457 = vst [vmem:[#allocation187_spill] sm:$0xff] %v10065_v38  ;;  %v10073_v28 = vpop.permute.xlu0 %4143  ;;  %v4660_v19 = vsel %vm2249_vm12, %v4612_v3, %v13459_v51  ;;  %v4615_v48 = vsel %vm12676_vm13, %v4568_v24, %v13460_v43  ;;  %13464 = vst [vmem:[#allocation88_spill] sm:$0xff] %v10092_v44  ;;  %v4705_v18 = vsel %vm2282_vm14, %v4657_v37, %v9050_v32  ;;  %v13480_v17 = vld [vmem:[#allocation238_spill] sm:$0xff] }
 0x505   : > { %4157 = vrot.lane.b32.xlu0 %v13434_v54, %s6377_s21  ;;  %v4504_v3 = vsel %vm2150_vm10, %v4464_v47, %v9822_v55  ;;  %v4704_v24 = vsel %vm2282_vm14, %v4656_v11, %v9843_v45  ;;  %v4396_v49 = vsel %vm388_vm1, %v13340_v59, %v9700_v16  ;;  %v4394_v54 = vsel %vm388_vm1, %v13329_v62, %v9709_v23  ;;  %v13465_v47 = vld [vmem:[#allocation268_spill] sm:$0xff]  ;;  %v13466_v23 = vld [vmem:[#allocation91_spill] sm:$0xff] }
 0x506   : > { %4245 = vrot.lane.b32.xlu1 %v13462_v22, %s6381_s22  ;;  %v4564_v52 = vsel %vm2183_vm11, %v4504_v3, %v9831_v25  ;;  %v4752_v22 = vshll.u32 %v4702_v7, 16  ;;  %v4430_v37 = vsel %vm12675_vm8, %v4394_v54, %v9763_v30  ;;  %v4708_v45 = vsel %vm2282_vm14, %v4660_v19, %v9033_v53  ;;  %v13467_v30 = vld [vmem:[#allocation207_spill] sm:$0xff] }
 0x507   : > { %v4298_v4 = vpop.permute.xlu1 %4297  ;;  %v4611_v55 = vsel %vm12676_vm13, %v4564_v52, %v9857_v1  ;;  %v4663_v59 = vsel %vm2249_vm12, %v4615_v48, %v13465_v47  ;;  %v4756_v11 = vshll.u32 %v4704_v24, 16  ;;  %v4466_v25 = vsel %vm2117_vm9, %v4430_v37, %v4142_v5  ;;  %v13468_v52 = vld [vmem:[#allocation127_spill] sm:$0xff] }
 0x508   : > { %v4218_v16 = vpop.permute.xlu0 %4217  ;;  %v4659_v62 = vsel %vm2249_vm12, %v4611_v55, %v9920_v31  ;;  %v4762_v1 = vshll.u32 %v4705_v18, 16  ;;  %v4400_v19 = vsel %vm388_vm1, %v13361_v36, %v9707_v58  ;;  %v4404_v48 = vsel %vm388_vm1, %v13374_v33, %v9715_v40 }
 0x509   : > { %4159 = vrot.lane.b32.xlu0 %v13467_v30, %s6377_s21  ;;  %v4398_v31 = vsel %vm388_vm1, %v13346_v39, %v9718_v0  ;;  %v4707_v5 = vsel %vm2282_vm14, %v4659_v62, %v9979_v15  ;;  %v10137_v8 = vsel %vm388_vm1, %v13387_v63, %v9724_v27  ;;  %v10141_v3 = vsel %vm2282_vm14, %v4663_v59, %v9058_v26 }
 0x50a   : > { %4283 = vrot.lane.b32.xlu1 %v13466_v23, %s6380_s26  ;;  %v4754_v58 = vrot.slane %v4752_v22, 1  ;;  %v4772_v24 = vshll.u32 %v4708_v45, 16  ;;  %v4402_v40 = vsel %vm388_vm1, %v13363_v14, %v9728_v29  ;;  %v10149_v39 = vsel %vm388_vm1, %v13378_v21, %v9736_v20 }
 0x50b   : > { %v4330_v36 = vpop.permute.xlu1 %4329  ;;  %v4508_v0 = vsel %vm2150_vm10, %v4466_v25, %v10018_v13  ;;  %v4750_v33 = vshrl.u32 %v4702_v7, 16  ;;  %v4758_v63 = vrot.slane %v4756_v11, 1  ;;  %v4766_v15 = vshll.u32 %v4707_v5, 16  ;;  %v13470_v11 = vld [vmem:[#allocation105_spill] sm:$0xff] }
 0x50c   : > { %v4270_v27 = vpop.permute.xlu0 %4269  ;;  %v4567_v54 = vsel %vm2183_vm11, %v4508_v0, %v4268_v56  ;;  %v13469_v29 = vrot.slane %v13468_v52, 7  ;;  %v4764_v14 = vrot.slane %v4762_v1, 1  ;;  %v10161_v21 = vsel %vm12675_vm8, %v4398_v31, %v9771_v46  ;;  %v13471_v1 = vld [vmem:[#allocation128_spill] sm:$0xff]  ;;  %v10198_v0 = vld [vmem:[%s6507_s27] sm:$0xff]  ;;  %v10208_v52 = vld [vmem:[%s6507_s27 + $0x10] sm:$0xff] }
 0x50d   : > { %v10165_v20 = vsel %vm12675_vm8, %v4402_v40, %v9779_v6  ;;  %v4614_v13 = vsel %vm12676_vm13, %v4567_v54, %v4298_v4  ;;  %v4782_v56 = vshll.u32 %v10141_v3, 16  ;;  %v4755_v22 = vor.u32 %v4754_v58, %v4750_v33 }
 0x50e   : > { %4313 = vrot.lane.b32.xlu1 %v13290_v60, %s6372_s28  ;;  %4249 = vrot.lane.b32.xlu0 %v13469_v29, %s6381_s22  ;;  %v4662_v7 = vsel %vm2249_vm12, %v4614_v13, %v4330_v36  ;;  %v4774_v37 = vrot.slane %v4772_v24, 1  ;;  %v4760_v55 = vshrl.u32 %v4705_v18, 16  ;;  %v4432_v59 = vsel %vm12675_vm8, %v4396_v49, %v9781_v42  ;;  %v13472_v18 = vld [vmem:[#allocation121_spill] sm:$0xff]  ;;  %v13473_v13 = vld [vmem:[#allocation136_spill] sm:$0xff] }
 0x50f   : > { %v4362_v60 = vpop.permute.xlu1 %4361  ;;  %v10174_v46 = vsel %vm12675_vm8, %v4400_v19, %v9789_v35  ;;  %v10178_v6 = vsel %vm12675_vm8, %v4404_v48, %v13470_v11  ;;  %v4768_v25 = vrot.slane %v4766_v15, 1  ;;  %v10186_v42 = vsel %vm1511_vm6, %v4755_v22, %v4758_v63  ;;  %v1000_v19 = vld [vmem:[%s12171_s3] sm:$0x3]  ;;  %v10204_v15 = vld [vmem:[%s6507_s27 + $0x8] sm:$0xff] }
 0x510   : > { %v4710_v4 = vsel %vm2282_vm14, %v4662_v7, %v4362_v60  ;;  %v4300_v62 = vpop.permute.xlu0 %4299  ;;  %v4770_v35 = vshrl.u32 %v4708_v45, 16  ;;  %v4765_v49 = vor.u32 %v4764_v14, %v4760_v55  ;;  %v4468_v48 = vsel %vm2117_vm9, %v4432_v59, %v10073_v28  ;;  %6172 = vmatprep.subr.msk.bf16.mxu1 %vm437_vm0, %v1000_v19  ;;  %v13474_v7 = vld [vmem:[#allocation126_spill] sm:$0xff]  ;;  %v6302_v22 = vld [vmem:[%s6507_s27 + $0x20] sm:$0xff] }
 0x511   : > { %v4776_v31 = vshll.u32 %v4710_v4, 16  ;;  %v4784_v5 = vrot.slane %v4782_v56, 1  ;;  %v1057_v36 = vsel %vm437_vm0, %v1000_v19, 0  ;;  %v4512_v58 = vsel %vm2150_vm10, %v4468_v48, %v4218_v16  ;;  %v13475_v11 = vld [vmem:[#allocation250_spill] sm:$0xff] }
 0x512   : > { %4345 = vrot.lane.b32.xlu1 %v13471_v1, %s6374_s14  ;;  %4285 = vrot.lane.b32.xlu0 %v13472_v18, %s6380_s26  ;;  %v4775_v24 = vor.u32 %v4774_v37, %v4770_v35  ;;  %v4780_v40 = vshrl.u32 %v10141_v3, 16  ;;  %v667_v28 = vrot.slane %v10198_v0, 7  ;;  %v668_v54 = vrot.slane %v10204_v15, 7  ;;  %v10212_v3 = vld [vmem:[%s6507_s27 + $0x18] sm:$0xff]  ;;  %v13476_v1 = vld [vmem:[#allocation265_spill] sm:$0xff]  ;;  %v6303_v19 = vld [vmem:[%s6507_s27 + $0x28] sm:$0xff] }
 0x513   : > { %v4220_v45 = vpop.permute.xlu1 %4219  ;;  %6054 = vmatpush3.bf16.msra.mxu1 %v1057_v36  ;;  %v670_v16 = vrot.slane %v10208_v52, 7  ;;  %v671_v29 = vrot.slane %v10212_v3, 7  ;;  %v4570_v14 = vsel %vm2183_vm11, %v4512_v58, %v4270_v27  ;;  %v10223_v60 = vsel %vm1511_vm6, %v4765_v49, %v4768_v25 }
 0x514   : > { %v4514_v33 = vsel %vm2150_vm10, %v10065_v38, %v4220_v45  ;;  %v4332_v63 = vpop.permute.xlu0 %4331  ;;  %v673_v37 = vrot.slane %v6302_v22, 7  ;;  %v4778_v55 = vrot.slane %v4776_v31, 1  ;;  %v4617_v59 = vsel %vm12676_vm13, %v4570_v14, %v4300_v62  ;;  %v13477_v45 = vld [vmem:[#allocation133_spill] sm:$0xff] }
 0x515   : > { %v4571_v56 = vsel %vm2183_vm11, %v4514_v33, %v13473_v13  ;;  %v10229_v4 = vor.u32 %v4784_v5, %v4780_v40  ;;  %v674_v48 = vrot.slane %v6303_v19, 7  ;;  %v764_v36 = vrot.slane %v10198_v0, 1  ;;  %v13478_v40 = vld [vmem:[#allocation194_spill] sm:$0xff] }
 0x516   : > { %4377 = vrot.lane.b32.xlu1 %v13467_v30, %s6376_s17  ;;  %4315 = vrot.lane.b32.xlu0 %v13474_v7, %s6372_s28  ;;  %v4618_v27 = vsel %vm12676_vm13, %v4571_v56, %v13475_v11  ;;  %v765_v25 = vrot.slane %v10204_v15, 1  ;;  %v669_v62 = vsel %vm666_vm2, %v667_v28, %v668_v54  ;;  %v672_v58 = vsel %vm666_vm2, %v670_v16, %v671_v29  ;;  %v13479_v7 = vld [vmem:[#allocation157_spill] sm:$0xff] }
 0x517   : > { %v4666_v35 = vsel %vm2249_vm12, %v4618_v27, %v13476_v1  ;;  %v4224_v30 = vpop.permute.xlu1 %4223  ;;  %v747_v5 = vsel %vm666_vm2, %v10198_v0, %v667_v28  ;;  %v748_v33 = vsel %vm666_vm2, %v10208_v52, %v670_v16  ;;  %v749_v14 = vsel %vm666_vm2, %v6302_v22, %v673_v37 }
 0x518   : > { %v4518_v49 = vsel %vm2150_vm10, %v10034_v9, %v4224_v30  ;;  %v4364_v31 = vpop.permute.xlu0 %4363  ;;  %v767_v56 = vrot.slane %v10208_v52, 1  ;;  %v768_v54 = vrot.slane %v10212_v3, 1  ;;  %v10253_v29 = vsel %vm2282_vm14, %v4666_v35, %v13479_v7 }
 0x519   : > { %v4665_v28 = vsel %vm2249_vm12, %v4617_v59, %v4332_v63  ;;  %v770_v27 = vrot.slane %v6302_v22, 1  ;;  %v771_v30 = vrot.slane %v6303_v19, 1  ;;  %v4574_v1 = vsel %vm2183_vm11, %v4518_v49, %v13480_v17  ;;  %v13481_v49 = vld [vmem:[#allocation231_spill] sm:$0xff] }
 0x51a   : > { %4379 = vrot.lane.b32.xlu1 %v13477_v45, %s6376_s17  ;;  %4347 = vrot.lane.b32.xlu0 %v13478_v40, %s6374_s14  ;;  %v10259_v16 = vsel %vm1511_vm6, %v4775_v24, %v4778_v55  ;;  %v675_v13 = vsel %vm666_vm2, %v673_v37, %v674_v48  ;;  %v766_v9 = vsel %vm763_vm4, %v764_v36, %v765_v25  ;;  %v13482_v24 = vld [vmem:[#allocation96_spill] sm:$0xff] }
 0x51b   : > { %v4222_v11 = vpop.permute.xlu1 %4221  ;;  %v10264_v38 = vsel %vm2282_vm14, %v4665_v28, %v4364_v31  ;;  %v844_v63 = vsel %vm763_vm4, %v765_v25, %v10204_v15  ;;  %v860_v59 = vmax.f32 %v747_v5, %v10198_v0  ;;  %v861_v7 = vmax.f32 %v669_v62, %v10204_v15  ;;  %v13483_v25 = vld [vmem:[#allocation247_spill] sm:$0xff] }
 0x51c   : > { %v4146_v35 = vpop.permute.xlu0 %4145  ;;  %v769_v48 = vsel %vm763_vm4, %v767_v56, %v768_v54  ;;  %v845_v36 = vsel %vm763_vm4, %v768_v54, %v10212_v3  ;;  %v4621_v0 = vsel %vm12676_vm13, %v4574_v1, %v13483_v25  ;;  %v772_v15 = vsel %vm763_vm4, %v770_v27, %v771_v30  ;;  %v13484_v25 = vld [vmem:[#allocation270_spill] sm:$0xff] }
 0x51d   : > { %v862_v31 = vmax.f32 %v748_v33, %v10208_v52  ;;  %v863_v62 = vmax.f32 %v672_v58, %v10212_v3  ;;  %v846_v28 = vsel %vm763_vm4, %v771_v30, %v6303_v19  ;;  %v892_v37 = vmax.f32 %v860_v59, %v766_v9  ;;  %v13485_v3 = vld [vmem:[#allocation80_spill] sm:$0xff] }
 0x51e   : > { %4163 = vrot.lane.b32.xlu1 %v13481_v49, %s6377_s21  ;;  %4127 = vrot.lane.b32.xlu0 %v13482_v24, %s6375_s16  ;;  %v864_v49 = vmax.f32 %v749_v14, %v6302_v22  ;;  %v865_v24 = vmax.f32 %v675_v13, %v6303_v19  ;;  %v4470_v56 = vsel %vm2117_vm9, %v10161_v21, %v4146_v35  ;;  %v13486_v13 = vld [vmem:[#allocation106_spill] sm:$0xff]  ;;  %v13487_v33 = vld [vmem:[#allocation176_spill] sm:$0xff] }
 0x51f   : > { %v4272_v5 = vpop.permute.xlu1 %4271  ;;  %v893_v54 = vmax.f32 %v861_v7, %v844_v63  ;;  %v894_v17 = vmax.f32 %v862_v31, %v769_v48  ;;  %v895_v1 = vmax.f32 %v863_v62, %v845_v36  ;;  %v4669_v27 = vsel %vm2249_vm12, %v4621_v0, %v13484_v25 }
 0x520   : > { %v10287_v55 = vpop.permute.xlu0 %4147  ;;  %v896_v9 = vmax.f32 %v864_v49, %v772_v15  ;;  %v773_v22 = vrot.slane %v13486_v13, 1  ;;  %v897_v21 = vmax.f32 %v865_v24, %v846_v28  ;;  %v13488_v14 = vrot.slane %v13487_v33, 7  ;;  %v13491_v28 = vld [vmem:[#allocation166_spill] sm:$0xff] }
 0x521   : > { %v924_v19 = vmax.f32 %v892_v37, %v894_v17  ;;  %v925_v58 = vmax.f32 %v893_v54, %v895_v1  ;;  %v13489_v7 = vrot.slane %v13486_v13, 7  ;;  %v4516_v35 = vsel %vm2150_vm10, %v4470_v56, %v4222_v11  ;;  %v13492_v11 = vld [vmem:[#allocation167_spill] sm:$0xff]  ;;  %v13493_v54 = vld [vmem:[#allocation174_spill] sm:$0xff] }
 0x522   : > { %4129 = vrot.lane.b32.xlu1 %v13485_v3, %s6375_s16  ;;  %4125 = vrot.lane.b32.xlu0 %v13478_v40, %s6375_s16  ;;  %v774_v48 = vrot.slane %v13487_v33, 1  ;;  %v4573_v37 = vsel %vm2183_vm11, %v4516_v35, %v4272_v5  ;;  %v926_v15 = vmax.f32 %v894_v17, %v896_v9  ;;  %v927_v49 = vmax.f32 %v895_v1, %v897_v21 }
 0x523   : > { %v678_v30 = vsel %vm666_vm2, %v13489_v7, %v13488_v14  ;;  %v4302_v63 = vpop.permute.xlu1 %4301  ;;  %v13490_v59 = vmov %v13489_v7  ;;  %v954_v31 = vmax.f32 %v924_v19, %v896_v9  ;;  %v955_v62 = vmax.f32 %v925_v58, %v897_v21 }
 0x524   : > { %v750_v40 = vsel %vm666_vm2, %v13486_v13, %v13490_v59  ;;  %v867_v36 = vmax.f32 %v678_v30, %v13487_v33  ;;  %v10310_v0 = vpop.permute.xlu0 %4225  ;;  %v984_v24 = vpack.c.bf16 %v925_v58, %v924_v19  ;;  %v775_v56 = vsel %vm763_vm4, %v773_v22, %v774_v48  ;;  %v13494_v30 = vld [vmem:[#allocation204_spill] sm:$0xff] }
 0x525   : > { %v776_v14 = vrot.slane %v13493_v54, 1  ;;  %v985_v7 = vpack.c.bf16 %v955_v62, %v954_v31  ;;  %v847_v5 = vsel %vm763_vm4, %v774_v48, %v13487_v33  ;;  %v866_v17 = vmax.f32 %v750_v40, %v13486_v13  ;;  %v13498_v13 = vld [vmem:[#allocation278_spill] sm:$0xff] }
 0x526   : > { %4255 = vrot.lane.b32.xlu1 %v13491_v28, %s6381_s22  ;;  %4251 = vrot.lane.b32.xlu0 %v13492_v11, %s6381_s22  ;;  %v13495_v35 = vrot.slane %v13494_v30, 7  ;;  %v13496_v59 = vrot.slane %v13493_v54, 7  ;;  %v899_v1 = vmax.f32 %v867_v36, %v847_v5  ;;  %v777_v58 = vrot.slane %v13494_v30, 1  ;;  %v13499_v11 = vld [vmem:[#allocation153_spill] sm:$0xff] }
 0x527   : > { %v4334_v52 = vpop.permute.xlu1 %4333  ;;  %6055 = vmatprep.mubr.msk.bf16.mxu1 %vm388_vm1, %v984_v24  ;;  %v10335_v40 = vsel %vm2282_vm14, %v4669_v27, %v13498_v13  ;;  %v4620_v48 = vsel %vm12676_vm13, %v4573_v37, %v4302_v63  ;;  %v898_v62 = vmax.f32 %v866_v17, %v775_v56  ;;  %v13500_v24 = vrot.slane %v13499_v11, 7  ;;  %v13501_v27 = vld [vmem:[#allocation112_spill] sm:$0xff] }
 0x528   : > { %v681_v28 = vsel %vm666_vm2, %v13496_v59, %v13495_v35  ;;  %v13497_v22 = vmov %v13496_v59  ;;  %v4274_v31 = vpop.permute.xlu0 %4273  ;;  %6056 = vmatmul.mubr.msk.bf16.vlgmr.msra.gmra.mrb[0].mxu1 %vm388_vm1, %v985_v7  ;;  %v957_v5 = vmax.f32 %v927_v49, %v899_v1  ;;  %v778_v35 = vsel %vm763_vm4, %v776_v14, %v777_v58 }
 0x529   : > { %v751_v19 = vsel %vm666_vm2, %v13493_v54, %v13497_v22  ;;  %v869_v33 = vmax.f32 %v681_v28, %v13494_v30  ;;  %v13502_v59 = vrot.slane %v13501_v27, 7  ;;  %v13503_v28 = vld [vmem:[#allocation98_spill] sm:$0xff]  ;;  %v956_v7 = vmax.f32 %v926_v15, %v898_v62 }
 0x52a   : > { %v868_v36 = vmax.f32 %v751_v19, %v13493_v54  ;;  %4253 = vrot.lane.b32.xlu1 %v13500_v24, %s6381_s22  ;;  %4161 = vrot.lane.b32.xlu0 %v13477_v45, %s6377_s21  ;;  %v13504_v63 = vrot.slane %v13503_v28, 7  ;;  %v779_v56 = vrot.slane %v13503_v28, 1  ;;  %v848_v54 = vsel %vm763_vm4, %v777_v58, %v13494_v30 }
 0x52b   : > { %v928_v22 = vmax.f32 %v896_v9, %v898_v62  ;;  %v4366_v19 = vpop.permute.xlu1 %4365  ;;  %v10356_v45 = vmax.f32 %v869_v33, %v848_v54  ;;  %v929_v49 = vmax.f32 %v897_v21, %v899_v1  ;;  %v780_v24 = vrot.slane %v13501_v27, 1  ;;  %v13506_v33 = vld [vmem:[#allocation154_spill] sm:$0xff] }
 0x52c   : > { %v684_v37 = vsel %vm666_vm2, %v13504_v63, %v13502_v59  ;;  %v10354_v17 = vmax.f32 %v868_v36, %v778_v35  ;;  %v13505_v14 = vmov %v13504_v63  ;;  %v4668_v59 = vsel %vm2249_vm12, %v4620_v48, %v4334_v52  ;;  %v4304_v15 = vpop.permute.xlu0 %4303  ;;  %v13508_v36 = vld [vmem:[#allocation226_spill] sm:$0xff] }
 0x52d   : > { %v752_v11 = vsel %vm666_vm2, %v13503_v28, %v13505_v14  ;;  %v986_v63 = vpack.c.bf16 %v957_v5, %v956_v7  ;;  %v4716_v9 = vsel %vm2282_vm14, %v4668_v59, %v4366_v19  ;;  %v13507_v21 = vrot.slane %v13506_v33, 7  ;;  %v13511_v59 = vld [vmem:[#allocation152_spill] sm:$0xff]  ;;  %v13514_v33 = vld [vmem:[#allocation6_spill] sm:$0xff] }
 0x52e   : > { %v958_v30 = vmax.f32 %v928_v22, %v10354_v17  ;;  %v870_v58 = vmax.f32 %v752_v11, %v13503_v28  ;;  %4165 = vrot.lane.b32.xlu0 %v13508_v36, %s6377_s21  ;;  %v4802_v35 = vshll.u32 %v10335_v40, 16  ;;  %v959_v54 = vmax.f32 %v929_v49, %v10356_v45 }
 0x52f   : > { %4257 = vrot.lane.b32.xlu1 %v13507_v21, %s6381_s22  ;;  %v781_v52 = vsel %vm763_vm4, %v779_v56, %v780_v24  ;;  %6059 = vmatprep.mubr.msk.bf16.mxu1 %vm388_vm1, %v986_v63  ;;  %v849_v48 = vsel %vm763_vm4, %v780_v24, %v13501_v27  ;;  %v871_v5 = vmax.f32 %v684_v37, %v13501_v27  ;;  %v4228_v19 = vpop.permute.xlu1 %4227  ;;  %v13509_v56 = vld [vmem:[#allocation165_spill] sm:$0xff]  ;;  %v13512_v63 = vrot.slane %v13511_v59, 7 }
 0x530   : > { %v10379_v28 = vmax.f32 %v870_v58, %v781_v52  ;;  %v930_v7 = vmax.f32 %v898_v62, %v10354_v17  ;;  %v4472_v22 = vsel %vm2117_vm9, %v10174_v46, %v10287_v55  ;;  %v987_v14 = vpack.c.bf16 %v959_v54, %v958_v30  ;;  %v4336_v37 = vpop.permute.xlu0 %4335  ;;  %v13515_v54 = vld [vmem:[#allocation275_spill] sm:$0xff]  ;;  %v13516_v52 = vld [vmem:[#allocation149_spill] sm:$0xff] }
 0x531   : > { %v931_v49 = vmax.f32 %v899_v1, %v10356_v45  ;;  %v13510_v11 = vrot.slane %v13509_v56, 7  ;;  %v4522_v27 = vsel %vm2150_vm10, %v10092_v44, %v4228_v19  ;;  %v10393_v58 = vmax.f32 %v871_v5, %v849_v48  ;;  %v13517_v5 = vld [vmem:[#allocation252_spill] sm:$0xff] }
 0x532   : > { %v960_v62 = vmax.f32 %v930_v7, %v10379_v28  ;;  %v13513_v46 = vmov %v13512_v63  ;;  %v4520_v1 = vsel %vm2150_vm10, %v4472_v22, %v10310_v0  ;;  %v4796_v30 = vshll.u32 %v4716_v9, 16  ;;  %4289 = vrot.lane.b32.xlu0 %v13516_v52, %s6380_s26  ;;  %6060 = vmatmul.mubr.msk.bf16.gmra.mrb[4].mxu1 %vm388_vm1, %v987_v14 }
 0x533   : > { %v687_v24 = vsel %vm666_vm2, %v13512_v63, %v13510_v11  ;;  %v753_v55 = vsel %vm666_vm2, %v13511_v59, %v13513_v46  ;;  %v4577_v21 = vsel %vm2183_vm11, %v4522_v27, %v13514_v33  ;;  %4319 = vrot.lane.b32.xlu1 %v13515_v54, %s6372_s28  ;;  %v782_v48 = vrot.slane %v13511_v59, 1  ;;  %v4232_v27 = vpop.permute.xlu1 %4231 }
 0x534   : > { %v4624_v7 = vsel %vm12676_vm13, %v4577_v21, %v13517_v5  ;;  %v961_v19 = vmax.f32 %v931_v49, %v10393_v58  ;;  %v783_v0 = vrot.slane %v13509_v56, 1  ;;  %v872_v9 = vmax.f32 %v753_v55, %v13511_v59  ;;  %v4368_v21 = vpop.permute.xlu0 %4367 }
 0x535   : > { %v13518_v22 = vshll.u32 %v10264_v38, 16  ;;  %v4576_v63 = vsel %vm2183_vm11, %v4520_v1, %v4274_v31  ;;  %v13519_v46 = vshll.u32 %v10253_v29, 16  ;;  %v873_v33 = vmax.f32 %v687_v24, %v13509_v56  ;;  %v13520_v31 = vld [vmem:[#allocation267_spill] sm:$0xff] }
 0x536   : > { %v4526_v14 = vsel %vm2150_vm10, %v10055_v57, %v4232_v27  ;;  %v988_v49 = vpack.c.bf16 %v961_v19, %v960_v62  ;;  %v784_v5 = vsel %vm763_vm4, %v782_v48, %v783_v0  ;;  %v932_v59 = vmax.f32 %v10354_v17, %v10379_v28  ;;  %v13522_v24 = vld [vmem:[#allocation111_spill] sm:$0xff] }
 0x537   : > { %v4788_v11 = vrot.slane %v13518_v22, 1  ;;  %v4794_v54 = vrot.slane %v13519_v46, 1  ;;  %v4798_v38 = vrot.slane %v4796_v30, 1  ;;  %v4623_v55 = vsel %vm12676_vm13, %v4576_v63, %v4304_v15  ;;  %v13521_v22 = vld [vmem:[#allocation222_spill] sm:$0xff]  ;;  %4287 = vrot.lane.b32.xlu0 %v13522_v24, %s6380_s26  ;;  %v13523_v46 = vld [vmem:[#allocation240_spill] sm:$0xff] }
 0x538   : > { %v4672_v1 = vsel %vm2249_vm12, %v4624_v7, %v13520_v31  ;;  %4317 = vrot.lane.b32.xlu1 %v13521_v22, %s6372_s28  ;;  %v4804_v27 = vrot.slane %v4802_v35, 1  ;;  %v4580_v62 = vsel %vm2183_vm11, %v4526_v14, %v13523_v46  ;;  %6063 = vmatprep.mubr.msk.bf16.mxu1 %vm388_vm1, %v988_v49  ;;  %v850_v17 = vsel %vm763_vm4, %v783_v0, %v13509_v56  ;;  %v4230_v7 = vpop.permute.xlu1 %4229  ;;  %v6267_v49 = vld [vmem:[%s12175_s7] sm:$0xff]   ;;  %v13525_v56 = vld [vmem:[#allocation276_spill] sm:$0xff]  ;;  %v4150_v0 = vpop.permute.xlu0 %4149  ;;  %v10466_v22 = vld [vmem:[%s6507_s27 + $0xf0] sm:$0xff] }
 0x539   : > { %v10438_v15 = vmax.f32 %v872_v9, %v784_v5  ;;  %v933_v30 = vmax.f32 %v10356_v45, %v10393_v58  ;;  %v4671_v48 = vsel %vm2249_vm12, %v4623_v55, %v4336_v37  ;;  %v13524_v19 = vshrl.u32 %v10253_v29, 16  ;;  %v13526_v37 = vld [vmem:[#allocation208_spill] sm:$0xff]  ;;  %v13528_v55 = vld [vmem:[#allocation189_spill] sm:$0xff]  ;;  %6125 = vmatprep.subr.bf16.mxu1 %v6267_v49 }
 0x53a   : > { %v4800_v63 = vshrl.u32 %v10335_v40, 16  ;;  %v10446_v14 = vmax.f32 %v873_v33, %v850_v17  ;;  %v10453_v5 = vsel %vm2282_vm14, %v4672_v1, %v13525_v56  ;;  %v13527_v9 = vrot.slane %v13526_v37, 7  ;;  %v13531_v1 = vld [vmem:[#allocation249_spill] sm:$0xff]  ;;  %6126 = vmatpush3.bf16.msra.mxu1 %v6267_v49  ;;  %v13535_v56 = vld [vmem:[#allocation310_spill] sm:$0xff] }
 0x53b   : > { %v4795_v35 = vor.u32 %v4794_v54, %v13524_v19  ;;  %v962_v45 = vmax.f32 %v932_v59, %v10438_v15  ;;  %v13529_v29 = vrot.slane %v13528_v55, 7  ;;  %v4627_v19 = vsel %vm12676_vm13, %v4580_v62, %v13531_v1  ;;  %v13532_v46 = vld [vmem:[#allocation301_spill] sm:$0xff] }
 0x53c   : > { %v10472_v59 = vsel %vm2282_vm14, %v4671_v48, %v4368_v21  ;;  %4321 = vrot.lane.b32.xlu1 %v13532_v46, %s6372_s28  ;;  %v10485_v17 = vor.u32 %v4804_v27, %v4800_v63  ;;  %v963_v62 = vmax.f32 %v933_v30, %v10446_v14  ;;  %v785_v21 = vrot.slane %v13528_v55, 1  ;;  %v4276_v48 = vpop.permute.xlu1 %4275 }
 0x53d   : > { %v690_v54 = vsel %vm666_vm2, %v13529_v29, %v13527_v9  ;;  %v13530_v40 = vmov %v13529_v29  ;;  %v13533_v9 = vld [vmem:[#allocation103_spill] sm:$0xff]  ;;  %v10480_v29 = vsel %vm1511_vm6, %v10229_v4, %v4788_v11  ;;  %v786_v1 = vrot.slane %v13526_v37, 1 }
 0x53e   : > { %v754_v33 = vsel %vm666_vm2, %v13528_v55, %v13530_v40  ;;  %4291 = vrot.lane.b32.xlu0 %v13533_v9, %s6380_s26  ;;  %v10483_v40 = vsel %vm1511_vm6, %v4795_v35, %v4798_v38  ;;  %v875_v4 = vmax.f32 %v690_v54, %v13526_v37  ;;  %v13534_v11 = vld [vmem:[#allocation271_spill] sm:$0xff]  ;;  %v4152_v35 = vpop.permute.xlu0 %4151  ;;  %v989_v30 = vpack.c.bf16 %v963_v62, %v962_v45  ;;  %s5942_s26 = sshll.u32 %s6463_s13, 12 }
 0x53f   : > { %v874_v57 = vmax.f32 %v754_v33, %v13528_v55  ;;  %v4675_v38 = vsel %vm2249_vm12, %v4627_v19, %v13534_v11  ;;  %v934_v63 = vmax.f32 %v10379_v28, %v10438_v15  ;;  %v4474_v46 = vsel %vm2117_vm9, %v10165_v20, %v4150_v0  ;;  %v13536_v55 = vld [vmem:[#allocation290_spill] sm:$0xff]  ;;  %v13537_v33 = vld [vmem:[#allocation159_spill] sm:$0xff]  ;;  %v13538_v20 = vld [vmem:[#allocation113_spill] sm:$0xff] }
 0x540   : > { %4383 = vrot.lane.b32.xlu1 %v13535_v56, %s6376_s17  ;;  %v787_v49 = vsel %vm763_vm4, %v785_v21, %v786_v1  ;;  %v935_v54 = vmax.f32 %v10393_v58, %v10446_v14  ;;  %v788_v19 = vrot.slane %v13537_v33, 1  ;;  %6064 = vmatmul.mubr.msk.bf16.gmra.mrb[8].mxu1 %vm388_vm1, %v989_v30  ;;  %v851_v28 = vsel %vm763_vm4, %v786_v1, %v13526_v37  ;;  %v6268_v58 = vld [vmem:[%s12175_s7 + $0x8] sm:$0xff]   ;;  %v4306_v30 = vpop.permute.xlu1 %4305 }
 0x541   : > { %v906_v45 = vmax.f32 %v874_v57, %v787_v49  ;;  %v13539_v0 = vrot.slane %v13538_v20, 7  ;;  %v13540_v62 = vrot.slane %v13537_v33, 7  ;;  %v10523_v31 = vmax.f32 %v875_v4, %v851_v28  ;;  %v13542_v49 = vld [vmem:[#allocation280_spill] sm:$0xff]  ;;  %6127 = vmatprep.subr.bf16.mxu1 %v6268_v58  ;;  %v6269_v4 = vld [vmem:[%s12175_s7 + $0x10] sm:$0xff]  }
 0x542   : > { %4351 = vrot.lane.b32.xlu0 %v13536_v55, %s6374_s14  ;;  %v789_v57 = vrot.slane %v13538_v20, 1  ;;  %v13543_v28 = vld [vmem:[#allocation287_spill] sm:$0xff]  ;;  %6128 = vmatpush3.bf16.msra.mxu1 %v6268_v58  ;;  %v6270_v58 = vld [vmem:[%s12175_s7 + $0x18] sm:$0xff]  }
 0x543   : > { %v693_v27 = vsel %vm666_vm2, %v13540_v62, %v13539_v0  ;;  %v13541_v11 = vmov %v13540_v62  ;;  %v10530_v0 = vsel %vm2282_vm14, %v4675_v38, %v13542_v49  ;;  %v4524_v62 = vsel %vm2150_vm10, %v4474_v46, %v4230_v7  ;;  %v13544_v7 = vld [vmem:[#allocation118_spill] sm:$0xff]  ;;  %6129 = vmatprep.subr.bf16.mxu1 %v6269_v4 }
 0x544   : > { %v755_v21 = vsel %vm666_vm2, %v13537_v33, %v13541_v11  ;;  %v877_v1 = vmax.f32 %v693_v27, %v13538_v20  ;;  %v4234_v11 = vpop.permute.xlu0 %4233  ;;  %v964_v44 = vmax.f32 %v934_v63, %v906_v45  ;;  %v936_v13 = vmax.f32 %v10438_v15, %v906_v45  ;;  %4353 = vrot.lane.b32.xlu1 %v13543_v28, %s6374_s14  ;;  %v13546_v63 = vld [vmem:[#allocation104_spill] sm:$0xff] }
 0x545   : > { %v876_v37 = vmax.f32 %v755_v21, %v13537_v33  ;;  %v965_v38 = vmax.f32 %v935_v54, %v10523_v31  ;;  %v790_v27 = vsel %vm763_vm4, %v788_v19, %v789_v57  ;;  %v13545_v46 = vrot.slane %v13544_v7, 7  ;;  %v4338_v19 = vpop.permute.xlu1 %4337 }
 0x546   : > { %4349 = vrot.lane.b32.xlu0 %v13485_v3, %s6374_s14  ;;  %v13547_v33 = vrot.slane %v13546_v63, 7  ;;  %v791_v21 = vrot.slane %v13546_v63, 1  ;;  %v852_v49 = vsel %vm763_vm4, %v789_v57, %v13538_v20  ;;  %v937_v26 = vmax.f32 %v10446_v14, %v10523_v31  ;;  %6130 = vmatpush3.bf16.msra.mxu1 %v6269_v4 }
 0x547   : > { %v908_v25 = vmax.f32 %v876_v37, %v790_v27  ;;  %v990_v53 = vpack.c.bf16 %v965_v38, %v964_v44  ;;  %v10557_v47 = vmax.f32 %v877_v1, %v852_v49  ;;  %v4579_v20 = vsel %vm2183_vm11, %v4524_v62, %v4276_v48  ;;  %v13549_v1 = vld [vmem:[#allocation123_spill] sm:$0xff]  ;;  %6131 = vmatprep.subr.bf16.mxu1 %v6270_v58 }
 0x548   : > { %v696_v15 = vsel %vm666_vm2, %v13547_v33, %v13545_v46  ;;  %v13548_v3 = vmov %v13547_v33  ;;  %v792_v46 = vrot.slane %v13544_v7, 1  ;;  %v4278_v57 = vpop.permute.xlu0 %4277  ;;  %v4476_v44 = vsel %vm2117_vm9, %v10178_v6, %v4152_v35  ;;  %4167 = vrot.lane.b32.xlu1 %v13535_v56, %s6377_s21  ;;  %v13550_v56 = vld [vmem:[#allocation139_spill] sm:$0xff] }
 0x549   : > { %v756_v54 = vsel %vm666_vm2, %v13546_v63, %v13548_v3  ;;  %v966_v37 = vmax.f32 %v936_v13, %v908_v25  ;;  %v879_v14 = vmax.f32 %v696_v15, %v13544_v7  ;;  %v938_v27 = vmax.f32 %v906_v45, %v908_v25  ;;  %6067 = vmatprep.mubr.msk.bf16.mxu1 %vm388_vm1, %v990_v53  ;;  %v4370_v38 = vpop.permute.xlu1 %4369 }
 0x54a   : > { %v878_v33 = vmax.f32 %v756_v54, %v13546_v63  ;;  %4131 = vrot.lane.b32.xlu0 %v13536_v55, %s6375_s16  ;;  %v967_v48 = vmax.f32 %v937_v26, %v10557_v47  ;;  %v793_v13 = vsel %vm763_vm4, %v791_v21, %v792_v46  ;;  %v794_v49 = vrot.slane %v13549_v1, 1  ;;  %6132 = vmatpush3.bf16.msra.mxu1 %v6270_v58  ;;  %v13559_v58 = vld [vmem:[#allocation5_spill] sm:$0xff] }
 0x54b   : > { %v853_v45 = vsel %vm763_vm4, %v792_v46, %v13544_v7  ;;  %v939_v6 = vmax.f32 %v10523_v31, %v10557_v47  ;;  %v13551_v35 = vrot.slane %v13550_v56, 7  ;;  %v13552_v55 = vrot.slane %v13549_v1, 7 }
 0x54c   : > { %v10578_v62 = vmax.f32 %v878_v33, %v793_v13  ;;  %v991_v63 = vpack.c.bf16 %v967_v48, %v966_v37  ;;  %v10587_v15 = vmax.f32 %v879_v14, %v853_v45  ;;  %v795_v21 = vrot.slane %v13550_v56, 1  ;;  %v4308_v3 = vpop.permute.xlu0 %4307  ;;  %v6271_v37 = vld [vmem:[%s12175_s7 + $0x20] sm:$0xff]   ;;  %4133 = vrot.lane.b32.xlu1 %v13543_v28, %s6375_s16 }
 0x54d   : > { %v699_v26 = vsel %vm666_vm2, %v13552_v55, %v13551_v35  ;;  %v13553_v53 = vmov %v13552_v55  ;;  %v4626_v31 = vsel %vm12676_vm13, %v4579_v20, %v4306_v30  ;;  %v4528_v14 = vsel %vm2150_vm10, %v4476_v44, %v4234_v11  ;;  %v10618_v44 = vpop.permute.xlu1 %4117  ;;  %6133 = vmatprep.subr.bf16.mxu1 %v6271_v37 }
 0x54e   : > { %v757_v7 = vsel %vm666_vm2, %v13549_v1, %v13553_v53  ;;  %v968_v54 = vmax.f32 %v938_v27, %v10578_v62  ;;  %v881_v33 = vmax.f32 %v699_v26, %v13550_v56  ;;  %4381 = vrot.lane.b32.xlu0 %v13508_v36, %s6376_s17  ;;  %v4822_v30 = vshll.u32 %v10530_v0, 16  ;;  %6068 = vmatmul.mubr.msk.bf16.gmra.mrb[12].mxu1 %vm388_vm1, %v991_v63  ;;  %v6272_v53 = vld [vmem:[%s12175_s7 + $0x28] sm:$0xff]  }
 0x54f   : > { %v880_v46 = vmax.f32 %v757_v7, %v13549_v1  ;;  %v969_v4 = vmax.f32 %v939_v6, %v10587_v15  ;;  %v796_v20 = vsel %vm763_vm4, %v794_v49, %v795_v21  ;;  %v854_v27 = vsel %vm763_vm4, %v795_v21, %v13550_v56  ;;  %v13554_v49 = vld [vmem:[#allocation175_spill] sm:$0xff]  ;;  %v13560_v21 = vld [vmem:[#allocation302_spill] sm:$0xff]  ;;  %6134 = vmatpush3.bf16.msra.mxu1 %v6271_v37 }
 0x550   : > { %v940_v11 = vmax.f32 %v908_v25, %v10578_v62  ;;  %v941_v28 = vmax.f32 %v10557_v47, %v10587_v15  ;;  %v4674_v36 = vsel %vm2249_vm12, %v4626_v31, %v4338_v19  ;;  %v10620_v1 = vmax.f32 %v881_v33, %v854_v27  ;;  %v13556_v6 = vld [vmem:[#allocation131_spill] sm:$0xff]  ;;  %v4340_v25 = vpop.permute.xlu0 %4339  ;;  %4171 = vrot.lane.b32.xlu1 %v13559_v58, %s6377_s21 }
 0x551   : > { %v10612_v48 = vmax.f32 %v880_v46, %v796_v20  ;;  %v992_v13 = vpack.c.bf16 %v969_v4, %v968_v54  ;;  %v13555_v45 = vrot.slane %v13554_v49, 7  ;;  %v13557_v35 = vrot.slane %v13556_v6, 7  ;;  %6135 = vmatprep.subr.bf16.mxu1 %v6272_v53 }
 0x552   : > { %v4582_v55 = vsel %vm2183_vm11, %v4528_v14, %v4278_v57  ;;  %v797_v63 = vrot.slane %v13556_v6, 1  ;;  %v10638_v7 = vsel %vm2282_vm14, %v4674_v36, %v4370_v38  ;;  %4385 = vrot.lane.b32.xlu0 %v13560_v21, %s6376_s17  ;;  %v971_v31 = vmax.f32 %v941_v28, %v10620_v1  ;;  %v10654_v14 = vpop.permute.xlu1 %4119  ;;  %v13563_v36 = vld [vmem:[#allocation150_spill] sm:$0xff] }
 0x553   : > { %v702_v56 = vsel %vm666_vm2, %v13557_v35, %v13555_v45  ;;  %v970_v26 = vmax.f32 %v940_v11, %v10612_v48  ;;  %v13558_v47 = vmov %v13557_v35  ;;  %v4629_v57 = vsel %vm12676_vm13, %v4582_v55, %v4308_v3  ;;  %6071 = vmatprep.mubr.msk.bf16.mxu1 %vm388_vm1, %v992_v13  ;;  %v13561_v11 = vld [vmem:[#allocation195_spill] sm:$0xff]  ;;  %6136 = vmatpush3.bf16.msra.mxu1 %v6272_v53 }
 0x554   : > { %v758_v19 = vsel %vm666_vm2, %v13556_v6, %v13558_v47  ;;  %v798_v54 = vrot.slane %v13554_v49, 1  ;;  %v883_v33 = vmax.f32 %v702_v56, %v13554_v49  ;;  %v942_v38 = vmax.f32 %v10578_v62, %v10612_v48 }
 0x555   : > { %v882_v46 = vmax.f32 %v758_v19, %v13556_v6  ;;  %v943_v3 = vmax.f32 %v10587_v15, %v10620_v1  ;;  %v993_v4 = vpack.c.bf16 %v971_v31, %v970_v26  ;;  %v13562_v28 = vrot.slane %v13561_v11, 7  ;;  %v4372_v6 = vpop.permute.xlu0 %4371  ;;  %v10684_v19 = vld [vmem:[%s12175_s7 + $0x30] ss:$0 sps:$4 sm:$0x33]  }
 0x556   : > { %v799_v20 = vsel %vm763_vm4, %v797_v63, %v798_v54  ;;  %v855_v27 = vsel %vm763_vm4, %v798_v54, %v13554_v49  ;;  %v13564_v13 = vrot.slane %v13563_v36, 7  ;;  %v4677_v62 = vsel %vm2249_vm12, %v4629_v57, %v4340_v25  ;;  %4169 = vrot.lane.b32.xlu0 %v13560_v21, %s6377_s21  ;;  %v4240_v54 = vpop.permute.xlu1 %4239  ;;  %6174 = vmatprep.subr.msk.bf16.mxu1 %vm437_vm0, %v10684_v19  ;;  %s6389_s21 = smov 64  }
 0x557   : > { %v10665_v35 = vmax.f32 %v882_v46, %v799_v20  ;;  %v10667_v15 = vmax.f32 %v883_v33, %v855_v27  ;;  %v4725_v49 = vsel %vm2282_vm14, %v4677_v62, %v4372_v6  ;;  %v13566_v26 = vmov 0   ;;  %6072 = vmatmul.mubr.msk.bf16.gmra.mrb[16].mxu1 %vm388_vm1, %v993_v4  ;;  %v13567_v27 = vld [vmem:[#allocation79_spill] sm:$0xff] }
 0x558   : > { %v705_v45 = vsel %vm666_vm2, %v13564_v13, %v13562_v28  ;;  %v13565_v56 = vmov %v13564_v13  ;;  %4323 = vrot.lane.b32.xlu1 %v13566_v26, %s6372_s28  ;;  %v800_v37 = vrot.slane %v13563_v36, 1  ;;  %v801_v25 = vrot.slane %v13561_v11, 1 }
 0x559   : > { %v759_v55 = vsel %vm666_vm2, %v13563_v36, %v13565_v56  ;;  %v4816_v63 = vshll.u32 %v10638_v7, 16  ;;  %v972_v57 = vmax.f32 %v942_v38, %v10665_v35  ;;  %v973_v31 = vmax.f32 %v943_v3, %v10667_v15  ;;  %v4236_v3 = vpop.permute.xlu0 %4235 }
 0x55a   : > { %v884_v47 = vmax.f32 %v759_v55, %v13563_v36  ;;  %v885_v21 = vmax.f32 %v705_v45, %v13561_v11  ;;  %v802_v46 = vsel %vm763_vm4, %v800_v37, %v801_v25  ;;  %v856_v33 = vsel %vm763_vm4, %v801_v25, %v13561_v11  ;;  %v13569_v45 = vld [vmem:[#allocation125_spill] sm:$0xff]  ;;  %v13573_v37 = vld [vmem:[#allocation236_spill] sm:$0xff] }
 0x55b   : > { %v944_v20 = vmax.f32 %v10612_v48, %v10665_v35  ;;  %v945_v7 = vmax.f32 %v10620_v1, %v10667_v15  ;;  %v4826_v4 = vshll.u32 %v4725_v49, 16  ;;  %v4534_v38 = vsel %vm2150_vm10, %v13567_v27, %v4240_v54  ;;  %v13570_v1 = vld [vmem:[#allocation135_spill] sm:$0xff]  ;;  %v13572_v49 = vld [vmem:[#allocation241_spill] sm:$0xff]  ;;  %v10734_v27 = vld [vmem:[%s6507_s27 + $0xf8] sm:$0xff] }
 0x55c   : > { %v994_v28 = vpack.c.bf16 %v973_v31, %v972_v57  ;;  %v10700_v36 = vmax.f32 %v884_v47, %v802_v46  ;;  %v13568_v11 = vshll.u32 %v10472_v59, 16  ;;  %v4530_v48 = vsel %vm2150_vm10, %v13569_v45, %v4236_v3  ;;  %4910 = vrot.lane.b32.xlu1 %v10186_v42, %s6389_s21  ;;  %4261 = vrot.lane.b32.xlu0 %v13570_v1, %s6381_s22  ;;  %v4238_v47 = vpop.permute.xlu1 %4237  ;;  %v13574_v31 = vld [vmem:[#allocation178_spill] sm:$0xff] }
 0x55d   : > { %v13571_v53 = vshll.u32 %v10453_v5, 16  ;;  %v10714_v6 = vmax.f32 %v885_v21, %v856_v33  ;;  %v4810_v56 = vshrl.u32 %v10453_v5, 16  ;;  %v4820_v59 = vshrl.u32 %v10530_v0, 16  ;;  %v4154_v46 = vpop.permute.xlu0 %4153  ;;  %v13576_v33 = vld [vmem:[#allocation155_spill] sm:$0xff] }
 0x55e   : > { %v4808_v13 = vrot.slane %v13568_v11, 1  ;;  %v4824_v55 = vrot.slane %v4822_v30, 1  ;;  %6075 = vmatprep.mubr.msk.bf16.mxu1 %vm388_vm1, %v994_v28  ;;  %v974_v42 = vmax.f32 %v944_v20, %v10700_v36  ;;  %v4586_v26 = vsel %vm2183_vm11, %v4534_v38, %v13572_v49  ;;  %v13579_v11 = vld [vmem:[#allocation251_spill] sm:$0xff] }
 0x55f   : > { %v4814_v62 = vrot.slane %v13571_v53, 1  ;;  %v4583_v25 = vsel %vm2183_vm11, %v4530_v48, %v13573_v37  ;;  %v975_v57 = vmax.f32 %v945_v7, %v10714_v6  ;;  %v803_v5 = vrot.slane %v13574_v31, 1  ;;  %v13580_v48 = vld [vmem:[#allocation254_spill] sm:$0xff] }
 0x560   : > { %v4818_v21 = vrot.slane %v4816_v63, 1  ;;  %v4828_v54 = vrot.slane %v4826_v4, 1  ;;  %v13575_v0 = vrot.slane %v13574_v31, 7  ;;  %v804_v20 = vrot.slane %v13576_v33, 1  ;;  %4914 = vrot.lane.b32.xlu1 %v10259_v16, %s6389_s21  ;;  %4355 = vrot.lane.b32.xlu0 %v13559_v58, %s6374_s14  ;;  %s12113_s14 = scalar_lea.hbm %s12177_s9, %s5942_s26 }
 0x561   : > { %v713_v38 = vrot.slane %v10734_v27, 7  ;;  %v4815_v63 = vor.u32 %v4814_v62, %v4810_v56  ;;  %v4809_v7 = vsel %vm1511_vm6, %v10485_v17, %v4808_v13  ;;  %v13577_v4 = vrot.slane %v13576_v33, 7  ;;  %v4280_v62 = vpop.permute.xlu1 %4279  ;;  %v10759_v49 = vpop.permute.xlu0 %4155 }
 0x562   : > { %v760_v30 = vsel %vm666_vm2, %v13574_v31, %v13575_v0  ;;  %v13578_v3 = vmov %v13575_v0  ;;  %v4633_v45 = vsel %vm12676_vm13, %v4586_v26, %v13579_v11  ;;  %v4630_v1 = vsel %vm12676_vm13, %v4583_v25, %v13580_v48  ;;  %v6306_v11 = vld [vmem:[%s6507_s27 + $0xe0] sm:$0xff] }
 0x563   : > { %v708_v28 = vsel %vm666_vm2, %v13578_v3, %v13577_v4  ;;  %v4825_v16 = vor.u32 %v4824_v55, %v4820_v59  ;;  %v995_v53 = vpack.c.bf16 %v975_v57, %v974_v42  ;;  %v4442_v58 = vsel %vm12675_vm8, %v10149_v39, %v10618_v44  ;;  %v13581_v44 = vld [vmem:[#allocation132_spill] sm:$0xff]  ;;  %v13582_v42 = vld [vmem:[#allocation269_spill] sm:$0xff]  ;;  %v13586_v4 = vld [vmem:[#allocation51_spill] sm:$0xff] }
 0x564   : > { %v805_v17 = vsel %vm763_vm4, %v803_v5, %v804_v20  ;;  %v857_v13 = vsel %vm763_vm4, %v804_v20, %v13576_v33  ;;  %v886_v56 = vmax.f32 %v760_v30, %v13574_v31  ;;  %v4819_v26 = vsel %vm1511_vm6, %v4815_v63, %v4818_v21  ;;  %4912 = vrot.lane.b32.xlu0 %v10223_v60, %s6389_s21 }
 0x565   : > { %v10763_v37 = vsel %vm1511_vm6, %v4825_v16, %v4828_v54  ;;  %6076 = vmatmul.mubr.msk.bf16.gmra.mrb[20].mxu1 %vm388_vm1, %v995_v53  ;;  %v887_v59 = vmax.f32 %v708_v28, %v13576_v33  ;;  %v946_v39 = vmax.f32 %v10665_v35, %v10700_v36  ;;  %v4681_v55 = vsel %vm2249_vm12, %v4633_v45, %v13581_v44  ;;  %v4310_v60 = vpop.permute.xlu1 %4309  ;;  %v10794_v3 = vpop.permute.xlu0 %4241 }
 0x566   : > { %v4678_v25 = vsel %vm2249_vm12, %v4630_v1, %v13582_v42  ;;  %4918 = vrot.lane.b32.xlu1 %v10483_v40, %s6389_s21  ;;  %v918_v57 = vmax.f32 %v886_v56, %v805_v17  ;;  %v806_v31 = vrot.slane %v10029_v10, 1  ;;  %v4478_v5 = vsel %vm2117_vm9, %v4442_v58, %v4154_v46 }
 0x567   : > { %v919_v21 = vmax.f32 %v887_v59, %v857_v13  ;;  %v947_v35 = vmax.f32 %v10667_v15, %v10714_v6  ;;  %v13583_v54 = vrot.slane %v10076_v12, 7  ;;  %v13584_v0 = vrot.slane %v10029_v10, 7 }
 0x568   : > { %v976_v33 = vmax.f32 %v946_v39, %v918_v57  ;;  %v807_v63 = vrot.slane %v10076_v12, 1  ;;  %v4726_v15 = vsel %vm2282_vm14, %v4678_v25, %v13586_v4  ;;  %v948_v48 = vmax.f32 %v10700_v36, %v918_v57  ;;  %4916 = vrot.lane.b32.xlu0 %v10480_v29, %s6389_s21 }
 0x569   : > { %v711_v30 = vsel %vm666_vm2, %v13584_v0, %v13583_v54  ;;  %v13585_v20 = vmov %v13584_v0  ;;  %v977_v28 = vmax.f32 %v947_v35, %v919_v21  ;;  %v4532_v1 = vsel %vm2150_vm10, %v4478_v5, %v4238_v47  ;;  %v4342_v36 = vpop.permute.xlu1 %4341  ;;  %v4282_v42 = vpop.permute.xlu0 %4281 }
 0x56a   : > { %v761_v40 = vsel %vm666_vm2, %v10029_v10, %v13585_v20  ;;  %v889_v46 = vmax.f32 %v711_v30, %v10076_v12  ;;  %4922 = vrot.lane.b32.xlu1 %v4819_v26, %s6389_s21  ;;  %v808_v10 = vsel %vm763_vm4, %v806_v31, %v807_v63  ;;  %v858_v16 = vsel %vm763_vm4, %v807_v63, %v10076_v12 }
 0x56b   : > { %v888_v45 = vmax.f32 %v761_v40, %v6306_v11  ;;  %v809_v53 = vrot.slane %v10466_v22, 1  ;;  %v996_v58 = vpack.c.bf16 %v977_v28, %v976_v33  ;;  %v949_v56 = vmax.f32 %v10714_v6, %v919_v21 }
 0x56c   : > { %v921_v13 = vmax.f32 %v889_v46, %v858_v16  ;;  %v4832_v59 = vshll.u32 %v4726_v15, 16  ;;  %v13587_v47 = vrot.slane %v10466_v22, 7  ;;  %v810_v12 = vrot.slane %v10734_v27, 1  ;;  %4920 = vrot.lane.b32.xlu0 %v4809_v7, %s6389_s21  ;;  %v13589_v7 = vld [vmem:[#allocation282_spill] sm:$0xff] }
 0x56d   : > { %v920_v17 = vmax.f32 %v888_v45, %v808_v10  ;;  %v4585_v44 = vsel %vm2183_vm11, %v4532_v1, %v4280_v62  ;;  %6079 = vmatprep.mubr.msk.bf16.mxu1 %vm388_vm1, %v996_v58  ;;  %v4374_v40 = vpop.permute.xlu1 %4373  ;;  %v4729_v46 = vsel %vm2282_vm14, %v4681_v55, %v13589_v7  ;;  %v4312_v28 = vpop.permute.xlu0 %4311  ;;  %v13595_v7 = vld [vmem:[#allocation82_spill] sm:$0xff] }
 0x56e   : > { %v714_v29 = vsel %vm666_vm2, %v13587_v47, %v713_v38  ;;  %v13588_v26 = vmov %v13587_v47  ;;  %v979_v6 = vmax.f32 %v949_v56, %v921_v13  ;;  %v4632_v5 = vsel %vm12676_vm13, %v4585_v44, %v4310_v60 }
 0x56f   : > { %v762_v39 = vsel %vm666_vm2, %v10466_v22, %v13588_v26  ;;  %v978_v25 = vmax.f32 %v948_v48, %v920_v17  ;;  %v811_v38 = vsel %vm763_vm4, %v809_v53, %v810_v12  ;;  %v859_v35 = vsel %vm763_vm4, %v810_v12, %v10734_v27 }
 0x570   : > { %v890_v31 = vmax.f32 %v762_v39, %v10466_v22  ;;  %v891_v54 = vmax.f32 %v714_v29, %v10734_v27  ;;  %v950_v30 = vmax.f32 %v918_v57, %v920_v17  ;;  %v951_v33 = vmax.f32 %v919_v21, %v921_v13  ;;  %4924 = vrot.lane.b32.xlu0 %v10763_v37, %s6389_s21 }
 0x571   : > { %v997_v0 = vpack.c.bf16 %v979_v6, %v978_v25  ;;  %v4680_v20 = vsel %vm2249_vm12, %v4632_v5, %v4342_v36  ;;  %v4834_v63 = vrot.slane %v4832_v59, 1  ;;  %v5068_v60 = vsel %vm437_vm0, %v10684_v19, 0  ;;  %v4122_v10 = vpop.permute.xlu1 %4121  ;;  %v4344_v56 = vpop.permute.xlu0 %4343 }
 0x572   : > { %v922_v62 = vmax.f32 %v890_v31, %v811_v38  ;;  %v923_v22 = vmax.f32 %v891_v54, %v859_v35  ;;  %v4728_v4 = vsel %vm2282_vm14, %v4680_v20, %v4374_v40  ;;  %v4830_v21 = vshrl.u32 %v4726_v15, 16  ;;  %6138 = vmatpush3.bf16.msra.mxu1 %v5068_v60  ;;  %v13591_v38 = vld [vmem:[#allocation50_spill] sm:$0xff] }
 0x573   : > { %6080 = vmatmul.mubr.msk.bf16.gmra.mrb[24].mxu1 %vm388_vm1, %v997_v0  ;;  %v4836_v57 = vshll.u32 %v4728_v4, 16  ;;  %v4444_v19 = vsel %vm12675_vm8, %v10137_v8, %v10654_v14  ;;  %v4842_v36 = vshll.u32 %v4729_v46, 16  ;;  %v4840_v39 = vshrl.u32 %v4729_v46, 16  ;;  %v13596_v4 = vld [vmem:[#allocation138_spill] sm:$0xff] }
 0x574   : > { %v980_v27 = vmax.f32 %v950_v30, %v922_v62  ;;  %v952_v11 = vmax.f32 %v920_v17, %v922_v62  ;;  %v981_v45 = vmax.f32 %v951_v33, %v923_v22  ;;  %v953_v48 = vmax.f32 %v921_v13, %v923_v22  ;;  %v13593_v33 = vld [vmem:[#allocation259_spill] sm:$0xff] }
 0x575   : > { %v4838_v1 = vrot.slane %v4836_v57, 1  ;;  %v4835_v16 = vor.u32 %v4834_v63, %v4830_v21  ;;  %v4480_v17 = vsel %vm2117_vm9, %v4444_v19, %v10759_v49  ;;  %v4124_v59 = vpop.permute.xlu1 %4123  ;;  %v4376_v49 = vpop.permute.xlu0 %4375  ;;  %v4844_v29 = vrot.slane %v4842_v36, 1  ;;  %v13598_v21 = vld [vmem:[#allocation253_spill] sm:$0xff] }
 0x576   : > { %v982_v55 = vmax.f32 %v952_v11, %v922_v62  ;;  %v998_v53 = vpack.c.bf16 %v981_v45, %v980_v27  ;;  %v983_v58 = vmax.f32 %v953_v48, %v923_v22  ;;  %v4536_v37 = vsel %vm2150_vm10, %v4480_v17, %v10794_v3  ;;  %v13592_v62 = vld [vmem:[#allocation212_spill] sm:$0xff]  ;;  %v13594_v22 = vld [vmem:[#allocation242_spill] sm:$0xff]  ;;  %v13599_v48 = vld [vmem:[#allocation279_spill] sm:$0xff] }
 0x577   : > { %v4839_v15 = vsel %vm1511_vm6, %v4835_v16, %v4838_v1  ;;  %v4588_v8 = vsel %vm2183_vm11, %v4536_v37, %v4282_v42  ;;  %v4845_v6 = vor.u32 %v4844_v29, %v4840_v39  ;;  %v13590_v42 = vld [vmem:[#allocation213_spill] sm:$0xff]  ;;  %v13600_v16 = vld [vmem:[#allocation170_spill] sm:$0xff]  ;;  %vm13652_vm0 = vcmask 392192  }
 0x578   : > { %6083 = vmatprep.mubr.msk.bf16.mxu1 %vm388_vm1, %v998_v53  ;;  %v999_v13 = vpack.c.bf16 %v983_v58, %v982_v55  ;;  %4926 = vrot.lane.b32.xlu1 %v4839_v15, %s6389_s21  ;;  %v4635_v14 = vsel %vm12676_vm13, %v4588_v8, %v4312_v28  ;;  %v13597_v28 = vld [vmem:[#allocation115_spill] sm:$0xff]  ;;  %v13602_v8 = vld [vmem:[#allocation156_spill] sm:$0xff]  ;;  %vm13654_vm2 = vcmask 424960   ;;  %vm13657_vm4 = vcmask 457728  }
 0x579   : > { %v4683_v47 = vsel %vm2249_vm12, %v4635_v14, %v4344_v56  ;;  %v4248_v12 = vpop.permute.xlu1 %4247  ;;  %v4244_v25 = vpop.permute.xlu0 %4243  ;;  %v4410_v27 = vsel %vm388_vm1, %v13597_v28, %v13596_v4  ;;  %v4412_v14 = vsel %vm388_vm1, %v13466_v23, %v13602_v8  ;;  %v10913_v8 = vld [vmem:[%s12174_s6] ss:$0 sm:$0xff] }
 0x57a   : > { %v4731_v3 = vsel %vm2282_vm14, %v4683_v47, %v4376_v49  ;;  %v4538_v31 = vsel %vm2150_vm10, %v13590_v42, %v4244_v25  ;;  %v4542_v30 = vsel %vm2150_vm10, %v13592_v62, %v4248_v12  ;;  %v4446_v57 = vsel %vm12675_vm8, %v4410_v27, %v4122_v10  ;;  %v13601_v10 = vld [vmem:[#allocation284_spill] sm:$0xff] }
 0x57b   : > { %6084 = vmatmul.mubr.msk.bf16.gmra.mrb[28].mxu1 %vm388_vm1, %v999_v13  ;;  %v4846_v26 = vshll.u32 %v4731_v3, 16  ;;  %v4589_v35 = vsel %vm2183_vm11, %v4538_v31, %v13591_v38  ;;  %v4592_v60 = vsel %vm2183_vm11, %v4542_v30, %v13594_v22  ;;  %v4448_v3 = vsel %vm12675_vm8, %v4412_v14, %v4124_v59  ;;  %v13608_v14 = vld [vmem:[#allocation142_spill] sm:$0xff] }
 0x57c   : > { %v4636_v20 = vsel %vm12676_vm13, %v4589_v35, %v13593_v33  ;;  %v4639_v45 = vsel %vm12676_vm13, %v4592_v60, %v13598_v21 }
 0x57d   : > { %v4848_v44 = vrot.slane %v4846_v26, 1  ;;  %v4246_v54 = vpop.permute.xlu1 %4245  ;;  %v4158_v0 = vpop.permute.xlu0 %4157  ;;  %v4684_v46 = vsel %vm2249_vm12, %v4636_v20, %v13595_v7  ;;  %v4687_v53 = vsel %vm2249_vm12, %v4639_v45, %v13600_v16 }
 0x57e   : > { %v4732_v19 = vsel %vm2282_vm14, %v4684_v46, %v13599_v48  ;;  %v4482_v1 = vsel %vm2117_vm9, %v4446_v57, %v4158_v0  ;;  %v4735_v15 = vsel %vm2282_vm14, %v4687_v53, %v13601_v10  ;;  %v13606_v10 = vld [vmem:[#allocation164_spill] sm:$0xff] }
 0x57f   : > { %v4849_v5 = vsel %vm1511_vm6, %v4845_v6, %v4848_v44  ;;  %v4852_v17 = vshll.u32 %v4732_v19, 16  ;;  %v4540_v56 = vsel %vm2150_vm10, %v4482_v1, %v4246_v54  ;;  %v4850_v25 = vshrl.u32 %v4732_v19, 16  ;;  %v13603_v1 = vld [vmem:[#allocation172_spill] sm:$0xff] }
 0x580   : > { %4928 = vrot.lane.b32.xlu0 %v4849_v5, %s6389_s21  ;;  %v4862_v6 = vshll.u32 %v4735_v15, 16 }
 0x581   : > { %v4284_v40 = vpop.permute.xlu1 %4283  ;;  %v4160_v63 = vpop.permute.xlu0 %4159  ;;  %v4854_v29 = vrot.slane %v4852_v17, 1 }
 0x582   : > { %v4591_v37 = vsel %vm2183_vm11, %v4540_v56, %v4284_v40  ;;  %v4484_v12 = vsel %vm2117_vm9, %v4448_v3, %v4160_v63  ;;  %v4864_v62 = vrot.slane %v4862_v6, 1  ;;  %v4860_v40 = vshrl.u32 %v4735_v15, 16  ;;  %v13605_v56 = vld [vmem:[#allocation65_spill] sm:$0xff]  ;;  %v13610_v3 = vld [vmem:[#allocation43_spill] sm:$0xff]  ;;  %v13612_v6 = vld [vmem:[#allocation262_spill] sm:$0xff] }
 0x583   : > { %v4855_v38 = vor.u32 %v4854_v29, %v4850_v25  ;;  %v13607_v15 = vld [vmem:[#allocation49_spill] sm:$0xff] }
 0x584   : > { %v4865_v60 = vor.u32 %v4864_v62, %v4860_v40  ;;  %v13616_v62 = vld [vmem:[#allocation42_spill] sm:$0xff] }
 0x585   : > { %v4314_v11 = vpop.permute.xlu1 %4313  ;;  %v4250_v55 = vpop.permute.xlu0 %4249 }
 0x586   : > { %v4638_v13 = vsel %vm12676_vm13, %v4591_v37, %v4314_v11  ;;  %v4544_v42 = vsel %vm2150_vm10, %v4484_v12, %v4250_v55 }
 0x589   : > { %v4346_v58 = vpop.permute.xlu1 %4345  ;;  %v4286_v36 = vpop.permute.xlu0 %4285 }
 0x58a   : > { %v4686_v47 = vsel %vm2249_vm12, %v4638_v13, %v4346_v58  ;;  %v4594_v31 = vsel %vm2183_vm11, %v4544_v42, %v4286_v36  ;;  %v13604_v58 = vld [vmem:[#allocation41_spill] sm:$0xff]  ;;  %v3592_v13 = vsel %vm388_vm1, %v13607_v15, %v13606_v10  ;;  %v13622_v15 = vld [vmem:[#allocation144_spill] sm:$0xff] }
 0x58b   : > { %v6238_v17 = vunpack.i.h.bf16 %v13604_v58 }
 0x58d   : > { %v4378_v49 = vpop.permute.xlu1 %4377  ;;  %v4316_v39 = vpop.permute.xlu0 %4315  ;;  %v4424_v12 = vsel %vm388_vm1, 0, %v6238_v17  ;;  %v13621_v17 = vld [vmem:[#allocation147_spill] sm:$0xff] }
 0x58e   : > { %v4734_v26 = vsel %vm2282_vm14, %v4686_v47, %v4378_v49  ;;  %v4641_v35 = vsel %vm12676_vm13, %v4594_v31, %v4316_v39  ;;  %v13609_v47 = vld [vmem:[#allocation148_spill] sm:$0xff] }
 0x58f   : > { %v4856_v44 = vshll.u32 %v4734_v26, 16  ;;  %v4416_v49 = vsel %vm388_vm1, %v13609_v47, %v13608_v14  ;;  %v6243_v26 = vunpack.i.h.bf16 %v13610_v3  ;;  %v13613_v31 = vld [vmem:[#allocation40_spill] sm:$0xff]  ;;  %v13624_v3 = vld [vmem:[#allocation230_spill] sm:$0xff] }
 0x590   : > { %v13623_v14 = vld [vmem:[#allocation140_spill] sm:$0xff] }
 0x591   : > { %v4858_v5 = vrot.slane %v4856_v44, 1  ;;  %v4380_v23 = vpop.permute.xlu1 %4379  ;;  %v4348_v54 = vpop.permute.xlu0 %4347  ;;  %v13611_v44 = vld [vmem:[#allocation59_spill] sm:$0xff] }
 0x592   : > { %v4689_v59 = vsel %vm2249_vm12, %v4641_v35, %v4348_v54  ;;  %v6263_v25 = vunpack.i.h.bf16 %v13611_v44  ;;  %v13615_v35 = vld [vmem:[#allocation52_spill] sm:$0xff] }
 0x593   : > { %v4859_v0 = vsel %vm1511_vm6, %v4855_v38, %v4858_v5  ;;  %v4737_v30 = vsel %vm2282_vm14, %v4689_v59, %v4380_v23  ;;  %v10927_v5 = vunpack.i.h.bf16 %v13613_v31  ;;  %v13614_v23 = vld [vmem:[#allocation137_spill] sm:$0xff]  ;;  %v10933_v54 = vadd.f32 %v13615_v35, %v10913_v8 }
 0x594   : > { %4930 = vrot.lane.b32.xlu1 %v4859_v0, %s6389_s21  ;;  %v4866_v33 = vshll.u32 %v4737_v30, 16  ;;  %v3620_v38 = vsel %vm12675_vm8, %v3592_v13, %v13614_v23  ;;  %v6262_v59 = vunpack.i.l.bf16 %v13611_v44  ;;  %v10937_v30 = vunpack.i.h.bf16 %v13616_v62  ;;  %v13625_v44 = vld [vmem:[#allocation60_spill] sm:$0xff]  ;;  %v13627_v35 = vld [vmem:[#allocation93_spill] sm:$0xff] }
 0x595   : > { %v4164_v20 = vpop.permute.xlu1 %4163  ;;  %v4128_v63 = vpop.permute.xlu0 %4127  ;;  %v3650_v13 = vsel %vm2117_vm9, %v3620_v38, %v13622_v15  ;;  %v13629_v62 = vld [vmem:[#allocation160_spill] sm:$0xff] }
 0x596   : > { %v4868_v22 = vrot.slane %v4866_v33, 1  ;;  %v4452_v39 = vsel %vm12675_vm8, %v4416_v49, %v4128_v63  ;;  %v13617_v33 = vld [vmem:[#allocation44_spill] sm:$0xff]  ;;  %v13618_v63 = vld [vmem:[#allocation45_spill] sm:$0xff]  ;;  %v2541_v49 = vmax.f32 %v10933_v54, 0.0 }
 0x597   : > { %v6258_v40 = vunpack.i.h.bf16 %v13617_v33 }
 0x598   : > { %v4869_v46 = vsel %vm1511_vm6, %v4865_v60, %v4868_v22  ;;  %v13619_v22 = vld [vmem:[#allocation171_spill] sm:$0xff] }
 0x599   : > { %v10892_v7 = vpop.permute.xlu1 %4129  ;;  %4932 = vrot.lane.b32.xlu0 %v4869_v46, %s6389_s21  ;;  %v4126_v4 = vpop.permute.xlu0 %4125  ;;  %v3648_v60 = vsel %vm2117_vm9, %v13619_v22, %v13618_v63  ;;  %v4488_v46 = vsel %vm2117_vm9, %v4452_v39, %v4164_v20  ;;  %v4414_v20 = vsel %vm388_vm1, %v13472_v18, %v13623_v14  ;;  %v13626_v18 = vld [vmem:[#allocation281_spill] sm:$0xff] }
 0x59a   : > { %v4557_v10 = vsel %vm2150_vm10, %v3648_v60, %v6263_v25 }
 0x59b   : > { %v4604_v39 = vsel %vm2183_vm11, %v4557_v10, %v13624_v3 }
 0x59d   : > { %v4256_v28 = vpop.permute.xlu1 %4255  ;;  %v4252_v27 = vpop.permute.xlu0 %4251 }
 0x59e   : > { %v4546_v16 = vsel %vm2150_vm10, %v13603_v1, %v4252_v27  ;;  %v13620_v1 = vld [vmem:[#allocation68_spill] sm:$0xff]  ;;  %v4550_v58 = vsel %vm2150_vm10, %v4488_v46, %v4256_v28  ;;  %v3678_v28 = vsel %vm2150_vm10, %v3648_v60, %v6262_v59  ;;  %v10978_v59 = vadd.f32 %v10913_v8, %v13627_v35  ;;  %v13630_v60 = vld [vmem:[#allocation169_spill] sm:$0xff] }
 0x59f   : > { %v4595_v36 = vsel %vm2183_vm11, %v4546_v16, %v13605_v56  ;;  %v10946_v16 = vadd.f32 %v10913_v8, %v13620_v1  ;;  %v13631_v46 = vld [vmem:[#allocation173_spill] sm:$0xff]  ;;  %v13636_v35 = vld [vmem:[#allocation184_spill] sm:$0xff] }
 0x5a0   : > { %v4642_v42 = vsel %vm12676_vm13, %v4595_v36, %v13612_v6  ;;  %v10952_v36 = vsel %vm12675_vm8, %v4424_v12, %v6243_v26  ;;  %v4450_v26 = vsel %vm12675_vm8, %v4414_v20, %v4126_v4  ;;  %v10968_v6 = vadd.f32 %v13625_v44, %v10913_v8  ;;  %v13628_v4 = vld [vmem:[#allocation191_spill] sm:$0xff] }
 0x5a1   : > { %v4254_v11 = vpop.permute.xlu1 %4253  ;;  %v4162_v57 = vpop.permute.xlu0 %4161  ;;  %v4690_v56 = vsel %vm2249_vm12, %v4642_v42, %v13621_v17  ;;  %v3708_v42 = vsel %vm2183_vm11, %v3678_v28, %v13624_v3  ;;  %v2539_v38 = vmax.f32 %v10946_v16, 0.0  ;;  %v3682_v63 = vsel %vm2150_vm10, %v13629_v62, %v13628_v4  ;;  %v13637_v4 = vld [vmem:[#allocation227_spill] sm:$0xff]  ;;  %v13638_v62 = vld [vmem:[#allocation229_spill] sm:$0xff] }
 0x5a2   : > { %v4486_v31 = vsel %vm2117_vm9, %v4450_v26, %v4162_v57  ;;  %v10987_v1 = vsel %vm2150_vm10, %v13631_v46, %v13630_v60  ;;  %v4652_v57 = vsel %vm12676_vm13, %v4604_v39, %v10927_v5  ;;  %v3740_v10 = vsel %vm12676_vm13, %v3708_v42, %v10927_v5  ;;  %v13634_v39 = vld [vmem:[#allocation199_spill] sm:$0xff]  ;;  %v13635_v42 = vld [vmem:[#allocation220_spill] sm:$0xff] }
 0x5a3   : > { %v4548_v15 = vsel %vm2150_vm10, %v4486_v31, %v4254_v11  ;;  %v4420_v44 = vsel %vm388_vm1, %v13516_v52, %v13634_v39  ;;  %v3710_v11 = vsel %vm2183_vm11, %v3678_v28, %v13637_v4  ;;  %v4700_v52 = vsel %vm2249_vm12, %v4652_v57, %v10937_v30 }
 0x5a5   : > { %v10896_v21 = vpop.permute.xlu1 %4257  ;;  %v4166_v45 = vpop.permute.xlu0 %4165 }
 0x5a9   : > { %v4320_v48 = vpop.permute.xlu1 %4319  ;;  %v4290_v19 = vpop.permute.xlu0 %4289 }
 0x5aa   : > { %v4599_v47 = vsel %vm2183_vm11, %v4550_v58, %v4290_v19  ;;  %v4738_v19 = vsel %vm2282_vm14, %v4690_v56, %v13626_v18  ;;  %v13632_v58 = vld [vmem:[#allocation198_spill] sm:$0xff] }
 0x5ab   : > { %v4646_v22 = vsel %vm12676_vm13, %v4599_v47, %v4320_v48  ;;  %v4418_v17 = vsel %vm388_vm1, %v13522_v24, %v13632_v58  ;;  %v4872_v20 = vshll.u32 %v4738_v19, 16  ;;  %v13633_v47 = vld [vmem:[#allocation185_spill] sm:$0xff] }
 0x5ac   : > { %v4454_v48 = vsel %vm12675_vm8, %v4418_v17, %v10892_v7  ;;  %v3680_v26 = vsel %vm2150_vm10, %v3650_v13, %v13633_v47  ;;  %v3684_v7 = vsel %vm2150_vm10, %v13636_v35, %v13635_v42  ;;  %v13639_v17 = vld [vmem:[#allocation233_spill] sm:$0xff] }
 0x5ad   : > { %v10898_v55 = vpop.permute.xlu1 %4317  ;;  %v4288_v53 = vpop.permute.xlu0 %4287  ;;  %v4490_v24 = vsel %vm2117_vm9, %v4454_v48, %v4166_v45  ;;  %v3772_v45 = vsel %vm2249_vm12, %v3740_v10, %v10937_v30  ;;  %v4874_v58 = vrot.slane %v4872_v20, 1  ;;  %v13641_v20 = vld [vmem:[#allocation89_spill] sm:$0xff] }
 0x5ae   : > { %v4552_v60 = vsel %vm2150_vm10, %v4490_v24, %v10896_v21 }
 0x5b1   : > { %v10905_v37 = vpop.permute.xlu1 %4321  ;;  %v10918_v29 = vpop.permute.xlu0 %4291 }
 0x5b2   : > { %v4601_v57 = vsel %vm2183_vm11, %v4552_v60, %v10918_v29  ;;  %v13642_v29 = vld [vmem:[#allocation190_spill] sm:$0xff] }
 0x5b3   : > { %v3804_v39 = vsel %vm2282_vm14, %v3772_v45, %v13642_v29  ;;  %v4648_v42 = vsel %vm12676_vm13, %v4601_v57, %v10905_v37  ;;  %v13645_v45 = vld [vmem:[#allocation246_spill] sm:$0xff]  ;;  %v13649_v57 = vld [vmem:[#allocation261_spill] sm:$0xff] }
 0x5b5   : > { %v4384_v0 = vpop.permute.xlu1 %4383  ;;  %v4352_v27 = vpop.permute.xlu0 %4351 }
 0x5b6   : > { %v4694_v56 = vsel %vm2249_vm12, %v4646_v22, %v4352_v27  ;;  %v4597_v27 = vsel %vm2183_vm11, %v4548_v15, %v4288_v53  ;;  %v3714_v22 = vsel %vm2183_vm11, %v3682_v63, %v13638_v62  ;;  %v3712_v63 = vsel %vm2183_vm11, %v3680_v26, %v13639_v17  ;;  %v13640_v15 = vld [vmem:[#allocation234_spill] sm:$0xff] }
 0x5b7   : > { %v4742_v31 = vsel %vm2282_vm14, %v4694_v56, %v4384_v0  ;;  %v4644_v28 = vsel %vm12676_vm13, %v4597_v27, %v10898_v55  ;;  %v3716_v21 = vsel %vm2183_vm11, %v3684_v7, %v13640_v15  ;;  %v3744_v47 = vsel %vm12676_vm13, %v3712_v63, %v13641_v20  ;;  %v13644_v27 = vld [vmem:[#allocation286_spill] sm:$0xff] }
 0x5b8   : > { %v4882_v56 = vshll.u32 %v4742_v31, 16  ;;  %v3748_v26 = vsel %vm12676_vm13, %v3716_v21, %v13444_v2 }
 0x5b9   : > { %v4354_v12 = vpop.permute.xlu1 %4353  ;;  %v4350_v23 = vpop.permute.xlu0 %4349 }
 0x5ba   : > { %v4692_v10 = vsel %vm2249_vm12, %v4644_v28, %v4350_v23  ;;  %v4884_v7 = vrot.slane %v4882_v56, 1  ;;  %v4696_v4 = vsel %vm2249_vm12, %v4648_v42, %v4354_v12  ;;  %v13647_v28 = vld [vmem:[#allocation303_spill] sm:$0xff]  ;;  %v4880_v12 = vshrl.u32 %v4742_v31, 16 }
 0x5bb   : > { %v4748_v31 = vsel %vm2282_vm14, %v4700_v52, %v13642_v29 }
 0x5bc   : > { %v4885_v20 = vor.u32 %v4884_v7, %v4880_v12  ;;  %v4902_v7 = vshll.u32 %v4748_v31, 16 }
 0x5bd   : > { %v4168_v14 = vpop.permute.xlu1 %4167  ;;  %v4132_v18 = vpop.permute.xlu0 %4131 }
 0x5be   : > { %v4456_v13 = vsel %vm12675_vm8, %v4420_v44, %v4132_v18  ;;  %v13643_v44 = vld [vmem:[#allocation244_spill] sm:$0xff]  ;;  %v3836_v18 = vsel %vm2342_vm15, %v3804_v39, %v13644_v27  ;;  %v13656_v27 = vld [vmem:[#allocation119_spill] sm:$0xff] }
 0x5bf   : > { %v4492_v53 = vsel %vm2117_vm9, %v4456_v13, %v4168_v14  ;;  %v4870_v14 = vshrl.u32 %v4738_v19, 16  ;;  %v3742_v24 = vsel %vm12676_vm13, %v3710_v11, %v13643_v44  ;;  %v13646_v11 = vld [vmem:[#allocation257_spill] sm:$0xff]  ;;  %v13655_v44 = vld [vmem:[#allocation179_spill] sm:$0xff] }
 0x5c0   : > { %v4554_v0 = vsel %vm2150_vm10, %v4492_v53, %v6263_v25  ;;  %v3746_v53 = vsel %vm12676_vm13, %v3714_v22, %v13645_v45  ;;  %v3774_v60 = vsel %vm2249_vm12, %v3742_v24, %v13646_v11  ;;  %v13661_v45 = vld [vmem:[#allocation283_spill] sm:$0xff] }
 0x5c1   : > { %v4134_v46 = vpop.permute.xlu1 %4133  ;;  %v4382_v48 = vpop.permute.xlu0 %4381  ;;  %v4602_v55 = vsel %vm2183_vm11, %v4554_v0, %v13624_v3  ;;  %v4875_v35 = vor.u32 %v4874_v58, %v4870_v14  ;;  %v3869_v0 = vsel %vm3867_vm5, %v3836_v18, %v13647_v28  ;;  %v13648_v58 = vld [vmem:[#allocation320_spill] sm:$0xff]  ;;  %v3778_v56 = vsel %vm2249_vm12, %v3746_v53, %v13649_v57  ;;  %v13662_v28 = vld [vmem:[#allocation289_spill] sm:$0xff]  ;;  %v13665_v57 = vld [vmem:[#allocation319_spill] sm:$0xff] }
 0x5c2   : > { %v4740_v25 = vsel %vm2282_vm14, %v4692_v10, %v4382_v48  ;;  %v4649_v2 = vsel %vm12676_vm13, %v4602_v55, %v10927_v5  ;;  %v3902_v17 = vsel %vm3900_vm7, %v3869_v0, %v13648_v58  ;;  %v13650_v10 = vld [vmem:[#allocation264_spill] sm:$0xff]  ;;  %v13651_v48 = vld [vmem:[#allocation71_spill] sm:$0xff]  ;;  %v3806_v24 = vsel %vm2282_vm14, %v3774_v60, %v13655_v44 }
 0x5c3   : > { %v4876_v23 = vshll.u32 %v4740_v25, 16  ;;  %v3776_v22 = vsel %vm2249_vm12, %v3744_v47, %v13650_v10  ;;  %v3935_v15 = vsel %vm13652_vm0, %v3902_v17, %v13651_v48  ;;  %v4697_v21 = vsel %vm2249_vm12, %v4649_v2, %v10937_v30  ;;  %v13653_v25 = vld [vmem:[#allocation67_spill] sm:$0xff]  ;;  %v13658_v18 = vld [vmem:[#allocation108_spill] sm:$0xff]  ;;  %v13663_v17 = vld [vmem:[#allocation206_spill] sm:$0xff] }
 0x5c4   : > { %v3968_v14 = vsel %vm13654_vm2, %v3935_v15, %v13653_v25  ;;  %v3780_v47 = vsel %vm2249_vm12, %v3748_v26, %v13455_v34  ;;  %vm4942_vm0 = vcmask 523264   ;;  %v4422_v52 = vsel %vm388_vm1, %v13533_v9, %v13658_v18  ;;  %v13660_v26 = vld [vmem:[#allocation177_spill] sm:$0xff] }
 0x5c5   : > { %v4172_v19 = vpop.permute.xlu1 %4171  ;;  %v4878_v13 = vrot.slane %v4876_v23, 1  ;;  %v4386_v62 = vpop.permute.xlu0 %4385  ;;  %v4001_v30 = vsel %vm13657_vm4, %v3968_v14, %v13656_v27  ;;  %vm5034_vm2 = vcmask 818176   ;;  %v3838_v9 = vsel %vm2342_vm15, %v3806_v24, %v13661_v45 }
 0x5c6   : > { %v4744_v37 = vsel %vm2282_vm14, %v4696_v4, %v4386_v62  ;;  %v13659_v4 = vld [vmem:[#allocation273_spill] sm:$0xff]  ;;  %v4034_v2 = vsel %vm4032_vm3, %v4001_v30, %v13660_v26  ;;  %v4496_v53 = vsel %vm2117_vm9, %v10952_v36, %v4172_v19  ;;  %v3871_v12 = vsel %vm3867_vm5, %v3838_v9, %v13663_v17  ;;  %v13677_v26 = vld [vmem:[#allocation78_spill] sm:$0xff]  ;;  %v13681_v17 = vld [vmem:[#allocation56_spill] sm:$0xff] }
 0x5c7   : > { %v4886_v63 = vshll.u32 %v4744_v37, 16  ;;  %v4879_v5 = vsel %vm1511_vm6, %v4875_v35, %v4878_v13  ;;  %v4745_v35 = vsel %vm2282_vm14, %v4697_v21, %v13642_v29  ;;  %v3808_v34 = vsel %vm2282_vm14, %v3776_v22, %v13659_v4  ;;  %v13666_v22 = vld [vmem:[#allocation81_spill] sm:$0xff] }
 0x5c8   : > { %4934 = vrot.lane.b32.xlu1 %v4879_v5, %s6389_s21  ;;  %v4458_v13 = vsel %vm12675_vm8, %v4422_v52, %v4134_v46  ;;  %v3840_v0 = vsel %vm2342_vm15, %v3808_v34, %v13662_v28  ;;  %v4892_v58 = vshll.u32 %v4745_v35, 16  ;;  %v3904_v10 = vsel %vm3900_vm7, %v3871_v12, %v13665_v57 }
 0x5c9   : > { %v4888_v39 = vrot.slane %v4886_v63, 1  ;;  %v4170_v23 = vpop.permute.xlu0 %4169  ;;  %v13664_v63 = vld [vmem:[#allocation308_spill] sm:$0xff]  ;;  %v4900_v25 = vshrl.u32 %v4748_v31, 16  ;;  %v4904_v14 = vrot.slane %v4902_v7, 1  ;;  %vm13668_vm1 = vcmask 392192   ;;  %v13675_v31 = vld [vmem:[#allocation202_spill] sm:$0xff] }
 0x5ca   : > { %v4324_v55 = vpop.permute.xlu1 %4323  ;;  %v4494_v29 = vsel %vm2117_vm9, %v4458_v13, %v4170_v23  ;;  %v3873_v36 = vsel %vm3867_vm5, %v3840_v0, %v13664_v63  ;;  %v13669_v23 = vld [vmem:[#allocation141_spill] sm:$0xff]  ;;  %vm13670_vm9 = vmmov %vm13668_vm1  ;;  %vm13672_vm4 = vcmask 424960   ;;  %v4894_v52 = vrot.slane %v4892_v58, 1 }
 0x5cb   : > { %v4889_v42 = vsel %vm1511_vm6, %v4885_v20, %v4888_v39  ;;  %v3906_v48 = vsel %vm3900_vm7, %v3873_v36, %v13666_v22  ;;  %v13667_v20 = vld [vmem:[#allocation217_spill] sm:$0xff]  ;;  %vm13674_vm8 = vmmov %vm13672_vm4  ;;  %v4890_v9 = vshrl.u32 %v4745_v35, 16  ;;  %v4905_v33 = vor.u32 %v4904_v14, %v4900_v25  ;;  %v13683_v36 = vld [vmem:[#allocation295_spill] sm:$0xff] }
 0x5cc   : > { %4936 = vrot.lane.b32.xlu0 %v4889_v42, %s6389_s21  ;;  %v3937_v39 = vsel %vm13668_vm1, %v3904_v10, %v13667_v20  ;;  %v3939_v44 = vsel %vm13670_vm9, %v3906_v48, %v13669_v23  ;;  %v13673_v42 = vld [vmem:[#allocation47_spill] sm:$0xff]  ;;  %v11146_v12 = vadd.f32 %v13681_v17, %v10913_v8  ;;  %v13687_v25 = vld [vmem:[#allocation214_spill] sm:$0xff]  ;;  %v13688_v20 = vld [vmem:[#allocation221_spill] sm:$0xff] }
 0x5cd   : > { %v4895_v58 = vor.u32 %v4894_v52, %v4890_v9  ;;  %v13689_v23 = vld [vmem:[#allocation7_spill] sm:$0xff]  ;;  %v2542_v9 = vmax.f32 %v10968_v6, 0.0  ;;  %v13712_v17 = vld [vmem:[#allocation288_spill] sm:$0xff] }
 0x5ce   : > { %v4911_v62 = vpop.permute.xlu1 %4910  ;;  %v4262_v60 = vpop.permute.xlu0 %4261 }
 0x5cf   : > { %v4944_v11 = vsel %vm4942_vm0, %v4034_v2, %v4911_v62  ;;  %v4556_v37 = vsel %vm2150_vm10, %v4494_v29, %v4262_v60  ;;  %v4558_v46 = vsel %vm2150_vm10, %v4496_v53, %v4262_v60  ;;  %v3810_v53 = vsel %vm2282_vm14, %v3778_v56, %v13458_v61  ;;  %v13679_v29 = vld [vmem:[#allocation143_spill] sm:$0xff]  ;;  %v13680_v60 = vld [vmem:[#allocation64_spill] sm:$0xff]  ;;  %v13682_v56 = vld [vmem:[#allocation285_spill] sm:$0xff] }
 0x5d0   : > { %6139 = vmatprep.mubr.msk.bf16.mxu1 %vm5034_vm2, %v4944_v11  ;;  %v4603_v19 = vsel %vm2183_vm11, %v4556_v37, %v13624_v3  ;;  %v4605_v5 = vsel %vm2183_vm11, %v4558_v46, %v13624_v3  ;;  %v13671_v3 = vld [vmem:[#allocation228_spill] sm:$0xff]  ;;  %v3812_v61 = vsel %vm2282_vm14, %v3780_v47, %v9050_v32  ;;  %v3842_v35 = vsel %vm2342_vm15, %v3810_v53, %v13682_v56  ;;  %v13714_v56 = vld [vmem:[#allocation187_spill] sm:$0xff] }
 0x5d1   : > { %v4651_v15 = vsel %vm12676_vm13, %v4603_v19, %v4324_v55  ;;  %v4653_v21 = vsel %vm12676_vm13, %v4605_v5, %v4324_v55  ;;  %v3970_v27 = vsel %vm13672_vm4, %v3937_v39, %v13671_v3  ;;  %v3972_v55 = vsel %vm13674_vm8, %v3939_v44, %v13673_v42  ;;  %v13684_v5 = vld [vmem:[#allocation117_spill] sm:$0xff]  ;;  %v13685_v47 = vld [vmem:[#allocation196_spill] sm:$0xff]  ;;  %v13690_v44 = vld [vmem:[#allocation183_spill] sm:$0xff] }
 0x5d2   : > { %v4356_v24 = vpop.permute.xlu0 %4355  ;;  %vm13676_vm13 = vcmask 457728   ;;  %v4915_v13 = vpop.permute.xlu1 %4914  ;;  %v3844_v19 = vsel %vm2342_vm15, %v3812_v61, %v13683_v36  ;;  %v3875_v57 = vsel %vm3867_vm5, %v3842_v35, %v13684_v5  ;;  %v2540_v32 = vmax.f32 %v10978_v59, 0.0  ;;  %v13713_v61 = vld [vmem:[#allocation218_spill] sm:$0xff] }
 0x5d3   : > { %v4699_v30 = vsel %vm2249_vm12, %v4651_v15, %v4356_v24  ;;  %v4701_v18 = vsel %vm2249_vm12, %v4653_v21, %v4356_v24  ;;  %v4003_v7 = vsel %vm13676_vm13, %v3970_v27, %v13675_v31  ;;  %vm13678_vm1 = vmmov %vm13676_vm13  ;;  %v11164_v48 = vadd.f32 %v10913_v8, %v13685_v47  ;;  %v13686_v15 = vld [vmem:[#allocation312_spill] sm:$0xff]  ;;  %v13691_v24 = vld [vmem:[#allocation146_spill] sm:$0xff] }
 0x5d4   : > { %v4747_v4 = vsel %vm2282_vm14, %v4699_v30, %v6258_v40  ;;  %v4749_v34 = vsel %vm2282_vm14, %v4701_v18, %v6258_v40  ;;  %v4005_v2 = vsel %vm13678_vm1, %v3972_v55, %v13677_v26  ;;  %v4036_v11 = vsel %vm4032_vm3, %v4003_v7, %v13679_v29  ;;  %v13692_v27 = vld [vmem:[#allocation124_spill] sm:$0xff]  ;;  %v13695_v55 = vld [vmem:[#allocation225_spill] sm:$0xff]  ;;  %v13697_v7 = vld [vmem:[#allocation107_spill] sm:$0xff] }
 0x5d5   : > { %v4896_v62 = vshll.u32 %v4747_v4, 16  ;;  %v4906_v45 = vshll.u32 %v4749_v34, 16  ;;  %v4038_v28 = vsel %vm4032_vm3, %v4005_v2, %v13680_v60  ;;  %v3877_v21 = vsel %vm3867_vm5, %v3844_v19, %v13686_v15  ;;  %v13694_v18 = vld [vmem:[#allocation232_spill] sm:$0xff]  ;;  %vm13698_vm13 = vmmov %vm13672_vm4  ;;  %v13705_v29 = vld [vmem:[#allocation69_spill] sm:$0xff] }
 0x5d6   : > { %v4913_v0 = vpop.permute.xlu0 %4912  ;;  %v4948_v63 = vsel %vm4942_vm0, %v4038_v28, %v4915_v13  ;;  %v3908_v14 = vsel %vm3900_vm7, %v3875_v57, %v13687_v25  ;;  %v2432_v39 = vadd.f32 %v10913_v8, %v13688_v20  ;;  %v3688_v59 = vsel %vm2150_vm10, %v13690_v44, %v13689_v23  ;;  %v13701_v13 = vld [vmem:[#allocation73_spill] sm:$0xff]  ;;  %vm13702_vm1 = vmmov %vm13698_vm13  ;;  %v13707_v60 = vld [vmem:[#allocation62_spill] sm:$0xff] }
 0x5d7   : > { %v4898_v37 = vrot.slane %v4896_v62, 1  ;;  %v4908_v40 = vrot.slane %v4906_v45, 1  ;;  %v4946_v46 = vsel %vm4942_vm0, %v4036_v11, %v4913_v0  ;;  %v3910_v3 = vsel %vm3900_vm7, %v3877_v21, %v13691_v24  ;;  %v13709_v0 = vld [vmem:[#allocation197_spill] sm:$0xff]  ;;  %v13716_v19 = vld [vmem:[#allocation298_spill] sm:$0xff]  ;;  %v13719_v15 = vld [vmem:[#allocation215_spill] sm:$0xff] }
 0x5d8   : > { %6140 = vmatmul.mubr.msk.bf16.vlgmr.msra.gmra.mrb[32].mxu1 %vm5034_vm2, %v4946_v46  ;;  %v3718_v52 = vsel %vm2183_vm11, %v10987_v1, %v13694_v18  ;;  %v3720_v42 = vsel %vm2183_vm11, %v3688_v59, %v13452_v50  ;;  %v13703_v1 = vld [vmem:[#allocation205_spill] sm:$0xff]  ;;  %v4919_v50 = vpop.permute.xlu1 %4918  ;;  %v3690_v35 = vsel %vm2150_vm10, %v13714_v56, %v13713_v61  ;;  %v13717_v5 = vld [vmem:[#allocation306_spill] sm:$0xff]  ;;  %v13722_v23 = vld [vmem:[#allocation136_spill] sm:$0xff] }
 0x5d9   : > { %6143 = vmatprep.mubr.msk.bf16.mxu1 %vm5034_vm2, %v4948_v63  ;;  %v4909_v10 = vsel %vm1511_vm6, %v4905_v33, %v4908_v40  ;;  %v4899_v22 = vsel %vm1511_vm6, %v4895_v58, %v4898_v37  ;;  %vm13693_vm6 = vmmov %vm13670_vm9  ;;  %vm13699_vm9 = vcmask 195584   ;;  %v13710_v33 = vld [vmem:[#allocation55_spill] sm:$0xff]  ;;  %v2545_v40 = vmax.f32 %v11146_v12, 0.0  ;;  %v13711_v46 = vld [vmem:[#allocation277_spill] sm:$0xff] }
 0x5da   : > { %4940 = vrot.lane.b32.xlu0 %v4909_v10, %s6389_s21  ;;  %4938 = vrot.lane.b32.xlu1 %v4899_v22, %s6389_s21  ;;  %v3941_v30 = vsel %vm13693_vm6, %v3908_v14, %v13692_v27  ;;  %vm13696_vm8 = vmmov %vm13693_vm6  ;;  %v4917_v34 = vpop.permute.xlu0 %4916  ;;  %v3752_v26 = vsel %vm13699_vm9, %v3720_v42, %v13460_v43  ;;  %vm13704_vm6 = vcmask 457728   ;;  %v13715_v63 = vld [vmem:[#allocation219_spill] sm:$0xff]  ;;  %v2543_v10 = vmax.f32 %v11164_v48, 0.0  ;;  %v13720_v25 = vld [vmem:[#allocation58_spill] sm:$0xff] }
 0x5db   : > { %v3943_v31 = vsel %vm13696_vm8, %v3910_v3, %v13695_v55  ;;  %v3974_v4 = vsel %vm13698_vm13, %v3941_v30, %v13697_v7  ;;  %vm13700_vm4 = vmmov %vm13699_vm9  ;;  %v2440_v36 = vadd.f32 %v13715_v63, %v10913_v8  ;;  %v2544_v22 = vmax.f32 %v2432_v39, 0.0  ;;  %v13721_v14 = vld [vmem:[#allocation182_spill] sm:$0xff]  ;;  %v13723_v39 = vld [vmem:[#allocation201_spill] sm:$0xff] }
 0x5dc   : > { %v3750_v2 = vsel %vm13700_vm4, %v3718_v52, %v13451_v41  ;;  %v3976_v62 = vsel %vm13702_vm1, %v3943_v31, %v13701_v13  ;;  %v4007_v45 = vsel %vm13704_vm6, %v3974_v4, %v13703_v1  ;;  %vm13706_vm8 = vmmov %vm13704_vm6  ;;  %v13708_v41 = vld [vmem:[#allocation268_spill] sm:$0xff]  ;;  %v3692_v20 = vsel %vm2150_vm10, %v13721_v14, %v13720_v25  ;;  %v13726_v3 = vld [vmem:[#allocation134_spill] sm:$0xff]  ;;  %v4923_v1 = vpop.permute.xlu1 %4922 }
 0x5dd   : > { %v3782_v53 = vsel %vm2249_vm12, %v3750_v2, %v13459_v51  ;;  %v4009_v11 = vsel %vm13706_vm8, %v3976_v62, %v13705_v29  ;;  %v4040_v43 = vsel %vm4032_vm3, %v4007_v45, %v13707_v60  ;;  %v3784_v28 = vsel %vm2249_vm12, %v3752_v26, %v13708_v41  ;;  %v13724_v59 = vld [vmem:[#allocation224_spill] sm:$0xff]  ;;  %v13727_v30 = vld [vmem:[#allocation238_spill] sm:$0xff]  ;;  %vm13731_vm4 = vmmov %vm13702_vm1 }
 0x5de   : > { %5297 = vrot.lane.b32.xlu0 %v2540_v32, %s6375_s16  ;;  %5295 = vrot.lane.b32.xlu1 %v2539_v38, %s6375_s16  ;;  %v3814_v6 = vsel %vm2282_vm14, %v3782_v53, %v13709_v0  ;;  %v4042_v51 = vsel %vm4032_vm3, %v4009_v11, %v13710_v33  ;;  %v4950_v37 = vsel %vm4942_vm0, %v4040_v43, %v4917_v34  ;;  %v13718_v32 = vld [vmem:[#allocation317_spill] sm:$0xff]  ;;  %vm13725_vm13 = vcmask 392192   ;;  %v13730_v52 = vld [vmem:[#allocation90_spill] sm:$0xff]  ;;  %v4921_v55 = vpop.permute.xlu0 %4920  ;;  %v13732_v31 = vld [vmem:[#allocation247_spill] sm:$0xff] }
 0x5df   : > { %v3816_v58 = vsel %vm2282_vm14, %v3784_v28, %v13711_v46  ;;  %v3846_v16 = vsel %vm2342_vm15, %v3814_v6, %v13712_v17  ;;  %v4952_v38 = vsel %vm4942_vm0, %v4042_v51, %v4919_v50  ;;  %v3722_v48 = vsel %vm2183_vm11, %v3690_v35, %v13722_v23  ;;  %vm13729_vm9 = vmmov %vm13725_vm13  ;;  %v13734_v4 = vld [vmem:[#allocation250_spill] sm:$0xff]  ;;  %v13738_v13 = vld [vmem:[#allocation57_spill] sm:$0xff] }
 0x5e0   : > { %6144 = vmatmul.mubr.msk.bf16.gmra.mrb[36].mxu1 %vm5034_vm2, %v4950_v37  ;;  %v3848_v12 = vsel %vm2342_vm15, %v3816_v58, %v13716_v19  ;;  %v3879_v57 = vsel %vm3867_vm5, %v3846_v16, %v13717_v5  ;;  %v2445_v27 = vadd.f32 %v10913_v8, %v13726_v3  ;;  %v3724_v54 = vsel %vm2183_vm11, %v3692_v20, %v13727_v30  ;;  %v13736_v26 = vld [vmem:[#allocation122_spill] sm:$0xff]  ;;  %vm13737_vm8 = vmmov %vm13731_vm4  ;;  %v13740_v50 = vld [vmem:[#allocation265_spill] sm:$0xff] }
 0x5e1   : > { %6147 = vmatprep.mubr.msk.bf16.mxu1 %vm5034_vm2, %v4952_v38  ;;  %v3881_v47 = vsel %vm3867_vm5, %v3848_v12, %v13718_v32  ;;  %v3912_v21 = vsel %vm3900_vm7, %v3879_v57, %v13719_v15  ;;  %vm13733_vm1 = vcmask 195584   ;;  %v2546_v45 = vmax.f32 %v2440_v36, 0.0  ;;  %v13741_v53 = vld [vmem:[#allocation92_spill] sm:$0xff]  ;;  %v13743_v11 = vld [vmem:[#allocation53_spill] sm:$0xff]  ;;  %v13744_v43 = vld [vmem:[#allocation270_spill] sm:$0xff] }
 0x5e2   : > { %5301 = vrot.lane.b32.xlu0 %v2542_v9, %s6375_s16  ;;  %5299 = vrot.lane.b32.xlu1 %v2541_v49, %s6375_s16  ;;  %v3914_v44 = vsel %vm3900_vm7, %v3881_v47, %v13723_v39  ;;  %v3945_v24 = vsel %vm13725_vm13, %v3912_v21, %v13724_v59  ;;  %v13728_v49 = vld [vmem:[#allocation48_spill] sm:$0xff]  ;;  %v3756_v7 = vsel %vm13733_vm1, %v3724_v54, %v13732_v31  ;;  %vm13735_vm6 = vmmov %vm13733_vm1  ;;  %vm13739_vm13 = vcmask 457728   ;;  %v13745_v28 = vld [vmem:[#allocation157_spill] sm:$0xff] }
 0x5e3   : > { %v3947_v18 = vsel %vm13729_vm9, %v3914_v44, %v13728_v49  ;;  %v3978_v42 = vsel %vm13731_vm4, %v3945_v24, %v13730_v52  ;;  %v3754_v34 = vsel %vm13735_vm6, %v3722_v48, %v13734_v4  ;;  %vm13742_vm9 = vmmov %vm13739_vm13  ;;  %v3788_v41 = vsel %vm2249_vm12, %v3756_v7, %v13744_v43  ;;  %v13746_v6 = vld [vmem:[#allocation95_spill] sm:$0xff]  ;;  %v13748_v58 = vld [vmem:[#allocation278_spill] sm:$0xff]  ;;  %v4925_v49 = vpop.permute.xlu0 %4924 }
 0x5e4   : > { %v3980_v2 = vsel %vm13737_vm8, %v3947_v18, %v13736_v26  ;;  %v4011_v62 = vsel %vm13739_vm13, %v3978_v42, %v13738_v13  ;;  %v3786_v9 = vsel %vm2249_vm12, %v3754_v34, %v13740_v50  ;;  %v13747_v37 = vld [vmem:[#allocation239_spill] sm:$0xff]  ;;  %v3820_v17 = vsel %vm2282_vm14, %v3788_v41, %v13748_v58  ;;  %v13749_v16 = vld [vmem:[#allocation293_spill] sm:$0xff]  ;;  %v13750_v56 = vld [vmem:[#allocation76_spill] sm:$0xff] }
 0x5e5   : > { %v4013_v29 = vsel %vm13742_vm9, %v3980_v2, %v13741_v53  ;;  %v4044_v60 = vsel %vm4032_vm3, %v4011_v62, %v13743_v11  ;;  %v3818_v0 = vsel %vm2282_vm14, %v3786_v9, %v13745_v28  ;;  %v2448_v46 = vadd.f32 %v10913_v8, %v13747_v37  ;;  %v13751_v35 = vld [vmem:[#allocation88_spill] sm:$0xff]  ;;  %v13752_v36 = vld [vmem:[#allocation299_spill] sm:$0xff]  ;;  %v13756_v47 = vld [vmem:[#allocation145_spill] sm:$0xff] }
 0x5e6   : > { %5305 = vrot.lane.b32.xlu0 %v2544_v22, %s6375_s16  ;;  %5303 = vrot.lane.b32.xlu1 %v2543_v10, %s6375_s16  ;;  %v4046_v33 = vsel %vm4032_vm3, %v4013_v29, %v13746_v6  ;;  %v4954_v51 = vsel %vm4942_vm0, %v4044_v60, %v4921_v55  ;;  %v3850_v38 = vsel %vm2342_vm15, %v3818_v0, %v13749_v16  ;;  %v13753_v12 = vld [vmem:[#allocation311_spill] sm:$0xff]  ;;  %v13755_v22 = vld [vmem:[#allocation209_spill] sm:$0xff]  ;;  %v13757_v21 = vld [vmem:[#allocation6_spill] sm:$0xff]  ;;  %vm13761_vm4 = vcmask 392192  }
 0x5e7   : > { %v4956_v61 = vsel %vm4942_vm0, %v4046_v33, %v4923_v1  ;;  %v3694_v63 = vsel %vm2150_vm10, %v13751_v35, %v13750_v56  ;;  %v3852_v19 = vsel %vm2342_vm15, %v3820_v17, %v13752_v36  ;;  %v3883_v5 = vsel %vm3867_vm5, %v3850_v38, %v13753_v12  ;;  %v13754_v57 = vld [vmem:[#allocation211_spill] sm:$0xff]  ;;  %v13758_v14 = vld [vmem:[#allocation237_spill] sm:$0xff]  ;;  %v13759_v23 = vld [vmem:[#allocation180_spill] sm:$0xff] }
 0x5e8   : > { %6148 = vmatmul.mubr.msk.bf16.gmra.mrb[40].mxu1 %vm5034_vm2, %v4954_v51  ;;  %v2453_v10 = vadd.f32 %v13754_v57, %v10913_v8  ;;  %v3885_v32 = vsel %vm3867_vm5, %v3852_v19, %v13755_v22  ;;  %v3916_v15 = vsel %vm3900_vm7, %v3883_v5, %v13756_v47  ;;  %v3726_v25 = vsel %vm2183_vm11, %v3694_v63, %v13757_v21  ;;  %v13760_v39 = vld [vmem:[#allocation54_spill] sm:$0xff]  ;;  %v13762_v3 = vld [vmem:[#allocation100_spill] sm:$0xff]  ;;  %vm13763_vm1 = vmmov %vm13761_vm4 }
 0x5e9   : > { %6151 = vmatprep.mubr.msk.bf16.mxu1 %vm5034_vm2, %v4956_v61  ;;  %v2456_v20 = vadd.f32 %v13758_v14, %v10913_v8  ;;  %v3918_v48 = vsel %vm3900_vm7, %v3885_v32, %v13759_v23  ;;  %v3949_v44 = vsel %vm13761_vm4, %v3916_v15, %v13760_v39  ;;  %v2547_v59 = vmax.f32 %v2445_v27, 0.0  ;;  %v13764_v54 = vld [vmem:[#allocation130_spill] sm:$0xff]  ;;  %vm13765_vm6 = vmmov %vm13737_vm8  ;;  %v13766_v18 = vld [vmem:[#allocation252_spill] sm:$0xff] }
 0x5ea   : > { %5309 = vrot.lane.b32.xlu0 %v2546_v45, %s6375_s16  ;;  %5307 = vrot.lane.b32.xlu1 %v2545_v40, %s6375_s16  ;;  %v2548_v24 = vmax.f32 %v2448_v46, 0.0  ;;  %v3951_v30 = vsel %vm13763_vm1, %v3918_v48, %v13762_v3  ;;  %v3982_v40 = vsel %vm13765_vm6, %v3949_v44, %v13764_v54  ;;  %vm13767_vm8 = vcmask 195584   ;;  %v13768_v42 = vld [vmem:[#allocation110_spill] sm:$0xff]  ;;  %vm13769_vm13 = vmmov %vm13765_vm6  ;;  %v4927_v4 = vpop.permute.xlu1 %4926  ;;  %v13771_v27 = vld [vmem:[#allocation267_spill] sm:$0xff] }
 0x5eb   : > { %v3758_v52 = vsel %vm13767_vm8, %v3726_v25, %v13766_v18  ;;  %v3984_v55 = vsel %vm13769_vm13, %v3951_v30, %v13768_v42  ;;  %v13770_v31 = vld [vmem:[#allocation66_spill] sm:$0xff]  ;;  %v2549_v34 = vmax.f32 %v2453_v10, 0.0  ;;  %vm13773_vm4 = vmmov %vm13742_vm9  ;;  %v13774_v62 = vld [vmem:[#allocation72_spill] sm:$0xff]  ;;  %v2550_v45 = vmax.f32 %v2456_v20, 0.0 }
 0x5ec   : > { %v4015_v7 = vsel %vm13742_vm9, %v3982_v40, %v13770_v31  ;;  %v3790_v26 = vsel %vm2249_vm12, %v3758_v52, %v13771_v27  ;;  %v13772_v2 = vld [vmem:[#allocation70_spill] sm:$0xff]  ;;  %v13775_v50 = vld [vmem:[#allocation276_spill] sm:$0xff]  ;;  %v13776_v53 = vld [vmem:[#allocation83_spill] sm:$0xff]  ;;  %vm13797_vm13 = vcmask 195584  }
 0x5ed   : > { %v4017_v13 = vsel %vm13773_vm4, %v3984_v55, %v13772_v2  ;;  %v4048_v1 = vsel %vm4032_vm3, %v4015_v7, %v13774_v62  ;;  %v3822_v9 = vsel %vm2282_vm14, %v3790_v26, %v13775_v50  ;;  %v13777_v60 = vld [vmem:[#allocation256_spill] sm:$0xff]  ;;  %v13779_v0 = vld [vmem:[#allocation297_spill] sm:$0xff]  ;;  %v13780_v51 = vld [vmem:[#allocation315_spill] sm:$0xff] }
 0x5ee   : > { %5313 = vrot.lane.b32.xlu0 %v2548_v24, %s6375_s16  ;;  %5311 = vrot.lane.b32.xlu1 %v2547_v59, %s6375_s16  ;;  %v4050_v29 = vsel %vm4032_vm3, %v4017_v13, %v13776_v53  ;;  %v4958_v11 = vsel %vm4942_vm0, %v4048_v1, %v4925_v49  ;;  %v2461_v43 = vadd.f32 %v10913_v8, %v13777_v60  ;;  %v13778_v41 = vld [vmem:[#allocation260_spill] sm:$0xff]  ;;  %v13781_v46 = vld [vmem:[#allocation109_spill] sm:$0xff]  ;;  %v13782_v17 = vld [vmem:[#allocation255_spill] sm:$0xff] }
 0x5ef   : > { %v2464_v28 = vadd.f32 %v10913_v8, %v13778_v41  ;;  %v3854_v6 = vsel %vm2342_vm15, %v3822_v9, %v13779_v0  ;;  %v4960_v33 = vsel %vm4942_vm0, %v4050_v29, %v4927_v4  ;;  %v2469_v16 = vadd.f32 %v13782_v17, %v10913_v8  ;;  %v13783_v38 = vld [vmem:[#allocation216_spill] sm:$0xff]  ;;  %v13784_v35 = vld [vmem:[#allocation258_spill] sm:$0xff]  ;;  %vm13787_vm8 = vmmov %vm13773_vm4 }
 0x5f0   : > { %6152 = vmatmul.mubr.msk.bf16.gmra.mrb[44].mxu1 %vm5034_vm2, %v4958_v11  ;;  %v3887_v37 = vsel %vm3867_vm5, %v3854_v6, %v13780_v51  ;;  %v2551_v56 = vmax.f32 %v2461_v43, 0.0  ;;  %v2472_v63 = vadd.f32 %v13784_v35, %v10913_v8  ;;  %v13785_v19 = vld [vmem:[#allocation102_spill] sm:$0xff]  ;;  %v13786_v57 = vld [vmem:[#allocation116_spill] sm:$0xff]  ;;  %v13789_v25 = vld [vmem:[#allocation85_spill] sm:$0xff] }
 0x5f1   : > { %6155 = vmatprep.mubr.msk.bf16.mxu1 %vm5034_vm2, %v4960_v33  ;;  %v3920_v58 = vsel %vm3900_vm7, %v3887_v37, %v13781_v46  ;;  %v2552_v36 = vmax.f32 %v2464_v28, 0.0  ;;  %v13788_v22 = vld [vmem:[#allocation94_spill] sm:$0xff]  ;;  %v2553_v15 = vmax.f32 %v2469_v16, 0.0  ;;  %v2477_v14 = vadd.f32 %v10913_v8, %v13789_v25  ;;  %v13791_v48 = vld [vmem:[#allocation223_spill] sm:$0xff]  ;;  %v13792_v39 = vld [vmem:[#allocation188_spill] sm:$0xff] }
 0x5f2   : > { %5317 = vrot.lane.b32.xlu0 %v2550_v45, %s6375_s16  ;;  %5315 = vrot.lane.b32.xlu1 %v2549_v34, %s6375_s16  ;;  %v3953_v61 = vsel %vm13763_vm1, %v3920_v58, %v13783_v38  ;;  %v4929_v5 = vpop.permute.xlu0 %4928  ;;  %v2554_v21 = vmax.f32 %v2472_v63, 0.0  ;;  %v13790_v20 = vld [vmem:[#allocation274_spill] sm:$0xff]  ;;  %v3696_v44 = vsel %vm2150_vm10, %v13792_v39, %v13791_v48  ;;  %v13794_v3 = vld [vmem:[#allocation240_spill] sm:$0xff]  ;;  %v13796_v52 = vld [vmem:[#allocation249_spill] sm:$0xff] }
 0x5f3   : > { %v3986_v12 = vsel %vm13765_vm6, %v3953_v61, %v13785_v19  ;;  %v2480_v23 = vadd.f32 %v10913_v8, %v13790_v20  ;;  %v13793_v59 = vld [vmem:[#allocation186_spill] sm:$0xff]  ;;  %v3728_v30 = vsel %vm2183_vm11, %v3696_v44, %v13794_v3  ;;  %v2555_v54 = vmax.f32 %v2477_v14, 0.0  ;;  %v13795_v40 = vld [vmem:[#allocation272_spill] sm:$0xff]  ;;  %v13798_v55 = vld [vmem:[#allocation271_spill] sm:$0xff] }
 0x5f4   : > { %v4019_v10 = vsel %vm13787_vm8, %v3986_v12, %v13786_v57  ;;  %v2485_v24 = vadd.f32 %v13793_v59, %v10913_v8  ;;  %v2488_v49 = vadd.f32 %v13795_v40, %v10913_v8  ;;  %v3760_v42 = vsel %vm13797_vm13, %v3728_v30, %v13796_v52  ;;  %v13799_v4 = vld [vmem:[#allocation280_spill] sm:$0xff]  ;;  %v13803_v50 = vld [vmem:[#allocation210_spill] sm:$0xff]  ;;  %v13805_v11 = vld [vmem:[#allocation291_spill] sm:$0xff] }
 0x5f5   : > { %v4052_v32 = vsel %vm4032_vm3, %v4019_v10, %v13788_v22  ;;  %v2556_v18 = vmax.f32 %v2480_v23, 0.0  ;;  %v3792_v31 = vsel %vm2249_vm12, %v3760_v42, %v13798_v55  ;;  %v13800_v26 = vld [vmem:[#allocation292_spill] sm:$0xff]  ;;  %v13804_v53 = vld [vmem:[#allocation46_spill] sm:$0xff]  ;;  %v2501_v60 = vadd.f32 %v13805_v11, %v10913_v8  ;;  %v13806_v43 = vld [vmem:[#allocation77_spill] sm:$0xff] }
 0x5f6   : > { %5321 = vrot.lane.b32.xlu0 %v2552_v36, %s6375_s16  ;;  %5319 = vrot.lane.b32.xlu1 %v2551_v56, %s6375_s16  ;;  %v4962_v47 = vsel %vm4942_vm0, %v4052_v32, %v4929_v5  ;;  %v2557_v7 = vmax.f32 %v2485_v24, 0.0  ;;  %v3824_v34 = vsel %vm2282_vm14, %v3792_v31, %v13799_v4  ;;  %v2558_v27 = vmax.f32 %v2488_v49, 0.0  ;;  %v13801_v13 = vld [vmem:[#allocation296_spill] sm:$0xff]  ;;  %vm13807_vm11 = vmmov %vm13763_vm1  ;;  %v13808_v0 = vld [vmem:[#allocation294_spill] sm:$0xff] }
 0x5f7   : > { %v2493_v2 = vadd.f32 %v10913_v8, %v13800_v26  ;;  %v2496_v62 = vadd.f32 %v10913_v8, %v13801_v13  ;;  %v13802_v1 = vld [vmem:[#allocation300_spill] sm:$0xff]  ;;  %v2504_v6 = vadd.f32 %v13808_v0, %v10913_v8  ;;  %vm13810_vm12 = vmmov %vm13765_vm6  ;;  %v13811_v46 = vld [vmem:[#allocation63_spill] sm:$0xff]  ;;  %v2561_v56 = vmax.f32 %v2501_v60, 0.0 }
 0x5f8   : > { %6156 = vmatmul.mubr.msk.bf16.gmra.mrb[48].mxu1 %vm5034_vm2, %v4962_v47  ;;  %v3856_v45 = vsel %vm2342_vm15, %v3824_v34, %v13802_v1  ;;  %v13809_v51 = vld [vmem:[#allocation200_spill] sm:$0xff]  ;;  %vm13812_vm15 = vmmov %vm13773_vm4  ;;  %v13813_v17 = vld [vmem:[#allocation87_spill] sm:$0xff] }
 0x5f9   : > { %v3889_v9 = vsel %vm3867_vm5, %v3856_v45, %v13803_v50  ;;  %v2559_v28 = vmax.f32 %v2493_v2, 0.0  ;;  %v2560_v33 = vmax.f32 %v2496_v62, 0.0  ;;  %v2562_v35 = vmax.f32 %v2504_v6, 0.0  ;;  %v13814_v63 = vld [vmem:[#allocation305_spill] sm:$0xff]  ;;  %v13816_v10 = vld [vmem:[#allocation304_spill] sm:$0xff]  ;;  %v13817_v47 = vld [vmem:[#allocation307_spill] sm:$0xff] }
 0x5fa   : > { %5325 = vrot.lane.b32.xlu0 %v2554_v21, %s6375_s16  ;;  %5323 = vrot.lane.b32.xlu1 %v2553_v15, %s6375_s16  ;;  %v3922_v29 = vsel %vm3900_vm7, %v3889_v9, %v13804_v53  ;;  %v2509_v36 = vadd.f32 %v10913_v8, %v13814_v63  ;;  %v13815_v19 = vld [vmem:[#allocation309_spill] sm:$0xff]  ;;  %v2517_v22 = vadd.f32 %v13816_v10, %v10913_v8  ;;  %v13818_v14 = vld [vmem:[#allocation86_spill] sm:$0xff]  ;;  %v13822_v31 = vld [vmem:[#allocation316_spill] sm:$0xff]  ;;  %vm13839_vm5 = vcmask 64512  }
 0x5fb   : > { %v3955_v41 = vsel %vm13807_vm11, %v3922_v29, %v13806_v43  ;;  %v2512_v12 = vadd.f32 %v10913_v8, %v13815_v19  ;;  %v11423_v5 = vpop.f32.mrb[0].mxu1  ;;  %v2520_v15 = vadd.f32 %v13817_v47, %v10913_v8  ;;  %v13819_v24 = vld [vmem:[#allocation314_spill] sm:$0xff]  ;;  %v13821_v52 = vld [vmem:[#allocation313_spill] sm:$0xff]  ;;  %v13825_v19 = vld [vmem:[#allocation168_spill] sm:$0xff] }
 0x5fc   : > { %v3988_v37 = vsel %vm13810_vm12, %v3955_v41, %v13809_v51  ;;  %v11427_v57 = vpop.f32.mrb[1].mxu1  ;;  %v2563_v32 = vmax.f32 %v2509_v36, 0.0  ;;  %v2565_v44 = vmax.f32 %v2517_v22, 0.0  ;;  %v2525_v3 = vadd.f32 %v10913_v8, %v13819_v24  ;;  %v13820_v30 = vld [vmem:[#allocation318_spill] sm:$0xff]  ;;  %v13826_v10 = vld [vmem:[#allocation97_spill] sm:$0xff]  ;;  %vm13842_vm7 = vmmov %vm13839_vm5 }
 0x5fd   : > { %v4021_v58 = vsel %vm13812_vm15, %v3988_v37, %v13811_v46  ;;  %v2564_v21 = vmax.f32 %v2512_v12, 0.0  ;;  %v11435_v23 = vpop.f32.mrb[2].mxu1  ;;  %v2566_v59 = vmax.f32 %v2520_v15, 0.0  ;;  %v2533_v42 = vadd.f32 %v13821_v52, %v10913_v8  ;;  %v13823_v6 = vld [vmem:[#allocation74_spill] sm:$0xff]  ;;  %v13824_v37 = vld [vmem:[#allocation75_spill] sm:$0xff] }
 0x5fe   : > { %5329 = vrot.lane.b32.xlu0 %v2556_v18, %s6375_s16  ;;  %5327 = vrot.lane.b32.xlu1 %v2555_v54, %s6375_s16  ;;  %v4054_v16 = vsel %vm4032_vm3, %v4021_v58, %v13813_v17  ;;  %v11439_v48 = vpop.f32.mrb[3].mxu1  ;;  %v2528_v54 = vadd.f32 %v10913_v8, %v13820_v30  ;;  %v2567_v55 = vmax.f32 %v2525_v3, 0.0  ;;  %v11527_v47 = vld [vmem:[%s12176_s8] ss:$0 sm:$0xff]  ;;  %vm13843_vm3 = vmmov %vm13797_vm13 }
 0x600   : > { %v2568_v4 = vmax.f32 %v2528_v54, 0.0 }
 0x602   : > { %5333 = vrot.lane.b32.xlu0 %v2558_v27, %s6375_s16  ;;  %5331 = vrot.lane.b32.xlu1 %v2557_v7, %s6375_s16  ;;  %v2536_v7 = vadd.f32 %v13822_v31, %v10913_v8  ;;  %v2569_v27 = vmax.f32 %v2533_v42, 0.0 }
 0x604   : > { %v2570_v26 = vmax.f32 %v2536_v7, 0.0 }
 0x605   : > { %v11442_v39 = vpop.f32.mrb[4].mxu1 }
 0x606   : > { %5337 = vrot.lane.b32.xlu0 %v2560_v33, %s6375_s16  ;;  %5335 = vrot.lane.b32.xlu1 %v2559_v28, %s6375_s16  ;;  %v4931_v38 = vpop.permute.xlu1 %4930  ;;  %v11448_v40 = vpop.f32.mrb[5].mxu1 }
 0x607   : > { %v4964_v61 = vsel %vm4942_vm0, %v4054_v16, %v4931_v38  ;;  %v11450_v49 = vpop.f32.mrb[6].mxu1 }
 0x608   : > { %6159 = vmatprep.mubr.msk.bf16.mxu1 %vm5034_vm2, %v4964_v61  ;;  %v11454_v18 = vpop.f32.mrb[7].mxu1 }
 0x60a   : > { %5341 = vrot.lane.b32.xlu0 %v2562_v35, %s6375_s16  ;;  %5339 = vrot.lane.b32.xlu1 %v2561_v56, %s6375_s16 }
 0x60b   : > { %v4933_v25 = vpop.permute.xlu0 %4932 }
 0x60c   : > { %v4966_v20 = vsel %vm4942_vm0, %v13818_v14, %v4933_v25 }
 0x60d   : > { %6160 = vmatmul.mubr.msk.bf16.gmra.mrb[52].mxu1 %vm5034_vm2, %v4966_v20 }
 0x60e   : > { %5345 = vrot.lane.b32.xlu0 %v2564_v21, %s6375_s16  ;;  %5343 = vrot.lane.b32.xlu1 %v2563_v32, %s6375_s16 }
 0x612   : > { %5349 = vrot.lane.b32.xlu0 %v2566_v59, %s6375_s16  ;;  %5347 = vrot.lane.b32.xlu1 %v2565_v44, %s6375_s16 }
 0x613   : > { %v11462_v34 = vpop.f32.mrb[8].mxu1 }
 0x614   : > { %v11464_v2 = vpop.f32.mrb[9].mxu1 }
 0x615   : > { %v11466_v13 = vpop.f32.mrb[10].mxu1 }
 0x616   : > { %5353 = vrot.lane.b32.xlu0 %v2568_v4, %s6375_s16  ;;  %5351 = vrot.lane.b32.xlu1 %v2567_v55, %s6375_s16  ;;  %v11470_v62 = vpop.f32.mrb[11].mxu1 }
 0x61a   : > { %5357 = vrot.lane.b32.xlu0 %v2570_v26, %s6375_s16  ;;  %5355 = vrot.lane.b32.xlu1 %v2569_v27, %s6375_s16 }
 0x621   : > { %v11472_v8 = vpop.f32.mrb[12].mxu1 }
 0x622   : > { %v11474_v1 = vpop.f32.mrb[13].mxu1 }
 0x623   : > { %v11476_v45 = vpop.f32.mrb[14].mxu1 }
 0x624   : > { %v11478_v50 = vpop.f32.mrb[15].mxu1 }
 0x62a   : > { %v11480_v9 = vpop.f32.mrb[16].mxu1 }
 0x62b   : > { %v11482_v53 = vpop.f32.mrb[17].mxu1 }
 0x62c   : > { %v11484_v29 = vpop.f32.mrb[18].mxu1 }
 0x62d   : > { %v11486_v11 = vpop.f32.mrb[19].mxu1 }
 0x638   : > { %v11488_v60 = vpop.f32.mrb[20].mxu1 }
 0x639   : > { %v11490_v43 = vpop.f32.mrb[21].mxu1 }
 0x63a   : > { %v11492_v41 = vpop.f32.mrb[22].mxu1  ;;  %v4935_v0 = vpop.permute.xlu1 %4934 }
 0x63b   : > { %v11494_v28 = vpop.f32.mrb[23].mxu1  ;;  %v4968_v33 = vsel %vm4942_vm0, %v13823_v6, %v4935_v0 }
 0x63c   : > { %6163 = vmatprep.mubr.msk.bf16.mxu1 %vm5034_vm2, %v4968_v33 }
 0x63e   : > { %v4937_v51 = vpop.permute.xlu0 %4936 }
 0x63f   : > { %v4970_v46 = vsel %vm4942_vm0, %v13824_v37, %v4937_v51 }
 0x640   : > { %6164 = vmatmul.mubr.msk.bf16.gmra.mrb[56].mxu1 %vm5034_vm2, %v4970_v46 }
 0x646   : > { %v11502_v58 = vpop.f32.mrb[24].mxu1 }
 0x647   : > { %v11504_v17 = vpop.f32.mrb[25].mxu1 }
 0x648   : > { %v11506_v16 = vpop.f32.mrb[26].mxu1 }
 0x649   : > { %v11508_v38 = vpop.f32.mrb[27].mxu1 }
 0x64c   : > { %v4939_v63 = vpop.permute.xlu1 %4938  ;;  %v4941_v36 = vpop.permute.xlu0 %4940 }
 0x64d   : > { %v4972_v12 = vsel %vm4942_vm0, %v13825_v19, %v4939_v63  ;;  %v4974_v22 = vsel %vm4942_vm0, %v13826_v10, %v4941_v36  ;;  %vm13846_vm0 = vmmov %vm13839_vm5 }
 0x64e   : > { %v11510_v61 = vpop.f32.mrb[28].mxu1  ;;  %6167 = vmatprep.mubr.msk.bf16.mxu1 %vm5034_vm2, %v4972_v12  ;;  %vm13850_vm9 = vmmov %vm13846_vm0 }
 0x64f   : > { %v11512_v56 = vpop.f32.mrb[29].mxu1  ;;  %6168 = vmatmul.mubr.msk.bf16.gmra.mrb[60].mxu1 %vm5034_vm2, %v4974_v22  ;;  %vm13847_vm2 = vmmov %vm13843_vm3 }
 0x650   : > { %v11514_v35 = vpop.f32.mrb[30].mxu1  ;;  %vm13851_vm4 = vmmov %vm13847_vm2 }
 0x651   : > { %v11520_v32 = vpop.f32.mrb[31].mxu1  ;;  %vm13854_vm1 = vmmov %vm13846_vm0 }
 0x652   : > { %vm13855_vm6 = vmmov %vm13847_vm2 }
 0x653   : > { %vm13858_vm8 = vmmov %vm13846_vm0 }
 0x654   : > { %vm13859_vm13 = vmmov %vm13847_vm2 }
 0x655   : > { %vm13862_vm11 = vmmov %vm13846_vm0 }
 0x656   : > { %vm13863_vm12 = vmmov %vm13847_vm2 }
 0x657   : > { %vm13866_vm15 = vmmov %vm13846_vm0 }
 0x6ab   : > { %v6141_v15 = vpop.f32.mrb[32].mxu1 }
 0x6ac   : > { %v5104_v21 = vpop.f32.mrb[33].mxu1  ;;  %v5113_v44 = vadd.f32 %v6141_v15, %v11527_v47 }
 0x6ad   : > { %v5105_v25 = vadd.f32 %v11527_v47, %v5104_v21  ;;  %v6142_v14 = vpop.f32.mrb[34].mxu1 }
 0x6ae   : > { %v5107_v20 = vpop.f32.mrb[35].mxu1  ;;  %v5116_v3 = vadd.f32 %v6142_v14, %v11527_v47  ;;  %v5233_v54 = vmax.f32 %v5113_v44, 0.0 }
 0x6af   : > { %v5231_v59 = vmax.f32 %v5105_v25, 0.0  ;;  %v5108_v24 = vadd.f32 %v11527_v47, %v5107_v20 }
 0x6b0   : > { %v5234_v55 = vmax.f32 %v5116_v3, 0.0 }
 0x6b1   : > { %v5232_v30 = vmax.f32 %v5108_v24, 0.0  ;;  %5423 = vrot.lane.b32.xlu1 %v5231_v59, %s6381_s22 }
 0x6b3   : > { %5425 = vrot.lane.b32.xlu0 %v5232_v30, %s6381_s22  ;;  %v6145_v52 = vpop.f32.mrb[36].mxu1 }
 0x6b4   : > { %v5120_v42 = vpop.f32.mrb[37].mxu1  ;;  %v5129_v27 = vadd.f32 %v6145_v52, %v11527_v47 }
 0x6b5   : > { %v5121_v31 = vadd.f32 %v11527_v47, %v5120_v42  ;;  %5427 = vrot.lane.b32.xlu1 %v5233_v54, %s6381_s22  ;;  %v6146_v7 = vpop.f32.mrb[38].mxu1 }
 0x6b6   : > { %v5123_v4 = vpop.f32.mrb[39].mxu1  ;;  %v5132_v6 = vadd.f32 %v6146_v7, %v11527_v47  ;;  %v5237_v51 = vmax.f32 %v5129_v27, 0.0 }
 0x6b7   : > { %v5235_v26 = vmax.f32 %v5121_v31, 0.0  ;;  %v5124_v0 = vadd.f32 %v11527_v47, %v5123_v4  ;;  %5429 = vrot.lane.b32.xlu0 %v5234_v55, %s6381_s22 }
 0x6b8   : > { %v5238_v63 = vmax.f32 %v5132_v6, 0.0 }
 0x6b9   : > { %v5236_v33 = vmax.f32 %v5124_v0, 0.0  ;;  %5431 = vrot.lane.b32.xlu1 %v5235_v26, %s6381_s22 }
 0x6bb   : > { %5433 = vrot.lane.b32.xlu0 %v5236_v33, %s6381_s22  ;;  %v6149_v37 = vpop.f32.mrb[40].mxu1 }
 0x6bc   : > { %v5136_v46 = vpop.f32.mrb[41].mxu1  ;;  %v5145_v10 = vadd.f32 %v6149_v37, %v11527_v47 }
 0x6bd   : > { %v5137_v36 = vadd.f32 %v11527_v47, %v5136_v46  ;;  %5435 = vrot.lane.b32.xlu1 %v5237_v51, %s6381_s22  ;;  %v6150_v19 = vpop.f32.mrb[42].mxu1 }
 0x6be   : > { %v5139_v12 = vpop.f32.mrb[43].mxu1  ;;  %v5148_v21 = vadd.f32 %v6150_v19, %v11527_v47  ;;  %v5241_v14 = vmax.f32 %v5145_v10, 0.0 }
 0x6bf   : > { %v5239_v22 = vmax.f32 %v5137_v36, 0.0  ;;  %v5140_v15 = vadd.f32 %v11527_v47, %v5139_v12  ;;  %5437 = vrot.lane.b32.xlu0 %v5238_v63, %s6381_s22 }
 0x6c0   : > { %v5242_v59 = vmax.f32 %v5148_v21, 0.0 }
 0x6c1   : > { %v5240_v25 = vmax.f32 %v5140_v15, 0.0  ;;  %5439 = vrot.lane.b32.xlu1 %v5239_v22, %s6381_s22 }
 0x6c3   : > { %5441 = vrot.lane.b32.xlu0 %v5240_v25, %s6381_s22  ;;  %v6153_v20 = vpop.f32.mrb[44].mxu1 }
 0x6c4   : > { %v5152_v44 = vpop.f32.mrb[45].mxu1  ;;  %v5161_v54 = vadd.f32 %v6153_v20, %v11527_v47 }
 0x6c5   : > { %v5153_v24 = vadd.f32 %v11527_v47, %v5152_v44  ;;  %5443 = vrot.lane.b32.xlu1 %v5241_v14, %s6381_s22  ;;  %v6154_v3 = vpop.f32.mrb[46].mxu1 }
 0x6c6   : > { %v5155_v30 = vpop.f32.mrb[47].mxu1  ;;  %v5164_v55 = vadd.f32 %v6154_v3, %v11527_v47  ;;  %v5245_v7 = vmax.f32 %v5161_v54, 0.0  ;;  %v11576_v54 = vpop.permute.xlu1 %5295 }
 0x6c7   : > { %v5243_v52 = vmax.f32 %v5153_v24, 0.0  ;;  %v5156_v42 = vadd.f32 %v11527_v47, %v5155_v30  ;;  %5445 = vrot.lane.b32.xlu0 %v5242_v59, %s6381_s22 }
 0x6c8   : > { %v5246_v26 = vmax.f32 %v5164_v55, 0.0 }
 0x6c9   : > { %v5244_v31 = vmax.f32 %v5156_v42, 0.0  ;;  %5447 = vrot.lane.b32.xlu1 %v5243_v52, %s6381_s22  ;;  %v11579_v52 = vpop.permute.xlu0 %5297 }
 0x6ca   : > { %v11581_v42 = vpop.permute.xlu1 %5299 }
 0x6cb   : > { %5449 = vrot.lane.b32.xlu0 %v5244_v31, %s6381_s22  ;;  %v6157_v4 = vpop.f32.mrb[48].mxu1 }
 0x6cc   : > { %v5168_v27 = vpop.f32.mrb[49].mxu1  ;;  %v5177_v51 = vadd.f32 %v6157_v4, %v11527_v47 }
 0x6cd   : > { %v5169_v0 = vadd.f32 %v11527_v47, %v5168_v27  ;;  %5451 = vrot.lane.b32.xlu1 %v5245_v7, %s6381_s22  ;;  %v6158_v6 = vpop.f32.mrb[50].mxu1  ;;  %v11583_v55 = vpop.permute.xlu0 %5301 }
 0x6ce   : > { %v5171_v33 = vpop.f32.mrb[51].mxu1  ;;  %v5180_v63 = vadd.f32 %v6158_v6, %v11527_v47  ;;  %v5249_v19 = vmax.f32 %v5177_v51, 0.0  ;;  %v11585_v31 = vpop.permute.xlu1 %5303 }
 0x6cf   : > { %v5247_v37 = vmax.f32 %v5169_v0, 0.0  ;;  %v5172_v46 = vadd.f32 %v11527_v47, %v5171_v33  ;;  %5453 = vrot.lane.b32.xlu0 %v5246_v26, %s6381_s22 }
 0x6d0   : > { %v5250_v12 = vmax.f32 %v5180_v63, 0.0 }
 0x6d1   : > { %v5248_v36 = vmax.f32 %v5172_v46, 0.0  ;;  %5455 = vrot.lane.b32.xlu1 %v5247_v37, %s6381_s22  ;;  %v11587_v7 = vpop.permute.xlu0 %5305 }
 0x6d2   : > { %v11589_v4 = vpop.permute.xlu1 %5307 }
 0x6d3   : > { %5457 = vrot.lane.b32.xlu0 %v5248_v36, %s6381_s22 }
 0x6d5   : > { %5459 = vrot.lane.b32.xlu1 %v5249_v19, %s6381_s22  ;;  %v11591_v27 = vpop.permute.xlu0 %5309 }
 0x6d6   : > { %v11593_v26 = vpop.permute.xlu1 %5311 }
 0x6d7   : > { %5461 = vrot.lane.b32.xlu0 %v5250_v12, %s6381_s22 }
 0x6d9   : > { %v11595_v0 = vpop.permute.xlu0 %5313 }
 0x6da   : > { %v11597_v6 = vpop.permute.xlu1 %5315 }
 0x6dd   : > { %v11599_v33 = vpop.permute.xlu0 %5317 }
 0x6de   : > { %v11601_v51 = vpop.permute.xlu1 %5319 }
 0x6e0   : > { %v6161_v10 = vpop.f32.mrb[52].mxu1 }
 0x6e1   : > { %v5184_v22 = vpop.f32.mrb[53].mxu1  ;;  %v5193_v14 = vadd.f32 %v6161_v10, %v11527_v47  ;;  %v11603_v37 = vpop.permute.xlu0 %5321 }
 0x6e2   : > { %v5185_v15 = vadd.f32 %v11527_v47, %v5184_v22  ;;  %v6162_v21 = vpop.f32.mrb[54].mxu1  ;;  %v11606_v10 = vpop.permute.xlu1 %5323 }
 0x6e3   : > { %v5187_v25 = vpop.f32.mrb[55].mxu1  ;;  %v5196_v59 = vadd.f32 %v6162_v21, %v11527_v47  ;;  %v5253_v3 = vmax.f32 %v5193_v14, 0.0 }
 0x6e4   : > { %v5251_v20 = vmax.f32 %v5185_v15, 0.0  ;;  %v5188_v44 = vadd.f32 %v11527_v47, %v5187_v25 }
 0x6e5   : > { %v5254_v30 = vmax.f32 %v5196_v59, 0.0  ;;  %v11610_v25 = vpop.permute.xlu0 %5325 }
 0x6e6   : > { %v5252_v24 = vmax.f32 %v5188_v44, 0.0  ;;  %5463 = vrot.lane.b32.xlu1 %v5251_v20, %s6381_s22  ;;  %v11615_v59 = vpop.permute.xlu1 %5327 }
 0x6e8   : > { %5465 = vrot.lane.b32.xlu0 %v5252_v24, %s6381_s22 }
 0x6ea   : > { %5467 = vrot.lane.b32.xlu1 %v5253_v3, %s6381_s22  ;;  %v11618_v3 = vpop.permute.xlu0 %5329 }
 0x6ec   : > { %5469 = vrot.lane.b32.xlu0 %v5254_v30, %s6381_s22 }
 0x713   : > { %v6165_v46 = vpop.f32.mrb[56].mxu1 }
 0x714   : > { %v5200_v63 = vpop.f32.mrb[57].mxu1  ;;  %v5209_v22 = vadd.f32 %v6165_v46, %v11527_v47 }
 0x715   : > { %v5201_v36 = vadd.f32 %v11527_v47, %v5200_v63  ;;  %v6166_v19 = vpop.f32.mrb[58].mxu1  ;;  %v11621_v63 = vpop.permute.xlu1 %5331 }
 0x716   : > { %v5203_v12 = vpop.f32.mrb[59].mxu1  ;;  %v5212_v14 = vadd.f32 %v6166_v19, %v11527_v47  ;;  %v5257_v44 = vmax.f32 %v5209_v22, 0.0  ;;  %13827 = vst [vmem:[#allocation84_spill] sm:$0xff] %v11621_v63  ;;  %v11624_v22 = vpop.permute.xlu0 %5333 }
 0x717   : > { %v5255_v15 = vmax.f32 %v5201_v36, 0.0  ;;  %v5204_v21 = vadd.f32 %v11527_v47, %v5203_v12  ;;  %13828 = vst [vmem:[#allocation129_spill] sm:$0xff] %v11624_v22 }
 0x718   : > { %v5258_v24 = vmax.f32 %v5212_v14, 0.0 }
 0x719   : > { %v5256_v20 = vmax.f32 %v5204_v21, 0.0  ;;  %5471 = vrot.lane.b32.xlu1 %v5255_v15, %s6381_s22 }
 0x71b   : > { %5473 = vrot.lane.b32.xlu0 %v5256_v20, %s6381_s22  ;;  %v11631_v20 = vld [vmem:[%s12172_s4] ss:$0 sm:$0xff] }
 0x71c   : > { %v1094_v22 = vadd.f32 %v11631_v20, %v11427_v57  ;;  %v1105_v57 = vadd.f32 %v11435_v23, %v11631_v20  ;;  %v1118_v23 = vadd.f32 %v11442_v39, %v11631_v20 }
 0x71d   : > { %5475 = vrot.lane.b32.xlu1 %v5257_v44, %s6381_s22 }
 0x71f   : > { %5477 = vrot.lane.b32.xlu0 %v5258_v24, %s6381_s22 }
 0x722   : > { %v6169_v30 = vpop.f32.mrb[60].mxu1 }
 0x723   : > { %v5216_v46 = vpop.f32.mrb[61].mxu1  ;;  %v5225_v15 = vadd.f32 %v6169_v30, %v11527_v47  ;;  %v11640_v30 = vpop.permute.xlu0 %5337 }
 0x724   : > { %v5217_v36 = vadd.f32 %v11527_v47, %v5216_v46  ;;  %v6170_v19 = vpop.f32.mrb[62].mxu1  ;;  %v11635_v46 = vpop.permute.xlu1 %5335 }
 0x725   : > { %v5219_v12 = vpop.f32.mrb[63].mxu1  ;;  %v5228_v44 = vadd.f32 %v6170_v19, %v11527_v47  ;;  %v5261_v63 = vmax.f32 %v5225_v15, 0.0  ;;  %v1220_v19 = vmax.f32 %v1094_v22, 0.0  ;;  %v1113_v22 = vadd.f32 %v11631_v20, %v11454_v18 }
 0x726   : > { %v5259_v21 = vmax.f32 %v5217_v36, 0.0  ;;  %v5220_v14 = vadd.f32 %v11527_v47, %v5219_v12  ;;  %v1097_v36 = vadd.f32 %v11631_v20, %v11439_v48  ;;  %v1102_v47 = vadd.f32 %v11423_v5, %v11631_v20 }
 0x727   : > { %v5262_v12 = vmax.f32 %v5228_v44, 0.0  ;;  %v1223_v5 = vmax.f32 %v1105_v57, 0.0  ;;  %v1126_v18 = vadd.f32 %v11631_v20, %v11464_v2  ;;  %v1129_v57 = vadd.f32 %v11631_v20, %v11470_v62 }
 0x728   : > { %v5260_v24 = vmax.f32 %v5220_v14, 0.0  ;;  %5479 = vrot.lane.b32.xlu1 %v5259_v21, %s6381_s22  ;;  %v11648_v21 = vpop.permute.xlu1 %5339  ;;  %v1221_v15 = vmax.f32 %v1097_v36, 0.0  ;;  %v11653_v14 = vpop.permute.xlu0 %5341  ;;  %v1222_v48 = vmax.f32 %v1102_v47, 0.0  ;;  %v1226_v47 = vmax.f32 %v1118_v23, 0.0 }
 0x729   : > { %v1137_v2 = vadd.f32 %v11466_v13, %v11631_v20  ;;  %v1142_v62 = vadd.f32 %v11631_v20, %v11474_v1  ;;  %v1150_v13 = vadd.f32 %v11472_v8, %v11631_v20  ;;  %v1153_v1 = vadd.f32 %v11476_v45, %v11631_v20 }
 0x72a   : > { %5481 = vrot.lane.b32.xlu0 %v5260_v24, %s6381_s22  ;;  %v1166_v45 = vadd.f32 %v11480_v9, %v11631_v20 }
 0x72b   : > { %v1235_v8 = vmax.f32 %v1153_v1, 0.0 }
 0x72c   : > { %5483 = vrot.lane.b32.xlu1 %v5261_v63, %s6381_s22  ;;  %v1110_v63 = vadd.f32 %v11631_v20, %v11448_v40  ;;  %v11661_v44 = vpop.permute.xlu1 %5343  ;;  %v11666_v36 = vpop.permute.xlu0 %5345  ;;  %v1121_v40 = vadd.f32 %v11450_v49, %v11631_v20  ;;  %v1134_v49 = vadd.f32 %v11462_v34, %v11631_v20  ;;  %v1231_v34 = vmax.f32 %v1137_v2, 0.0 }
 0x72e   : > { %5485 = vrot.lane.b32.xlu0 %v5262_v12, %s6381_s22  ;;  %v1224_v24 = vmax.f32 %v1110_v63, 0.0  ;;  %v1225_v12 = vmax.f32 %v1113_v22, 0.0  ;;  %v1227_v39 = vmax.f32 %v1121_v40, 0.0  ;;  %v1229_v63 = vmax.f32 %v1129_v57, 0.0 }
 0x72f   : > { %v1230_v22 = vmax.f32 %v1134_v49, 0.0  ;;  %v1232_v40 = vmax.f32 %v1142_v62, 0.0  ;;  %v1161_v57 = vadd.f32 %v11631_v20, %v11486_v11  ;;  %v1174_v11 = vadd.f32 %v11631_v20, %v11490_v43 }
 0x730   : > { %5551 = vrot.lane.b32.xlu1 %v1220_v19, %s6372_s28  ;;  %v11674_v19 = vpop.permute.xlu1 %5347  ;;  %v1185_v43 = vadd.f32 %v11492_v41, %v11631_v20  ;;  %v1198_v41 = vadd.f32 %v11502_v58, %v11631_v20 }
 0x732   : > { %5553 = vrot.lane.b32.xlu0 %v1221_v15, %s6372_s28  ;;  %v11679_v15 = vpop.permute.xlu0 %5349 }
 0x734   : > { %5555 = vrot.lane.b32.xlu1 %v1222_v48, %s6372_s28  ;;  %v1228_v48 = vmax.f32 %v1126_v18, 0.0 }
 0x736   : > { %5557 = vrot.lane.b32.xlu0 %v1223_v5, %s6372_s28  ;;  %v11687_v5 = vpop.permute.xlu1 %5351  ;;  %v11692_v23 = vpop.permute.xlu0 %5353 }
 0x737   : > { %13829 = vst [vmem:[#allocation203_spill] sm:$0xff] %v11687_v5  ;;  %13830 = vst [vmem:[#allocation192_spill] sm:$0xff] %v11692_v23 }
 0x738   : > { %5559 = vrot.lane.b32.xlu1 %v1224_v24, %s6372_s28  ;;  %v1145_v24 = vadd.f32 %v11631_v20, %v11478_v50  ;;  %v1158_v50 = vadd.f32 %v11631_v20, %v11482_v53  ;;  %v1169_v53 = vadd.f32 %v11484_v29, %v11631_v20  ;;  %v1182_v29 = vadd.f32 %v11488_v60, %v11631_v20 }
 0x739   : > { %v1243_v60 = vmax.f32 %v1185_v43, 0.0 }
 0x73a   : > { %5561 = vrot.lane.b32.xlu0 %v1225_v12, %s6372_s28  ;;  %v11700_v12 = vpop.permute.xlu1 %5355  ;;  %v11705_v18 = vpop.permute.xlu0 %5357  ;;  %v1239_v9 = vmax.f32 %v1169_v53, 0.0  ;;  %v1246_v53 = vmax.f32 %v1198_v41, 0.0 }
 0x73b   : > { %13831 = vst [vmem:[#allocation101_spill] sm:$0xff] %v11700_v12  ;;  %13832 = vst [vmem:[#allocation181_spill] sm:$0xff] %v11705_v18 }
 0x73c   : > { %5563 = vrot.lane.b32.xlu1 %v1226_v47, %s6372_s28  ;;  %v1233_v47 = vmax.f32 %v1145_v24, 0.0 }
 0x73e   : > { %5565 = vrot.lane.b32.xlu0 %v1227_v39, %s6372_s28  ;;  %v1234_v39 = vmax.f32 %v1150_v13, 0.0  ;;  %v11712_v49 = vpop.permute.xlu1 %5423  ;;  %v11717_v2 = vpop.permute.xlu0 %5425  ;;  %v1240_v13 = vmax.f32 %v1174_v11, 0.0 }
 0x740   : > { %5567 = vrot.lane.b32.xlu1 %v1228_v48, %s6372_s28  ;;  %v1236_v48 = vmax.f32 %v1158_v50, 0.0  ;;  %v1193_v50 = vadd.f32 %v11631_v20, %v11508_v38  ;;  %v1206_v38 = vadd.f32 %v11631_v20, %v11512_v56  ;;  %v1217_v56 = vadd.f32 %v11514_v35, %v11631_v20 }
 0x742   : > { %5569 = vrot.lane.b32.xlu0 %v1229_v63, %s6372_s28  ;;  %v1237_v63 = vmax.f32 %v1161_v57, 0.0  ;;  %v11725_v62 = vpop.permute.xlu1 %5427  ;;  %v11730_v24 = vpop.permute.xlu0 %5429  ;;  %v1248_v11 = vmax.f32 %v1206_v38, 0.0 }
 0x744   : > { %5571 = vrot.lane.b32.xlu1 %v1230_v22, %s6372_s28  ;;  %v1238_v22 = vmax.f32 %v1166_v45, 0.0  ;;  %v1245_v45 = vmax.f32 %v1193_v50, 0.0 }
 0x746   : > { %5573 = vrot.lane.b32.xlu0 %v1231_v34, %s6372_s28  ;;  %v1177_v34 = vadd.f32 %v11631_v20, %v11494_v28  ;;  %v11738_v1 = vpop.permute.xlu1 %5431  ;;  %v1190_v28 = vadd.f32 %v11631_v20, %v11504_v17  ;;  %v1201_v17 = vadd.f32 %v11506_v16, %v11631_v20  ;;  %v1214_v16 = vadd.f32 %v11510_v61, %v11631_v20 }
 0x748   : > { %5575 = vrot.lane.b32.xlu1 %v1232_v40, %s6372_s28  ;;  %v1241_v40 = vmax.f32 %v1177_v34, 0.0  ;;  %v1247_v58 = vmax.f32 %v1201_v17, 0.0 }
 0x74a   : > { %5577 = vrot.lane.b32.xlu0 %v1233_v47, %s6372_s28  ;;  %v1242_v47 = vmax.f32 %v1182_v29, 0.0  ;;  %v11751_v57 = vpop.permute.xlu1 %5435  ;;  %v1250_v29 = vmax.f32 %v1214_v16, 0.0 }
 0x74c   : > { %5579 = vrot.lane.b32.xlu1 %v1234_v39, %s6372_s28  ;;  %v11743_v39 = vpop.permute.xlu0 %5433 }
 0x74e   : > { %5581 = vrot.lane.b32.xlu0 %v1235_v8, %s6372_s28  ;;  %v1244_v8 = vmax.f32 %v1190_v28, 0.0 }
 0x750   : > { %5583 = vrot.lane.b32.xlu1 %v1236_v48, %s6372_s28  ;;  %v11756_v48 = vpop.permute.xlu0 %5437 }
 0x752   : > { %5585 = vrot.lane.b32.xlu0 %v1237_v63, %s6372_s28  ;;  %v1209_v63 = vadd.f32 %v11631_v20, %v11520_v32 }
 0x754   : > { %5587 = vrot.lane.b32.xlu1 %v1238_v22, %s6372_s28  ;;  %v11764_v22 = vpop.permute.xlu1 %5439  ;;  %v1249_v34 = vmax.f32 %v1209_v63, 0.0 }
 0x756   : > { %5589 = vrot.lane.b32.xlu0 %v1239_v9, %s6372_s28  ;;  %v11769_v9 = vpop.permute.xlu0 %5441 }
 0x758   : > { %5591 = vrot.lane.b32.xlu1 %v1240_v13, %s6372_s28  ;;  %v11775_v32 = vpop.permute.xlu1 %5443  ;;  %v1251_v13 = vmax.f32 %v1217_v56, 0.0 }
 0x75a   : > { %5593 = vrot.lane.b32.xlu0 %v1241_v40, %s6372_s28  ;;  %v11778_v43 = vpop.permute.xlu0 %5445 }
 0x75c   : > { %5595 = vrot.lane.b32.xlu1 %v1242_v47, %s6372_s28  ;;  %v11782_v61 = vpop.permute.xlu1 %5447 }
 0x75e   : > { %5597 = vrot.lane.b32.xlu0 %v1243_v60, %s6372_s28  ;;  %v11784_v40 = vpop.permute.xlu0 %5449 }
 0x760   : > { %5599 = vrot.lane.b32.xlu1 %v1244_v8, %s6372_s28  ;;  %v11786_v35 = vpop.permute.xlu1 %5451 }
 0x762   : > { %5601 = vrot.lane.b32.xlu0 %v1245_v45, %s6372_s28  ;;  %v11788_v20 = vpop.permute.xlu0 %5453 }
 0x764   : > { %5603 = vrot.lane.b32.xlu1 %v1246_v53, %s6372_s28  ;;  %v11790_v47 = vpop.permute.xlu1 %5455 }
 0x766   : > { %5605 = vrot.lane.b32.xlu0 %v1247_v58, %s6372_s28  ;;  %v11792_v28 = vpop.permute.xlu0 %5457 }
 0x768   : > { %5607 = vrot.lane.b32.xlu1 %v1248_v11, %s6372_s28  ;;  %v11794_v60 = vpop.permute.xlu1 %5459 }
 0x76a   : > { %5609 = vrot.lane.b32.xlu0 %v1249_v34, %s6372_s28  ;;  %v11796_v50 = vpop.permute.xlu0 %5461 }
 0x76c   : > { %5611 = vrot.lane.b32.xlu1 %v1250_v29, %s6372_s28  ;;  %v11798_v41 = vpop.permute.xlu1 %5463  ;;  %v13837_v29 = vld [vmem:[#allocation9_spill] sm:$0xff] }
 0x76e   : > { %5613 = vrot.lane.b32.xlu0 %v1251_v13, %s6372_s28  ;;  %v11800_v8 = vpop.permute.xlu0 %5465  ;;  %s323_s28 = sand.u32 1, %s6361_s10   ;;  %v13838_v13 = vmax.f32 %v13837_v29, 0.0 }
 0x76f   : > { %s5855_s22 = sshll.u32 %s323_s28, 8  ;;  %s12126_s29 = scalar_lea.sflag [#allocation3], %s323_s28 }
 0x770   : > { %v11802_v17 = vpop.permute.xlu1 %5467  ;;  %v5647_v18 = vsel %vm13839_vm5, %v13838_v13, %v11576_v54  ;;  %s11838_s17 = scalar_lea.vmem [#allocation2], %s5855_s22  ;;  %vm13867_vm5 = vmmov %vm13847_vm2  ;;  %s6313_s22 = scalar_lea.vmem %s6312_s23, 8192 }
 0x771   : > { %v5679_v12 = vsel %vm2150_vm10, %v5647_v18, %v11712_v49  ;;  %v13844_v18 = vld [vmem:[#allocation8_spill] sm:$0xff]  ;;  %s5789_s21 = sshll.u32 %s11838_s17, 4  ;;  %s12119_s21 = int_to_ptr.vmem [resolvable:$true] %s5789_s21 }
 0x772   : > { %v11804_v45 = vpop.permute.xlu0 %5469  ;;  %v13845_v49 = vmax.f32 %v13844_v18, 0.0  ;;  %s6307_s24 = scalar_lea.vmem %s12119_s21, 4096  ;;  %p6314_p0 = scmp.lt.s32.totalorder %s12119_s21, %s6312_s23 }
 0x773   : > { %p6308_p11 = scmp.ne.s32.totalorder %s12119_s21, %s6307_s24  ;;  %p6315_p1 = scmp.lt.s32.totalorder %s6313_s22, %s6307_s24 }
 0x775   : > { %p6309_p12 = pnand %p6308_p11, %p6480_p5  ;;  %p6316_p2 = por %p6315_p1, %p6314_p0 }
 0x777   : > { %p6310_p13 = pneg %p6309_p12 }
 0x779   : > { %p6317_p3 = pnand %p6316_p2, %p6310_p13 }
 0x78b   : > { %v11806_v53 = vpop.permute.xlu1 %5471 }
 0x78d   : > { %v11808_v38 = vpop.permute.xlu0 %5473 }
 0x78f   : > { %v11810_v58 = vpop.permute.xlu1 %5475 }
 0x791   : > { %v11812_v63 = vpop.permute.xlu0 %5477 }
 0x792   : > { %13833 = vst [vmem:[#allocation193_spill] sm:$0xff] %v11812_v63 }
 0x79a   : > { %v11814_v16 = vpop.permute.xlu1 %5479 }
 0x79b   : > { %13834 = vst [vmem:[#allocation243_spill] sm:$0xff] %v11814_v16  ;;  %v13840_v16 = vld [vmem:[#allocation11_spill] sm:$0xff] }
 0x79c   : > { %v11817_v11 = vpop.permute.xlu0 %5481  ;;  %v13841_v5 = vmax.f32 %v13840_v16, 0.0  ;;  %v5649_v16 = vsel %vm13846_vm0, %v13845_v49, %v11581_v42 }
 0x79d   : > { %13835 = vst [vmem:[#allocation158_spill] sm:$0xff] %v11817_v11 }
 0x79e   : > { %v11819_v56 = vpop.permute.xlu1 %5483  ;;  %v5648_v11 = vsel %vm13842_vm7, %v13841_v5, %v11579_v52  ;;  %v5681_v5 = vsel %vm2150_vm10, %v5649_v16, %v11725_v62  ;;  %v13852_v62 = vld [vmem:[#allocation13_spill] sm:$0xff]  ;;  %vm13870_vm7 = vmmov %vm13846_vm0 }
 0x79f   : > { %13836 = vst [vmem:[#allocation114_spill] sm:$0xff] %v11819_v56  ;;  %v5680_v63 = vsel %vm2150_vm10, %v5648_v11, %v11717_v2 }
 0x7a0   : > { %v11823_v34 = vpop.permute.xlu0 %5485 }
 0x7a2   : > { %v5552_v23 = vpop.permute.xlu1 %5551 }
 0x7a3   : > { %v5711_v56 = vsel %vm13843_vm3, %v5679_v12, %v5552_v23  ;;  %v13848_v12 = vld [vmem:[#allocation10_spill] sm:$0xff]  ;;  %vm13871_vm3 = vmmov %vm13847_vm2 }
 0x7a4   : > { %5743 = vst.msk [vmem:[%s11838_s17] sm:$0xff] %vm2282_vm14, %v5711_v56  ;;  %v5554_v54 = vpop.permute.xlu0 %5553  ;;  %v13849_v2 = vmax.f32 %v13848_v12, 0.0 }
 0x7a5   : > { %v5712_v52 = vsel %vm13847_vm2, %v5680_v63, %v5554_v54  ;;  %v13853_v63 = vmax.f32 %v13852_v62, 0.0 }
 0x7a6   : > { %5744 = vst.msk [vmem:[%s11838_s17 + $0x8] sm:$0xff] %vm2282_vm14, %v5712_v52  ;;  %v5556_v23 = vpop.permute.xlu1 %5555  ;;  %v5650_v11 = vsel %vm13850_vm9, %v13849_v2, %v11583_v55  ;;  %vm13876_vm9 = vmmov %vm13846_vm0 }
 0x7a7   : > { %v5713_v56 = vsel %vm13851_vm4, %v5681_v5, %v5556_v23  ;;  %v5682_v29 = vsel %vm2150_vm10, %v5650_v11, %v11730_v24  ;;  %v5651_v13 = vsel %vm13854_vm1, %v13853_v63, %v11585_v31  ;;  %v13856_v24 = vld [vmem:[#allocation15_spill] sm:$0xff]  ;;  %vm13877_vm4 = vmmov %vm13847_vm2 }
 0x7a8   : > { %5745 = vst.msk [vmem:[%s11838_s17 + $0x10] sm:$0xff] %vm2282_vm14, %v5713_v56  ;;  %v5558_v42 = vpop.permute.xlu0 %5557  ;;  %v5683_v18 = vsel %vm2150_vm10, %v5651_v13, %v11738_v1  ;;  %v13857_v49 = vmax.f32 %v13856_v24, 0.0  ;;  %v13860_v1 = vld [vmem:[#allocation12_spill] sm:$0xff]  ;;  %vm13880_vm1 = vmmov %vm13846_vm0 }
 0x7a9   : > { %v5714_v54 = vsel %vm13855_vm6, %v5682_v29, %v5558_v42  ;;  %v13861_v23 = vmax.f32 %v13860_v1, 0.0  ;;  %vm13881_vm6 = vmmov %vm13847_vm2 }
 0x7aa   : > { %5746 = vst.msk [vmem:[%s11838_s17 + $0x18] sm:$0xff] %vm2282_vm14, %v5714_v54  ;;  %v5560_v55 = vpop.permute.xlu1 %5559  ;;  %v5652_v16 = vsel %vm13858_vm8, %v13857_v49, %v11587_v7  ;;  %vm13884_vm8 = vmmov %vm13846_vm0 }
 0x7ab   : > { %v5715_v52 = vsel %vm13859_vm13, %v5683_v18, %v5560_v55  ;;  %v5684_v5 = vsel %vm2150_vm10, %v5652_v16, %v11743_v39  ;;  %v5653_v12 = vsel %vm13862_vm11, %v13861_v23, %v11589_v4  ;;  %v13864_v39 = vld [vmem:[#allocation14_spill] sm:$0xff]  ;;  %vm13885_vm13 = vmmov %vm13847_vm2 }
 0x7ac   : > { %5747 = vst.msk [vmem:[%s11838_s17 + $0x20] sm:$0xff] %vm2282_vm14, %v5715_v52  ;;  %v5562_v31 = vpop.permute.xlu0 %5561  ;;  %v5685_v11 = vsel %vm2150_vm10, %v5653_v12, %v11751_v57  ;;  %v13865_v56 = vmax.f32 %v13864_v39, 0.0  ;;  %v13868_v57 = vld [vmem:[#allocation17_spill] sm:$0xff]  ;;  %vm13888_vm11 = vmmov %vm13846_vm0 }
 0x7ad   : > { %v5716_v2 = vsel %vm13863_vm12, %v5684_v5, %v5562_v31  ;;  %v13869_v63 = vmax.f32 %v13868_v57, 0.0  ;;  %vm13889_vm12 = vmmov %vm13847_vm2 }
 0x7ae   : > { %5748 = vst.msk [vmem:[%s11838_s17 + $0x28] sm:$0xff] %vm2282_vm14, %v5716_v2  ;;  %v5564_v7 = vpop.permute.xlu1 %5563  ;;  %v5654_v29 = vsel %vm13866_vm15, %v13865_v56, %v11591_v27  ;;  %vm13892_vm15 = vmmov %vm13846_vm0 }
 0x7af   : > { %v5717_v42 = vsel %vm13867_vm5, %v5685_v11, %v5564_v7  ;;  %v5686_v62 = vsel %vm2150_vm10, %v5654_v29, %v11756_v48  ;;  %v5655_v13 = vsel %vm13870_vm7, %v13869_v63, %v11593_v26  ;;  %v13872_v48 = vld [vmem:[#allocation19_spill] sm:$0xff]  ;;  %vm13893_vm5 = vmmov %vm13847_vm2 }
 0x7b0   : > { %5749 = vst.msk [vmem:[%s11838_s17 + $0x30] sm:$0xff] %vm2282_vm14, %v5717_v42  ;;  %v5566_v4 = vpop.permute.xlu0 %5565  ;;  %v5687_v18 = vsel %vm2150_vm10, %v5655_v13, %v11764_v22  ;;  %v13873_v55 = vmax.f32 %v13872_v48, 0.0  ;;  %v13874_v22 = vld [vmem:[#allocation16_spill] sm:$0xff]  ;;  %vm13896_vm7 = vmmov %vm13846_vm0 }
 0x7b1   : > { %v5718_v54 = vsel %vm13871_vm3, %v5686_v62, %v5566_v4  ;;  %v13875_v52 = vmax.f32 %v13874_v22, 0.0  ;;  %vm13897_vm3 = vmmov %vm13847_vm2 }
 0x7b2   : > { %5750 = vst.msk [vmem:[%s11838_s17 + $0x38] sm:$0xff] %vm2282_vm14, %v5718_v54  ;;  %v5568_v27 = vpop.permute.xlu1 %5567  ;;  %v5656_v24 = vsel %vm13846_vm0, %v13873_v55, %v11595_v0 }
 0x7b3   : > { %v5719_v49 = vsel %vm13847_vm2, %v5687_v18, %v5568_v27  ;;  %v5688_v16 = vsel %vm2150_vm10, %v5656_v24, %v11769_v9  ;;  %v5657_v5 = vsel %vm13876_vm9, %v13875_v52, %v11597_v6  ;;  %v13878_v9 = vld [vmem:[#allocation18_spill] sm:$0xff]  ;;  %vm13902_vm9 = vmmov %vm13846_vm0 }
 0x7b4   : > { %5751 = vst.msk [vmem:[%s11838_s17 + $0x40] sm:$0xff] %vm2282_vm14, %v5719_v49  ;;  %v5570_v26 = vpop.permute.xlu0 %5569  ;;  %v5689_v1 = vsel %vm2150_vm10, %v5657_v5, %v11775_v32  ;;  %v13879_v23 = vmax.f32 %v13878_v9, 0.0  ;;  %v13882_v32 = vld [vmem:[#allocation22_spill] sm:$0xff] }
 0x7b5   : > { %v5720_v31 = vsel %vm13877_vm4, %v5688_v16, %v5570_v26  ;;  %v13883_v7 = vmax.f32 %v13882_v32, 0.0  ;;  %vm13903_vm4 = vmmov %vm13847_vm2 }
 0x7b6   : > { %5752 = vst.msk [vmem:[%s11838_s17 + $0x48] sm:$0xff] %vm2282_vm14, %v5720_v31  ;;  %v5572_v0 = vpop.permute.xlu1 %5571  ;;  %v5658_v12 = vsel %vm13880_vm1, %v13879_v23, %v11599_v33  ;;  %vm13907_vm1 = vmmov %vm13846_vm0 }
 0x7b7   : > { %v5721_v2 = vsel %vm13881_vm6, %v5689_v1, %v5572_v0  ;;  %v5690_v11 = vsel %vm2150_vm10, %v5658_v12, %v11778_v43  ;;  %v5659_v39 = vsel %vm13884_vm8, %v13883_v7, %v11601_v51  ;;  %v13886_v43 = vld [vmem:[#allocation23_spill] sm:$0xff]  ;;  %v13904_v0 = vld [vmem:[#allocation84_spill] sm:$0xff]  ;;  %vm13908_vm6 = vmmov %vm13847_vm2 }
 0x7b8   : > { %5753 = vst.msk [vmem:[%s11838_s17 + $0x50] sm:$0xff] %vm2282_vm14, %v5721_v2  ;;  %v5574_v6 = vpop.permute.xlu0 %5573  ;;  %v5691_v29 = vsel %vm2150_vm10, %v5659_v39, %v11782_v61  ;;  %v13887_v42 = vmax.f32 %v13886_v43, 0.0  ;;  %v13890_v61 = vld [vmem:[#allocation20_spill] sm:$0xff]  ;;  %vm13912_vm8 = vmmov %vm13846_vm0 }
 0x7b9   : > { %v5722_v56 = vsel %vm13885_vm13, %v5690_v11, %v5574_v6  ;;  %v13891_v63 = vmax.f32 %v13890_v61, 0.0  ;;  %v13909_v11 = vld [vmem:[#allocation129_spill] sm:$0xff]  ;;  %vm13913_vm13 = vmmov %vm13847_vm2 }
 0x7ba   : > { %5754 = vst.msk [vmem:[%s11838_s17 + $0x58] sm:$0xff] %vm2282_vm14, %v5722_v56  ;;  %v5576_v33 = vpop.permute.xlu1 %5575  ;;  %v5660_v62 = vsel %vm13888_vm11, %v13887_v42, %v11603_v37  ;;  %vm13916_vm11 = vmmov %vm13846_vm0 }
 0x7bb   : > { %v5723_v4 = vsel %vm13889_vm12, %v5691_v29, %v5576_v33  ;;  %v5692_v57 = vsel %vm2150_vm10, %v5660_v62, %v11784_v40  ;;  %v5661_v13 = vsel %vm13892_vm15, %v13891_v63, %v11606_v10  ;;  %v13894_v40 = vld [vmem:[#allocation21_spill] sm:$0xff]  ;;  %vm13917_vm12 = vmmov %vm13847_vm2 }
 0x7bc   : > { %5755 = vst.msk [vmem:[%s11838_s17 + $0x60] sm:$0xff] %vm2282_vm14, %v5723_v4  ;;  %v5578_v51 = vpop.permute.xlu0 %5577  ;;  %v5693_v18 = vsel %vm2150_vm10, %v5661_v13, %v11786_v35  ;;  %v13895_v27 = vmax.f32 %v13894_v40, 0.0  ;;  %v13898_v35 = vld [vmem:[#allocation26_spill] sm:$0xff]  ;;  %vm13920_vm15 = vmmov %vm13846_vm0 }
 0x7bd   : > { %v5724_v54 = vsel %vm13893_vm5, %v5692_v57, %v5578_v51  ;;  %v13899_v49 = vmax.f32 %v13898_v35, 0.0  ;;  %vm13921_vm5 = vmmov %vm13847_vm2 }
 0x7be   : > { %5756 = vst.msk [vmem:[%s11838_s17 + $0x68] sm:$0xff] %vm2282_vm14, %v5724_v54  ;;  %v5580_v37 = vpop.permute.xlu1 %5579  ;;  %v5662_v48 = vsel %vm13896_vm7, %v13895_v27, %v11610_v25  ;;  %vm13924_vm7 = vmmov %vm13846_vm0 }
 0x7bf   : > { %v5725_v55 = vsel %vm13897_vm3, %v5693_v18, %v5580_v37  ;;  %v5694_v24 = vsel %vm2150_vm10, %v5662_v48, %v11788_v20  ;;  %v5663_v16 = vsel %vm13846_vm0, %v13899_v49, %v11615_v59  ;;  %v13900_v20 = vld [vmem:[#allocation27_spill] sm:$0xff]  ;;  %vm13925_vm3 = vmmov %vm13847_vm2 }
 0x7c0   : > { %5757 = vst.msk [vmem:[%s11838_s17 + $0x70] sm:$0xff] %vm2282_vm14, %v5725_v55  ;;  %v5582_v10 = vpop.permute.xlu0 %5581  ;;  %v5695_v22 = vsel %vm2150_vm10, %v5663_v16, %v11790_v47  ;;  %v13901_v52 = vmax.f32 %v13900_v20, 0.0  ;;  %v13905_v47 = vld [vmem:[#allocation24_spill] sm:$0xff] }
 0x7c1   : > { %v5726_v26 = vsel %vm13847_vm2, %v5694_v24, %v5582_v10  ;;  %v13906_v9 = vmax.f32 %v13905_v47, 0.0 }
 0x7c2   : > { %5758 = vst.msk [vmem:[%s11838_s17 + $0x78] sm:$0xff] %vm2282_vm14, %v5726_v26  ;;  %v5584_v25 = vpop.permute.xlu1 %5583  ;;  %v5664_v5 = vsel %vm13902_vm9, %v13901_v52, %v11618_v3  ;;  %vm13930_vm9 = vmmov %vm13846_vm0 }
 0x7c3   : > { %v5727_v31 = vsel %vm13903_vm4, %v5695_v22, %v5584_v25  ;;  %v5696_v1 = vsel %vm2150_vm10, %v5664_v5, %v11792_v28  ;;  %v5665_v23 = vsel %vm13907_vm1, %v13906_v9, %v13904_v0  ;;  %v13910_v28 = vld [vmem:[#allocation25_spill] sm:$0xff]  ;;  %vm13931_vm4 = vmmov %vm13847_vm2 }
 0x7c4   : > { %5759 = vst.msk [vmem:[%s11838_s17 + $0x80] sm:$0xff] %vm2282_vm14, %v5727_v31  ;;  %v5586_v59 = vpop.permute.xlu0 %5585  ;;  %v5697_v2 = vsel %vm2150_vm10, %v5665_v23, %v11794_v60  ;;  %v13911_v6 = vmax.f32 %v13910_v28, 0.0  ;;  %v13914_v60 = vld [vmem:[#allocation34_spill] sm:$0xff]  ;;  %vm13934_vm1 = vmmov %vm13846_vm0  ;;  %v13944_v0 = vld [vmem:[#allocation193_spill] sm:$0xff] }
 0x7c5   : > { %v5728_v12 = vsel %vm13908_vm6, %v5696_v1, %v5586_v59  ;;  %v13915_v29 = vmax.f32 %v13914_v60, 0.0  ;;  %vm13935_vm6 = vmmov %vm13847_vm2  ;;  %v13946_v9 = vld [vmem:[#allocation37_spill] sm:$0xff]  ;;  %v13951_v28 = vld [vmem:[#allocation192_spill] sm:$0xff] }
 0x7c6   : > { %5760 = vst.msk [vmem:[%s11838_s17 + $0x88] sm:$0xff] %vm2282_vm14, %v5728_v12  ;;  %v5588_v3 = vpop.permute.xlu1 %5587  ;;  %v5666_v32 = vsel %vm13912_vm8, %v13911_v6, %v13909_v11  ;;  %vm13938_vm8 = vmmov %vm13846_vm0  ;;  %v13947_v23 = vmax.f32 %v13946_v9, 0.0  ;;  %v13952_v6 = vld [vmem:[#allocation39_spill] sm:$0xff] }
 0x7c7   : > { %v5729_v7 = vsel %vm13913_vm13, %v5697_v2, %v5588_v3  ;;  %v5698_v39 = vsel %vm2150_vm10, %v5666_v32, %v11796_v50  ;;  %v5667_v33 = vsel %vm13916_vm11, %v13915_v29, %v11635_v46  ;;  %v13918_v50 = vld [vmem:[#allocation35_spill] sm:$0xff]  ;;  %vm13939_vm13 = vmmov %vm13847_vm2  ;;  %v13953_v32 = vmax.f32 %v13952_v6, 0.0 }
 0x7c8   : > { %5761 = vst.msk [vmem:[%s11838_s17 + $0x90] sm:$0xff] %vm2282_vm14, %v5729_v7  ;;  %v5590_v56 = vpop.permute.xlu0 %5589  ;;  %v5699_v42 = vsel %vm2150_vm10, %v5667_v33, %v11798_v41  ;;  %v13919_v4 = vmax.f32 %v13918_v50, 0.0  ;;  %v13922_v41 = vld [vmem:[#allocation31_spill] sm:$0xff]  ;;  %vm13942_vm11 = vmmov %vm13846_vm0  ;;  %v13957_v33 = vld [vmem:[#allocation101_spill] sm:$0xff] }
 0x7c9   : > { %v5730_v43 = vsel %vm13917_vm12, %v5698_v39, %v5590_v56  ;;  %v13923_v63 = vmax.f32 %v13922_v41, 0.0  ;;  %vm13943_vm12 = vmmov %vm13847_vm2  ;;  %v13950_v3 = vld [vmem:[#allocation243_spill] sm:$0xff]  ;;  %v13956_v56 = vld [vmem:[#allocation158_spill] sm:$0xff] }
 0x7ca   : > { %5762 = vst.msk [vmem:[%s11838_s17 + $0x98] sm:$0xff] %vm2282_vm14, %v5730_v43  ;;  %v5592_v62 = vpop.permute.xlu1 %5591  ;;  %v5668_v57 = vsel %vm13920_vm15, %v13919_v4, %v11640_v30  ;;  %vm13948_vm15 = vmmov %vm13846_vm0  ;;  %v13958_v43 = vld [vmem:[#allocation36_spill] sm:$0xff]  ;;  %v13960_v4 = vld [vmem:[#allocation114_spill] sm:$0xff] }
 0x7cb   : > { %v5731_v51 = vsel %vm13921_vm5, %v5699_v42, %v5592_v62  ;;  %v5700_v61 = vsel %vm2150_vm10, %v5668_v57, %v11800_v8  ;;  %v5669_v13 = vsel %vm13924_vm7, %v13923_v63, %v11648_v21  ;;  %v13926_v8 = vld [vmem:[#allocation32_spill] sm:$0xff]  ;;  %vm13949_vm5 = vmmov %vm13847_vm2  ;;  %v13959_v42 = vmax.f32 %v13958_v43, 0.0 }
 0x7cc   : > { %5763 = vst.msk [vmem:[%s11838_s17 + $0xa0] sm:$0xff] %vm2282_vm14, %v5731_v51  ;;  %v5594_v46 = vpop.permute.xlu0 %5593  ;;  %v5701_v18 = vsel %vm2150_vm10, %v5669_v13, %v11802_v17  ;;  %v13927_v37 = vmax.f32 %v13926_v8, 0.0  ;;  %v13928_v17 = vld [vmem:[#allocation29_spill] sm:$0xff]  ;;  %vm13954_vm7 = vmmov %vm13846_vm0 }
 0x7cd   : > { %v5732_v54 = vsel %vm13925_vm3, %v5700_v61, %v5594_v46  ;;  %v13929_v55 = vmax.f32 %v13928_v17, 0.0  ;;  %v5676_v7 = vsel %vm13954_vm7, %v13953_v32, %v13951_v28  ;;  %vm13955_vm3 = vmmov %vm13847_vm2  ;;  %v5677_v62 = vsel %vm13846_vm0, %v13959_v42, %v13957_v33  ;;  %v13961_v61 = vld [vmem:[#allocation181_spill] sm:$0xff]  ;;  %v13962_v46 = vld [vmem:[#allocation38_spill] sm:$0xff] }
 0x7ce   : > { %5764 = vst.msk [vmem:[%s11838_s17 + $0xa8] sm:$0xff] %vm2282_vm14, %v5732_v54  ;;  %v5596_v30 = vpop.permute.xlu1 %5595  ;;  %v5670_v40 = vsel %vm13846_vm0, %v13927_v37, %v11653_v14  ;;  %v5708_v60 = vsel %vm2150_vm10, %v5676_v7, %v13956_v56  ;;  %v5709_v57 = vsel %vm2150_vm10, %v5677_v62, %v13960_v4  ;;  %v13963_v41 = vmax.f32 %v13962_v46, 0.0 }
 0x7cf   : > { %v5733_v27 = vsel %vm13847_vm2, %v5701_v18, %v5596_v30  ;;  %v5702_v48 = vsel %vm2150_vm10, %v5670_v40, %v11804_v45  ;;  %v5671_v24 = vsel %vm13930_vm9, %v13929_v55, %v11661_v44  ;;  %v13932_v45 = vld [vmem:[#allocation33_spill] sm:$0xff]  ;;  %vm13964_vm9 = vmmov %vm13846_vm0 }
 0x7d0   : > { %5765 = vst.msk [vmem:[%s11838_s17 + $0xb0] sm:$0xff] %vm2282_vm14, %v5733_v27  ;;  %v5598_v21 = vpop.permute.xlu0 %5597  ;;  %v5703_v35 = vsel %vm2150_vm10, %v5671_v24, %v11806_v53  ;;  %v13933_v49 = vmax.f32 %v13932_v45, 0.0  ;;  %v13936_v53 = vld [vmem:[#allocation28_spill] sm:$0xff]  ;;  %v5678_v63 = vsel %vm13964_vm9, %v13963_v41, %v13961_v61 }
 0x7d1   : > { %v5734_v10 = vsel %vm13931_vm4, %v5702_v48, %v5598_v21  ;;  %v13937_v25 = vmax.f32 %v13936_v53, 0.0  ;;  %vm13965_vm4 = vmmov %vm13847_vm2  ;;  %v5710_v54 = vsel %vm2150_vm10, %v5678_v63, %v11823_v34 }
 0x7d2   : > { %5766 = vst.msk [vmem:[%s11838_s17 + $0xb8] sm:$0xff] %vm2282_vm14, %v5734_v10  ;;  %v5600_v14 = vpop.permute.xlu1 %5599  ;;  %v5672_v16 = vsel %vm13934_vm1, %v13933_v49, %v11666_v36  ;;  %vm13966_vm1 = vmmov %vm13847_vm2 }
 0x7d3   : > { %v5735_v26 = vsel %vm13935_vm6, %v5703_v35, %v5600_v14  ;;  %v5704_v22 = vsel %vm2150_vm10, %v5672_v16, %v11808_v38  ;;  %v5673_v20 = vsel %vm13938_vm8, %v13937_v25, %v11674_v19  ;;  %v13940_v38 = vld [vmem:[#allocation30_spill] sm:$0xff] }
 0x7d4   : > { %5767 = vst.msk [vmem:[%s11838_s17 + $0xc0] sm:$0xff] %vm2282_vm14, %v5735_v26  ;;  %v5602_v44 = vpop.permute.xlu0 %5601  ;;  %v5705_v5 = vsel %vm2150_vm10, %v5673_v20, %v11810_v58  ;;  %v13941_v31 = vmax.f32 %v13940_v38, 0.0  ;;  %v13945_v58 = vld [vmem:[#allocation203_spill] sm:$0xff] }
 0x7d5   : > { %v5736_v52 = vsel %vm13939_vm13, %v5704_v22, %v5602_v44  ;;  %v5675_v12 = vsel %vm13948_vm15, %v13947_v23, %v13945_v58 }
 0x7d6   : > { %5768 = vst.msk [vmem:[%s11838_s17 + $0xc8] sm:$0xff] %vm2282_vm14, %v5736_v52  ;;  %v5604_v36 = vpop.permute.xlu1 %5603  ;;  %v5674_v1 = vsel %vm13942_vm11, %v13941_v31, %v11679_v15  ;;  %v5707_v15 = vsel %vm2150_vm10, %v5675_v12, %v13950_v3 }
 0x7d7   : > { %v5737_v59 = vsel %vm13943_vm12, %v5705_v5, %v5604_v36  ;;  %v5706_v19 = vsel %vm2150_vm10, %v5674_v1, %v13944_v0 }
 0x7d8   : > { %5769 = vst.msk [vmem:[%s11838_s17 + $0xd0] sm:$0xff] %vm2282_vm14, %v5737_v59  ;;  %v5606_v47 = vpop.permute.xlu0 %5605 }
 0x7d9   : > { %v5738_v2 = vsel %vm13949_vm5, %v5706_v19, %v5606_v47 }
 0x7da   : > { %5770 = vst.msk [vmem:[%s11838_s17 + $0xd8] sm:$0xff] %vm2282_vm14, %v5738_v2  ;;  %v5608_v11 = vpop.permute.xlu1 %5607 }
 0x7db   : > { %v5739_v39 = vsel %vm13955_vm3, %v5707_v15, %v5608_v11 }
 0x7dc   : > { %5771 = vst.msk [vmem:[%s11838_s17 + $0xe0] sm:$0xff] %vm2282_vm14, %v5739_v39  ;;  %v5610_v29 = vpop.permute.xlu0 %5609 }
 0x7dd   : > { %v5740_v50 = vsel %vm13847_vm2, %v5708_v60, %v5610_v29 }
 0x7de   : > { %5772 = vst.msk [vmem:[%s11838_s17 + $0xe8] sm:$0xff] %vm2282_vm14, %v5740_v50  ;;  %v5612_v51 = vpop.permute.xlu1 %5611 }
 0x7df   : > { %v5741_v13 = vsel %vm13965_vm4, %v5709_v57, %v5612_v51 }
 0x7e0   : > { %5773 = vst.msk [vmem:[%s11838_s17 + $0xf0] sm:$0xff] %vm2282_vm14, %v5741_v13  ;;  %v5614_v18 = vpop.permute.xlu0 %5613 }
 0x7e1   : > { %v5742_v30 = vsel %vm13966_vm1, %v5710_v54, %v5614_v18 }
 0x7e2   : > { %5774 = vst.msk [vmem:[%s11838_s17 + $0xf8] sm:$0xff] %vm2282_vm14, %v5742_v30 }
 0x7e3   : > { %6320 = shalt.err (!%p6317_p3)
}
 0x7e4   : > { %s6321_s28 = scalar_lea.hbm %s12113_s14, 4096  ;;  %s6325_s13 = scalar_lea.hbm %s12177_s9, 8192 }
 0x7e5   : > { %p6322_p4 = scmp.ne.s32.totalorder %s12113_s14, %s6321_s28  ;;  %p6326_p9 = scmp.lt.u32.totalorder %s12113_s14, %s12177_s9 }
 0x7e6   : > { %p6327_p10 = scmp.lt.u32.totalorder %s6325_s13, %s6321_s28  ;;  %p6329_p12 = scmp.lt.u32.totalorder %s6321_s28, %s12113_s14 }
 0x7e7   : > { %p6323_p7 = pnand %p6322_p4, %p6480_p5 }
 0x7e8   : > { %p6328_p11 = por %p6327_p10, %p6326_p9 }
 0x7e9   : > { %p6324_p8 = pneg %p6323_p7 }
 0x7ea   : > { %p6330_p13 = por %p6329_p12, %p6328_p11 }
 0x7ec   : > { %p6331_p0 = pnand %p6330_p13, %p6324_p8 }
 0x7ee   : > { %6334 = shalt.err (!%p6331_p0)
}
 0x7ef   : > { %s6391_s24 = smov 128  }
 0x7f0   : > { %6175 = dma.vmem_to_hbm [thread:$0]  (%p6480_p5), %s12119_s21, 4096, %s12113_s14, %s12126_s29, %s6391_s24, %s6391_s24, %s6375_s16  }
 0x7f1 PF: > { %p6181_p1 = scmp.ge.s32.totalorder %s6369_s12, 2  ;;  %s5804_s23 = sand.u32 1, %s6357_s30  }
 0x7f2   : > { %s5805_s22 = scalar_lea.sflag [#allocation3], %s5804_s23 }
 0x7f3   : > { %p6178_p2 = pnand %p6181_p1, %p6484_p6 }
 0x7f5   : > { %6352 = dma.done.wait (!%p6178_p2), %s5805_s22, 4096  }
 0x7f6   : > { %6354 = vsyncadd (!%p6178_p2), %s5805_s22, 4294963200  ;;  %p19_p3 = scmp.ge.s32.totalorder %s6467_s15, 4   ;;  %s13967_s30 = smov %s6361_s10 }
 0x7f7   : > { %s13968_s10 = smov %s6365_s11  ;;  %s13969_s11 = smov %s6478_s18 }
 0x7f8   : > { %s13970_s12 = smov %s6467_s15  ;;  %21 = sbr.rel (!%p19_p3) target bundleno = 3 (0x3), region = 91 }
 0x7ff   :  { %5810 = vsyncpa [#allocation3], 1 }
 0x800   :  { %5812 = vsyncpa [#allocation3 + $0x1], 1 }

</bundles_post_ra>
